<compile_context>
chip_gen: v6e
topology: v6e:2x2x1
jax: 0.10.0
libtpu: 0.0.40
codegen_flags: <defaults>
</compile_context>

<pallas_src>
import jax
import jax.numpy as jnp
from jax import lax
from jax.experimental import pallas as pl
from jax.experimental.pallas import tpu as pltpu


_PADL = 8  # left zero-pad on the W axis so the interior store is sublane-aligned


def _grn_kernel(x_ref, r_ref, eye_ref,
                w1_ref, b1_ref,
                w2_ref, b2_ref,
                w3_ref, b3_ref,
                bn_scale_ref, bn_shift_ref,
                o_ref,
                pad_ref):
    """One batch element: conv1 -> ELU -> conv2 -> conv3 -> GLU -> +skip -> BN."""
    H, W, C_in = x_ref.shape
    C_h = w1_ref.shape[2]
    C_out = w3_ref.shape[2] // 2
    HW = H * W
    Wp = W + 2 * _PADL
    c_max = pad_ref.shape[2]

    # The interior of the shared padded scratch is fully rewritten by every
    # stage before it is read, so only the one-element halo that the 3x3
    # windows actually touch needs to be zero.  Zeroing just that halo every
    # step is ~20x less store traffic than the old per-stage full-buffer zero
    # and stays correct under any grid-to-core assignment.
    pad_ref[0:1, :, :] = jnp.zeros((1, Wp, c_max), pad_ref.dtype)
    pad_ref[H + 1:H + 2, :, :] = jnp.zeros((1, Wp, c_max), pad_ref.dtype)
    pad_ref[:, _PADL - 1:_PADL, :] = jnp.zeros((H + 2, 1, c_max), pad_ref.dtype)
    pad_ref[:, _PADL + W:_PADL + W + 1, :] = jnp.zeros((H + 2, 1, c_max),
                                                       pad_ref.dtype)

    def set_interior(v, c):
        # v: (H, W, c) f32 interior, stored at a sublane-aligned offset.
        pad_ref[1:H + 1, _PADL:_PADL + W, :c] = v

    def conv3x3(c_in, w_ref, b_ref):
        # 3x3 "same" conv as 9 shifted bf16 MXU matmuls, windows read straight
        # from the padded scratch ref.  w_ref: (9, c_in, c_out), k = dy*3 + dx.
        c_out = w_ref.shape[2]
        acc = jnp.zeros((HW, c_out), jnp.float32)
        for k in range(9):
            dy, dx = divmod(k, 3)
            col = _PADL - 1 + dx
            win = pad_ref[dy:dy + H, col:col + W, :c_in]
            acc = acc + jnp.dot(win.reshape(HW, c_in).astype(jnp.bfloat16),
                                w_ref[k],
                                preferred_element_type=jnp.float32)
        return acc + b_ref[...]

    # conv1 + ELU(alpha=1)
    set_interior(x_ref[...], C_in)
    h = conv3x3(C_in, w1_ref, b1_ref)                       # (HW, C_h)
    h = jnp.where(h > 0.0, h, jnp.exp(h) - 1.0)

    # conv2
    set_interior(h.reshape(H, W, C_h), C_h)
    h = conv3x3(C_h, w2_ref, b2_ref)                        # (HW, 2*C_h)

    # GatedConvUnit: Dropout2d is identity at inference; single conv3 + GLU.
    set_interior(h.reshape(H, W, 2 * C_h), 2 * C_h)
    h3 = conv3x3(2 * C_h, w3_ref, b3_ref)                   # (HW, 2*C_out)
    val = h3[:, :C_out]
    gate = h3[:, C_out:]
    glu = val * pl.reciprocal(1.0 + jnp.exp(-gate), approx=True)

    # (HW, C_out) -> (C_out, HW) channel-major via an identity NT matmul
    # (contract last dims, same pattern as q @ k^T).  AddNorm math and the
    # output store then run lane-dense and the output leaves the kernel
    # directly in flattened NCHW (no wrapper transpose on the way out).
    glu_cm = lax.dot_general(eye_ref[...], glu, (((1,), (1,)), ((), ())),
                             preferred_element_type=jnp.float32)  # (C_out, HW)

    # AddNorm (trainable_add=False): BatchNorm2d(glu + skip) with eval-mode
    # running statistics folded into a per-channel scale/shift.
    y = glu_cm + r_ref[...]
    y = y * bn_scale_ref[...] + bn_shift_ref[...]
    o_ref[...] = y.astype(o_ref.dtype)


def conv_gated_residual_network(x, params, residual=None):
    """Forward of ConvGatedResidualNetwork (inference mode).

    x:        (B, C_in, H, W) float32, NCHW (PyTorch layout).
    residual: optional (B, C_out, H, W); defaults to x (requires C_in == C_out).
    params:   PyTorch-convention tensors:
      w1 (C_h, C_in, 3, 3), b1 (C_h,), w2 (2C_h, C_h, 3, 3), b2 (2C_h,),
      w3 (2C_out, 2C_h, 3, 3), b3 (2C_out,),
      bn_gamma / bn_beta / bn_mean / bn_var (C_out,).
    """
    B, C_in, H, W = x.shape
    C_h = params["w1"].shape[0]
    C_out = params["w3"].shape[0] // 2
    HW = H * W

    if residual is None:
        residual = x
    # TODO(synk): ResampleNorm path (C_in != C_out) not implemented.
    assert residual.shape == (B, C_out, H, W), "residual must have C_out channels"

    # x is the only array that still needs an HBM layout change (NCHW -> NHWC);
    # residual and the output stay in flattened NCHW (free reshapes), so two of
    # the three wrapper transposes / HBM round-trips are gone.
    # TODO(synk): feed x as NHWC from the surrounding model to drop this one too.
    x_nhwc = jnp.transpose(x, (0, 2, 3, 1))
    r_flat = residual.reshape(B, C_out, HW)

    def conv_w(w):  # (Cout, Cin, 3, 3) -> (9, Cin, Cout) bf16, k = dy*3 + dx
        return (jnp.transpose(w, (2, 3, 1, 0))
                .reshape(9, w.shape[1], w.shape[0]).astype(jnp.bfloat16))

    w1 = conv_w(params["w1"]); b1 = params["b1"].reshape(1, C_h).astype(jnp.float32)
    w2 = conv_w(params["w2"]); b2 = params["b2"].reshape(1, 2 * C_h).astype(jnp.float32)
    w3 = conv_w(params["w3"]); b3 = params["b3"].reshape(1, 2 * C_out).astype(jnp.float32)

    eps = 1e-5
    bn_scale = (params["bn_gamma"] / jnp.sqrt(params["bn_var"] + eps)).astype(jnp.float32)
    bn_shift = (params["bn_beta"] - params["bn_mean"] * bn_scale).astype(jnp.float32)
    bn_scale = bn_scale.reshape(C_out, 1)
    bn_shift = bn_shift.reshape(C_out, 1)

    eye_out = jnp.eye(C_out, dtype=jnp.float32)

    c_max = max(C_in, C_h, 2 * C_h)

    # Explicit VMEM budget: single shared padded scratch + double-buffered I/O
    # blocks + resident weights, so the kernel also fits v7x's 64 MiB VMEM.
    scratch_bytes = 4 * (H + 2) * (W + 2 * _PADL) * c_max
    io_bytes = 4 * HW * (C_in + 2 * C_out)
    weight_bytes = int(2 * (w1.size + w2.size + w3.size)
                       + 4 * (b1.size + b2.size + b3.size
                              + eye_out.size + 2 * C_out))
    vmem_limit = int(min(100 * 2 ** 20,
                         max(32 * 2 ** 20,
                             scratch_bytes + 4 * io_bytes + 2 * weight_bytes
                             + (4 << 20))))

    flops = 2 * B * HW * (9 * (C_in * C_h + C_h * 2 * C_h + 2 * C_h * 2 * C_out)
                          + C_out * C_out)
    transcendentals = B * HW * (C_h + C_out)
    bytes_accessed = int(4 * (x.size + residual.size + B * HW * C_out)
                         + weight_bytes)

    full = lambda *shape: pl.BlockSpec(shape, lambda b: (0,) * len(shape))
    img_nhwc = pl.BlockSpec((pl.Squeezed(), H, W, C_in), lambda b: (b, 0, 0, 0))
    img_cm = pl.BlockSpec((pl.Squeezed(), C_out, HW), lambda b: (b, 0, 0))

    y_flat = pl.pallas_call(
        _grn_kernel,
        out_shape=jax.ShapeDtypeStruct((B, C_out, HW), x.dtype),
        grid_spec=pltpu.PrefetchScalarGridSpec(
            num_scalar_prefetch=0,
            # TODO(synk): add a second "parallel" H-row axis (1-row halo) so
            # both v7x TensorCores stay busy when B is 1 or odd.
            grid=(B,),
            in_specs=[
                img_nhwc,                                        # x (NHWC)
                img_cm,                                          # residual (NCHW flat)
                full(C_out, C_out),                              # identity for layout change
                full(9, C_in, C_h), full(1, C_h),                # conv1
                full(9, C_h, 2 * C_h), full(1, 2 * C_h),         # conv2
                full(9, 2 * C_h, 2 * C_out), full(1, 2 * C_out), # conv3 (un-split)
                full(C_out, 1), full(C_out, 1),                  # folded BN
            ],
            out_specs=img_cm,
            scratch_shapes=[
                pltpu.VMEM((H + 2, W + 2 * _PADL, c_max), jnp.float32),
            ],
        ),
        compiler_params=pltpu.CompilerParams(
            dimension_semantics=("parallel",),
            vmem_limit_bytes=vmem_limit),
        cost_estimate=pl.CostEstimate(
            flops=flops, transcendentals=transcendentals,
            bytes_accessed=bytes_accessed),
    )(x_nhwc, r_flat, eye_out, w1, b1, w2, b2, w3, b3, bn_scale, bn_shift)

    # (B, C_out, H*W) -> (B, C_out, H, W): free reshape, already NCHW.
    return y_flat.reshape(B, C_out, H, W)


def _ref_forward(x, params, eps=1e-5):
    """Plain-JAX reference with identical (inference) semantics."""
    def conv(h, w, b):
        y = lax.conv_general_dilated(
            h, w, window_strides=(1, 1), padding=((1, 1), (1, 1)),
            dimension_numbers=("NCHW", "OIHW", "NCHW"),
            precision=lax.Precision.HIGHEST)
        return y + b[None, :, None, None]

    c_out = params["w3"].shape[0] // 2
    residual = x
    h = conv(x, params["w1"], params["b1"])
    h = jnp.where(h > 0.0, h, jnp.exp(h) - 1.0)
    h = conv(h, params["w2"], params["b2"])
    h = conv(h, params["w3"], params["b3"])
    glu = h[:, :c_out] * (1.0 / (1.0 + jnp.exp(-h[:, c_out:])))
    y = glu + residual
    scale = params["bn_gamma"] / jnp.sqrt(params["bn_var"] + eps)
    shift = params["bn_beta"] - params["bn_mean"] * scale
    return y * scale[None, :, None, None] + shift[None, :, None, None]


if __name__ == "__main__":
    B, C_IN, C_HID, C_OUT, H, W = 2, 16, 32, 16, 16, 16
    key = jax.random.PRNGKey(0)
    ks = jax.random.split(key, 8)
    s = 0.08

    x = jax.random.normal(ks[0], (B, C_IN, H, W), dtype=jnp.float32)
    params = dict(
        w1=jax.random.normal(ks[1], (C_HID, C_IN, 3, 3), jnp.float32) * s,
        b1=jax.random.normal(ks[2], (C_HID,), jnp.float32) * s,
        w2=jax.random.normal(ks[3], (2 * C_HID, C_HID, 3, 3), jnp.float32) * s,
        b2=jax.random.normal(ks[4], (2 * C_HID,), jnp.float32) * s,
        w3=jax.random.normal(ks[5], (2 * C_OUT, 2 * C_HID, 3, 3), jnp.float32) * s,
        b3=jax.random.normal(ks[6], (2 * C_OUT,), jnp.float32) * s,
        bn_gamma=jnp.full((C_OUT,), 1.1, jnp.float32),
        bn_beta=jnp.full((C_OUT,), 0.05, jnp.float32),
        bn_mean=jax.random.normal(ks[7], (C_OUT,), jnp.float32) * 0.1,
        bn_var=jnp.full((C_OUT,), 0.9, jnp.float32),
    )

    fwd = jax.jit(conv_gated_residual_network)
    y = jax.block_until_ready(fwd(x, params))

    ref = _ref_forward(x, params)
    assert y.shape == (B, C_OUT, H, W)
    # bf16 MXU operands (f32 accumulation) vs. f32 reference.
    rel_err = float(jnp.max(jnp.abs(y - ref)) / (jnp.max(jnp.abs(ref)) + 1e-6))
    assert rel_err < 3e-2, f"relative error too large: {rel_err}"

    print("KERNEL_OK")
</pallas_src>

<mosaic_0001>
module attributes {stable_mosaic.version = 11 : i64} {
  func.func @_grn_kernel(%arg0: i32, %arg1: memref<1x16x16x16xf32, #tpu.memory_space<vmem>>, %arg2: memref<1x16x256xf32, #tpu.memory_space<vmem>>, %arg3: memref<16x16xf32, #tpu.memory_space<vmem>>, %arg4: memref<9x16x32xbf16, #tpu.memory_space<vmem>>, %arg5: memref<1x32xf32, #tpu.memory_space<vmem>>, %arg6: memref<9x32x64xbf16, #tpu.memory_space<vmem>>, %arg7: memref<1x64xf32, #tpu.memory_space<vmem>>, %arg8: memref<9x64x32xbf16, #tpu.memory_space<vmem>>, %arg9: memref<1x32xf32, #tpu.memory_space<vmem>>, %arg10: memref<16x1xf32, #tpu.memory_space<vmem>>, %arg11: memref<16x1xf32, #tpu.memory_space<vmem>>, %arg12: memref<1x16x256xf32, #tpu.memory_space<vmem>>, %arg13: memref<18x32x64xf32, #tpu.memory_space<vmem>>) attributes {dimension_semantics = [#tpu.dimension_semantics<parallel>], iteration_bounds = array<i64: 2>, scalar_prefetch = 0 : i64, scratch_operands = 1 : i64, tpu.core_type = #tpu.core_type<tc>, window_params = [{transform_indices = @transform_0, window_bounds = array<i64: 1, 16, 16, 16>}, {transform_indices = @transform_1, window_bounds = array<i64: 1, 16, 256>}, {pipeline_mode = #tpu.pipeline_mode<synchronous>, transform_indices = @transform_2, window_bounds = array<i64: 16, 16>}, {pipeline_mode = #tpu.pipeline_mode<synchronous>, transform_indices = @transform_3, window_bounds = array<i64: 9, 16, 32>}, {pipeline_mode = #tpu.pipeline_mode<synchronous>, transform_indices = @transform_4, window_bounds = array<i64: 1, 32>}, {pipeline_mode = #tpu.pipeline_mode<synchronous>, transform_indices = @transform_5, window_bounds = array<i64: 9, 32, 64>}, {pipeline_mode = #tpu.pipeline_mode<synchronous>, transform_indices = @transform_6, window_bounds = array<i64: 1, 64>}, {pipeline_mode = #tpu.pipeline_mode<synchronous>, transform_indices = @transform_7, window_bounds = array<i64: 9, 64, 32>}, {pipeline_mode = #tpu.pipeline_mode<synchronous>, transform_indices = @transform_8, window_bounds = array<i64: 1, 32>}, {pipeline_mode = #tpu.pipeline_mode<synchronous>, transform_indices = @transform_9, window_bounds = array<i64: 16, 1>}, {pipeline_mode = #tpu.pipeline_mode<synchronous>, transform_indices = @transform_10, window_bounds = array<i64: 16, 1>}, {transform_indices = @transform_11, window_bounds = array<i64: 1, 16, 256>}]} {
    %cst = arith.constant 0.000000e+00 : f32
    %0 = vector.broadcast %cst : f32 to vector<1x32x64xf32>
    %c0 = arith.constant 0 : index
    %c0_0 = arith.constant 0 : index
    %c0_1 = arith.constant 0 : index
    %1 = vector.load %arg13[%c0, %c0_0, %c0_1] : memref<18x32x64xf32, #tpu.memory_space<vmem>>, vector<1x32x64xf32>
    tpu.vector_store %arg13[%c0, %c0_0, %c0_1], %0 {strides = array<i32>} : memref<18x32x64xf32, #tpu.memory_space<vmem>>, vector<1x32x64xf32>,
    %cst_2 = arith.constant 0.000000e+00 : f32
    %2 = vector.broadcast %cst_2 : f32 to vector<1x32x64xf32>
    %c17 = arith.constant 17 : index
    %c0_3 = arith.constant 0 : index
    %c0_4 = arith.constant 0 : index
    %3 = vector.load %arg13[%c17, %c0_3, %c0_4] : memref<18x32x64xf32, #tpu.memory_space<vmem>>, vector<1x32x64xf32>
    tpu.vector_store %arg13[%c17, %c0_3, %c0_4], %2 {strides = array<i32>} : memref<18x32x64xf32, #tpu.memory_space<vmem>>, vector<1x32x64xf32>,
    %cst_5 = arith.constant 0.000000e+00 : f32
    %4 = vector.broadcast %cst_5 : f32 to vector<18x1x64xf32>
    %c0_6 = arith.constant 0 : index
    %c7 = arith.constant 7 : index
    %c0_7 = arith.constant 0 : index
    %5 = vector.load %arg13[%c0_6, %c7, %c0_7] : memref<18x32x64xf32, #tpu.memory_space<vmem>>, vector<18x1x64xf32>
    tpu.vector_store %arg13[%c0_6, %c7, %c0_7], %4 {strides = array<i32>} : memref<18x32x64xf32, #tpu.memory_space<vmem>>, vector<18x1x64xf32>,
    %cst_8 = arith.constant 0.000000e+00 : f32
    %6 = vector.broadcast %cst_8 : f32 to vector<18x1x64xf32>
    %c0_9 = arith.constant 0 : index
    %c24 = arith.constant 24 : index
    %c0_10 = arith.constant 0 : index
    %7 = vector.load %arg13[%c0_9, %c24, %c0_10] : memref<18x32x64xf32, #tpu.memory_space<vmem>>, vector<18x1x64xf32>
    tpu.vector_store %arg13[%c0_9, %c24, %c0_10], %6 {strides = array<i32>} : memref<18x32x64xf32, #tpu.memory_space<vmem>>, vector<18x1x64xf32>,
    %c0_11 = arith.constant 0 : index
    %c0_12 = arith.constant 0 : index
    %c0_13 = arith.constant 0 : index
    %c0_14 = arith.constant 0 : index
    %8 = vector.load %arg1[%c0_11, %c0_12, %c0_13, %c0_14] : memref<1x16x16x16xf32, #tpu.memory_space<vmem>>, vector<1x16x16x16xf32>
    %9 = vector.shape_cast %8 : vector<1x16x16x16xf32> to vector<16x16x16xf32>
    %c1 = arith.constant 1 : index
    %c8 = arith.constant 8 : index
    %c0_15 = arith.constant 0 : index
    %10 = vector.load %arg13[%c1, %c8, %c0_15] : memref<18x32x64xf32, #tpu.memory_space<vmem>>, vector<16x16x16xf32>
    tpu.vector_store %arg13[%c1, %c8, %c0_15], %9 {strides = array<i32>} : memref<18x32x64xf32, #tpu.memory_space<vmem>>, vector<16x16x16xf32>,
    %cst_16 = arith.constant 0.000000e+00 : f32
    %11 = vector.broadcast %cst_16 : f32 to vector<256x32xf32>
    %c0_17 = arith.constant 0 : index
    %c7_18 = arith.constant 7 : index
    %c0_19 = arith.constant 0 : index
    %12 = vector.load %arg13[%c0_17, %c7_18, %c0_19] : memref<18x32x64xf32, #tpu.memory_space<vmem>>, vector<16x16x16xf32>
    %13 = vector.shape_cast %12 : vector<16x16x16xf32> to vector<256x16xf32>
    %14 = arith.truncf %13 : vector<256x16xf32> to vector<256x16xbf16>
    %c0_20 = arith.constant 0 : index
    %c0_21 = arith.constant 0 : index
    %c0_22 = arith.constant 0 : index
    %15 = vector.load %arg4[%c0_20, %c0_21, %c0_22] : memref<9x16x32xbf16, #tpu.memory_space<vmem>>, vector<1x16x32xbf16>
    %16 = vector.shape_cast %15 : vector<1x16x32xbf16> to vector<16x32xbf16>
    %cst_23 = arith.constant dense<0.000000e+00> : vector<256x32xf32>
    %17 = tpu.matmul %14, %16, %cst_23 {dimension_numbers = #tpu.dot_dimension_numbers<[1], [0], [0], [1], [0, 0, 1, 1], [], []>} : vector<256x16xbf16>, vector<16x32xbf16>, vector<256x32xf32> -> vector<256x32xf32>
    %18 = arith.addf %11, %17 : vector<256x32xf32>
    %c0_24 = arith.constant 0 : index
    %c8_25 = arith.constant 8 : index
    %c0_26 = arith.constant 0 : index
    %19 = vector.load %arg13[%c0_24, %c8_25, %c0_26] : memref<18x32x64xf32, #tpu.memory_space<vmem>>, vector<16x16x16xf32>
    %20 = vector.shape_cast %19 : vector<16x16x16xf32> to vector<256x16xf32>
    %21 = arith.truncf %20 : vector<256x16xf32> to vector<256x16xbf16>
    %c1_27 = arith.constant 1 : index
    %c0_28 = arith.constant 0 : index
    %c0_29 = arith.constant 0 : index
    %22 = vector.load %arg4[%c1_27, %c0_28, %c0_29] : memref<9x16x32xbf16, #tpu.memory_space<vmem>>, vector<1x16x32xbf16>
    %23 = vector.shape_cast %22 : vector<1x16x32xbf16> to vector<16x32xbf16>
    %cst_30 = arith.constant dense<0.000000e+00> : vector<256x32xf32>
    %24 = tpu.matmul %21, %23, %cst_30 {dimension_numbers = #tpu.dot_dimension_numbers<[1], [0], [0], [1], [0, 0, 1, 1], [], []>} : vector<256x16xbf16>, vector<16x32xbf16>, vector<256x32xf32> -> vector<256x32xf32>
    %25 = arith.addf %18, %24 : vector<256x32xf32>
    %c0_31 = arith.constant 0 : index
    %c9 = arith.constant 9 : index
    %c0_32 = arith.constant 0 : index
    %26 = vector.load %arg13[%c0_31, %c9, %c0_32] : memref<18x32x64xf32, #tpu.memory_space<vmem>>, vector<16x16x16xf32>
    %27 = vector.shape_cast %26 : vector<16x16x16xf32> to vector<256x16xf32>
    %28 = arith.truncf %27 : vector<256x16xf32> to vector<256x16xbf16>
    %c2 = arith.constant 2 : index
    %c0_33 = arith.constant 0 : index
    %c0_34 = arith.constant 0 : index
    %29 = vector.load %arg4[%c2, %c0_33, %c0_34] : memref<9x16x32xbf16, #tpu.memory_space<vmem>>, vector<1x16x32xbf16>
    %30 = vector.shape_cast %29 : vector<1x16x32xbf16> to vector<16x32xbf16>
    %cst_35 = arith.constant dense<0.000000e+00> : vector<256x32xf32>
    %31 = tpu.matmul %28, %30, %cst_35 {dimension_numbers = #tpu.dot_dimension_numbers<[1], [0], [0], [1], [0, 0, 1, 1], [], []>} : vector<256x16xbf16>, vector<16x32xbf16>, vector<256x32xf32> -> vector<256x32xf32>
    %32 = arith.addf %25, %31 : vector<256x32xf32>
    %c1_36 = arith.constant 1 : index
    %c7_37 = arith.constant 7 : index
    %c0_38 = arith.constant 0 : index
    %33 = vector.load %arg13[%c1_36, %c7_37, %c0_38] : memref<18x32x64xf32, #tpu.memory_space<vmem>>, vector<16x16x16xf32>
    %34 = vector.shape_cast %33 : vector<16x16x16xf32> to vector<256x16xf32>
    %35 = arith.truncf %34 : vector<256x16xf32> to vector<256x16xbf16>
    %c3 = arith.constant 3 : index
    %c0_39 = arith.constant 0 : index
    %c0_40 = arith.constant 0 : index
    %36 = vector.load %arg4[%c3, %c0_39, %c0_40] : memref<9x16x32xbf16, #tpu.memory_space<vmem>>, vector<1x16x32xbf16>
    %37 = vector.shape_cast %36 : vector<1x16x32xbf16> to vector<16x32xbf16>
    %cst_41 = arith.constant dense<0.000000e+00> : vector<256x32xf32>
    %38 = tpu.matmul %35, %37, %cst_41 {dimension_numbers = #tpu.dot_dimension_numbers<[1], [0], [0], [1], [0, 0, 1, 1], [], []>} : vector<256x16xbf16>, vector<16x32xbf16>, vector<256x32xf32> -> vector<256x32xf32>
    %39 = arith.addf %32, %38 : vector<256x32xf32>
    %c1_42 = arith.constant 1 : index
    %c8_43 = arith.constant 8 : index
    %c0_44 = arith.constant 0 : index
    %40 = vector.load %arg13[%c1_42, %c8_43, %c0_44] : memref<18x32x64xf32, #tpu.memory_space<vmem>>, vector<16x16x16xf32>
    %41 = vector.shape_cast %40 : vector<16x16x16xf32> to vector<256x16xf32>
    %42 = arith.truncf %41 : vector<256x16xf32> to vector<256x16xbf16>
    %c4 = arith.constant 4 : index
    %c0_45 = arith.constant 0 : index
    %c0_46 = arith.constant 0 : index
    %43 = vector.load %arg4[%c4, %c0_45, %c0_46] : memref<9x16x32xbf16, #tpu.memory_space<vmem>>, vector<1x16x32xbf16>
    %44 = vector.shape_cast %43 : vector<1x16x32xbf16> to vector<16x32xbf16>
    %cst_47 = arith.constant dense<0.000000e+00> : vector<256x32xf32>
    %45 = tpu.matmul %42, %44, %cst_47 {dimension_numbers = #tpu.dot_dimension_numbers<[1], [0], [0], [1], [0, 0, 1, 1], [], []>} : vector<256x16xbf16>, vector<16x32xbf16>, vector<256x32xf32> -> vector<256x32xf32>
    %46 = arith.addf %39, %45 : vector<256x32xf32>
    %c1_48 = arith.constant 1 : index
    %c9_49 = arith.constant 9 : index
    %c0_50 = arith.constant 0 : index
    %47 = vector.load %arg13[%c1_48, %c9_49, %c0_50] : memref<18x32x64xf32, #tpu.memory_space<vmem>>, vector<16x16x16xf32>
    %48 = vector.shape_cast %47 : vector<16x16x16xf32> to vector<256x16xf32>
    %49 = arith.truncf %48 : vector<256x16xf32> to vector<256x16xbf16>
    %c5 = arith.constant 5 : index
    %c0_51 = arith.constant 0 : index
    %c0_52 = arith.constant 0 : index
    %50 = vector.load %arg4[%c5, %c0_51, %c0_52] : memref<9x16x32xbf16, #tpu.memory_space<vmem>>, vector<1x16x32xbf16>
    %51 = vector.shape_cast %50 : vector<1x16x32xbf16> to vector<16x32xbf16>
    %cst_53 = arith.constant dense<0.000000e+00> : vector<256x32xf32>
    %52 = tpu.matmul %49, %51, %cst_53 {dimension_numbers = #tpu.dot_dimension_numbers<[1], [0], [0], [1], [0, 0, 1, 1], [], []>} : vector<256x16xbf16>, vector<16x32xbf16>, vector<256x32xf32> -> vector<256x32xf32>
    %53 = arith.addf %46, %52 : vector<256x32xf32>
    %c2_54 = arith.constant 2 : index
    %c7_55 = arith.constant 7 : index
    %c0_56 = arith.constant 0 : index
    %54 = vector.load %arg13[%c2_54, %c7_55, %c0_56] : memref<18x32x64xf32, #tpu.memory_space<vmem>>, vector<16x16x16xf32>
    %55 = vector.shape_cast %54 : vector<16x16x16xf32> to vector<256x16xf32>
    %56 = arith.truncf %55 : vector<256x16xf32> to vector<256x16xbf16>
    %c6 = arith.constant 6 : index
    %c0_57 = arith.constant 0 : index
    %c0_58 = arith.constant 0 : index
    %57 = vector.load %arg4[%c6, %c0_57, %c0_58] : memref<9x16x32xbf16, #tpu.memory_space<vmem>>, vector<1x16x32xbf16>
    %58 = vector.shape_cast %57 : vector<1x16x32xbf16> to vector<16x32xbf16>
    %cst_59 = arith.constant dense<0.000000e+00> : vector<256x32xf32>
    %59 = tpu.matmul %56, %58, %cst_59 {dimension_numbers = #tpu.dot_dimension_numbers<[1], [0], [0], [1], [0, 0, 1, 1], [], []>} : vector<256x16xbf16>, vector<16x32xbf16>, vector<256x32xf32> -> vector<256x32xf32>
    %60 = arith.addf %53, %59 : vector<256x32xf32>
    %c2_60 = arith.constant 2 : index
    %c8_61 = arith.constant 8 : index
    %c0_62 = arith.constant 0 : index
    %61 = vector.load %arg13[%c2_60, %c8_61, %c0_62] : memref<18x32x64xf32, #tpu.memory_space<vmem>>, vector<16x16x16xf32>
    %62 = vector.shape_cast %61 : vector<16x16x16xf32> to vector<256x16xf32>
    %63 = arith.truncf %62 : vector<256x16xf32> to vector<256x16xbf16>
    %c7_63 = arith.constant 7 : index
    %c0_64 = arith.constant 0 : index
    %c0_65 = arith.constant 0 : index
    %64 = vector.load %arg4[%c7_63, %c0_64, %c0_65] : memref<9x16x32xbf16, #tpu.memory_space<vmem>>, vector<1x16x32xbf16>
    %65 = vector.shape_cast %64 : vector<1x16x32xbf16> to vector<16x32xbf16>
    %cst_66 = arith.constant dense<0.000000e+00> : vector<256x32xf32>
    %66 = tpu.matmul %63, %65, %cst_66 {dimension_numbers = #tpu.dot_dimension_numbers<[1], [0], [0], [1], [0, 0, 1, 1], [], []>} : vector<256x16xbf16>, vector<16x32xbf16>, vector<256x32xf32> -> vector<256x32xf32>
    %67 = arith.addf %60, %66 : vector<256x32xf32>
    %c2_67 = arith.constant 2 : index
    %c9_68 = arith.constant 9 : index
    %c0_69 = arith.constant 0 : index
    %68 = vector.load %arg13[%c2_67, %c9_68, %c0_69] : memref<18x32x64xf32, #tpu.memory_space<vmem>>, vector<16x16x16xf32>
    %69 = vector.shape_cast %68 : vector<16x16x16xf32> to vector<256x16xf32>
    %70 = arith.truncf %69 : vector<256x16xf32> to vector<256x16xbf16>
    %c8_70 = arith.constant 8 : index
    %c0_71 = arith.constant 0 : index
    %c0_72 = arith.constant 0 : index
    %71 = vector.load %arg4[%c8_70, %c0_71, %c0_72] : memref<9x16x32xbf16, #tpu.memory_space<vmem>>, vector<1x16x32xbf16>
    %72 = vector.shape_cast %71 : vector<1x16x32xbf16> to vector<16x32xbf16>
    %cst_73 = arith.constant dense<0.000000e+00> : vector<256x32xf32>
    %73 = tpu.matmul %70, %72, %cst_73 {dimension_numbers = #tpu.dot_dimension_numbers<[1], [0], [0], [1], [0, 0, 1, 1], [], []>} : vector<256x16xbf16>, vector<16x32xbf16>, vector<256x32xf32> -> vector<256x32xf32>
    %74 = arith.addf %67, %73 : vector<256x32xf32>
    %c0_74 = arith.constant 0 : index
    %c0_75 = arith.constant 0 : index
    %75 = vector.load %arg5[%c0_74, %c0_75] : memref<1x32xf32, #tpu.memory_space<vmem>>, vector<1x32xf32>
    %76 = vector.broadcast %75 : vector<1x32xf32> to vector<256x32xf32>
    %77 = arith.addf %74, %76 : vector<256x32xf32>
    %cst_76 = arith.constant 0.000000e+00 : f32
    %78 = vector.broadcast %cst_76 : f32 to vector<256x32xf32>
    %79 = arith.cmpf ogt, %77, %78 : vector<256x32xf32>
    %80 = math.exp %77 : vector<256x32xf32>
    %cst_77 = arith.constant 1.000000e+00 : f32
    %81 = vector.broadcast %cst_77 : f32 to vector<256x32xf32>
    %82 = arith.subf %80, %81 : vector<256x32xf32>
    %83 = arith.select %79, %77, %82 : vector<256x32xi1>, vector<256x32xf32>
    %84 = vector.shape_cast %83 : vector<256x32xf32> to vector<16x16x32xf32>
    %c1_78 = arith.constant 1 : index
    %c8_79 = arith.constant 8 : index
    %c0_80 = arith.constant 0 : index
    %85 = vector.load %arg13[%c1_78, %c8_79, %c0_80] : memref<18x32x64xf32, #tpu.memory_space<vmem>>, vector<16x16x32xf32>
    tpu.vector_store %arg13[%c1_78, %c8_79, %c0_80], %84 {strides = array<i32>} : memref<18x32x64xf32, #tpu.memory_space<vmem>>, vector<16x16x32xf32>,
    %cst_81 = arith.constant 0.000000e+00 : f32
    %86 = vector.broadcast %cst_81 : f32 to vector<256x64xf32>
    %c0_82 = arith.constant 0 : index
    %c7_83 = arith.constant 7 : index
    %c0_84 = arith.constant 0 : index
    %87 = vector.load %arg13[%c0_82, %c7_83, %c0_84] : memref<18x32x64xf32, #tpu.memory_space<vmem>>, vector<16x16x32xf32>
    %88 = vector.shape_cast %87 : vector<16x16x32xf32> to vector<256x32xf32>
    %89 = arith.truncf %88 : vector<256x32xf32> to vector<256x32xbf16>
    %c0_85 = arith.constant 0 : index
    %c0_86 = arith.constant 0 : index
    %c0_87 = arith.constant 0 : index
    %90 = vector.load %arg6[%c0_85, %c0_86, %c0_87] : memref<9x32x64xbf16, #tpu.memory_space<vmem>>, vector<1x32x64xbf16>
    %91 = vector.shape_cast %90 : vector<1x32x64xbf16> to vector<32x64xbf16>
    %cst_88 = arith.constant dense<0.000000e+00> : vector<256x64xf32>
    %92 = tpu.matmul %89, %91, %cst_88 {dimension_numbers = #tpu.dot_dimension_numbers<[1], [0], [0], [1], [0, 0, 1, 1], [], []>} : vector<256x32xbf16>, vector<32x64xbf16>, vector<256x64xf32> -> vector<256x64xf32>
    %93 = arith.addf %86, %92 : vector<256x64xf32>
    %c0_89 = arith.constant 0 : index
    %c8_90 = arith.constant 8 : index
    %c0_91 = arith.constant 0 : index
    %94 = vector.load %arg13[%c0_89, %c8_90, %c0_91] : memref<18x32x64xf32, #tpu.memory_space<vmem>>, vector<16x16x32xf32>
    %95 = vector.shape_cast %94 : vector<16x16x32xf32> to vector<256x32xf32>
    %96 = arith.truncf %95 : vector<256x32xf32> to vector<256x32xbf16>
    %c1_92 = arith.constant 1 : index
    %c0_93 = arith.constant 0 : index
    %c0_94 = arith.constant 0 : index
    %97 = vector.load %arg6[%c1_92, %c0_93, %c0_94] : memref<9x32x64xbf16, #tpu.memory_space<vmem>>, vector<1x32x64xbf16>
    %98 = vector.shape_cast %97 : vector<1x32x64xbf16> to vector<32x64xbf16>
    %cst_95 = arith.constant dense<0.000000e+00> : vector<256x64xf32>
    %99 = tpu.matmul %96, %98, %cst_95 {dimension_numbers = #tpu.dot_dimension_numbers<[1], [0], [0], [1], [0, 0, 1, 1], [], []>} : vector<256x32xbf16>, vector<32x64xbf16>, vector<256x64xf32> -> vector<256x64xf32>
    %100 = arith.addf %93, %99 : vector<256x64xf32>
    %c0_96 = arith.constant 0 : index
    %c9_97 = arith.constant 9 : index
    %c0_98 = arith.constant 0 : index
    %101 = vector.load %arg13[%c0_96, %c9_97, %c0_98] : memref<18x32x64xf32, #tpu.memory_space<vmem>>, vector<16x16x32xf32>
    %102 = vector.shape_cast %101 : vector<16x16x32xf32> to vector<256x32xf32>
    %103 = arith.truncf %102 : vector<256x32xf32> to vector<256x32xbf16>
    %c2_99 = arith.constant 2 : index
    %c0_100 = arith.constant 0 : index
    %c0_101 = arith.constant 0 : index
    %104 = vector.load %arg6[%c2_99, %c0_100, %c0_101] : memref<9x32x64xbf16, #tpu.memory_space<vmem>>, vector<1x32x64xbf16>
    %105 = vector.shape_cast %104 : vector<1x32x64xbf16> to vector<32x64xbf16>
    %cst_102 = arith.constant dense<0.000000e+00> : vector<256x64xf32>
    %106 = tpu.matmul %103, %105, %cst_102 {dimension_numbers = #tpu.dot_dimension_numbers<[1], [0], [0], [1], [0, 0, 1, 1], [], []>} : vector<256x32xbf16>, vector<32x64xbf16>, vector<256x64xf32> -> vector<256x64xf32>
    %107 = arith.addf %100, %106 : vector<256x64xf32>
    %c1_103 = arith.constant 1 : index
    %c7_104 = arith.constant 7 : index
    %c0_105 = arith.constant 0 : index
    %108 = vector.load %arg13[%c1_103, %c7_104, %c0_105] : memref<18x32x64xf32, #tpu.memory_space<vmem>>, vector<16x16x32xf32>
    %109 = vector.shape_cast %108 : vector<16x16x32xf32> to vector<256x32xf32>
    %110 = arith.truncf %109 : vector<256x32xf32> to vector<256x32xbf16>
    %c3_106 = arith.constant 3 : index
    %c0_107 = arith.constant 0 : index
    %c0_108 = arith.constant 0 : index
    %111 = vector.load %arg6[%c3_106, %c0_107, %c0_108] : memref<9x32x64xbf16, #tpu.memory_space<vmem>>, vector<1x32x64xbf16>
    %112 = vector.shape_cast %111 : vector<1x32x64xbf16> to vector<32x64xbf16>
    %cst_109 = arith.constant dense<0.000000e+00> : vector<256x64xf32>
    %113 = tpu.matmul %110, %112, %cst_109 {dimension_numbers = #tpu.dot_dimension_numbers<[1], [0], [0], [1], [0, 0, 1, 1], [], []>} : vector<256x32xbf16>, vector<32x64xbf16>, vector<256x64xf32> -> vector<256x64xf32>
    %114 = arith.addf %107, %113 : vector<256x64xf32>
    %c1_110 = arith.constant 1 : index
    %c8_111 = arith.constant 8 : index
    %c0_112 = arith.constant 0 : index
    %115 = vector.load %arg13[%c1_110, %c8_111, %c0_112] : memref<18x32x64xf32, #tpu.memory_space<vmem>>, vector<16x16x32xf32>
    %116 = vector.shape_cast %115 : vector<16x16x32xf32> to vector<256x32xf32>
    %117 = arith.truncf %116 : vector<256x32xf32> to vector<256x32xbf16>
    %c4_113 = arith.constant 4 : index
    %c0_114 = arith.constant 0 : index
    %c0_115 = arith.constant 0 : index
    %118 = vector.load %arg6[%c4_113, %c0_114, %c0_115] : memref<9x32x64xbf16, #tpu.memory_space<vmem>>, vector<1x32x64xbf16>
    %119 = vector.shape_cast %118 : vector<1x32x64xbf16> to vector<32x64xbf16>
    %cst_116 = arith.constant dense<0.000000e+00> : vector<256x64xf32>
    %120 = tpu.matmul %117, %119, %cst_116 {dimension_numbers = #tpu.dot_dimension_numbers<[1], [0], [0], [1], [0, 0, 1, 1], [], []>} : vector<256x32xbf16>, vector<32x64xbf16>, vector<256x64xf32> -> vector<256x64xf32>
    %121 = arith.addf %114, %120 : vector<256x64xf32>
    %c1_117 = arith.constant 1 : index
    %c9_118 = arith.constant 9 : index
    %c0_119 = arith.constant 0 : index
    %122 = vector.load %arg13[%c1_117, %c9_118, %c0_119] : memref<18x32x64xf32, #tpu.memory_space<vmem>>, vector<16x16x32xf32>
    %123 = vector.shape_cast %122 : vector<16x16x32xf32> to vector<256x32xf32>
    %124 = arith.truncf %123 : vector<256x32xf32> to vector<256x32xbf16>
    %c5_120 = arith.constant 5 : index
    %c0_121 = arith.constant 0 : index
    %c0_122 = arith.constant 0 : index
    %125 = vector.load %arg6[%c5_120, %c0_121, %c0_122] : memref<9x32x64xbf16, #tpu.memory_space<vmem>>, vector<1x32x64xbf16>
    %126 = vector.shape_cast %125 : vector<1x32x64xbf16> to vector<32x64xbf16>
    %cst_123 = arith.constant dense<0.000000e+00> : vector<256x64xf32>
    %127 = tpu.matmul %124, %126, %cst_123 {dimension_numbers = #tpu.dot_dimension_numbers<[1], [0], [0], [1], [0, 0, 1, 1], [], []>} : vector<256x32xbf16>, vector<32x64xbf16>, vector<256x64xf32> -> vector<256x64xf32>
    %128 = arith.addf %121, %127 : vector<256x64xf32>
    %c2_124 = arith.constant 2 : index
    %c7_125 = arith.constant 7 : index
    %c0_126 = arith.constant 0 : index
    %129 = vector.load %arg13[%c2_124, %c7_125, %c0_126] : memref<18x32x64xf32, #tpu.memory_space<vmem>>, vector<16x16x32xf32>
    %130 = vector.shape_cast %129 : vector<16x16x32xf32> to vector<256x32xf32>
    %131 = arith.truncf %130 : vector<256x32xf32> to vector<256x32xbf16>
    %c6_127 = arith.constant 6 : index
    %c0_128 = arith.constant 0 : index
    %c0_129 = arith.constant 0 : index
    %132 = vector.load %arg6[%c6_127, %c0_128, %c0_129] : memref<9x32x64xbf16, #tpu.memory_space<vmem>>, vector<1x32x64xbf16>
    %133 = vector.shape_cast %132 : vector<1x32x64xbf16> to vector<32x64xbf16>
    %cst_130 = arith.constant dense<0.000000e+00> : vector<256x64xf32>
    %134 = tpu.matmul %131, %133, %cst_130 {dimension_numbers = #tpu.dot_dimension_numbers<[1], [0], [0], [1], [0, 0, 1, 1], [], []>} : vector<256x32xbf16>, vector<32x64xbf16>, vector<256x64xf32> -> vector<256x64xf32>
    %135 = arith.addf %128, %134 : vector<256x64xf32>
    %c2_131 = arith.constant 2 : index
    %c8_132 = arith.constant 8 : index
    %c0_133 = arith.constant 0 : index
    %136 = vector.load %arg13[%c2_131, %c8_132, %c0_133] : memref<18x32x64xf32, #tpu.memory_space<vmem>>, vector<16x16x32xf32>
    %137 = vector.shape_cast %136 : vector<16x16x32xf32> to vector<256x32xf32>
    %138 = arith.truncf %137 : vector<256x32xf32> to vector<256x32xbf16>
    %c7_134 = arith.constant 7 : index
    %c0_135 = arith.constant 0 : index
    %c0_136 = arith.constant 0 : index
    %139 = vector.load %arg6[%c7_134, %c0_135, %c0_136] : memref<9x32x64xbf16, #tpu.memory_space<vmem>>, vector<1x32x64xbf16>
    %140 = vector.shape_cast %139 : vector<1x32x64xbf16> to vector<32x64xbf16>
    %cst_137 = arith.constant dense<0.000000e+00> : vector<256x64xf32>
    %141 = tpu.matmul %138, %140, %cst_137 {dimension_numbers = #tpu.dot_dimension_numbers<[1], [0], [0], [1], [0, 0, 1, 1], [], []>} : vector<256x32xbf16>, vector<32x64xbf16>, vector<256x64xf32> -> vector<256x64xf32>
    %142 = arith.addf %135, %141 : vector<256x64xf32>
    %c2_138 = arith.constant 2 : index
    %c9_139 = arith.constant 9 : index
    %c0_140 = arith.constant 0 : index
    %143 = vector.load %arg13[%c2_138, %c9_139, %c0_140] : memref<18x32x64xf32, #tpu.memory_space<vmem>>, vector<16x16x32xf32>
    %144 = vector.shape_cast %143 : vector<16x16x32xf32> to vector<256x32xf32>
    %145 = arith.truncf %144 : vector<256x32xf32> to vector<256x32xbf16>
    %c8_141 = arith.constant 8 : index
    %c0_142 = arith.constant 0 : index
    %c0_143 = arith.constant 0 : index
    %146 = vector.load %arg6[%c8_141, %c0_142, %c0_143] : memref<9x32x64xbf16, #tpu.memory_space<vmem>>, vector<1x32x64xbf16>
    %147 = vector.shape_cast %146 : vector<1x32x64xbf16> to vector<32x64xbf16>
    %cst_144 = arith.constant dense<0.000000e+00> : vector<256x64xf32>
    %148 = tpu.matmul %145, %147, %cst_144 {dimension_numbers = #tpu.dot_dimension_numbers<[1], [0], [0], [1], [0, 0, 1, 1], [], []>} : vector<256x32xbf16>, vector<32x64xbf16>, vector<256x64xf32> -> vector<256x64xf32>
    %149 = arith.addf %142, %148 : vector<256x64xf32>
    %c0_145 = arith.constant 0 : index
    %c0_146 = arith.constant 0 : index
    %150 = vector.load %arg7[%c0_145, %c0_146] : memref<1x64xf32, #tpu.memory_space<vmem>>, vector<1x64xf32>
    %151 = vector.broadcast %150 : vector<1x64xf32> to vector<256x64xf32>
    %152 = arith.addf %149, %151 : vector<256x64xf32>
    %153 = vector.shape_cast %152 : vector<256x64xf32> to vector<16x16x64xf32>
    %c1_147 = arith.constant 1 : index
    %c8_148 = arith.constant 8 : index
    %c0_149 = arith.constant 0 : index
    %154 = vector.load %arg13[%c1_147, %c8_148, %c0_149] : memref<18x32x64xf32, #tpu.memory_space<vmem>>, vector<16x16x64xf32>
    tpu.vector_store %arg13[%c1_147, %c8_148, %c0_149], %153 {strides = array<i32>} : memref<18x32x64xf32, #tpu.memory_space<vmem>>, vector<16x16x64xf32>,
    %cst_150 = arith.constant 0.000000e+00 : f32
    %155 = vector.broadcast %cst_150 : f32 to vector<256x32xf32>
    %c0_151 = arith.constant 0 : index
    %c7_152 = arith.constant 7 : index
    %c0_153 = arith.constant 0 : index
    %156 = vector.load %arg13[%c0_151, %c7_152, %c0_153] : memref<18x32x64xf32, #tpu.memory_space<vmem>>, vector<16x16x64xf32>
    %157 = vector.shape_cast %156 : vector<16x16x64xf32> to vector<256x64xf32>
    %158 = arith.truncf %157 : vector<256x64xf32> to vector<256x64xbf16>
    %c0_154 = arith.constant 0 : index
    %c0_155 = arith.constant 0 : index
    %c0_156 = arith.constant 0 : index
    %159 = vector.load %arg8[%c0_154, %c0_155, %c0_156] : memref<9x64x32xbf16, #tpu.memory_space<vmem>>, vector<1x64x32xbf16>
    %160 = vector.shape_cast %159 : vector<1x64x32xbf16> to vector<64x32xbf16>
    %cst_157 = arith.constant dense<0.000000e+00> : vector<256x32xf32>
    %161 = tpu.matmul %158, %160, %cst_157 {dimension_numbers = #tpu.dot_dimension_numbers<[1], [0], [0], [1], [0, 0, 1, 1], [], []>} : vector<256x64xbf16>, vector<64x32xbf16>, vector<256x32xf32> -> vector<256x32xf32>
    %162 = arith.addf %155, %161 : vector<256x32xf32>
    %c0_158 = arith.constant 0 : index
    %c8_159 = arith.constant 8 : index
    %c0_160 = arith.constant 0 : index
    %163 = vector.load %arg13[%c0_158, %c8_159, %c0_160] : memref<18x32x64xf32, #tpu.memory_space<vmem>>, vector<16x16x64xf32>
    %164 = vector.shape_cast %163 : vector<16x16x64xf32> to vector<256x64xf32>
    %165 = arith.truncf %164 : vector<256x64xf32> to vector<256x64xbf16>
    %c1_161 = arith.constant 1 : index
    %c0_162 = arith.constant 0 : index
    %c0_163 = arith.constant 0 : index
    %166 = vector.load %arg8[%c1_161, %c0_162, %c0_163] : memref<9x64x32xbf16, #tpu.memory_space<vmem>>, vector<1x64x32xbf16>
    %167 = vector.shape_cast %166 : vector<1x64x32xbf16> to vector<64x32xbf16>
    %cst_164 = arith.constant dense<0.000000e+00> : vector<256x32xf32>
    %168 = tpu.matmul %165, %167, %cst_164 {dimension_numbers = #tpu.dot_dimension_numbers<[1], [0], [0], [1], [0, 0, 1, 1], [], []>} : vector<256x64xbf16>, vector<64x32xbf16>, vector<256x32xf32> -> vector<256x32xf32>
    %169 = arith.addf %162, %168 : vector<256x32xf32>
    %c0_165 = arith.constant 0 : index
    %c9_166 = arith.constant 9 : index
    %c0_167 = arith.constant 0 : index
    %170 = vector.load %arg13[%c0_165, %c9_166, %c0_167] : memref<18x32x64xf32, #tpu.memory_space<vmem>>, vector<16x16x64xf32>
    %171 = vector.shape_cast %170 : vector<16x16x64xf32> to vector<256x64xf32>
    %172 = arith.truncf %171 : vector<256x64xf32> to vector<256x64xbf16>
    %c2_168 = arith.constant 2 : index
    %c0_169 = arith.constant 0 : index
    %c0_170 = arith.constant 0 : index
    %173 = vector.load %arg8[%c2_168, %c0_169, %c0_170] : memref<9x64x32xbf16, #tpu.memory_space<vmem>>, vector<1x64x32xbf16>
    %174 = vector.shape_cast %173 : vector<1x64x32xbf16> to vector<64x32xbf16>
    %cst_171 = arith.constant dense<0.000000e+00> : vector<256x32xf32>
    %175 = tpu.matmul %172, %174, %cst_171 {dimension_numbers = #tpu.dot_dimension_numbers<[1], [0], [0], [1], [0, 0, 1, 1], [], []>} : vector<256x64xbf16>, vector<64x32xbf16>, vector<256x32xf32> -> vector<256x32xf32>
    %176 = arith.addf %169, %175 : vector<256x32xf32>
    %c1_172 = arith.constant 1 : index
    %c7_173 = arith.constant 7 : index
    %c0_174 = arith.constant 0 : index
    %177 = vector.load %arg13[%c1_172, %c7_173, %c0_174] : memref<18x32x64xf32, #tpu.memory_space<vmem>>, vector<16x16x64xf32>
    %178 = vector.shape_cast %177 : vector<16x16x64xf32> to vector<256x64xf32>
    %179 = arith.truncf %178 : vector<256x64xf32> to vector<256x64xbf16>
    %c3_175 = arith.constant 3 : index
    %c0_176 = arith.constant 0 : index
    %c0_177 = arith.constant 0 : index
    %180 = vector.load %arg8[%c3_175, %c0_176, %c0_177] : memref<9x64x32xbf16, #tpu.memory_space<vmem>>, vector<1x64x32xbf16>
    %181 = vector.shape_cast %180 : vector<1x64x32xbf16> to vector<64x32xbf16>
    %cst_178 = arith.constant dense<0.000000e+00> : vector<256x32xf32>
    %182 = tpu.matmul %179, %181, %cst_178 {dimension_numbers = #tpu.dot_dimension_numbers<[1], [0], [0], [1], [0, 0, 1, 1], [], []>} : vector<256x64xbf16>, vector<64x32xbf16>, vector<256x32xf32> -> vector<256x32xf32>
    %183 = arith.addf %176, %182 : vector<256x32xf32>
    %c1_179 = arith.constant 1 : index
    %c8_180 = arith.constant 8 : index
    %c0_181 = arith.constant 0 : index
    %184 = vector.load %arg13[%c1_179, %c8_180, %c0_181] : memref<18x32x64xf32, #tpu.memory_space<vmem>>, vector<16x16x64xf32>
    %185 = vector.shape_cast %184 : vector<16x16x64xf32> to vector<256x64xf32>
    %186 = arith.truncf %185 : vector<256x64xf32> to vector<256x64xbf16>
    %c4_182 = arith.constant 4 : index
    %c0_183 = arith.constant 0 : index
    %c0_184 = arith.constant 0 : index
    %187 = vector.load %arg8[%c4_182, %c0_183, %c0_184] : memref<9x64x32xbf16, #tpu.memory_space<vmem>>, vector<1x64x32xbf16>
    %188 = vector.shape_cast %187 : vector<1x64x32xbf16> to vector<64x32xbf16>
    %cst_185 = arith.constant dense<0.000000e+00> : vector<256x32xf32>
    %189 = tpu.matmul %186, %188, %cst_185 {dimension_numbers = #tpu.dot_dimension_numbers<[1], [0], [0], [1], [0, 0, 1, 1], [], []>} : vector<256x64xbf16>, vector<64x32xbf16>, vector<256x32xf32> -> vector<256x32xf32>
    %190 = arith.addf %183, %189 : vector<256x32xf32>
    %c1_186 = arith.constant 1 : index
    %c9_187 = arith.constant 9 : index
    %c0_188 = arith.constant 0 : index
    %191 = vector.load %arg13[%c1_186, %c9_187, %c0_188] : memref<18x32x64xf32, #tpu.memory_space<vmem>>, vector<16x16x64xf32>
    %192 = vector.shape_cast %191 : vector<16x16x64xf32> to vector<256x64xf32>
    %193 = arith.truncf %192 : vector<256x64xf32> to vector<256x64xbf16>
    %c5_189 = arith.constant 5 : index
    %c0_190 = arith.constant 0 : index
    %c0_191 = arith.constant 0 : index
    %194 = vector.load %arg8[%c5_189, %c0_190, %c0_191] : memref<9x64x32xbf16, #tpu.memory_space<vmem>>, vector<1x64x32xbf16>
    %195 = vector.shape_cast %194 : vector<1x64x32xbf16> to vector<64x32xbf16>
    %cst_192 = arith.constant dense<0.000000e+00> : vector<256x32xf32>
    %196 = tpu.matmul %193, %195, %cst_192 {dimension_numbers = #tpu.dot_dimension_numbers<[1], [0], [0], [1], [0, 0, 1, 1], [], []>} : vector<256x64xbf16>, vector<64x32xbf16>, vector<256x32xf32> -> vector<256x32xf32>
    %197 = arith.addf %190, %196 : vector<256x32xf32>
    %c2_193 = arith.constant 2 : index
    %c7_194 = arith.constant 7 : index
    %c0_195 = arith.constant 0 : index
    %198 = vector.load %arg13[%c2_193, %c7_194, %c0_195] : memref<18x32x64xf32, #tpu.memory_space<vmem>>, vector<16x16x64xf32>
    %199 = vector.shape_cast %198 : vector<16x16x64xf32> to vector<256x64xf32>
    %200 = arith.truncf %199 : vector<256x64xf32> to vector<256x64xbf16>
    %c6_196 = arith.constant 6 : index
    %c0_197 = arith.constant 0 : index
    %c0_198 = arith.constant 0 : index
    %201 = vector.load %arg8[%c6_196, %c0_197, %c0_198] : memref<9x64x32xbf16, #tpu.memory_space<vmem>>, vector<1x64x32xbf16>
    %202 = vector.shape_cast %201 : vector<1x64x32xbf16> to vector<64x32xbf16>
    %cst_199 = arith.constant dense<0.000000e+00> : vector<256x32xf32>
    %203 = tpu.matmul %200, %202, %cst_199 {dimension_numbers = #tpu.dot_dimension_numbers<[1], [0], [0], [1], [0, 0, 1, 1], [], []>} : vector<256x64xbf16>, vector<64x32xbf16>, vector<256x32xf32> -> vector<256x32xf32>
    %204 = arith.addf %197, %203 : vector<256x32xf32>
    %c2_200 = arith.constant 2 : index
    %c8_201 = arith.constant 8 : index
    %c0_202 = arith.constant 0 : index
    %205 = vector.load %arg13[%c2_200, %c8_201, %c0_202] : memref<18x32x64xf32, #tpu.memory_space<vmem>>, vector<16x16x64xf32>
    %206 = vector.shape_cast %205 : vector<16x16x64xf32> to vector<256x64xf32>
    %207 = arith.truncf %206 : vector<256x64xf32> to vector<256x64xbf16>
    %c7_203 = arith.constant 7 : index
    %c0_204 = arith.constant 0 : index
    %c0_205 = arith.constant 0 : index
    %208 = vector.load %arg8[%c7_203, %c0_204, %c0_205] : memref<9x64x32xbf16, #tpu.memory_space<vmem>>, vector<1x64x32xbf16>
    %209 = vector.shape_cast %208 : vector<1x64x32xbf16> to vector<64x32xbf16>
    %cst_206 = arith.constant dense<0.000000e+00> : vector<256x32xf32>
    %210 = tpu.matmul %207, %209, %cst_206 {dimension_numbers = #tpu.dot_dimension_numbers<[1], [0], [0], [1], [0, 0, 1, 1], [], []>} : vector<256x64xbf16>, vector<64x32xbf16>, vector<256x32xf32> -> vector<256x32xf32>
    %211 = arith.addf %204, %210 : vector<256x32xf32>
    %c2_207 = arith.constant 2 : index
    %c9_208 = arith.constant 9 : index
    %c0_209 = arith.constant 0 : index
    %212 = vector.load %arg13[%c2_207, %c9_208, %c0_209] : memref<18x32x64xf32, #tpu.memory_space<vmem>>, vector<16x16x64xf32>
    %213 = vector.shape_cast %212 : vector<16x16x64xf32> to vector<256x64xf32>
    %214 = arith.truncf %213 : vector<256x64xf32> to vector<256x64xbf16>
    %c8_210 = arith.constant 8 : index
    %c0_211 = arith.constant 0 : index
    %c0_212 = arith.constant 0 : index
    %215 = vector.load %arg8[%c8_210, %c0_211, %c0_212] : memref<9x64x32xbf16, #tpu.memory_space<vmem>>, vector<1x64x32xbf16>
    %216 = vector.shape_cast %215 : vector<1x64x32xbf16> to vector<64x32xbf16>
    %cst_213 = arith.constant dense<0.000000e+00> : vector<256x32xf32>
    %217 = tpu.matmul %214, %216, %cst_213 {dimension_numbers = #tpu.dot_dimension_numbers<[1], [0], [0], [1], [0, 0, 1, 1], [], []>} : vector<256x64xbf16>, vector<64x32xbf16>, vector<256x32xf32> -> vector<256x32xf32>
    %218 = arith.addf %211, %217 : vector<256x32xf32>
    %c0_214 = arith.constant 0 : index
    %c0_215 = arith.constant 0 : index
    %219 = vector.load %arg9[%c0_214, %c0_215] : memref<1x32xf32, #tpu.memory_space<vmem>>, vector<1x32xf32>
    %220 = vector.broadcast %219 : vector<1x32xf32> to vector<256x32xf32>
    %221 = arith.addf %218, %220 : vector<256x32xf32>
    %222 = vector.extract_strided_slice %221 {offsets = [0, 0], sizes = [256, 16], strides = [1, 1]} : vector<256x32xf32> to vector<256x16xf32>
    %223 = vector.extract_strided_slice %221 {offsets = [0, 16], sizes = [256, 16], strides = [1, 1]} : vector<256x32xf32> to vector<256x16xf32>
    %cst_216 = arith.constant 0.000000e+00 : f32
    %224 = vector.broadcast %cst_216 : f32 to vector<256x16xf32>
    %225 = arith.subf %224, %223 : vector<256x16xf32>
    %226 = math.exp %225 : vector<256x16xf32>
    %cst_217 = arith.constant 1.000000e+00 : f32
    %227 = vector.broadcast %cst_217 : f32 to vector<256x16xf32>
    %228 = arith.addf %227, %226 : vector<256x16xf32>
    %229 = tpu.reciprocal %228 {approx = true} : vector<256x16xf32> -> vector<256x16xf32>
    %230 = arith.mulf %222, %229 : vector<256x16xf32>
    %c0_218 = arith.constant 0 : index
    %c0_219 = arith.constant 0 : index
    %231 = vector.load %arg3[%c0_218, %c0_219] : memref<16x16xf32, #tpu.memory_space<vmem>>, vector<16x16xf32>
    %cst_220 = arith.constant dense<0.000000e+00> : vector<16x256xf32>
    %232 = tpu.matmul %231, %230, %cst_220 {dimension_numbers = #tpu.dot_dimension_numbers<[1], [1], [0], [0], [0, 0, 1, 0], [], []>} : vector<16x16xf32>, vector<256x16xf32>, vector<16x256xf32> -> vector<16x256xf32>
    %c0_221 = arith.constant 0 : index
    %c0_222 = arith.constant 0 : index
    %c0_223 = arith.constant 0 : index
    %233 = vector.load %arg2[%c0_221, %c0_222, %c0_223] : memref<1x16x256xf32, #tpu.memory_space<vmem>>, vector<1x16x256xf32>
    %234 = vector.shape_cast %233 : vector<1x16x256xf32> to vector<16x256xf32>
    %235 = arith.addf %232, %234 : vector<16x256xf32>
    %c0_224 = arith.constant 0 : index
    %c0_225 = arith.constant 0 : index
    %236 = vector.load %arg10[%c0_224, %c0_225] : memref<16x1xf32, #tpu.memory_space<vmem>>, vector<16x1xf32>
    %237 = vector.broadcast %236 : vector<16x1xf32> to vector<16x256xf32>
    %238 = arith.mulf %235, %237 : vector<16x256xf32>
    %c0_226 = arith.constant 0 : index
    %c0_227 = arith.constant 0 : index
    %239 = vector.load %arg11[%c0_226, %c0_227] : memref<16x1xf32, #tpu.memory_space<vmem>>, vector<16x1xf32>
    %240 = vector.broadcast %239 : vector<16x1xf32> to vector<16x256xf32>
    %241 = arith.addf %238, %240 : vector<16x256xf32>
    %c0_228 = arith.constant 0 : index
    %c0_229 = arith.constant 0 : index
    %c0_230 = arith.constant 0 : index
    %242 = vector.load %arg12[%c0_228, %c0_229, %c0_230] : memref<1x16x256xf32, #tpu.memory_space<vmem>>, vector<1x16x256xf32>
    %243 = vector.shape_cast %242 : vector<1x16x256xf32> to vector<16x256xf32>
    %244 = vector.shape_cast %241 : vector<16x256xf32> to vector<1x16x256xf32>
    tpu.vector_store %arg12[%c0_228, %c0_229, %c0_230], %244 {strides = array<i32>} : memref<1x16x256xf32, #tpu.memory_space<vmem>>, vector<1x16x256xf32>,
    return
  }
  func.func @transform_0(%arg0: i32) -> (i32, i32, i32, i32) {
    %c0_i32 = arith.constant 0 : i32
    %c0_i32_0 = arith.constant 0 : i32
    %c0_i32_1 = arith.constant 0 : i32
    %c0_i32_2 = arith.constant 0 : i32
    return %arg0, %c0_i32, %c0_i32_0, %c0_i32_1 : i32, i32, i32, i32
  }
  func.func @transform_1(%arg0: i32) -> (i32, i32, i32) {
    %c0_i32 = arith.constant 0 : i32
    %c0_i32_0 = arith.constant 0 : i32
    %c0_i32_1 = arith.constant 0 : i32
    return %arg0, %c0_i32, %c0_i32_0 : i32, i32, i32
  }
  func.func @transform_2(%arg0: i32) -> (i32, i32) {
    %c0_i32 = arith.constant 0 : i32
    %c0_i32_0 = arith.constant 0 : i32
    %c0_i32_1 = arith.constant 0 : i32
    return %c0_i32, %c0_i32_0 : i32, i32
  }
  func.func @transform_3(%arg0: i32) -> (i32, i32, i32) {
    %c0_i32 = arith.constant 0 : i32
    %c0_i32_0 = arith.constant 0 : i32
    %c0_i32_1 = arith.constant 0 : i32
    %c0_i32_2 = arith.constant 0 : i32
    return %c0_i32, %c0_i32_0, %c0_i32_1 : i32, i32, i32
  }
  func.func @transform_4(%arg0: i32) -> (i32, i32) {
    %c0_i32 = arith.constant 0 : i32
    %c0_i32_0 = arith.constant 0 : i32
    %c0_i32_1 = arith.constant 0 : i32
    return %c0_i32, %c0_i32_0 : i32, i32
  }
  func.func @transform_5(%arg0: i32) -> (i32, i32, i32) {
    %c0_i32 = arith.constant 0 : i32
    %c0_i32_0 = arith.constant 0 : i32
    %c0_i32_1 = arith.constant 0 : i32
    %c0_i32_2 = arith.constant 0 : i32
    return %c0_i32, %c0_i32_0, %c0_i32_1 : i32, i32, i32
  }
  func.func @transform_6(%arg0: i32) -> (i32, i32) {
    %c0_i32 = arith.constant 0 : i32
    %c0_i32_0 = arith.constant 0 : i32
    %c0_i32_1 = arith.constant 0 : i32
    return %c0_i32, %c0_i32_0 : i32, i32
  }
  func.func @transform_7(%arg0: i32) -> (i32, i32, i32) {
    %c0_i32 = arith.constant 0 : i32
    %c0_i32_0 = arith.constant 0 : i32
    %c0_i32_1 = arith.constant 0 : i32
    %c0_i32_2 = arith.constant 0 : i32
    return %c0_i32, %c0_i32_0, %c0_i32_1 : i32, i32, i32
  }
  func.func @transform_8(%arg0: i32) -> (i32, i32) {
    %c0_i32 = arith.constant 0 : i32
    %c0_i32_0 = arith.constant 0 : i32
    %c0_i32_1 = arith.constant 0 : i32
    return %c0_i32, %c0_i32_0 : i32, i32
  }
  func.func @transform_9(%arg0: i32) -> (i32, i32) {
    %c0_i32 = arith.constant 0 : i32
    %c0_i32_0 = arith.constant 0 : i32
    %c0_i32_1 = arith.constant 0 : i32
    return %c0_i32, %c0_i32_0 : i32, i32
  }
  func.func @transform_10(%arg0: i32) -> (i32, i32) {
    %c0_i32 = arith.constant 0 : i32
    %c0_i32_0 = arith.constant 0 : i32
    %c0_i32_1 = arith.constant 0 : i32
    return %c0_i32, %c0_i32_0 : i32, i32
  }
  func.func @transform_11(%arg0: i32) -> (i32, i32, i32) {
    %c0_i32 = arith.constant 0 : i32
    %c0_i32_0 = arith.constant 0 : i32
    %c0_i32_1 = arith.constant 0 : i32
    return %arg0, %c0_i32, %c0_i32_0 : i32, i32, i32
  }
}

</mosaic_0001>

<bundles_post_ra>
// kernel: conv_gated_residual_network.1
= control target key start
LH: loop header
LB: loop body
LE: loop exit
PB: predicated region body
PF: predicated region fallthrough
CT: control target
= control target key end

     0   :  { %s12165_s17 = smov 0   ;;  %s15871_s0 = inlined_call_operand.vmem [shape: f32[2,16,16,16], index: 0, kind: input, shape index: {}]   ;;  %s15872_s1 = inlined_call_operand.vmem [shape: f32[2,16,256], index: 1, kind: input, shape index: {}]   ;;  %s15873_s2 = inlined_call_operand.vmem [shape: f32[16,16], index: 2, kind: input, shape index: {}]   ;;  %s15874_s3 = inlined_call_operand.vmem [shape: bf16[9,16,32], index: 3, kind: input, shape index: {}]   ;;  %s15875_s4 = inlined_call_operand.vmem [shape: f32[1,32], index: 4, kind: input, shape index: {}]   ;;  %s15876_s5 = inlined_call_operand.vmem [shape: bf16[9,32,64], index: 5, kind: input, shape index: {}]   ;;  %s15877_s6 = inlined_call_operand.vmem [shape: f32[1,64], index: 6, kind: input, shape index: {}]   ;;  %s15878_s7 = inlined_call_operand.vmem [shape: bf16[9,64,32], index: 7, kind: input, shape index: {}]   ;;  %s15879_s8 = inlined_call_operand.vmem [shape: f32[1,32], index: 8, kind: input, shape index: {}]   ;;  %s15880_s9 = inlined_call_operand.vmem [shape: f32[16,1], index: 9, kind: input, shape index: {}]   ;;  %s15881_s10 = inlined_call_operand.vmem [shape: f32[16,1], index: 10, kind: input, shape index: {}]   ;;  %s15882_s11 = inlined_call_operand.vmem [shape: f32[2,16,256], index: 11, kind: output, shape index: {}]  }
   0x1 LB: > { %s9611_s18 = sadd.s32 4294967295, %s12100_s17   ;;  %p9615_p0 = scmp.ge.s32.totalorder %s12100_s17, 1  ;;  %s12100_s17 = sphi %s12165_s17, %s21_s17  }
   0x2   : > { %p347_p1 = scmp.lt.s32.totalorder %s12100_s17, 3 }
   0x4   : > { %p348_p2 = pnand %p9615_p0, %p347_p1 }
   0x6   : > { %351 = sbr.rel (%p348_p2) target bundleno = 1919 (0x77f), region = 64 }
   0xb   : > { %v11839_v0 = vld [vmem:[%s15874_s3 + $0x8] sm:$0xff]   ;;  %vm408_vm0 = vcmask 523264   ;;  %p12176_p3 = scmp.lt.s32.totalorder %s9611_s18, 1  ;;  %v12183_v1 = vld [vmem:[%s15874_s3 + $0x10] sm:$0xff]   ;;  %v12102_v2 = vmov 0.0   ;;  %v12200_v3 = vld [vmem:[%s15874_s3] sm:$0xff]  }
   0xc   : > { %10834 = vmatprep.subr.bf16.mxu0 %v11839_v0  ;;  %11824 = vmatprep.subr.bf16.mxu1 %v11839_v0  ;;  %410 = vst.msk [vmem:[#allocation2 + $0x8] sm:$0xff] %vm408_vm0, %v12102_v2  ;;  %411 = vst.msk [vmem:[#allocation2 + $0x10] sm:$0xff] %vm408_vm0, %v12102_v2  ;;  %vm418_vm1 = vcmask 516096   ;;  %vm488_vm2 = vcmask 130048   ;;  %v12291_v29 = vld [vmem:[%s15874_s3 + $0x20] sm:$0xff]   ;;  %v12311_v44 = vld [vmem:[%s15874_s3 + $0x18] sm:$0xff]  }
   0xd   : > { %409 = vst.msk [vmem:[#allocation2] sm:$0xff] %vm408_vm0, %v12102_v2  ;;  %412 = vst.msk [vmem:[#allocation2 + $0x18] sm:$0xff] %vm408_vm0, %v12102_v2  ;;  %10835 = vmatpush3.bf16.msra.mxu0 %v11839_v0  ;;  %11825 = vmatpush3.bf16.msra.mxu1 %v11839_v0  ;;  %s16182_s18 = smov (!%p12176_p3, %s9611_s18), 1  ;;  %vm3338_vm3 = vcmask 261120   ;;  %s12103_s20 = smov 112  }
   0xe   : > { %414 = vst.msk [vmem:[#allocation2 + $0x220] sm:$0xff] %vm408_vm0, %v12102_v2  ;;  %415 = vst.msk [vmem:[#allocation2 + $0x228] sm:$0xff] %vm408_vm0, %v12102_v2  ;;  %10902 = vmatprep.subr.bf16.mxu0 %v12183_v1  ;;  %s10300_s26 = sshll.u32 %s16182_s18, 8  ;;  %10868 = vmatprep.subr.bf16.mxu1 %v12200_v3  ;;  %s10301_s14 = sshll.u32 %s16182_s18, 5 }
   0xf   : > { %416 = vst.msk [vmem:[#allocation2 + $0x230] sm:$0xff] %vm408_vm0, %v12102_v2  ;;  %417 = vst.msk [vmem:[#allocation2 + $0x238] sm:$0xff] %vm408_vm0, %v12102_v2  ;;  %s12244_s29 = scalar_lea.vmem %s15871_s0, %s10300_s26  ;;  %s401_s19 = scalar_lea.vmem %s15872_s1, %s10301_s14 }
  0x10   : > { %419 = vst.msk [vmem:[#allocation2 + $0x7] sm:$0x1] %vm418_vm1, %v12102_v2  ;;  %420 = vst.msk [vmem:[#allocation2 + $0x27] sm:$0x1] %vm418_vm1, %v12102_v2  ;;  %v455_v4 = vld [vmem:[%s12244_s29] sm:$0xff]  ;;  %v456_v5 = vld [vmem:[%s12244_s29 + $0x8] sm:$0xff]  ;;  %s406_s18 = scalar_lea.vmem %s15882_s11, %s10301_s14 }
  0x11   : > { %421 = vst.msk [vmem:[#allocation2 + $0x47] sm:$0x1] %vm418_vm1, %v12102_v2  ;;  %422 = vst.msk [vmem:[#allocation2 + $0x67] sm:$0x1] %vm418_vm1, %v12102_v2  ;;  %v473_v6 = vld [vmem:[%s12244_s29 + $0x90] sm:$0xff]  ;;  %v474_v7 = vld [vmem:[%s12244_s29 + $0x98] sm:$0xff] }
  0x12   : > { %423 = vst.msk [vmem:[#allocation2 + $0x87] sm:$0x1] %vm418_vm1, %v12102_v2  ;;  %424 = vst.msk [vmem:[#allocation2 + $0xa7] sm:$0x1] %vm418_vm1, %v12102_v2  ;;  %v475_v8 = vld [vmem:[%s12244_s29 + $0xa0] sm:$0xff]  ;;  %v476_v9 = vld [vmem:[%s12244_s29 + $0xa8] sm:$0xff] }
  0x13   : > { %425 = vst.msk [vmem:[#allocation2 + $0xc7] sm:$0x1] %vm418_vm1, %v12102_v2  ;;  %426 = vst.msk [vmem:[#allocation2 + $0xe7] sm:$0x1] %vm418_vm1, %v12102_v2  ;;  %v571_v10 = vld [vmem:[#allocation2 + $0x8] sm:$0xff]  ;;  %v572_v11 = vld [vmem:[#allocation2 + $0x10] sm:$0xff] }
  0x14   : > { %427 = vst.msk [vmem:[#allocation2 + $0x107] sm:$0x1] %vm418_vm1, %v12102_v2  ;;  %428 = vst.msk [vmem:[#allocation2 + $0x127] sm:$0x1] %vm418_vm1, %v12102_v2  ;;  %v457_v12 = vld [vmem:[%s12244_s29 + $0x10] sm:$0xff]  ;;  %v603_v13 = vpack.c.bf16 %v572_v11, %v571_v10  ;;  %v458_v14 = vld [vmem:[%s12244_s29 + $0x18] sm:$0xff] }
  0x15   : > { %429 = vst.msk [vmem:[#allocation2 + $0x147] sm:$0x1] %vm418_vm1, %v12102_v2  ;;  %430 = vst.msk [vmem:[#allocation2 + $0x167] sm:$0x1] %vm418_vm1, %v12102_v2  ;;  %v459_v15 = vld [vmem:[%s12244_s29 + $0x20] sm:$0xff]  ;;  %v460_v16 = vld [vmem:[%s12244_s29 + $0x28] sm:$0xff] }
  0x16   : > { %431 = vst.msk [vmem:[#allocation2 + $0x187] sm:$0x1] %vm418_vm1, %v12102_v2  ;;  %432 = vst.msk [vmem:[#allocation2 + $0x1a7] sm:$0x1] %vm418_vm1, %v12102_v2  ;;  %v477_v17 = vld [vmem:[%s12244_s29 + $0xb0] sm:$0xff]  ;;  %v478_v18 = vld [vmem:[%s12244_s29 + $0xb8] sm:$0xff]  ;;  %10836 = vmatprep.mubr.msk.bf16.mxu0 %vm488_vm2, %v603_v13 }
  0x17   : > { %433 = vst.msk [vmem:[#allocation2 + $0x1c7] sm:$0x1] %vm418_vm1, %v12102_v2  ;;  %434 = vst.msk [vmem:[#allocation2 + $0x1e7] sm:$0x1] %vm418_vm1, %v12102_v2  ;;  %v479_v19 = vld [vmem:[%s12244_s29 + $0xc0] sm:$0xff]  ;;  %v480_v20 = vld [vmem:[%s12244_s29 + $0xc8] sm:$0xff] }
  0x18   : > { %435 = vst.msk [vmem:[#allocation2 + $0x207] sm:$0x1] %vm418_vm1, %v12102_v2  ;;  %436 = vst.msk [vmem:[#allocation2 + $0x227] sm:$0x1] %vm418_vm1, %v12102_v2  ;;  %v461_v21 = vld [vmem:[%s12244_s29 + $0x30] sm:$0xff]  ;;  %v462_v22 = vld [vmem:[%s12244_s29 + $0x38] sm:$0xff] }
  0x19   : > { %437 = vst.msk [vmem:[#allocation2 + $0x18] sm:$0x1] %vm418_vm1, %v12102_v2  ;;  %438 = vst.msk [vmem:[#allocation2 + $0x38] sm:$0x1] %vm418_vm1, %v12102_v2  ;;  %v463_v23 = vld [vmem:[%s12244_s29 + $0x40] sm:$0xff]  ;;  %v464_v24 = vld [vmem:[%s12244_s29 + $0x48] sm:$0xff] }
  0x1a   : > { %439 = vst.msk [vmem:[#allocation2 + $0x58] sm:$0x1] %vm418_vm1, %v12102_v2  ;;  %440 = vst.msk [vmem:[#allocation2 + $0x78] sm:$0x1] %vm418_vm1, %v12102_v2  ;;  %v481_v25 = vld [vmem:[%s12244_s29 + $0xd0] sm:$0xff]  ;;  %v482_v26 = vld [vmem:[%s12244_s29 + $0xd8] sm:$0xff] }
  0x1b   : > { %441 = vst.msk [vmem:[#allocation2 + $0x98] sm:$0x1] %vm418_vm1, %v12102_v2  ;;  %442 = vst.msk [vmem:[#allocation2 + $0xb8] sm:$0x1] %vm418_vm1, %v12102_v2  ;;  %v483_v27 = vld [vmem:[%s12244_s29 + $0xe0] sm:$0xff]  ;;  %v484_v28 = vld [vmem:[%s12244_s29 + $0xe8] sm:$0xff] }
  0x1c   : > { %443 = vst.msk [vmem:[#allocation2 + $0xd8] sm:$0x1] %vm418_vm1, %v12102_v2  ;;  %444 = vst.msk [vmem:[#allocation2 + $0xf8] sm:$0x1] %vm418_vm1, %v12102_v2  ;;  %v465_v40 = vld [vmem:[%s12244_s29 + $0x50] sm:$0xff]  ;;  %v466_v41 = vld [vmem:[%s12244_s29 + $0x58] sm:$0xff] }
  0x1d   : > { %445 = vst.msk [vmem:[#allocation2 + $0x118] sm:$0x1] %vm418_vm1, %v12102_v2  ;;  %446 = vst.msk [vmem:[#allocation2 + $0x138] sm:$0x1] %vm418_vm1, %v12102_v2  ;;  %v467_v58 = vld [vmem:[%s12244_s29 + $0x60] sm:$0xff]  ;;  %v468_v59 = vld [vmem:[%s12244_s29 + $0x68] sm:$0xff] }
  0x1e   : > { %447 = vst.msk [vmem:[#allocation2 + $0x158] sm:$0x1] %vm418_vm1, %v12102_v2  ;;  %448 = vst.msk [vmem:[#allocation2 + $0x178] sm:$0x1] %vm418_vm1, %v12102_v2  ;;  %v469_v62 = vld [vmem:[%s12244_s29 + $0x70] sm:$0xff]  ;;  %v470_v63 = vld [vmem:[%s12244_s29 + $0x78] sm:$0xff] }
  0x1f   : > { %449 = vst.msk [vmem:[#allocation2 + $0x198] sm:$0x1] %vm418_vm1, %v12102_v2  ;;  %450 = vst.msk [vmem:[#allocation2 + $0x1b8] sm:$0x1] %vm418_vm1, %v12102_v2  ;;  %v471_v0 = vld [vmem:[%s12244_s29 + $0x80] sm:$0xff]  ;;  %v522_v10 = vld [vmem:[#allocation2 + $0xf] sm:$0xff] }
  0x20   : > { %451 = vst.msk [vmem:[#allocation2 + $0x1d8] sm:$0x1] %vm418_vm1, %v12102_v2  ;;  %452 = vst.msk [vmem:[#allocation2 + $0x1f8] sm:$0x1] %vm418_vm1, %v12102_v2 }
  0x21   : > { %453 = vst.msk [vmem:[#allocation2 + $0x218] sm:$0x1] %vm418_vm1, %v12102_v2  ;;  %454 = vst.msk [vmem:[#allocation2 + $0x238] sm:$0x1] %vm418_vm1, %v12102_v2 }
  0x22   : > { %489 = vst.msk [vmem:[#allocation2 + $0x28] sm:$0xff] %vm488_vm2, %v455_v4  ;;  %490 = vst.msk [vmem:[#allocation2 + $0x30] sm:$0xff] %vm488_vm2, %v456_v5 }
  0x23   : > { %507 = vst.msk [vmem:[#allocation2 + $0x148] sm:$0xff] %vm488_vm2, %v473_v6  ;;  %508 = vst.msk [vmem:[#allocation2 + $0x150] sm:$0xff] %vm488_vm2, %v474_v7 }
  0x24   : > { %509 = vst.msk [vmem:[#allocation2 + $0x168] sm:$0xff] %vm488_vm2, %v475_v8  ;;  %510 = vst.msk [vmem:[#allocation2 + $0x170] sm:$0xff] %vm488_vm2, %v476_v9  ;;  %v521_v9 = vld [vmem:[#allocation2 + $0x7] sm:$0xff] }
  0x25   : > { %491 = vst.msk [vmem:[#allocation2 + $0x48] sm:$0xff] %vm488_vm2, %v457_v12  ;;  %492 = vst.msk [vmem:[#allocation2 + $0x50] sm:$0xff] %vm488_vm2, %v458_v14  ;;  %v553_v13 = vpack.c.bf16 %v522_v10, %v521_v9 }
  0x26   : > { %493 = vst.msk [vmem:[#allocation2 + $0x68] sm:$0xff] %vm488_vm2, %v459_v15  ;;  %494 = vst.msk [vmem:[#allocation2 + $0x70] sm:$0xff] %vm488_vm2, %v460_v16 }
  0x27   : > { %511 = vst.msk [vmem:[#allocation2 + $0x188] sm:$0xff] %vm488_vm2, %v477_v17  ;;  %512 = vst.msk [vmem:[#allocation2 + $0x190] sm:$0xff] %vm488_vm2, %v478_v18 }
  0x28   : > { %513 = vst.msk [vmem:[#allocation2 + $0x1a8] sm:$0xff] %vm488_vm2, %v479_v19  ;;  %514 = vst.msk [vmem:[#allocation2 + $0x1b0] sm:$0xff] %vm488_vm2, %v480_v20 }
  0x29   : > { %495 = vst.msk [vmem:[#allocation2 + $0x88] sm:$0xff] %vm488_vm2, %v461_v21  ;;  %496 = vst.msk [vmem:[#allocation2 + $0x90] sm:$0xff] %vm488_vm2, %v462_v22  ;;  %v573_v30 = vld [vmem:[#allocation2 + $0x28] sm:$0xff]  ;;  %v574_v31 = vld [vmem:[#allocation2 + $0x30] sm:$0xff] }
  0x2a   : > { %497 = vst.msk [vmem:[#allocation2 + $0xa8] sm:$0xff] %vm488_vm2, %v463_v23  ;;  %498 = vst.msk [vmem:[#allocation2 + $0xb0] sm:$0xff] %vm488_vm2, %v464_v24  ;;  %v591_v32 = vld [vmem:[#allocation2 + $0x148] sm:$0xff]  ;;  %v12296_v33 = vpack.c.bf16 %v574_v31, %v573_v30  ;;  %v592_v34 = vld [vmem:[#allocation2 + $0x150] sm:$0xff] }
  0x2b   : > { %515 = vst.msk [vmem:[#allocation2 + $0x1c8] sm:$0xff] %vm488_vm2, %v481_v25  ;;  %516 = vst.msk [vmem:[#allocation2 + $0x1d0] sm:$0xff] %vm488_vm2, %v482_v26  ;;  %v593_v35 = vld [vmem:[#allocation2 + $0x168] sm:$0xff]  ;;  %v594_v36 = vld [vmem:[#allocation2 + $0x170] sm:$0xff]  ;;  %v12298_v37 = vpack.c.bf16 %v592_v34, %v591_v32 }
  0x2c   : > { %517 = vst.msk [vmem:[#allocation2 + $0x1e8] sm:$0xff] %vm488_vm2, %v483_v27  ;;  %518 = vst.msk [vmem:[#allocation2 + $0x1f0] sm:$0xff] %vm488_vm2, %v484_v28  ;;  %v12300_v38 = vpack.c.bf16 %v594_v36, %v593_v35  ;;  %v575_v39 = vld [vmem:[#allocation2 + $0x48] sm:$0xff]  ;;  %10837 = vmatmul.mubr.msk.bf16.vlgmr.msra.gmra.mxu0 %vm488_vm2, %v12296_v33  ;;  %v576_v42 = vld [vmem:[#allocation2 + $0x50] sm:$0xff] }
  0x2d   : > { %v577_v43 = vld [vmem:[#allocation2 + $0x68] sm:$0xff]  ;;  %499 = vst.msk [vmem:[#allocation2 + $0xc8] sm:$0xff] %vm488_vm2, %v465_v40  ;;  %500 = vst.msk [vmem:[#allocation2 + $0xd0] sm:$0xff] %vm488_vm2, %v466_v41  ;;  %10856 = vmatprep.mubr.msk.bf16.mxu1 %vm488_vm2, %v12298_v37  ;;  %10903 = vmatpush3.bf16.msra.mxu0 %v12183_v1  ;;  %v12316_v45 = vpack.c.bf16 %v576_v42, %v575_v39  ;;  %v578_v46 = vld [vmem:[#allocation2 + $0x70] sm:$0xff] }
  0x2e   : > { %v595_v47 = vld [vmem:[#allocation2 + $0x188] sm:$0xff]  ;;  %v596_v48 = vld [vmem:[#allocation2 + $0x190] sm:$0xff]  ;;  %10857 = vmatmul.mubr.msk.bf16.vlgmr.msra.gmra.mxu1 %vm488_vm2, %v12300_v38  ;;  %10970 = vmatprep.subr.bf16.mxu0 %v12291_v29  ;;  %v12326_v54 = vpack.c.bf16 %v578_v46, %v577_v43  ;;  %501 = vst.msk [vmem:[#allocation2 + $0xe8] sm:$0xff] %vm488_vm2, %v467_v58  ;;  %502 = vst.msk [vmem:[#allocation2 + $0xf0] sm:$0xff] %vm488_vm2, %v468_v59 }
  0x2f   : > { %v12320_v49 = vpack.c.bf16 %v596_v48, %v595_v47  ;;  %10840 = vmatprep.mubr.msk.bf16.mxu0 %vm488_vm2, %v12316_v45  ;;  %v597_v52 = vld [vmem:[#allocation2 + $0x1a8] sm:$0xff]  ;;  %v598_v53 = vld [vmem:[#allocation2 + $0x1b0] sm:$0xff]  ;;  %10869 = vmatpush3.bf16.msra.mxu1 %v12200_v3  ;;  %503 = vst.msk [vmem:[#allocation2 + $0x108] sm:$0xff] %vm488_vm2, %v469_v62  ;;  %504 = vst.msk [vmem:[#allocation2 + $0x110] sm:$0xff] %vm488_vm2, %v470_v63 }
  0x30   : > { %v579_v50 = vld [vmem:[#allocation2 + $0x88] sm:$0xff]  ;;  %v580_v51 = vld [vmem:[#allocation2 + $0x90] sm:$0xff]  ;;  %10936 = vmatprep.subr.bf16.mxu1 %v12311_v44  ;;  %v12335_v60 = vpack.c.bf16 %v598_v53, %v597_v52  ;;  %505 = vst.msk [vmem:[#allocation2 + $0x128] sm:$0xff] %vm488_vm2, %v471_v0  ;;  %v486_v48 = vld [vmem:[%s12244_s29 + $0xf8] sm:$0xff] }
  0x31   : > { %10860 = vmatprep.mubr.msk.bf16.mxu1 %vm488_vm2, %v12320_v49  ;;  %v12331_v57 = vpack.c.bf16 %v580_v51, %v579_v50  ;;  %v472_v1 = vld [vmem:[%s12244_s29 + $0x88] sm:$0xff]  ;;  %v582_v3 = vld [vmem:[#allocation2 + $0xb0] sm:$0xff]  ;;  %520 = vst.msk [vmem:[#allocation2 + $0x210] sm:$0xff] %vm488_vm2, %v486_v48 }
  0x32   : > { %v599_v55 = vld [vmem:[#allocation2 + $0x1c8] sm:$0xff]  ;;  %v600_v56 = vld [vmem:[#allocation2 + $0x1d0] sm:$0xff]  ;;  %506 = vst.msk [vmem:[#allocation2 + $0x130] sm:$0xff] %vm488_vm2, %v472_v1 }
  0x33   : > { %v12339_v61 = vpack.c.bf16 %v600_v56, %v599_v55  ;;  %v581_v2 = vld [vmem:[#allocation2 + $0xa8] sm:$0xff]  ;;  %v602_v7 = vld [vmem:[#allocation2 + $0x1f0] sm:$0xff] }
  0x34   : > { %10841 = vmatmul.mubr.msk.bf16.gmra.mxu0 %vm488_vm2, %v12326_v54  ;;  %v583_v4 = vld [vmem:[#allocation2 + $0xc8] sm:$0xff]  ;;  %v584_v5 = vld [vmem:[#allocation2 + $0xd0] sm:$0xff]  ;;  %v12357_v8 = vpack.c.bf16 %v582_v3, %v581_v2 }
  0x35   : > { %10844 = vmatprep.mubr.msk.bf16.mxu0 %vm488_vm2, %v12331_v57  ;;  %v601_v6 = vld [vmem:[#allocation2 + $0x1e8] sm:$0xff]  ;;  %v12359_v11 = vpack.c.bf16 %v584_v5, %v583_v4  ;;  %v586_v15 = vld [vmem:[#allocation2 + $0xf0] sm:$0xff] }
  0x36   : > { %10861 = vmatmul.mubr.msk.bf16.gmra.mxu1 %vm488_vm2, %v12335_v60  ;;  %v12361_v12 = vpack.c.bf16 %v602_v7, %v601_v6  ;;  %v585_v14 = vld [vmem:[#allocation2 + $0xe8] sm:$0xff]  ;;  %v588_v17 = vld [vmem:[#allocation2 + $0x110] sm:$0xff] }
  0x37   : > { %10864 = vmatprep.mubr.msk.bf16.mxu1 %vm488_vm2, %v12339_v61  ;;  %v587_v16 = vld [vmem:[#allocation2 + $0x108] sm:$0xff]  ;;  %v12370_v20 = vpack.c.bf16 %v586_v15, %v585_v14  ;;  %v1053_v31 = vld [vmem:[#allocation2 + $0x11] sm:$0xff] }
  0x38   : > { %v523_v18 = vld [vmem:[#allocation2 + $0x27] sm:$0xff]  ;;  %v524_v19 = vld [vmem:[#allocation2 + $0x2f] sm:$0xff]  ;;  %v12372_v23 = vpack.c.bf16 %v588_v17, %v587_v16 }
  0x39   : > { %v525_v21 = vld [vmem:[#allocation2 + $0x47] sm:$0xff]  ;;  %v526_v22 = vld [vmem:[#allocation2 + $0x4f] sm:$0xff]  ;;  %v12374_v24 = vpack.c.bf16 %v524_v19, %v523_v18 }
  0x3a   : > { %v12376_v25 = vpack.c.bf16 %v526_v22, %v525_v21  ;;  %v12383_v26 = vld [vmem:[%s15874_s3 + $0x28] sm:$0xff]   ;;  %v590_v28 = vld [vmem:[#allocation2 + $0x130] sm:$0xff] }
  0x3b   : > { %v589_v27 = vld [vmem:[#allocation2 + $0x128] sm:$0xff]  ;;  %v1055_v46 = vld [vmem:[#allocation2 + $0x31] sm:$0xff] }
  0x3c   : > { %10845 = vmatmul.mubr.msk.bf16.gmra.mxu0 %vm488_vm2, %v12357_v8  ;;  %v1052_v30 = vld [vmem:[#allocation2 + $0x9] sm:$0xff]  ;;  %v12392_v35 = vpack.c.bf16 %v590_v28, %v589_v27  ;;  %v1059_v1 = vld [vmem:[#allocation2 + $0x71] sm:$0xff] }
  0x3d   : > { %10848 = vmatprep.mubr.msk.bf16.mxu0 %vm488_vm2, %v12359_v11  ;;  %v527_v32 = vld [vmem:[#allocation2 + $0x67] sm:$0xff]  ;;  %v528_v34 = vld [vmem:[#allocation2 + $0x6f] sm:$0xff]  ;;  %v1084_v40 = vpack.c.bf16 %v1053_v31, %v1052_v30 }
  0x3e   : > { %10865 = vmatmul.mubr.msk.bf16.gmra.mxu1 %vm488_vm2, %v12361_v12  ;;  %v529_v36 = vld [vmem:[#allocation2 + $0x87] sm:$0xff]  ;;  %v530_v39 = vld [vmem:[#allocation2 + $0x8f] sm:$0xff]  ;;  %v12395_v41 = vpack.c.bf16 %v528_v34, %v527_v32 }
  0x3f   : > { %10870 = vmatprep.mubr.msk.bf16.mxu1 %vm488_vm2, %v553_v13  ;;  %v12397_v42 = vpack.c.bf16 %v530_v39, %v529_v36  ;;  %v1054_v43 = vld [vmem:[#allocation2 + $0x29] sm:$0xff]  ;;  %v1061_v3 = vld [vmem:[#allocation2 + $0x91] sm:$0xff] }
  0x40   : > { %v485_v47 = vld [vmem:[%s12244_s29 + $0xf0] sm:$0xff]  ;;  %v531_v51 = vld [vmem:[#allocation2 + $0xa7] sm:$0xff]  ;;  %v12410_v56 = vpack.c.bf16 %v1055_v46, %v1054_v43 }
  0x41   : > { %v1056_v50 = vld [vmem:[#allocation2 + $0x49] sm:$0xff]  ;;  %519 = vst.msk [vmem:[#allocation2 + $0x208] sm:$0xff] %vm488_vm2, %v485_v47  ;;  %v1063_v15 = vld [vmem:[#allocation2 + $0xb1] sm:$0xff] }
  0x42   : > { %v532_v52 = vld [vmem:[#allocation2 + $0xaf] sm:$0xff]  ;;  %v533_v53 = vld [vmem:[#allocation2 + $0xc7] sm:$0xff] }
  0x43   : > { %v534_v55 = vld [vmem:[#allocation2 + $0xcf] sm:$0xff]  ;;  %v12419_v62 = vpack.c.bf16 %v532_v52, %v531_v51  ;;  %v535_v4 = vld [vmem:[#allocation2 + $0xe7] sm:$0xff] }
  0x44   : > { %10849 = vmatmul.mubr.msk.bf16.gmra.mxu0 %vm488_vm2, %v12370_v20  ;;  %v12415_v58 = vld [vmem:[%s15874_s3 + $0x30] sm:$0xff]   ;;  %v12421_v63 = vpack.c.bf16 %v534_v55, %v533_v53  ;;  %v537_v6 = vld [vmem:[#allocation2 + $0x107] sm:$0xff] }
  0x45   : > { %10852 = vmatprep.mubr.msk.bf16.mxu0 %vm488_vm2, %v12372_v23  ;;  %v1058_v0 = vld [vmem:[#allocation2 + $0x69] sm:$0xff]  ;;  %v1065_v17 = vld [vmem:[#allocation2 + $0xd1] sm:$0xff] }
  0x46   : > { %10871 = vmatmul.mubr.msk.bf16.vlgmr.msra.gmra.mxu1 %vm488_vm2, %v12374_v24  ;;  %v1060_v2 = vld [vmem:[#allocation2 + $0x89] sm:$0xff]  ;;  %v12433_v9 = vpack.c.bf16 %v1059_v1, %v1058_v0  ;;  %v1067_v34 = vld [vmem:[#allocation2 + $0xf1] sm:$0xff] }
  0x47   : > { %10874 = vmatprep.mubr.msk.bf16.mxu1 %vm488_vm2, %v12376_v25  ;;  %10937 = vmatpush3.bf16.msra.mxu1 %v12311_v44  ;;  %v1057_v44 = vld [vmem:[#allocation2 + $0x51] sm:$0xff]  ;;  %v12435_v10 = vpack.c.bf16 %v1061_v3, %v1060_v2  ;;  %v1062_v14 = vld [vmem:[#allocation2 + $0xa9] sm:$0xff] }
  0x48   : > { %11004 = vmatprep.subr.bf16.mxu1 %v12383_v26  ;;  %v12417_v59 = vpack.c.bf16 %v1057_v44, %v1056_v50  ;;  %v536_v5 = vld [vmem:[#allocation2 + $0xef] sm:$0xff]  ;;  %v539_v18 = vld [vmem:[#allocation2 + $0x127] sm:$0xff]  ;;  %v12449_v27 = vpack.c.bf16 %v1063_v15, %v1062_v14 }
  0x49   : > { %v538_v7 = vld [vmem:[#allocation2 + $0x10f] sm:$0xff]  ;;  %v541_v21 = vld [vmem:[#allocation2 + $0x147] sm:$0xff] }
  0x4a   : > { %v12439_v13 = vpack.c.bf16 %v538_v7, %v537_v6  ;;  %v1064_v16 = vld [vmem:[#allocation2 + $0xc9] sm:$0xff]  ;;  %v1069_v39 = vld [vmem:[#allocation2 + $0x111] sm:$0xff] }
  0x4b   : > { %v540_v19 = vld [vmem:[#allocation2 + $0x12f] sm:$0xff]  ;;  %v12451_v28 = vpack.c.bf16 %v1065_v17, %v1064_v16  ;;  %v545_v46 = vld [vmem:[#allocation2 + $0x187] sm:$0xff] }
  0x4c   : > { %10853 = vmatmul.mubr.msk.bf16.gmra.mxu0 %vm488_vm2, %v12392_v35  ;;  %v542_v22 = vld [vmem:[#allocation2 + $0x14f] sm:$0xff]  ;;  %v12453_v30 = vpack.c.bf16 %v540_v19, %v539_v18  ;;  %v547_v1 = vld [vmem:[#allocation2 + $0x1a7] sm:$0xff] }
  0x4d   : > { %10904 = vmatprep.mubr.msk.bf16.mxu0 %vm488_vm2, %v1084_v40  ;;  %v12455_v31 = vpack.c.bf16 %v542_v22, %v541_v21  ;;  %v1066_v32 = vld [vmem:[#allocation2 + $0xe9] sm:$0xff]  ;;  %v1071_v53 = vld [vmem:[#allocation2 + $0x131] sm:$0xff] }
  0x4e   : > { %10875 = vmatmul.mubr.msk.bf16.gmra.mxu1 %vm488_vm2, %v12395_v41  ;;  %v1068_v36 = vld [vmem:[#allocation2 + $0x109] sm:$0xff]  ;;  %v12465_v48 = vpack.c.bf16 %v1067_v34, %v1066_v32  ;;  %v1073_v0 = vld [vmem:[#allocation2 + $0x151] sm:$0xff] }
  0x4f   : > { %10878 = vmatprep.mubr.msk.bf16.mxu1 %vm488_vm2, %v12397_v42  ;;  %v543_v40 = vld [vmem:[#allocation2 + $0x167] sm:$0xff]  ;;  %v544_v43 = vld [vmem:[#allocation2 + $0x16f] sm:$0xff]  ;;  %v12467_v50 = vpack.c.bf16 %v1069_v39, %v1068_v36 }
  0x50   : > { %v546_v47 = vld [vmem:[#allocation2 + $0x18f] sm:$0xff]  ;;  %v12469_v44 = vpack.c.bf16 %v544_v43, %v543_v40  ;;  %v549_v3 = vld [vmem:[#allocation2 + $0x1c7] sm:$0xff] }
  0x51   : > { %v12471_v51 = vpack.c.bf16 %v546_v47, %v545_v46  ;;  %v1070_v52 = vld [vmem:[#allocation2 + $0x129] sm:$0xff]  ;;  %v1075_v16 = vld [vmem:[#allocation2 + $0x171] sm:$0xff] }
  0x52   : > { %v1072_v55 = vld [vmem:[#allocation2 + $0x149] sm:$0xff]  ;;  %v1077_v18 = vld [vmem:[#allocation2 + $0x191] sm:$0xff] }
  0x53   : > { %v548_v2 = vld [vmem:[#allocation2 + $0x1af] sm:$0xff]  ;;  %v12483_v6 = vpack.c.bf16 %v1073_v0, %v1072_v55  ;;  %v551_v19 = vld [vmem:[#allocation2 + $0x1e7] sm:$0xff] }
  0x54   : > { %10905 = vmatmul.mubr.msk.bf16.vlgmr.msra.gmra.mxu0 %vm488_vm2, %v12410_v56  ;;  %v12485_v7 = vpack.c.bf16 %v548_v2, %v547_v1  ;;  %v1074_v15 = vld [vmem:[#allocation2 + $0x169] sm:$0xff]  ;;  %v1079_v39 = vld [vmem:[#allocation2 + $0x1b1] sm:$0xff]  ;;  %v11847_v0 = vld [vmem:[%s15874_s3 + $0x40] sm:$0xff]  }
  0x55   : > { %10971 = vmatpush3.bf16.msra.mxu0 %v12291_v29  ;;  %10908 = vmatprep.mubr.msk.bf16.mxu0 %vm488_vm2, %v12417_v59  ;;  %v12437_v29 = vpack.c.bf16 %v536_v5, %v535_v4  ;;  %v550_v4 = vld [vmem:[#allocation2 + $0x1cf] sm:$0xff]  ;;  %v12481_v5 = vpack.c.bf16 %v1071_v53, %v1070_v52  ;;  %v12497_v22 = vpack.c.bf16 %v1075_v16, %v1074_v15  ;;  %v11846_v52 = vld [vmem:[%s15874_s3 + $0x38] sm:$0xff]  }
  0x56   : > { %10879 = vmatmul.mubr.msk.bf16.gmra.mxu1 %vm488_vm2, %v12419_v62  ;;  %11038 = vmatprep.subr.bf16.mxu0 %v12415_v58  ;;  %v12487_v14 = vpack.c.bf16 %v550_v4, %v549_v3  ;;  %v1076_v17 = vld [vmem:[#allocation2 + $0x189] sm:$0xff]  ;;  %v1081_v43 = vld [vmem:[#allocation2 + $0x1d1] sm:$0xff] }
  0x57   : > { %10882 = vmatprep.mubr.msk.bf16.mxu1 %vm488_vm2, %v12421_v63  ;;  %v552_v21 = vld [vmem:[#allocation2 + $0x1ef] sm:$0xff]  ;;  %v12499_v32 = vpack.c.bf16 %v1077_v18, %v1076_v17 }
  0x58   : > { %v12501_v34 = vpack.c.bf16 %v552_v21, %v551_v19  ;;  %v1078_v36 = vld [vmem:[#allocation2 + $0x1a9] sm:$0xff]  ;;  %v1083_v55 = vld [vmem:[#allocation2 + $0x1f1] sm:$0xff] }
  0x59   : > { %v1080_v40 = vld [vmem:[#allocation2 + $0x1c9] sm:$0xff]  ;;  %v12511_v46 = vpack.c.bf16 %v1079_v39, %v1078_v36 }
  0x5a   : > { %v12513_v47 = vpack.c.bf16 %v1081_v43, %v1080_v40  ;;  %v1082_v53 = vld [vmem:[#allocation2 + $0x1e9] sm:$0xff] }
  0x5b   : > { %v2545_v3 = vld [vmem:[#allocation2 + $0x68] sm:$0xff]  ;;  %v2546_v4 = vld [vmem:[#allocation2 + $0x70] sm:$0xff] }
  0x5c   : > { %10909 = vmatmul.mubr.msk.bf16.gmra.mxu0 %vm488_vm2, %v12433_v9  ;;  %v2547_v17 = vld [vmem:[#allocation2 + $0x88] sm:$0xff]  ;;  %v2576_v19 = vpack.c.bf16 %v2546_v4, %v2545_v3  ;;  %v2554_v4 = vld [vmem:[#allocation2 + $0xf0] sm:$0xff] }
  0x5d   : > { %10912 = vmatprep.mubr.msk.bf16.mxu0 %vm488_vm2, %v12435_v10  ;;  %v2275_v39 = vld [vmem:[#allocation2 + $0x227] sm:$0xff]  ;;  %v2276_v40 = vld [vmem:[#allocation2 + $0x22f] sm:$0xff] }
  0x5e   : > { %10883 = vmatmul.mubr.msk.bf16.gmra.mxu1 %vm488_vm2, %v12437_v29 }
  0x5f   : > { %10886 = vmatprep.mubr.msk.bf16.mxu1 %vm488_vm2, %v12439_v13 }
  0x64   : > { %10913 = vmatmul.mubr.msk.bf16.gmra.mxu0 %vm488_vm2, %v12449_v27 }
  0x65   : > { %10916 = vmatprep.mubr.msk.bf16.mxu0 %vm488_vm2, %v12451_v28 }
  0x66   : > { %10887 = vmatmul.mubr.msk.bf16.gmra.mxu1 %vm488_vm2, %v12453_v30 }
  0x67   : > { %10890 = vmatprep.mubr.msk.bf16.mxu1 %vm488_vm2, %v12455_v31 }
  0x6c   : > { %10917 = vmatmul.mubr.msk.bf16.gmra.mxu0 %vm488_vm2, %v12465_v48 }
  0x6d   : > { %10920 = vmatprep.mubr.msk.bf16.mxu0 %vm488_vm2, %v12467_v50 }
  0x6e   : > { %10891 = vmatmul.mubr.msk.bf16.gmra.mxu1 %vm488_vm2, %v12469_v44 }
  0x6f   : > { %10894 = vmatprep.mubr.msk.bf16.mxu1 %vm488_vm2, %v12471_v51 }
  0x74   : > { %10921 = vmatmul.mubr.msk.bf16.gmra.mxu0 %vm488_vm2, %v12481_v5 }
  0x75   : > { %10924 = vmatprep.mubr.msk.bf16.mxu0 %vm488_vm2, %v12483_v6 }
  0x76   : > { %10895 = vmatmul.mubr.msk.bf16.gmra.mxu1 %vm488_vm2, %v12485_v7 }
  0x77   : > { %10898 = vmatprep.mubr.msk.bf16.mxu1 %vm488_vm2, %v12487_v14 }
  0x7c   : > { %10925 = vmatmul.mubr.msk.bf16.gmra.mxu0 %vm488_vm2, %v12497_v22 }
  0x7d   : > { %10928 = vmatprep.mubr.msk.bf16.mxu0 %vm488_vm2, %v12499_v32 }
  0x7e   : > { %10899 = vmatmul.mubr.msk.bf16.gmra.mxu1 %vm488_vm2, %v12501_v34 }
  0x7f   : > { %10938 = vmatprep.mubr.msk.bf16.mxu1 %vm488_vm2, %v12374_v24  ;;  %v12527_v24 = vpack.c.bf16 %v1083_v55, %v1082_v53  ;;  %v2550_v53 = vld [vmem:[#allocation2 + $0xb0] sm:$0xff] }
  0x84   : > { %10929 = vmatmul.mubr.msk.bf16.gmra.mxu0 %vm488_vm2, %v12511_v46 }
  0x85   : > { %10932 = vmatprep.mubr.msk.bf16.mxu0 %vm488_vm2, %v12513_v47 }
  0x86   : > { %10939 = vmatmul.mubr.msk.bf16.vlgmr.msra.gmra.mxu1 %vm488_vm2, %v12376_v25 }
  0x87   : > { %10942 = vmatprep.mubr.msk.bf16.mxu1 %vm488_vm2, %v12395_v41  ;;  %11005 = vmatpush3.bf16.msra.mxu1 %v12383_v26 }
  0x88   : > { %11072 = vmatprep.subr.bf16.mxu1 %v11846_v52 }
  0x8c   : > { %10933 = vmatmul.mubr.msk.bf16.gmra.mxu0 %vm488_vm2, %v12527_v24 }
  0x8d   : > { %10972 = vmatprep.mubr.msk.bf16.mxu0 %vm488_vm2, %v12296_v33  ;;  %v1380_v33 = vld [vmem:[#allocation2 + $0x207] sm:$0xff] }
  0x8e   : > { %10943 = vmatmul.mubr.msk.bf16.gmra.mxu1 %vm488_vm2, %v12397_v42 }
  0x8f   : > { %10946 = vmatprep.mubr.msk.bf16.mxu1 %vm488_vm2, %v12419_v62 }
  0x94   : > { %10973 = vmatmul.mubr.msk.bf16.vlgmr.msra.gmra.mxu0 %vm488_vm2, %v12316_v45  ;;  %v1381_v45 = vld [vmem:[#allocation2 + $0x20f] sm:$0xff] }
  0x95   : > { %11039 = vmatpush3.bf16.msra.mxu0 %v12415_v58  ;;  %10976 = vmatprep.mubr.msk.bf16.mxu0 %vm488_vm2, %v12326_v54  ;;  %v12581_v54 = vpack.c.bf16 %v1381_v45, %v1380_v33  ;;  %v2552_v33 = vld [vmem:[#allocation2 + $0xd0] sm:$0xff] }
  0x96   : > { %10947 = vmatmul.mubr.msk.bf16.gmra.mxu1 %vm488_vm2, %v12421_v63  ;;  %11106 = vmatprep.subr.bf16.mxu0 %v11847_v0 }
  0x97   : > { %10950 = vmatprep.mubr.msk.bf16.mxu1 %vm488_vm2, %v12437_v29 }
  0x9c   : > { %10977 = vmatmul.mubr.msk.bf16.gmra.mxu0 %vm488_vm2, %v12331_v57 }
  0x9d   : > { %10980 = vmatprep.mubr.msk.bf16.mxu0 %vm488_vm2, %v12357_v8 }
  0x9e   : > { %10951 = vmatmul.mubr.msk.bf16.gmra.mxu1 %vm488_vm2, %v12439_v13 }
  0x9f   : > { %10954 = vmatprep.mubr.msk.bf16.mxu1 %vm488_vm2, %v12453_v30 }
  0xa4   : > { %10981 = vmatmul.mubr.msk.bf16.gmra.mxu0 %vm488_vm2, %v12359_v11 }
  0xa5   : > { %10984 = vmatprep.mubr.msk.bf16.mxu0 %vm488_vm2, %v12370_v20 }
  0xa6   : > { %10955 = vmatmul.mubr.msk.bf16.gmra.mxu1 %vm488_vm2, %v12455_v31 }
  0xa7   : > { %10958 = vmatprep.mubr.msk.bf16.mxu1 %vm488_vm2, %v12469_v44 }
  0xac   : > { %10985 = vmatmul.mubr.msk.bf16.gmra.mxu0 %vm488_vm2, %v12372_v23 }
  0xad   : > { %10988 = vmatprep.mubr.msk.bf16.mxu0 %vm488_vm2, %v12392_v35 }
  0xae   : > { %10959 = vmatmul.mubr.msk.bf16.gmra.mxu1 %vm488_vm2, %v12471_v51 }
  0xaf   : > { %10962 = vmatprep.mubr.msk.bf16.mxu1 %vm488_vm2, %v12485_v7 }
  0xb4   : > { %10989 = vmatmul.mubr.msk.bf16.gmra.mxu0 %vm488_vm2, %v12298_v37  ;;  %v1678_v37 = vld [vmem:[#allocation2 + $0x208] sm:$0xff] }
  0xb5   : > { %10992 = vmatprep.mubr.msk.bf16.mxu0 %vm488_vm2, %v12300_v38  ;;  %v1679_v38 = vld [vmem:[#allocation2 + $0x210] sm:$0xff] }
  0xb6   : > { %10963 = vmatmul.mubr.msk.bf16.gmra.mxu1 %vm488_vm2, %v12487_v14 }
  0xb7   : > { %10966 = vmatprep.mubr.msk.bf16.mxu1 %vm488_vm2, %v12501_v34 }
  0xbc   : > { %10993 = vmatmul.mubr.msk.bf16.gmra.mxu0 %vm488_vm2, %v12320_v49  ;;  %v12599_v49 = vpack.c.bf16 %v1679_v38, %v1678_v37 }
  0xbd   : > { %10996 = vmatprep.mubr.msk.bf16.mxu0 %vm488_vm2, %v12335_v60 }
  0xbe   : > { %10967 = vmatmul.mubr.msk.bf16.gmra.mxu1 %vm488_vm2, %v12581_v54 }
  0xbf   : > { %11006 = vmatprep.mubr.msk.bf16.mxu1 %vm488_vm2, %v12410_v56 }
  0xc4   : > { %10997 = vmatmul.mubr.msk.bf16.gmra.mxu0 %vm488_vm2, %v12339_v61 }
  0xc5   : > { %11000 = vmatprep.mubr.msk.bf16.mxu0 %vm488_vm2, %v12361_v12 }
  0xc6   : > { %11007 = vmatmul.mubr.msk.bf16.vlgmr.msra.gmra.mxu1 %vm488_vm2, %v12417_v59 }
  0xc7   : > { %11010 = vmatprep.mubr.msk.bf16.mxu1 %vm488_vm2, %v12433_v9  ;;  %11073 = vmatpush3.bf16.msra.mxu1 %v11846_v52  ;;  %v2549_v52 = vld [vmem:[#allocation2 + $0xa8] sm:$0xff] }
  0xc8   : > { %v2578_v38 = vpack.c.bf16 %v2550_v53, %v2549_v52 }
  0xcc   : > { %11001 = vmatmul.mubr.msk.bf16.gmra.mxu0 %vm488_vm2, %v12599_v49 }
  0xcd   : > { %11040 = vmatprep.mubr.msk.bf16.mxu0 %vm488_vm2, %v12376_v25 }
  0xce   : > { %11011 = vmatmul.mubr.msk.bf16.gmra.mxu1 %vm488_vm2, %v12435_v10 }
  0xcf   : > { %11014 = vmatprep.mubr.msk.bf16.mxu1 %vm488_vm2, %v12449_v27 }
  0xd4   : > { %11041 = vmatmul.mubr.msk.bf16.vlgmr.msra.gmra.mxu0 %vm488_vm2, %v12395_v41  ;;  %v1976_v41 = vld [vmem:[#allocation2 + $0x209] sm:$0xff] }
  0xd5   : > { %11107 = vmatpush3.bf16.msra.mxu0 %v11847_v0  ;;  %11044 = vmatprep.mubr.msk.bf16.mxu0 %vm488_vm2, %v12397_v42  ;;  %v1977_v42 = vld [vmem:[#allocation2 + $0x211] sm:$0xff]  ;;  %v2292_v0 = vpack.c.bf16 %v2276_v40, %v2275_v39 }
  0xd6   : > { %11015 = vmatmul.mubr.msk.bf16.gmra.mxu1 %vm488_vm2, %v12451_v28 }
  0xd7   : > { %11018 = vmatprep.mubr.msk.bf16.mxu1 %vm488_vm2, %v12465_v48 }
  0xdc   : > { %11045 = vmatmul.mubr.msk.bf16.gmra.mxu0 %vm488_vm2, %v12419_v62  ;;  %v2543_v62 = vld [vmem:[#allocation2 + $0x48] sm:$0xff] }
  0xdd   : > { %11048 = vmatprep.mubr.msk.bf16.mxu0 %vm488_vm2, %v12421_v63  ;;  %v2544_v63 = vld [vmem:[#allocation2 + $0x50] sm:$0xff] }
  0xde   : > { %11019 = vmatmul.mubr.msk.bf16.gmra.mxu1 %vm488_vm2, %v12467_v50 }
  0xdf   : > { %11022 = vmatprep.mubr.msk.bf16.mxu1 %vm488_vm2, %v12481_v5 }
  0xe4   : > { %11049 = vmatmul.mubr.msk.bf16.gmra.mxu0 %vm488_vm2, %v12437_v29 }
  0xe5   : > { %11052 = vmatprep.mubr.msk.bf16.mxu0 %vm488_vm2, %v12439_v13 }
  0xe6   : > { %11023 = vmatmul.mubr.msk.bf16.gmra.mxu1 %vm488_vm2, %v12483_v6 }
  0xe7   : > { %11026 = vmatprep.mubr.msk.bf16.mxu1 %vm488_vm2, %v12497_v22 }
  0xec   : > { %v10838_v57 = vpop.f32.mrf.mxu0  ;;  %11053 = vmatmul.mubr.msk.bf16.gmra.mxu0 %vm488_vm2, %v12453_v30  ;;  %v12673_v30 = vpack.c.bf16 %v1977_v42, %v1976_v41 }
  0xed   : > { %11056 = vmatprep.mubr.msk.bf16.mxu0 %vm488_vm2, %v12455_v31  ;;  %v2575_v31 = vpack.c.bf16 %v2544_v63, %v2543_v62 }
  0xee   : > { %v12637_v60 = vpop.f32.mrf.mxu1  ;;  %11027 = vmatmul.mubr.msk.bf16.gmra.mxu1 %vm488_vm2, %v12499_v32  ;;  %v710_v61 = vpop.f32.mrf.mxu0 }
  0xef   : > { %11030 = vmatprep.mubr.msk.bf16.mxu1 %vm488_vm2, %v12511_v46 }
  0xf0   : > { %v12643_v8 = vpop.f32.mrf.mxu1  ;;  %v10839_v11 = vpop.f32.mrf.mxu0 }
  0xf2   : > { %v12645_v12 = vpop.f32.mrf.mxu1  ;;  %v12647_v20 = vpop.f32.mrf.mxu0 }
  0xf4   : > { %v12649_v23 = vpop.f32.mrf.mxu1  ;;  %v12651_v25 = vpop.f32.mrf.mxu0  ;;  %11057 = vmatmul.mubr.msk.bf16.gmra.mxu0 %vm488_vm2, %v12469_v44 }
  0xf5   : > { %11060 = vmatprep.mubr.msk.bf16.mxu0 %vm488_vm2, %v12471_v51 }
  0xf6   : > { %v12657_v26 = vpop.f32.mrf.mxu1  ;;  %11031 = vmatmul.mubr.msk.bf16.gmra.mxu1 %vm488_vm2, %v12513_v47  ;;  %v12661_v35 = vpop.f32.mrf.mxu0 }
  0xf7   : > { %11034 = vmatprep.mubr.msk.bf16.mxu1 %vm488_vm2, %v12527_v24 }
  0xf8   : > { %v12665_v56 = vpop.f32.mrf.mxu1  ;;  %v12667_v58 = vpop.f32.mrf.mxu0 }
  0xfa   : > { %v12669_v29 = vpop.f32.mrf.mxu1  ;;  %v12671_v13 = vpop.f32.mrf.mxu0 }
  0xfc   : > { %v12675_v44 = vpop.f32.mrf.mxu1  ;;  %v12677_v51 = vpop.f32.mrf.mxu0  ;;  %11061 = vmatmul.mubr.msk.bf16.gmra.mxu0 %vm488_vm2, %v12485_v7  ;;  %v2548_v7 = vld [vmem:[#allocation2 + $0x90] sm:$0xff] }
  0xfd   : > { %11064 = vmatprep.mubr.msk.bf16.mxu0 %vm488_vm2, %v12487_v14  ;;  %v2577_v21 = vpack.c.bf16 %v2548_v7, %v2547_v17 }
  0xfe   : > { %v12683_v1 = vpop.f32.mrf.mxu1  ;;  %11035 = vmatmul.mubr.msk.bf16.gmra.mxu1 %vm488_vm2, %v12673_v30  ;;  %v12687_v2 = vpop.f32.mrf.mxu0 }
  0xff   : > { %11074 = vmatprep.mubr.msk.bf16.mxu1 %vm488_vm2, %v2575_v31 }
 0x100   : > { %v12690_v15 = vpop.f32.mrf.mxu1  ;;  %v12692_v16 = vpop.f32.mrf.mxu0 }
 0x102   : > { %v12694_v18 = vpop.f32.mrf.mxu1  ;;  %v12696_v14 = vpop.f32.mrf.mxu0 }
 0x104   : > { %v12698_v32 = vpop.f32.mrf.mxu1  ;;  %v12700_v36 = vpop.f32.mrf.mxu0  ;;  %11065 = vmatmul.mubr.msk.bf16.gmra.mxu0 %vm488_vm2, %v12501_v34  ;;  %v2551_v34 = vld [vmem:[#allocation2 + $0xc8] sm:$0xff] }
 0x105   : > { %11068 = vmatprep.mubr.msk.bf16.mxu0 %vm488_vm2, %v12581_v54  ;;  %v2579_v42 = vpack.c.bf16 %v2552_v33, %v2551_v34 }
 0x106   : > { %v10872_v43 = vpop.f32.mrf.mxu1  ;;  %11075 = vmatmul.mubr.msk.bf16.vlgmr.msra.gmra.mxu1 %vm488_vm2, %v2576_v19  ;;  %v12707_v46 = vpop.f32.mrf.mxu0  ;;  %v2555_v19 = vld [vmem:[#allocation2 + $0x108] sm:$0xff] }
 0x107   : > { %v934_v47 = vadd.f32 %v10872_v43, %v10838_v57  ;;  %11078 = vmatprep.mubr.msk.bf16.mxu1 %vm488_vm2, %v2577_v21  ;;  %v2556_v21 = vld [vmem:[#allocation2 + $0x110] sm:$0xff] }
 0x108   : > { %v925_v55 = vpop.f32.mrf.mxu1  ;;  %v12710_v24 = vpop.f32.mrf.mxu0  ;;  %v2581_v52 = vpack.c.bf16 %v2556_v21, %v2555_v19 }
 0x109   : > { %v926_v45 = vadd.f32 %v925_v55, %v710_v61 }
 0x10a   : > { %v10873_v54 = vpop.f32.mrf.mxu1  ;;  %v12712_v37 = vpop.f32.mrf.mxu0 }
 0x10b   : > { %v937_v41 = vadd.f32 %v10873_v54, %v10839_v11  ;;  %v2553_v11 = vld [vmem:[#allocation2 + $0xe8] sm:$0xff] }
 0x10c   : > { %v928_v62 = vpop.f32.mrf.mxu1  ;;  %v12714_v63 = vpop.f32.mrf.mxu0  ;;  %11069 = vmatmul.mubr.msk.bf16.gmra.mxu0 %vm488_vm2, %v2292_v0  ;;  %v2580_v40 = vpack.c.bf16 %v2554_v4, %v2553_v11  ;;  %v2557_v54 = vld [vmem:[#allocation2 + $0x128] sm:$0xff] }
 0x10d   : > { %v929_v57 = vadd.f32 %v928_v62, %v12647_v20  ;;  %11108 = vmatprep.mubr.msk.bf16.mxu0 %vm488_vm2, %v12417_v59 }
 0x10e   : > { %v10876_v31 = vpop.f32.mrf.mxu1  ;;  %11079 = vmatmul.mubr.msk.bf16.gmra.mxu1 %vm488_vm2, %v2578_v38  ;;  %v12721_v61 = vpop.f32.mrf.mxu0  ;;  %v2558_v38 = vld [vmem:[#allocation2 + $0x130] sm:$0xff] }
 0x10f   : > { %v950_v3 = vadd.f32 %v10876_v31, %v12651_v25  ;;  %11082 = vmatprep.mubr.msk.bf16.mxu1 %vm488_vm2, %v2579_v42  ;;  %v2582_v4 = vpack.c.bf16 %v2558_v38, %v2557_v54 }
 0x110   : > { %v941_v17 = vpop.f32.mrf.mxu1  ;;  %v12725_v7 = vpop.f32.mrf.mxu0 }
 0x111   : > { %v942_v20 = vadd.f32 %v941_v17, %v12661_v35 }
 0x112   : > { %v10877_v39 = vpop.f32.mrf.mxu1  ;;  %v12728_v59 = vpop.f32.mrf.mxu0 }
 0x113   : > { %v953_v43 = vadd.f32 %v10877_v39, %v12667_v58 }
 0x114   : > { %v944_v53 = vpop.f32.mrf.mxu1  ;;  %v10906_v25 = vpop.f32.mrf.mxu0  ;;  %11109 = vmatmul.mubr.msk.bf16.vlgmr.msra.gmra.mxu0 %vm488_vm2, %v12433_v9 }
 0x115   : > { %v945_v55 = vadd.f32 %v944_v53, %v12671_v13  ;;  %v12734_v0 = vadd.f32 %v10906_v25, %v934_v47  ;;  %11112 = vmatprep.mubr.msk.bf16.mxu0 %vm488_vm2, %v12435_v10  ;;  %v2559_v13 = vld [vmem:[#allocation2 + $0x148] sm:$0xff]  ;;  %v2560_v47 = vld [vmem:[#allocation2 + $0x150] sm:$0xff] }
 0x116   : > { %v10880_v35 = vpop.f32.mrf.mxu1  ;;  %11083 = vmatmul.mubr.msk.bf16.gmra.mxu1 %vm488_vm2, %v2580_v40  ;;  %v1191_v34 = vpop.f32.mrf.mxu0  ;;  %v2562_v53 = vld [vmem:[#allocation2 + $0x170] sm:$0xff] }
 0x117   : > { %v966_v33 = vadd.f32 %v10880_v35, %v12677_v51  ;;  %v12740_v58 = vadd.f32 %v1191_v34, %v926_v45  ;;  %11086 = vmatprep.mubr.msk.bf16.mxu1 %vm488_vm2, %v2581_v52  ;;  %v2583_v45 = vpack.c.bf16 %v2560_v47, %v2559_v13  ;;  %v2561_v52 = vld [vmem:[#allocation2 + $0x168] sm:$0xff] }
 0x118   : > { %v957_v9 = vpop.f32.mrf.mxu1  ;;  %v10907_v42 = vpop.f32.mrf.mxu0  ;;  %v2584_v38 = vpack.c.bf16 %v2562_v53, %v2561_v52 }
 0x119   : > { %v958_v62 = vadd.f32 %v957_v9, %v12687_v2  ;;  %v12744_v31 = vadd.f32 %v10907_v42, %v937_v41 }
 0x11a   : > { %v10881_v10 = vpop.f32.mrf.mxu1  ;;  %v1194_v11 = vpop.f32.mrf.mxu0 }
 0x11b   : > { %v969_v17 = vadd.f32 %v10881_v10, %v12692_v16  ;;  %v12747_v51 = vadd.f32 %v1194_v11, %v929_v57  ;;  %v2565_v11 = vld [vmem:[#allocation2 + $0x1a8] sm:$0xff] }
 0x11c   : > { %v960_v19 = vpop.f32.mrf.mxu1  ;;  %v10910_v21 = vpop.f32.mrf.mxu0  ;;  %11113 = vmatmul.mubr.msk.bf16.gmra.mxu0 %vm488_vm2, %v12449_v27 }
 0x11d   : > { %v961_v39 = vadd.f32 %v960_v19, %v12696_v14  ;;  %v12752_v40 = vadd.f32 %v10910_v21, %v950_v3  ;;  %11116 = vmatprep.mubr.msk.bf16.mxu0 %vm488_vm2, %v12451_v28  ;;  %v2563_v14 = vld [vmem:[#allocation2 + $0x188] sm:$0xff]  ;;  %v2564_v3 = vld [vmem:[#allocation2 + $0x190] sm:$0xff] }
 0x11e   : > { %v10884_v2 = vpop.f32.mrf.mxu1  ;;  %11087 = vmatmul.mubr.msk.bf16.gmra.mxu1 %vm488_vm2, %v2582_v4  ;;  %v1207_v41 = vpop.f32.mrf.mxu0  ;;  %v2566_v4 = vld [vmem:[#allocation2 + $0x1b0] sm:$0xff] }
 0x11f   : > { %v982_v16 = vadd.f32 %v10884_v2, %v12700_v36  ;;  %v12758_v57 = vadd.f32 %v1207_v41, %v942_v20  ;;  %11090 = vmatprep.mubr.msk.bf16.mxu1 %vm488_vm2, %v2583_v45  ;;  %v2585_v20 = vpack.c.bf16 %v2564_v3, %v2563_v14  ;;  %v2586_v41 = vpack.c.bf16 %v2566_v4, %v2565_v11  ;;  %v2861_v14 = vld [vmem:[#allocation2 + $0x189] sm:$0xff] }
 0x120   : > { %v973_v27 = vpop.f32.mrf.mxu1  ;;  %v10911_v25 = vpop.f32.mrf.mxu0 }
 0x121   : > { %v974_v35 = vadd.f32 %v973_v27, %v12707_v46  ;;  %v12762_v34 = vadd.f32 %v10911_v25, %v953_v43 }
 0x122   : > { %v10885_v28 = vpop.f32.mrf.mxu1  ;;  %v1210_v54 = vpop.f32.mrf.mxu0 }
 0x123   : > { %v985_v9 = vadd.f32 %v10885_v28, %v12710_v24  ;;  %v12765_v36 = vadd.f32 %v1210_v54, %v945_v55  ;;  %v2569_v28 = vld [vmem:[#allocation2 + $0x1e8] sm:$0xff]  ;;  %v2570_v54 = vld [vmem:[#allocation2 + $0x1f0] sm:$0xff] }
 0x124   : > { %v976_v42 = vpop.f32.mrf.mxu1  ;;  %v10914_v13 = vpop.f32.mrf.mxu0  ;;  %11117 = vmatmul.mubr.msk.bf16.gmra.mxu0 %vm488_vm2, %v12465_v48 }
 0x125   : > { %v977_v47 = vadd.f32 %v976_v42, %v12712_v37  ;;  %v12770_v10 = vadd.f32 %v10914_v13, %v966_v33  ;;  %11120 = vmatprep.mubr.msk.bf16.mxu0 %vm488_vm2, %v12467_v50  ;;  %v2567_v37 = vld [vmem:[#allocation2 + $0x1c8] sm:$0xff]  ;;  %v2568_v33 = vld [vmem:[#allocation2 + $0x1d0] sm:$0xff] }
 0x126   : > { %v10888_v46 = vpop.f32.mrf.mxu1  ;;  %11091 = vmatmul.mubr.msk.bf16.gmra.mxu1 %vm488_vm2, %v2584_v38  ;;  %v1223_v43 = vpop.f32.mrf.mxu0 }
 0x127   : > { %v998_v24 = vadd.f32 %v10888_v46, %v12714_v63  ;;  %v12776_v55 = vadd.f32 %v1223_v43, %v958_v62  ;;  %11094 = vmatprep.mubr.msk.bf16.mxu1 %vm488_vm2, %v2585_v20  ;;  %v2587_v62 = vpack.c.bf16 %v2568_v33, %v2567_v37  ;;  %v2588_v46 = vpack.c.bf16 %v2570_v54, %v2569_v28  ;;  %v2865_v37 = vld [vmem:[#allocation2 + $0x1c9] sm:$0xff] }
 0x128   : > { %v989_v48 = vpop.f32.mrf.mxu1  ;;  %v10915_v45 = vpop.f32.mrf.mxu0  ;;  %v2867_v54 = vld [vmem:[#allocation2 + $0x1e9] sm:$0xff] }
 0x129   : > { %v990_v19 = vadd.f32 %v989_v48, %v12721_v61  ;;  %v12780_v21 = vadd.f32 %v10915_v45, %v969_v17 }
 0x12a   : > { %v10889_v50 = vpop.f32.mrf.mxu1  ;;  %v1226_v2 = vpop.f32.mrf.mxu0 }
 0x12b   : > { %v1001_v52 = vadd.f32 %v10889_v50, %v12725_v7  ;;  %v12783_v63 = vadd.f32 %v1226_v2, %v961_v39  ;;  %v2862_v7 = vld [vmem:[#allocation2 + $0x191] sm:$0xff] }
 0x12c   : > { %v12785_v53 = vpop.f32.mrf.mxu1  ;;  %v10918_v27 = vpop.f32.mrf.mxu0  ;;  %11121 = vmatmul.mubr.msk.bf16.gmra.mxu0 %vm488_vm2, %v12481_v5 }
 0x12d   : > { %v12789_v25 = vadd.f32 %v10918_v27, %v982_v16  ;;  %11124 = vmatprep.mubr.msk.bf16.mxu0 %vm488_vm2, %v12483_v6  ;;  %v2883_v6 = vpack.c.bf16 %v2862_v7, %v2861_v14 }
 0x12e   : > { %v10892_v61 = vpop.f32.mrf.mxu1  ;;  %11095 = vmatmul.mubr.msk.bf16.gmra.mxu1 %vm488_vm2, %v2586_v41  ;;  %v1239_v17 = vpop.f32.mrf.mxu0 }
 0x12f   : > { %v1014_v39 = vadd.f32 %v10892_v61, %v12637_v60  ;;  %v12795_v3 = vadd.f32 %v1239_v17, %v974_v35  ;;  %11098 = vmatprep.mubr.msk.bf16.mxu1 %vm488_vm2, %v2587_v62 }
 0x130   : > { %v1005_v5 = vpop.f32.mrf.mxu1  ;;  %v10919_v16 = vpop.f32.mrf.mxu0 }
 0x131   : > { %v1006_v38 = vadd.f32 %v1005_v5, %v12643_v8  ;;  %v12799_v20 = vadd.f32 %v10919_v16, %v985_v9  ;;  %v2863_v8 = vld [vmem:[#allocation2 + $0x1a9] sm:$0xff]  ;;  %v2864_v9 = vld [vmem:[#allocation2 + $0x1b1] sm:$0xff] }
 0x132   : > { %v10893_v42 = vpop.f32.mrf.mxu1  ;;  %v1242_v13 = vpop.f32.mrf.mxu0  ;;  %v2884_v41 = vpack.c.bf16 %v2864_v9, %v2863_v8 }
 0x133   : > { %v1017_v43 = vadd.f32 %v10893_v42, %v12645_v12  ;;  %v12802_v11 = vadd.f32 %v1242_v13, %v977_v47  ;;  %v2866_v12 = vld [vmem:[#allocation2 + $0x1d1] sm:$0xff] }
 0x134   : > { %v12804_v60 = vpop.f32.mrf.mxu1  ;;  %v10922_v35 = vpop.f32.mrf.mxu0  ;;  %11125 = vmatmul.mubr.msk.bf16.gmra.mxu0 %vm488_vm2, %v12497_v22  ;;  %v2573_v22 = vld [vmem:[#allocation2 + $0x228] sm:$0xff]  ;;  %v2885_v61 = vpack.c.bf16 %v2866_v12, %v2865_v37  ;;  %v2872_v12 = vld [vmem:[#allocation2 + $0x231] sm:$0xff] }
 0x135   : > { %v12808_v4 = vadd.f32 %v10922_v35, %v998_v24  ;;  %11128 = vmatprep.mubr.msk.bf16.mxu0 %vm488_vm2, %v2883_v6  ;;  %v2574_v24 = vld [vmem:[#allocation2 + $0x230] sm:$0xff] }
 0x136   : > { %v10896_v48 = vpop.f32.mrf.mxu1  ;;  %11099 = vmatmul.mubr.msk.bf16.gmra.mxu1 %vm488_vm2, %v2588_v46  ;;  %v1255_v45 = vpop.f32.mrf.mxu0  ;;  %v2590_v7 = vpack.c.bf16 %v2574_v24, %v2573_v22 }
 0x137   : > { %v1030_v47 = vadd.f32 %v10896_v48, %v12657_v26  ;;  %v12813_v33 = vadd.f32 %v1255_v45, %v990_v19  ;;  %11102 = vmatprep.mubr.msk.bf16.mxu1 %vm488_vm2, %v12599_v49 }
 0x138   : > { %v1021_v50 = vpop.f32.mrf.mxu1  ;;  %v10923_v2 = vpop.f32.mrf.mxu0 }
 0x139   : > { %v1022_v62 = vadd.f32 %v1021_v50, %v12665_v56  ;;  %v12818_v27 = vadd.f32 %v10923_v2, %v1001_v52  ;;  %v2868_v56 = vld [vmem:[#allocation2 + $0x1f1] sm:$0xff] }
 0x13a   : > { %v10897_v17 = vpop.f32.mrf.mxu1  ;;  %v12820_v14 = vpop.f32.mrf.mxu0  ;;  %v11848_v52 = vld [vmem:[%s15876_s5 + $0x18] sm:$0xff]   ;;  %v2886_v13 = vpack.c.bf16 %v2868_v56, %v2867_v54 }
 0x13b   : > { %v1033_v26 = vadd.f32 %v10897_v17, %v12669_v29  ;;  %11140 = vmatprep.subr.bf16.mxu1 %v11848_v52 }
 0x13c   : > { %v12823_v19 = vpop.f32.mrf.mxu1  ;;  %v10926_v28 = vpop.f32.mrf.mxu0  ;;  %11129 = vmatmul.mubr.msk.bf16.gmra.mxu0 %vm488_vm2, %v2884_v41  ;;  %11141 = vmatpush3.bf16.msra.mxu1 %v11848_v52 }
 0x13d   : > { %v12826_v49 = vadd.f32 %v10926_v28, %v1014_v39  ;;  %11132 = vmatprep.mubr.msk.bf16.mxu0 %vm488_vm2, %v2885_v61 }
 0x13e   : > { %v10900_v5 = vpop.f32.mrf.mxu1  ;;  %11103 = vmatmul.mubr.msk.bf16.gmra.mxu1 %vm488_vm2, %v2590_v7  ;;  %v1271_v16 = vpop.f32.mrf.mxu0 }
 0x13f   : > { %v1046_v29 = vadd.f32 %v10900_v5, %v12683_v1  ;;  %v12834_v6 = vadd.f32 %v1271_v16, %v1006_v38  ;;  %v2871_v38 = vld [vmem:[#allocation2 + $0x229] sm:$0xff] }
 0x140   : > { %v1037_v42 = vpop.f32.mrf.mxu1  ;;  %v10927_v39 = vpop.f32.mrf.mxu0  ;;  %v2888_v2 = vpack.c.bf16 %v2872_v12, %v2871_v38 }
 0x141   : > { %v1038_v46 = vadd.f32 %v1037_v42, %v12690_v15  ;;  %v12837_v35 = vadd.f32 %v10927_v39, %v1017_v43 }
 0x142   : > { %v10901_v8 = vpop.f32.mrf.mxu1  ;;  %v12839_v9 = vpop.f32.mrf.mxu0 }
 0x143   : > { %v1049_v48 = vadd.f32 %v10901_v8, %v12694_v18 }
 0x144   : > { %v12842_v45 = vpop.f32.mrf.mxu1  ;;  %v10930_v37 = vpop.f32.mrf.mxu0  ;;  %11133 = vmatmul.mubr.msk.bf16.gmra.mxu0 %vm488_vm2, %v2886_v13 }
 0x145   : > { %v12845_v1 = vadd.f32 %v10930_v37, %v1030_v47  ;;  %11136 = vmatprep.mubr.msk.bf16.mxu0 %vm488_vm2, %v12673_v30 }
 0x146   : > { %v10940_v15 = vpop.f32.mrf.mxu1  ;;  %v1287_v43 = vpop.f32.mrf.mxu0 }
 0x147   : > { %v1618_v22 = vadd.f32 %v10940_v15, %v12734_v0  ;;  %v12850_v24 = vadd.f32 %v1287_v43, %v1022_v62 }
 0x148   : > { %v1489_v50 = vpop.f32.mrf.mxu1  ;;  %v10931_v18 = vpop.f32.mrf.mxu0 }
 0x149   : > { %v1616_v41 = vadd.f32 %v1489_v50, %v12740_v58  ;;  %v12853_v61 = vadd.f32 %v10931_v18, %v1033_v26 }
 0x14a   : > { %v10941_v47 = vpop.f32.mrf.mxu1  ;;  %v12855_v17 = vpop.f32.mrf.mxu0 }
 0x14b   : > { %v1619_v30 = vadd.f32 %v10941_v47, %v12744_v31 }
 0x14c   : > { %v12858_v7 = vpop.f32.mrf.mxu1  ;;  %v10934_v28 = vpop.f32.mrf.mxu0  ;;  %11137 = vmatmul.mubr.msk.bf16.gmra.mxu0 %vm488_vm2, %v2888_v2 }
 0x14d   : > { %v12861_v0 = vadd.f32 %v10934_v28, %v1046_v29 }
 0x14e   : > { %v10944_v62 = vpop.f32.mrf.mxu1  ;;  %v1303_v54 = vpop.f32.mrf.mxu0 }
 0x14f   : > { %v1622_v56 = vadd.f32 %v10944_v62, %v12752_v40  ;;  %v12864_v52 = vadd.f32 %v1303_v54, %v1038_v46 }
 0x150   : > { %v1505_v58 = vpop.f32.mrf.mxu1  ;;  %v10935_v26 = vpop.f32.mrf.mxu0 }
 0x151   : > { %v1620_v5 = vadd.f32 %v1505_v58, %v12758_v57  ;;  %v12867_v16 = vadd.f32 %v10935_v26, %v1049_v48 }
 0x152   : > { %v10945_v31 = vpop.f32.mrf.mxu1  ;;  %v12869_v42 = vpop.f32.mrf.mxu0 }
 0x153   : > { %v1623_v39 = vadd.f32 %v10945_v31, %v12762_v34 }
 0x154   : > { %v12872_v13 = vpop.f32.mrf.mxu1  ;;  %v10974_v29 = vpop.f32.mrf.mxu0 }
 0x155   : > { %v12874_v8 = vadd.f32 %v10974_v29, %v1618_v22 }
 0x156   : > { %v10948_v37 = vpop.f32.mrf.mxu1  ;;  %v1787_v40 = vpop.f32.mrf.mxu0 }
 0x157   : > { %v1626_v46 = vadd.f32 %v10948_v37, %v12770_v10  ;;  %v12877_v38 = vadd.f32 %v1787_v40, %v1616_v41 }
 0x158   : > { %v1521_v12 = vpop.f32.mrf.mxu1  ;;  %v10975_v57 = vpop.f32.mrf.mxu0 }
 0x159   : > { %v1624_v48 = vadd.f32 %v1521_v12, %v12776_v55  ;;  %v12880_v15 = vadd.f32 %v10975_v57, %v1619_v30 }
 0x15a   : > { %v10949_v43 = vpop.f32.mrf.mxu1  ;;  %v12882_v50 = vpop.f32.mrf.mxu0 }
 0x15b   : > { %v1627_v34 = vadd.f32 %v10949_v43, %v12780_v21 }
 0x15c   : > { %v12885_v18 = vpop.f32.mrf.mxu1  ;;  %v10978_v22 = vpop.f32.mrf.mxu0 }
 0x15d   : > { %v12887_v2 = vadd.f32 %v10978_v22, %v1622_v56 }
 0x15e   : > { %v10952_v47 = vpop.f32.mrf.mxu1  ;;  %v1803_v10 = vpop.f32.mrf.mxu0 }
 0x15f   : > { %v1630_v41 = vadd.f32 %v10952_v47, %v12789_v25  ;;  %v12890_v28 = vadd.f32 %v1803_v10, %v1620_v5 }
 0x160   : > { %v1537_v62 = vpop.f32.mrf.mxu1  ;;  %v10979_v55 = vpop.f32.mrf.mxu0 }
 0x161   : > { %v1628_v30 = vadd.f32 %v1537_v62, %v12795_v3  ;;  %v12893_v54 = vadd.f32 %v10979_v55, %v1623_v39 }
 0x162   : > { %v10953_v58 = vpop.f32.mrf.mxu1  ;;  %v12895_v26 = vpop.f32.mrf.mxu0 }
 0x163   : > { %15889 = vst [vmem:[#allocation3_spill] sm:$0xff] %v12893_v54  ;;  %v1631_v21 = vadd.f32 %v10953_v58, %v12799_v20 }
 0x164   : > { %v12898_v31 = vpop.f32.mrf.mxu1  ;;  %v10982_v56 = vpop.f32.mrf.mxu0 }
 0x165   : > { %v12900_v29 = vadd.f32 %v10982_v56, %v1626_v46 }
 0x166   : > { %v10956_v37 = vpop.f32.mrf.mxu1  ;;  %v1819_v25 = vpop.f32.mrf.mxu0 }
 0x167   : > { %15890 = vst [vmem:[#allocation4_spill] sm:$0xff] %v12900_v29  ;;  %v1634_v5 = vadd.f32 %v10956_v37, %v12808_v4  ;;  %v12903_v40 = vadd.f32 %v1819_v25, %v1624_v48 }
 0x168   : > { %v1553_v12 = vpop.f32.mrf.mxu1  ;;  %v10983_v3 = vpop.f32.mrf.mxu0 }
 0x169   : > { %15891 = vst [vmem:[#allocation5_spill] sm:$0xff] %v12903_v40  ;;  %v1632_v39 = vadd.f32 %v1553_v12, %v12813_v33  ;;  %v12906_v57 = vadd.f32 %v10983_v3, %v1627_v34 }
 0x16a   : > { %v10957_v43 = vpop.f32.mrf.mxu1  ;;  %v12908_v22 = vpop.f32.mrf.mxu0 }
 0x16b   : > { %15892 = vst [vmem:[#allocation6_spill] sm:$0xff] %v12906_v57  ;;  %v1635_v20 = vadd.f32 %v10957_v43, %v12818_v27 }
 0x16c   : > { %v12911_v47 = vpop.f32.mrf.mxu1  ;;  %v10986_v46 = vpop.f32.mrf.mxu0 }
 0x16d   : > { %v12913_v10 = vadd.f32 %v10986_v46, %v1630_v41 }
 0x16e   : > { %v10960_v62 = vpop.f32.mrf.mxu1  ;;  %v1835_v4 = vpop.f32.mrf.mxu0 }
 0x16f   : > { %15893 = vst [vmem:[#allocation7_spill] sm:$0xff] %v12913_v10  ;;  %v1638_v48 = vadd.f32 %v10960_v62, %v12826_v49  ;;  %v12916_v55 = vadd.f32 %v1835_v4, %v1628_v30  ;;  %v11849_v49 = vld [vmem:[%s15876_s5 + $0x10] sm:$0xff]   ;;  %v11850_v30 = vld [vmem:[%s15876_s5 + $0x8] sm:$0xff]  }
 0x170   : > { %v1569_v58 = vpop.f32.mrf.mxu1  ;;  %v10987_v33 = vpop.f32.mrf.mxu0  ;;  %11142 = vmatprep.subr.bf16.mxu1 %v11849_v49  ;;  %11176 = vmatprep.subr.bf16.mxu0 %v11850_v30 }
 0x171   : > { %15894 = vst [vmem:[#allocation8_spill] sm:$0xff] %v12916_v55  ;;  %v1636_v34 = vadd.f32 %v1569_v58, %v12834_v6  ;;  %v12919_v56 = vadd.f32 %v10987_v33, %v1631_v21  ;;  %11143 = vmatpush3.bf16.msra.mxu1 %v11849_v49  ;;  %11177 = vmatpush3.bf16.msra.mxu0 %v11850_v30  ;;  %v3371_v49 = vld [vmem:[#allocation2 + $0x7] sm:$0xff] }
 0x172   : > { %v10961_v37 = vpop.f32.mrf.mxu1  ;;  %v12921_v25 = vpop.f32.mrf.mxu0 }
 0x173   : > { %15895 = vst [vmem:[#allocation9_spill] sm:$0xff] %v12919_v56  ;;  %v1639_v27 = vadd.f32 %v10961_v37, %v12837_v35 }
 0x174   : > { %v12924_v12 = vpop.f32.mrf.mxu1  ;;  %v10990_v41 = vpop.f32.mrf.mxu0 }
 0x175   : > { %v12932_v3 = vadd.f32 %v10990_v41, %v1634_v5  ;;  %v11851_v5 = vld [vmem:[%s15876_s5] sm:$0xff]  }
 0x176   : > { %v10964_v6 = vpop.f32.mrf.mxu1  ;;  %v1851_v21 = vpop.f32.mrf.mxu0  ;;  %11178 = vmatprep.subr.bf16.mxu0 %v11851_v5 }
 0x177   : > { %15896 = vst [vmem:[#allocation10_spill] sm:$0xff] %v12932_v3  ;;  %v1642_v43 = vadd.f32 %v10964_v6, %v12845_v1  ;;  %v12935_v35 = vadd.f32 %v1851_v21, %v1632_v39  ;;  %v3423_v1 = vld [vmem:[#allocation2 + $0x8] sm:$0xff]  ;;  %v3424_v39 = vld [vmem:[#allocation2 + $0x10] sm:$0xff]  ;;  %11179 = vmatpush3.bf16.msra.mxu0 %v11851_v5 }
 0x178   : > { %v1585_v46 = vpop.f32.mrf.mxu1  ;;  %v10991_v62 = vpop.f32.mrf.mxu0 }
 0x179   : > { %15897 = vst [vmem:[#allocation11_spill] sm:$0xff] %v12935_v35  ;;  %v1640_v4 = vadd.f32 %v1585_v46, %v12850_v24  ;;  %v12938_v58 = vadd.f32 %v10991_v62, %v1635_v20  ;;  %v3455_v24 = vpack.c.bf16 %v3424_v39, %v3423_v1  ;;  %v3372_v20 = vld [vmem:[#allocation2 + $0xf] sm:$0xff] }
 0x17a   : > { %v10965_v33 = vpop.f32.mrf.mxu1  ;;  %v12943_v37 = vpop.f32.mrf.mxu0  ;;  %v3403_v46 = vpack.c.bf16 %v3372_v20, %v3371_v49 }
 0x17b   : > { %15898 = vst [vmem:[#allocation12_spill] sm:$0xff] %v12938_v58  ;;  %v1643_v41 = vadd.f32 %v10965_v33, %v12853_v61  ;;  %11144 = vmatprep.mubr.msk.bf16.mxu1 %vm3338_vm3, %v3455_v24 }
 0x17c   : > { %v12946_v30 = vpop.f32.mrf.mxu1  ;;  %v10994_v6 = vpop.f32.mrf.mxu0  ;;  %11180 = vmatprep.mubr.msk.bf16.mxu0 %vm3338_vm3, %v3403_v46 }
 0x17d   : > { %v12948_v21 = vadd.f32 %v10994_v6, %v1638_v48 }
 0x17e   : > { %v10968_v62 = vpop.f32.mrf.mxu1  ;;  %v1867_v58 = vpop.f32.mrf.mxu0 }
 0x17f   : > { %15899 = vst [vmem:[#allocation13_spill] sm:$0xff] %v12948_v21  ;;  %v1646_v61 = vadd.f32 %v10968_v62, %v12861_v0  ;;  %v12952_v33 = vadd.f32 %v1867_v58, %v1636_v34 }
 0x180   : > { %v1601_v35 = vpop.f32.mrf.mxu1  ;;  %v10995_v3 = vpop.f32.mrf.mxu0 }
 0x181   : > { %v1644_v5 = vadd.f32 %v1601_v35, %v12864_v52  ;;  %v1937_v1 = vadd.f32 %v10995_v3, %v1639_v27 }
 0x182   : > { %v10969_v39 = vpop.f32.mrf.mxu1  ;;  %v12956_v48 = vpop.f32.mrf.mxu0 }
 0x183   : > { %v1647_v49 = vadd.f32 %v10969_v39, %v12867_v16 }
 0x184   : > { %v12959_v6 = vpop.f32.mrf.mxu1  ;;  %v10998_v20 = vpop.f32.mrf.mxu0 }
 0x185   : > { %v12961_v24 = vadd.f32 %v10998_v20, %v1642_v43 }
 0x186   : > { %v12963_v0 = vpop.f32.mrf.mxu1  ;;  %v1883_v34 = vpop.f32.mrf.mxu0 }
 0x187   : > { %15900 = vst [vmem:[#allocation14_spill] sm:$0xff] %v12961_v24  ;;  %v1938_v58 = vadd.f32 %v1883_v34, %v1640_v4 }
 0x188   : > { %v12965_v46 = vpop.f32.mrf.mxu1  ;;  %v10999_v62 = vpop.f32.mrf.mxu0 }
 0x189   : > { %v1941_v21 = vadd.f32 %v10999_v62, %v1643_v41 }
 0x18a   : > { %v12967_v52 = vpop.f32.mrf.mxu1  ;;  %v12969_v27 = vpop.f32.mrf.mxu0 }
 0x18c   : > { %v12971_v3 = vpop.f32.mrf.mxu1  ;;  %v11002_v16 = vpop.f32.mrf.mxu0 }
 0x18d   : > { %v12973_v35 = vadd.f32 %v11002_v16, %v1646_v61  ;;  %v12990_v61 = vld [vmem:[%s15876_s5 + $0x28] sm:$0xff]  }
 0x18e   : > { %v12975_v39 = vpop.f32.mrf.mxu1  ;;  %v1899_v43 = vpop.f32.mrf.mxu0  ;;  %15905 = vst [vmem:[#allocation19_spill] sm:$0xff] %v12990_v61  ;;  %11212 = vmatprep.subr.bf16.mxu1 %v12990_v61 }
 0x18f   : > { %15901 = vst [vmem:[#allocation15_spill] sm:$0xff] %v12973_v35  ;;  %v1942_v20 = vadd.f32 %v1899_v43, %v1644_v5 }
 0x190   : > { %v12977_v24 = vpop.f32.mrf.mxu1  ;;  %v11003_v4 = vpop.f32.mrf.mxu0 }
 0x191   : > { %v1945_v34 = vadd.f32 %v11003_v4, %v1647_v49 }
 0x192   : > { %v12979_v56 = vpop.f32.mrf.mxu1  ;;  %v12981_v41 = vpop.f32.mrf.mxu0 }
 0x193   : > { %15902 = vst [vmem:[#allocation16_spill] sm:$0xff] %v12979_v56  ;;  %15903 = vst [vmem:[#allocation17_spill] sm:$0xff] %v12981_v41 }
 0x194   : > { %v12983_v62 = vpop.f32.mrf.mxu1  ;;  %v12985_v55 = vpop.f32.mrf.mxu0 }
 0x195   : > { %15904 = vst [vmem:[#allocation18_spill] sm:$0xff] %v12983_v62 }
 0x196   : > { %v12992_v16 = vpop.f32.mrf.mxu1  ;;  %v12994_v5 = vpop.f32.mrf.mxu0 }
 0x197   : > { %15906 = vst [vmem:[#allocation20_spill] sm:$0xff] %v12992_v16  ;;  %15907 = vst [vmem:[#allocation21_spill] sm:$0xff] %v12994_v5 }
 0x198   : > { %v12997_v49 = vpop.f32.mrf.mxu1  ;;  %v12999_v43 = vpop.f32.mrf.mxu0 }
 0x199   : > { %15908 = vst [vmem:[#allocation22_spill] sm:$0xff] %v12997_v49  ;;  %15909 = vst [vmem:[#allocation23_spill] sm:$0xff] %v12999_v43 }
 0x19a   : > { %v13001_v4 = vpop.f32.mrf.mxu1  ;;  %v13003_v35 = vpop.f32.mrf.mxu0 }
 0x19b   : > { %15910 = vst [vmem:[#allocation24_spill] sm:$0xff] %v13001_v4  ;;  %15911 = vst [vmem:[#allocation25_spill] sm:$0xff] %v13003_v35 }
 0x19c   : > { %v13005_v10 = vpop.f32.mrf.mxu1  ;;  %v13007_v57 = vpop.f32.mrf.mxu0 }
 0x19d   : > { %15912 = vst [vmem:[#allocation26_spill] sm:$0xff] %v13005_v10  ;;  %15913 = vst [vmem:[#allocation27_spill] sm:$0xff] %v13007_v57 }
 0x19e   : > { %v13009_v40 = vpop.f32.mrf.mxu1  ;;  %v13011_v29 = vpop.f32.mrf.mxu0 }
 0x19f   : > { %15914 = vst [vmem:[#allocation28_spill] sm:$0xff] %v13009_v40  ;;  %15915 = vst [vmem:[#allocation29_spill] sm:$0xff] %v13011_v29 }
 0x1a0   : > { %v13013_v16 = vpop.f32.mrf.mxu1  ;;  %v13015_v5 = vpop.f32.mrf.mxu0 }
 0x1a1   : > { %15916 = vst [vmem:[#allocation30_spill] sm:$0xff] %v13013_v16  ;;  %15917 = vst [vmem:[#allocation31_spill] sm:$0xff] %v13015_v5 }
 0x1a2   : > { %v13017_v61 = vpop.f32.mrf.mxu1  ;;  %v13019_v49 = vpop.f32.mrf.mxu0 }
 0x1a3   : > { %15918 = vst [vmem:[#allocation32_spill] sm:$0xff] %v13017_v61  ;;  %15919 = vst [vmem:[#allocation33_spill] sm:$0xff] %v13019_v49 }
 0x1a4   : > { %v13021_v43 = vpop.f32.mrf.mxu1  ;;  %v13023_v4 = vpop.f32.mrf.mxu0 }
 0x1a5   : > { %15920 = vst [vmem:[#allocation34_spill] sm:$0xff] %v13021_v43  ;;  %15921 = vst [vmem:[#allocation35_spill] sm:$0xff] %v13023_v4 }
 0x1a6   : > { %v13025_v35 = vpop.f32.mrf.mxu1  ;;  %v13027_v10 = vpop.f32.mrf.mxu0 }
 0x1a7   : > { %15922 = vst [vmem:[#allocation36_spill] sm:$0xff] %v13025_v35  ;;  %15923 = vst [vmem:[#allocation37_spill] sm:$0xff] %v13027_v10 }
 0x1a8   : > { %v13029_v57 = vpop.f32.mrf.mxu1  ;;  %v13031_v40 = vpop.f32.mrf.mxu0 }
 0x1a9   : > { %15924 = vst [vmem:[#allocation38_spill] sm:$0xff] %v13029_v57  ;;  %15925 = vst [vmem:[#allocation39_spill] sm:$0xff] %v13031_v40 }
 0x1aa   : > { %v13033_v29 = vpop.f32.mrf.mxu1  ;;  %v13035_v16 = vpop.f32.mrf.mxu0 }
 0x1ab   : > { %15926 = vst [vmem:[#allocation40_spill] sm:$0xff] %v13033_v29  ;;  %15927 = vst [vmem:[#allocation41_spill] sm:$0xff] %v13035_v16 }
 0x1ac   : > { %v13037_v5 = vpop.f32.mrf.mxu1  ;;  %v13039_v61 = vpop.f32.mrf.mxu0 }
 0x1ad   : > { %15928 = vst [vmem:[#allocation42_spill] sm:$0xff] %v13037_v5  ;;  %15929 = vst [vmem:[#allocation43_spill] sm:$0xff] %v13039_v61 }
 0x1ae   : > { %v13041_v49 = vpop.f32.mrf.mxu1  ;;  %v13043_v43 = vpop.f32.mrf.mxu0 }
 0x1af   : > { %15930 = vst [vmem:[#allocation44_spill] sm:$0xff] %v13041_v49  ;;  %15931 = vst [vmem:[#allocation45_spill] sm:$0xff] %v13043_v43 }
 0x1b0   : > { %v2165_v4 = vpop.f32.mrf.mxu1  ;;  %v13045_v35 = vpop.f32.mrf.mxu0 }
 0x1b1   : > { %15932 = vst [vmem:[#allocation46_spill] sm:$0xff] %v13045_v35  ;;  %v2232_v10 = vadd.f32 %v2165_v4, %v12952_v33  ;;  %v13065_v33 = vld [vmem:[%s15876_s5 + $0x38] sm:$0xff]  }
 0x1b2   : > { %v11029_v57 = vpop.f32.mrf.mxu1  ;;  %v13048_v62 = vpop.f32.mrf.mxu0  ;;  %15940 = vst [vmem:[#allocation54_spill] sm:$0xff] %v13065_v33  ;;  %11248 = vmatprep.subr.bf16.mxu0 %v13065_v33 }
 0x1b3   : > { %15933 = vst [vmem:[#allocation47_spill] sm:$0xff] %v13048_v62  ;;  %v2235_v40 = vadd.f32 %v11029_v57, %v1937_v1 }
 0x1b4   : > { %v13050_v29 = vpop.f32.mrf.mxu1  ;;  %v13052_v16 = vpop.f32.mrf.mxu0 }
 0x1b5   : > { %15934 = vst [vmem:[#allocation48_spill] sm:$0xff] %v13050_v29  ;;  %15935 = vst [vmem:[#allocation49_spill] sm:$0xff] %v13052_v16 }
 0x1b6   : > { %v13054_v5 = vpop.f32.mrf.mxu1  ;;  %v13056_v61 = vpop.f32.mrf.mxu0 }
 0x1b7   : > { %15936 = vst [vmem:[#allocation50_spill] sm:$0xff] %v13054_v5  ;;  %15937 = vst [vmem:[#allocation51_spill] sm:$0xff] %v13056_v61 }
 0x1b8   : > { %v2181_v49 = vpop.f32.mrf.mxu1  ;;  %v13058_v41 = vpop.f32.mrf.mxu0 }
 0x1b9   : > { %15938 = vst [vmem:[#allocation52_spill] sm:$0xff] %v13058_v41  ;;  %v2236_v43 = vadd.f32 %v2181_v49, %v1938_v58 }
 0x1ba   : > { %v11033_v56 = vpop.f32.mrf.mxu1  ;;  %v13060_v35 = vpop.f32.mrf.mxu0 }
 0x1bb   : > { %15939 = vst [vmem:[#allocation53_spill] sm:$0xff] %v13060_v35  ;;  %v2239_v57 = vadd.f32 %v11033_v56, %v1941_v21 }
 0x1bc   : > { %v13067_v1 = vpop.f32.mrf.mxu1  ;;  %v13069_v4 = vpop.f32.mrf.mxu0 }
 0x1bd   : > { %15941 = vst [vmem:[#allocation55_spill] sm:$0xff] %v13067_v1  ;;  %15942 = vst [vmem:[#allocation56_spill] sm:$0xff] %v13069_v4 }
 0x1be   : > { %v13072_v61 = vpop.f32.mrf.mxu1  ;;  %v2464_v5 = vpop.f32.mrf.mxu0 }
 0x1bf   : > { %v13074_v41 = vadd.f32 %v2464_v5, %v2232_v10  ;;  %v993_v10 = vadd.f32 %v12785_v53, %v12728_v59  ;;  %v1041_v59 = vadd.f32 %v12842_v45, %v12698_v32  ;;  %v1617_v53 = vadd.f32 %v12858_v7, %v12747_v51 }
 0x1c0   : > { %v2197_v58 = vpop.f32.mrf.mxu1  ;;  %v11063_v49 = vpop.f32.mrf.mxu0 }
 0x1c1   : > { %15943 = vst [vmem:[#allocation57_spill] sm:$0xff] %v13074_v41  ;;  %v2240_v35 = vadd.f32 %v2197_v58, %v1942_v20  ;;  %v13076_v16 = vadd.f32 %v11063_v49, %v2235_v40  ;;  %v1009_v40 = vadd.f32 %v12804_v60, %v12649_v23  ;;  %v1621_v23 = vadd.f32 %v12872_v13, %v12765_v36 }
 0x1c2   : > { %v11037_v29 = vpop.f32.mrf.mxu1  ;;  %v13078_v62 = vpop.f32.mrf.mxu0  ;;  %v1347_v32 = vadd.f32 %v12869_v42, %v1041_v59  ;;  %v1915_v51 = vadd.f32 %v12882_v50, %v1617_v53  ;;  %v2214_v50 = vadd.f32 %v12963_v0, %v12874_v8  ;;  %v2216_v8 = vadd.f32 %v12977_v24, %v12890_v28  ;;  %v15944_v0 = vld [vmem:[#allocation3_spill] sm:$0xff]  ;;  %v15950_v28 = vld [vmem:[#allocation21_spill] sm:$0xff]  ;;  %v15954_v59 = vld [vmem:[#allocation6_spill] sm:$0xff] }
 0x1c3   : > { %v2243_v56 = vadd.f32 %v11037_v29, %v1945_v34  ;;  %v1335_v29 = vadd.f32 %v12820_v14, %v993_v10  ;;  %v1025_v34 = vadd.f32 %v12823_v19, %v12675_v44  ;;  %v1625_v44 = vadd.f32 %v12885_v18, %v12783_v63  ;;  %v15955_v53 = vld [vmem:[#allocation24_spill] sm:$0xff] }
 0x1c4   : > { %v13080_v21 = vpop.f32.mrf.mxu1  ;;  %v13082_v1 = vpop.f32.mrf.mxu0  ;;  %v1629_v14 = vadd.f32 %v12898_v31, %v12802_v11  ;;  %v1919_v36 = vadd.f32 %v12895_v26, %v1621_v23  ;;  %v1645_v42 = vadd.f32 %v12959_v6, %v1347_v32  ;;  %v2513_v6 = vadd.f32 %v12985_v55, %v2214_v50  ;;  %v15951_v55 = vld [vmem:[#allocation5_spill] sm:$0xff]  ;;  %v15958_v32 = vld [vmem:[#allocation27_spill] sm:$0xff] }
 0x1c5   : > { %v1343_v60 = vadd.f32 %v12855_v17, %v1025_v34  ;;  %v1633_v19 = vadd.f32 %v12911_v47, %v1335_v29  ;;  %v1923_v17 = vadd.f32 %v12908_v22, %v1625_v44  ;;  %v2212_v22 = vadd.f32 %v12965_v46, %v12877_v38  ;;  %v15953_v29 = vld [vmem:[#allocation23_spill] sm:$0xff]  ;;  %v15961_v50 = vld [vmem:[#allocation29_spill] sm:$0xff] }
 0x1c6   : > { %v11076_v4 = vpop.f32.mrf.mxu1  ;;  %v2480_v33 = vpop.f32.mrf.mxu0  ;;  %v1927_v63 = vadd.f32 %v12921_v25, %v1629_v14  ;;  %v2215_v47 = vadd.f32 %v12967_v52, %v12880_v15  ;;  %v15945_v15 = vld [vmem:[#allocation16_spill] sm:$0xff]  ;;  %v15946_v52 = vld [vmem:[#allocation17_spill] sm:$0xff]  ;;  %v2223_v23 = vadd.f32 %v15955_v53, %v15954_v59  ;;  %v15957_v14 = vld [vmem:[#allocation26_spill] sm:$0xff] }
 0x1c7   : > { %v13084_v54 = vadd.f32 %v2480_v33, %v2236_v43  ;;  %v1339_v43 = vadd.f32 %v12839_v9, %v1009_v40  ;;  %v1931_v11 = vadd.f32 %v12943_v37, %v1633_v19  ;;  %v1641_v7 = vadd.f32 %v12946_v30, %v1343_v60  ;;  %v15948_v33 = vld [vmem:[#allocation4_spill] sm:$0xff]  ;;  %v15956_v60 = vld [vmem:[#allocation25_spill] sm:$0xff]  ;;  %v15969_v59 = vld [vmem:[#allocation35_spill] sm:$0xff] }
 0x1c8   : > { %v2682_v5 = vpop.f32.mrf.mxu1  ;;  %v11067_v41 = vpop.f32.mrf.mxu0  ;;  %v2219_v46 = vadd.f32 %v15945_v15, %v15944_v0  ;;  %v2511_v24 = vadd.f32 %v15950_v28, %v2212_v22  ;;  %v2514_v34 = vadd.f32 %v15953_v29, %v2215_v47  ;;  %v2221_v19 = vadd.f32 %v15957_v14, %v1923_v17  ;;  %v15964_v0 = vld [vmem:[#allocation31_spill] sm:$0xff]  ;;  %v15965_v15 = vld [vmem:[#allocation9_spill] sm:$0xff] }
 0x1c9   : > { %v13090_v20 = vadd.f32 %v11067_v41, %v2239_v57  ;;  %v1637_v45 = vadd.f32 %v12924_v12, %v1339_v43  ;;  %v13139_v25 = vadd.f32 %v12969_v27, %v1641_v7  ;;  %v2213_v12 = vadd.f32 %v12971_v3, %v1915_v51  ;;  %v15947_v3 = vld [vmem:[#allocation18_spill] sm:$0xff]  ;;  %v15949_v57 = vld [vmem:[#allocation20_spill] sm:$0xff]  ;;  %v13177_v7 = vld [vmem:[%s15875_s4] ss:$0 sm:$0xff] }
 0x1ca   : > { %v13095_v58 = vpop.f32.mrf.mxu1  ;;  %v13097_v49 = vpop.f32.mrf.mxu0  ;;  %v13154_v27 = vadd.f32 %v15946_v52, %v1645_v42  ;;  %v2222_v10 = vadd.f32 %v15949_v57, %v15948_v33  ;;  %v2811_v43 = vadd.f32 %v11076_v4, %v2513_v6  ;;  %v15960_v42 = vld [vmem:[#allocation28_spill] sm:$0xff]  ;;  %v2515_v22 = vadd.f32 %v15961_v50, %v2216_v8  ;;  %v15963_v6 = vld [vmem:[#allocation30_spill] sm:$0xff]  ;;  %v15967_v33 = vld [vmem:[#allocation33_spill] sm:$0xff] }
 0x1cb   : > { %v13127_v31 = vadd.f32 %v12956_v48, %v1637_v45  ;;  %v2218_v48 = vadd.f32 %v12975_v39, %v12887_v2  ;;  %v15952_v39 = vld [vmem:[#allocation22_spill] sm:$0xff]  ;;  %v2512_v44 = vadd.f32 %v15956_v60, %v2213_v12  ;;  %v2809_v47 = vadd.f32 %v2682_v5, %v2511_v24  ;;  %v15962_v12 = vld [vmem:[#allocation8_spill] sm:$0xff]  ;;  %v15975_v50 = vld [vmem:[#allocation39_spill] sm:$0xff] }
 0x1cc   : > { %v13112_v9 = vpop.f32.mrf.mxu1  ;;  %v13114_v41 = vpop.f32.mrf.mxu0  ;;  %v2224_v17 = vadd.f32 %v15963_v6, %v15962_v12  ;;  %v15966_v52 = vld [vmem:[#allocation32_spill] sm:$0xff]  ;;  %v2521_v53 = vadd.f32 %v15969_v59, %v2222_v10  ;;  %v15970_v24 = vld [vmem:[#allocation10_spill] sm:$0xff]  ;;  %v13206_v10 = vadd.f32 %v15975_v50, %v2223_v23  ;;  %v15985_v50 = vld [vmem:[#allocation47_spill] sm:$0xff] }
 0x1cd   : > { %v2517_v51 = vadd.f32 %v15958_v32, %v2218_v48  ;;  %v2518_v48 = vadd.f32 %v15964_v0, %v2219_v46  ;;  %v15972_v46 = vld [vmem:[#allocation37_spill] sm:$0xff]  ;;  %v15973_v32 = vld [vmem:[#allocation11_spill] sm:$0xff]  ;;  %v15977_v12 = vld [vmem:[#allocation40_spill] sm:$0xff] }
 0x1ce   : > { %v13124_v13 = vpop.f32.mrf.mxu1  ;;  %v2496_v18 = vpop.f32.mrf.mxu0 }
 0x1cf   : > { %v13132_v26 = vadd.f32 %v2496_v18, %v2240_v35  ;;  %v2217_v35 = vadd.f32 %v15947_v3, %v1919_v36  ;;  %v15959_v18 = vld [vmem:[#allocation7_spill] sm:$0xff]  ;;  %v2227_v3 = vadd.f32 %v15966_v52, %v15965_v15  ;;  %v15979_v52 = vld [vmem:[#allocation42_spill] sm:$0xff] }
 0x1d0   : > { %v13142_v37 = vpop.f32.mrf.mxu1  ;;  %v11071_v30 = vpop.f32.mrf.mxu0  ;;  %v2226_v4 = vadd.f32 %v15960_v42, %v15959_v18  ;;  %v2812_v18 = vadd.f32 %v13095_v58, %v2514_v34  ;;  %v2810_v58 = vadd.f32 %v13112_v9, %v2512_v44 }
 0x1d1   : > { %v13149_v38 = vadd.f32 %v11071_v30, %v2243_v56  ;;  %v2220_v56 = vadd.f32 %v15952_v39, %v15951_v55  ;;  %v2516_v57 = vadd.f32 %v15967_v33, %v2217_v35  ;;  %v15968_v39 = vld [vmem:[#allocation34_spill] sm:$0xff]  ;;  %v2229_v33 = vadd.f32 %v15979_v52, %v1931_v11 }
 0x1d2   : > { %v13159_v40 = vpop.f32.mrf.mxu1  ;;  %v13161_v2 = vpop.f32.mrf.mxu0  ;;  %v2225_v29 = vadd.f32 %v15968_v39, %v1927_v63  ;;  %v15980_v39 = vld [vmem:[#allocation43_spill] sm:$0xff] }
 0x1d3   : > { %v13198_v14 = vadd.f32 %v15972_v46, %v2220_v56  ;;  %v15978_v56 = vld [vmem:[#allocation41_spill] sm:$0xff]  ;;  %v13222_v59 = vadd.f32 %v15980_v39, %v2226_v4  ;;  %v15982_v46 = vld [vmem:[#allocation44_spill] sm:$0xff]  ;;  %v15984_v4 = vld [vmem:[#allocation46_spill] sm:$0xff] }
 0x1d4   : > { %v13172_v36 = vpop.f32.mrf.mxu1  ;;  %v11110_v45 = vpop.f32.mrf.mxu0  ;;  %v13215_v15 = vadd.f32 %v15978_v56, %v2221_v19 }
 0x1d5   : > { %v3109_v30 = vadd.f32 %v11110_v45, %v2811_v43  ;;  %v15971_v43 = vld [vmem:[#allocation36_spill] sm:$0xff]  ;;  %v15974_v45 = vld [vmem:[#allocation38_spill] sm:$0xff] }
 0x1d6   : > { %v13188_v28 = vpop.f32.mrf.mxu1  ;;  %v2980_v55 = vpop.f32.mrf.mxu0  ;;  %v2230_v60 = vadd.f32 %v15971_v43, %v15970_v24  ;;  %v2228_v35 = vadd.f32 %v15974_v45, %v15973_v32  ;;  %v2815_v24 = vadd.f32 %v13124_v13, %v2517_v51  ;;  %v15981_v43 = vld [vmem:[#allocation13_spill] sm:$0xff]  ;;  %v2813_v13 = vadd.f32 %v13142_v37, %v2515_v22  ;;  %v15988_v37 = vld [vmem:[#allocation14_spill] sm:$0xff] }
 0x1d7   : > { %v13193_v5 = vadd.f32 %v13177_v7, %v3109_v30  ;;  %v3107_v8 = vadd.f32 %v2980_v55, %v2809_v47  ;;  %v15976_v30 = vld [vmem:[#allocation12_spill] sm:$0xff]  ;;  %v2234_v19 = vadd.f32 %v15982_v46, %v15981_v43  ;;  %v15983_v32 = vld [vmem:[#allocation45_spill] sm:$0xff]  ;;  %v15989_v22 = vld [vmem:[#allocation50_spill] sm:$0xff] }
 0x1d8   : > { %v13203_v42 = vpop.f32.mrf.mxu1  ;;  %v11111_v63 = vpop.f32.mrf.mxu0  ;;  %v2231_v47 = vadd.f32 %v15977_v12, %v15976_v30  ;;  %v13229_v45 = vadd.f32 %v15983_v32, %v2224_v17  ;;  %v13241_v30 = vadd.f32 %v15985_v50, %v2225_v29  ;;  %v15986_v17 = vld [vmem:[#allocation48_spill] sm:$0xff] }
 0x1d9   : > { %v3214_v6 = vmul.f32 1.442695, %v13193_v5  ;;  %v13212_v0 = vadd.f32 %v13177_v7, %v3107_v8  ;;  %v3110_v34 = vadd.f32 %v11111_v63, %v2812_v18  ;;  %v13237_v63 = vadd.f32 %v15984_v4, %v2227_v3  ;;  %v15987_v3 = vld [vmem:[#allocation49_spill] sm:$0xff] }
 0x1da   : > { %v13219_v55 = vpop.f32.mrf.mxu1  ;;  %v2983_v23 = vpop.f32.mrf.mxu0  ;;  %v2233_v12 = vadd.f32 %v15986_v17, %v13127_v31  ;;  %vm3180_vm4 = vcmp.gt.f32.partialorder %v13193_v5, 0.0 }
 0x1db   : > { %11902 = vpow2.f32 %v3214_v6  ;;  %v3210_v8 = vmul.f32 1.442695, %v13212_v0  ;;  %v13232_v9 = vadd.f32 %v13177_v7, %v3110_v34  ;;  %v3108_v11 = vadd.f32 %v2983_v23, %v2810_v58 }
 0x1dc   : > { %v13234_v44 = vpop.f32.mrf.mxu1  ;;  %v11114_v18 = vpop.f32.mrf.mxu0  ;;  %v13252_v34 = vadd.f32 %v15987_v3, %v2230_v60  ;;  %v2238_v23 = vadd.f32 %v15989_v22, %v15988_v37  ;;  %v15991_v60 = vld [vmem:[#allocation52_spill] sm:$0xff]  ;;  %v15995_v37 = vld [vmem:[#allocation15_spill] sm:$0xff]  ;;  %vm3178_vm5 = vcmp.gt.f32.partialorder %v13212_v0, 0.0 }
 0x1dd   : > { %11904 = vpow2.f32 %v3210_v8  ;;  %v3113_v51 = vadd.f32 %v11114_v18, %v2815_v24  ;;  %v3216_v6 = vmul.f32 1.442695, %v13232_v9  ;;  %v13247_v56 = vadd.f32 %v13177_v7, %v3108_v11  ;;  %v15990_v24 = vld [vmem:[#allocation51_spill] sm:$0xff]  ;;  %v15992_v18 = vld [vmem:[#allocation53_spill] sm:$0xff] }
 0x1de   : > { %v13249_v52 = vpop.f32.mrf.mxu1  ;;  %v2996_v58 = vpop.f32.mrf.mxu0  ;;  %v13260_v31 = vadd.f32 %v15990_v24, %v2228_v35  ;;  %v2816_v8 = vadd.f32 %v13159_v40, %v2518_v48  ;;  %v13267_v11 = vadd.f32 %v15991_v60, %v2231_v47  ;;  %v13270_v4 = vadd.f32 %v15992_v18, %v2229_v33  ;;  %v15993_v35 = vld [vmem:[#allocation55_spill] sm:$0xff]  ;;  %v15994_v47 = vld [vmem:[#allocation56_spill] sm:$0xff] }
 0x1df   : > { %v13257_v29 = vadd.f32 %v13177_v7, %v3113_v51  ;;  %v3111_v39 = vadd.f32 %v2996_v58, %v2813_v13  ;;  %11906 = vpow2.f32 %v3216_v6  ;;  %v3212_v43 = vmul.f32 1.442695, %v13247_v56 }
 0x1e0   : > { %v13264_v46 = vpop.f32.mrf.mxu1  ;;  %v11115_v32 = vpop.f32.mrf.mxu0  ;;  %v2237_v40 = vadd.f32 %v15993_v35, %v13139_v25  ;;  %v2814_v48 = vadd.f32 %v13172_v36, %v2516_v57  ;;  %v13282_v58 = vadd.f32 %v15994_v47, %v2234_v19  ;;  %v2819_v33 = vadd.f32 %v13188_v28, %v2521_v53 }
 0x1e1   : > { %v3222_v51 = vmul.f32 1.442695, %v13257_v29  ;;  %v13274_v13 = vadd.f32 %v13177_v7, %v3111_v39  ;;  %11908 = vpow2.f32 %v3212_v43  ;;  %v3114_v50 = vadd.f32 %v11115_v32, %v2816_v8 }
 0x1e2   : > { %v13279_v17 = vpop.f32.mrf.mxu1  ;;  %v2999_v6 = vpop.f32.mrf.mxu0  ;;  %v2242_v22 = vadd.f32 %v13072_v61, %v15995_v37  ;;  %v13289_v25 = vadd.f32 %v13078_v62, %v2233_v12  ;;  %v2241_v19 = vadd.f32 %v13080_v21, %v13154_v27  ;;  %v2817_v28 = vadd.f32 %v13203_v42, %v13198_v14 }
 0x1e3   : > { %11910 = vpow2.f32 %v3222_v51  ;;  %v3218_v3 = vmul.f32 1.442695, %v13274_v13  ;;  %v13292_v36 = vadd.f32 %v13177_v7, %v3114_v50  ;;  %v3112_v57 = vadd.f32 %v2999_v6, %v2814_v48 }
 0x1e4   : > { %v13294_v39 = vpop.f32.mrf.mxu1  ;;  %v11118_v24 = vpop.f32.mrf.mxu0  ;;  %v13301_v61 = vadd.f32 %v13082_v1, %v2238_v23  ;;  %v13304_v62 = vadd.f32 %v13097_v49, %v2237_v40  ;;  %v13311_v21 = vadd.f32 %v13114_v41, %v2242_v22  ;;  %v13314_v27 = vadd.f32 %v13161_v2, %v2241_v19 }
 0x1e5   : > { %11912 = vpow2.f32 %v3218_v3  ;;  %v3117_v53 = vadd.f32 %v11118_v24, %v2819_v33  ;;  %v3224_v12 = vmul.f32 1.442695, %v13292_v36  ;;  %v13308_v8 = vadd.f32 %v13177_v7, %v3112_v57 }
 0x1e6   : > { %v11092_v43 = vpop.f32.mrf.mxu1  ;;  %v3012_v32 = vpop.f32.mrf.mxu0  ;;  %v2820_v49 = vadd.f32 %v13219_v55, %v13206_v10  ;;  %vm3181_vm6 = vcmp.gt.f32.partialorder %v13232_v9, 0.0  ;;  %v2818_v10 = vadd.f32 %v13234_v44, %v13215_v15  ;;  %v2823_v47 = vadd.f32 %v13249_v52, %v13222_v59 }
 0x1e7   : > { %v13317_v14 = vadd.f32 %v13177_v7, %v3117_v53  ;;  %v3115_v1 = vadd.f32 %v3012_v32, %v2817_v28  ;;  %11914 = vpow2.f32 %v3224_v12  ;;  %v3220_v23 = vmul.f32 1.442695, %v13308_v8 }
 0x1e8   : > { %v11903_v42 = vpop.eup %11902  ;;  %v13323_v60 = vpop.f32.mrf.mxu1  ;;  %vm3179_vm7 = vcmp.gt.f32.partialorder %v13247_v56, 0.0  ;;  %vm3184_vm8 = vcmp.gt.f32.partialorder %v13257_v29, 0.0  ;;  %v2821_v59 = vadd.f32 %v13264_v46, %v13229_v45  ;;  %vm3182_vm9 = vcmp.gt.f32.partialorder %v13274_v13, 0.0 }
 0x1e9   : > { %v11119_v41 = vpop.f32.mrf.mxu0  ;;  %v9794_v18 = vadd.f32 -1.0, %v11903_v42  ;;  %v3230_v2 = vmul.f32 1.442695, %v13317_v14  ;;  %v13328_v51 = vadd.f32 %v13177_v7, %v3115_v1  ;;  %11916 = vpow2.f32 %v3220_v23 }
 0x1ea   : > { %v11905_v35 = vpop.eup %11904  ;;  %v3118_v55 = vadd.f32 %v11119_v41, %v2820_v49  ;;  %v13333_v40 = vpop.f32.mrf.mxu1  ;;  %v2822_v49 = vadd.f32 %v13294_v39, %v13241_v30  ;;  %vm3185_vm10 = vcmp.gt.f32.partialorder %v13292_v36, 0.0  ;;  %v2827_v41 = vadd.f32 %v11092_v43, %v13252_v34 }
 0x1eb   : > { %v3015_v48 = vpop.f32.mrf.mxu0  ;;  %v3308_v50 = vsel %vm3180_vm4, %v13193_v5, %v9794_v18  ;;  %v9792_v6 = vadd.f32 -1.0, %v11905_v35  ;;  %11918 = vpow2.f32 %v3230_v2  ;;  %v3226_v15 = vmul.f32 1.442695, %v13328_v51 }
 0x1ec   : > { %3341 = vst.msk [vmem:[#allocation2 + $0x48] sm:$0xff] %vm3338_vm3, %v3308_v50  ;;  %v13344_v44 = vadd.f32 %v13177_v7, %v3118_v55  ;;  %v3116_v33 = vadd.f32 %v3015_v48, %v2818_v10  ;;  %v13346_v3 = vpop.f32.mrf.mxu1  ;;  %v11907_v22 = vpop.eup %11906  ;;  %vm3183_vm11 = vcmp.gt.f32.partialorder %v13308_v8, 0.0  ;;  %vm3188_vm12 = vcmp.gt.f32.partialorder %v13317_v14, 0.0 }
 0x1ed   : > { %v11122_v37 = vpop.f32.mrf.mxu0  ;;  %v3306_v5 = vsel %vm3178_vm5, %v13212_v0, %v9792_v6  ;;  %v9795_v57 = vadd.f32 -1.0, %v11907_v22  ;;  %11920 = vpow2.f32 %v3226_v15  ;;  %v2824_v0 = vadd.f32 %v13279_v17, %v13237_v63 }
 0x1ee   : > { %v3121_v52 = vadd.f32 %v11122_v37, %v2823_v47  ;;  %3339 = vst.msk [vmem:[#allocation2 + $0x28] sm:$0xff] %vm3338_vm3, %v3306_v5  ;;  %v3232_v24 = vmul.f32 1.442695, %v13344_v44  ;;  %v13357_v19 = vpop.f32.mrf.mxu1  ;;  %v11909_v53 = vpop.eup %11908  ;;  %v13362_v12 = vadd.f32 %v13177_v7, %v3116_v33  ;;  %vm3186_vm13 = vcmp.gt.f32.partialorder %v13328_v51, 0.0 }
 0x1ef   : > { %v3028_v28 = vpop.f32.mrf.mxu0  ;;  %v3309_v1 = vsel %vm3181_vm6, %v13232_v9, %v9795_v57  ;;  %v9793_v42 = vadd.f32 -1.0, %v11909_v53  ;;  %vm3189_vm14 = vcmp.gt.f32.partialorder %v13344_v44, 0.0 }
 0x1f0   : > { %v13365_v45 = vadd.f32 %v13177_v7, %v3121_v52  ;;  %v3119_v46 = vadd.f32 %v3028_v28, %v2821_v59  ;;  %v11911_v32 = vpop.eup %11910  ;;  %11922 = vpow2.f32 %v3232_v24  ;;  %v13372_v23 = vpop.f32.mrf.mxu1  ;;  %3342 = vst.msk [vmem:[#allocation2 + $0x50] sm:$0xff] %vm3338_vm3, %v3309_v1  ;;  %v3228_v18 = vmul.f32 1.442695, %v13362_v12 }
 0x1f1   : > { %v11123_v63 = vpop.f32.mrf.mxu0  ;;  %v9798_v17 = vadd.f32 -1.0, %v11911_v32  ;;  %v3307_v9 = vsel %vm3179_vm7, %v13247_v56, %v9793_v42  ;;  %v2825_v56 = vadd.f32 %v13323_v60, %v13260_v31  ;;  %v2828_v60 = vadd.f32 %v13333_v40, %v13267_v11 }
 0x1f2   : > { %v11913_v2 = vpop.eup %11912  ;;  %v3238_v30 = vmul.f32 1.442695, %v13365_v45  ;;  %v13384_v39 = vadd.f32 %v13177_v7, %v3119_v46  ;;  %v13386_v35 = vpop.f32.mrf.mxu1  ;;  %3340 = vst.msk [vmem:[#allocation2 + $0x30] sm:$0xff] %vm3338_vm3, %v3307_v9  ;;  %11924 = vpow2.f32 %v3228_v18  ;;  %v3122_v55 = vadd.f32 %v11123_v63, %v2824_v0 }
 0x1f3   : > { %v3031_v10 = vpop.f32.mrf.mxu0  ;;  %v3312_v34 = vsel %vm3184_vm8, %v13257_v29, %v9798_v17  ;;  %v9796_v43 = vadd.f32 -1.0, %v11913_v2  ;;  %vm3187_vm15 = vcmp.gt.f32.partialorder %v13362_v12, 0.0  ;;  %vm3192_vm1 = vcmp.gt.f32.partialorder %v13365_v45, 0.0  ;;  %v15996_v17 = vld [vmem:[#allocation57_spill] sm:$0xff] }
 0x1f4   : > { %3345 = vst.msk [vmem:[#allocation2 + $0x88] sm:$0xff] %vm3338_vm3, %v3312_v34  ;;  %11926 = vpow2.f32 %v3238_v30  ;;  %v3234_v48 = vmul.f32 1.442695, %v13384_v39  ;;  %v13397_v50 = vpop.f32.mrf.mxu1  ;;  %v11915_v47 = vpop.eup %11914  ;;  %v13404_v15 = vadd.f32 %v13177_v7, %v3122_v55  ;;  %v3120_v33 = vadd.f32 %v3031_v10, %v2822_v49 }
 0x1f5   : > { %v11126_v6 = vpop.f32.mrf.mxu0  ;;  %v3310_v29 = vsel %vm3182_vm9, %v13274_v13, %v9796_v43  ;;  %v9799_v31 = vadd.f32 -1.0, %v11915_v47  ;;  %v2826_v13 = vadd.f32 %v13346_v3, %v13270_v4  ;;  %v2831_v3 = vadd.f32 %v13357_v19, %v13282_v58 }
 0x1f6   : > { %3343 = vst.msk [vmem:[#allocation2 + $0x68] sm:$0xff] %vm3338_vm3, %v3310_v29  ;;  %11928 = vpow2.f32 %v3234_v48  ;;  %v3125_v37 = vadd.f32 %v11126_v6, %v2827_v41  ;;  %v13409_v22 = vpop.f32.mrf.mxu1  ;;  %v11917_v59 = vpop.eup %11916  ;;  %v3240_v52 = vmul.f32 1.442695, %v13404_v15  ;;  %v13416_v57 = vadd.f32 %v13177_v7, %v3120_v33  ;;  %v3425_v6 = vld [vmem:[#allocation2 + $0x28] sm:$0xff] }
 0x1f7   : > { %v3044_v5 = vpop.f32.mrf.mxu0  ;;  %v3313_v11 = vsel %vm3185_vm10, %v13292_v36, %v9799_v31  ;;  %v9797_v40 = vadd.f32 -1.0, %v11917_v59  ;;  %v2829_v41 = vadd.f32 %v13372_v23, %v15996_v17  ;;  %vm3190_vm4 = vcmp.gt.f32.partialorder %v13384_v39, 0.0  ;;  %v3373_v31 = vld [vmem:[#allocation2 + $0x27] sm:$0xff] }
 0x1f8   : > { %v11919_v24 = vpop.eup %11918  ;;  %v13422_v28 = vadd.f32 %v13177_v7, %v3125_v37  ;;  %v3123_v53 = vadd.f32 %v3044_v5, %v2825_v56  ;;  %v13424_v0 = vpop.f32.mrf.mxu1  ;;  %3346 = vst.msk [vmem:[#allocation2 + $0x90] sm:$0xff] %vm3338_vm3, %v3313_v11  ;;  %11930 = vpow2.f32 %v3240_v52  ;;  %v3236_v32 = vmul.f32 1.442695, %v13416_v57  ;;  %v13507_v17 = vld [vmem:[%s15876_s5 + $0x48] sm:$0xff]  }
 0x1f9   : > { %v11127_v46 = vpop.f32.mrf.mxu0  ;;  %v9802_v4 = vadd.f32 -1.0, %v11919_v24  ;;  %v3311_v36 = vsel %vm3183_vm11, %v13308_v8, %v9797_v40  ;;  %v3426_v30 = vld [vmem:[#allocation2 + $0x30] sm:$0xff]  ;;  %vm3193_vm5 = vcmp.gt.f32.partialorder %v13404_v15, 0.0  ;;  %vm3191_vm6 = vcmp.gt.f32.partialorder %v13416_v57, 0.0 }
 0x1fa   : > { %v3246_v1 = vmul.f32 1.442695, %v13422_v28  ;;  %v13436_v42 = vadd.f32 %v13177_v7, %v3123_v53  ;;  %v11921_v63 = vpop.eup %11920  ;;  %3344 = vst.msk [vmem:[#allocation2 + $0x70] sm:$0xff] %vm3338_vm3, %v3311_v36  ;;  %11932 = vpow2.f32 %v3236_v32  ;;  %v3126_v19 = vadd.f32 %v11127_v46, %v2828_v60  ;;  %v13447_v2 = vpop.f32.mrf.mxu1  ;;  %v3374_v55 = vld [vmem:[#allocation2 + $0x2f] sm:$0xff]  ;;  %v3375_v36 = vld [vmem:[#allocation2 + $0x47] sm:$0xff] }
 0x1fb   : > { %v3047_v49 = vpop.f32.mrf.mxu0  ;;  %v3316_v58 = vsel %vm3188_vm12, %v13317_v14, %v9802_v4  ;;  %v9800_v8 = vadd.f32 -1.0, %v11921_v63  ;;  %v13452_v14 = vadd.f32 %v13386_v35, %v13076_v16  ;;  %v2830_v16 = vadd.f32 %v13397_v50, %v13289_v25  ;;  %v3428_v60 = vld [vmem:[#allocation2 + $0x50] sm:$0xff]  ;;  %v3427_v46 = vld [vmem:[#allocation2 + $0x48] sm:$0xff] }
 0x1fc   : > { %3349 = vst.msk [vmem:[#allocation2 + $0xc8] sm:$0xff] %vm3338_vm3, %v3316_v58  ;;  %11934 = vpow2.f32 %v3246_v1  ;;  %v3242_v18 = vmul.f32 1.442695, %v13436_v42  ;;  %v13455_v34 = vadd.f32 %v13177_v7, %v3126_v19  ;;  %v3124_v43 = vadd.f32 %v3047_v49, %v2826_v13  ;;  %v2781_v25 = vpop.f32.mrf.mxu1  ;;  %v3376_v13 = vld [vmem:[#allocation2 + $0x4f] sm:$0xff]  ;;  %v15997_v1 = vld [vmem:[#allocation19_spill] sm:$0xff] }
 0x1fd   : > { %v11130_v9 = vpop.f32.mrf.mxu0  ;;  %v11923_v10 = vpop.eup %11922  ;;  %v3314_v23 = vsel %vm3186_vm13, %v13328_v51, %v9800_v8  ;;  %v13467_v33 = vpack.c.bf16 %v3426_v30, %v3425_v6  ;;  %v11853_v51 = vld [vmem:[%s15876_s5 + $0x20] sm:$0xff]   ;;  %v13479_v59 = vpack.c.bf16 %v3374_v55, %v3373_v31  ;;  %v11855_v24 = vld [vmem:[%s15876_s5 + $0x30] sm:$0xff]   ;;  %v13494_v32 = vpack.c.bf16 %v3428_v60, %v3427_v46  ;;  %v15998_v8 = vld [vmem:[#allocation54_spill] sm:$0xff] }
 0x1fe   : > { %v9803_v56 = vadd.f32 -1.0, %v11923_v10  ;;  %11936 = vpow2.f32 %v3242_v18  ;;  %v3129_v48 = vadd.f32 %v11130_v9, %v2831_v3  ;;  %3347 = vst.msk [vmem:[#allocation2 + $0xa8] sm:$0xff] %vm3338_vm3, %v3314_v23  ;;  %v3248_v35 = vmul.f32 1.442695, %v13455_v34  ;;  %v13522_v10 = vld [vmem:[%s15876_s5 + $0x58] sm:$0xff]  }
 0x1ff   : > { %v3060_v47 = vpop.f32.mrf.mxu0  ;;  %v13465_v29 = vadd.f32 %v13177_v7, %v3124_v43  ;;  %v11925_v37 = vpop.eup %11924  ;;  %11145 = vmatmul.mubr.msk.bf16.vlgmr.msra.gmra.mxu1 %vm3338_vm3, %v13467_v33  ;;  %11181 = vmatmul.mubr.msk.bf16.vlgmr.msra.gmra.mxu0 %vm3338_vm3, %v13479_v59  ;;  %vm3196_vm7 = vcmp.gt.f32.partialorder %v13422_v28, 0.0  ;;  %v13501_v63 = vpack.c.bf16 %v3376_v13, %v3375_v36  ;;  %v13515_v9 = vadd.f32 %v13424_v0, %v13084_v54  ;;  %v3429_v43 = vld [vmem:[#allocation2 + $0x68] sm:$0xff]  ;;  %v3432_v23 = vld [vmem:[#allocation2 + $0x90] sm:$0xff] }
 0x200   : > { %v3317_v5 = vsel %vm3189_vm14, %v13344_v44, %v9803_v56  ;;  %v13477_v50 = vadd.f32 %v13177_v7, %v3129_v48  ;;  %v9801_v40 = vadd.f32 -1.0, %v11925_v37  ;;  %v2835_v44 = vadd.f32 %v13409_v22, %v13301_v61  ;;  %11213 = vmatpush3.bf16.msra.mxu1 %v15997_v1  ;;  %11249 = vmatpush3.bf16.msra.mxu0 %v15998_v8 }
 0x201   : > { %v11131_v52 = vpop.f32.mrf.mxu0  ;;  %v11927_v11 = vpop.eup %11926  ;;  %3350 = vst.msk [vmem:[#allocation2 + $0xd0] sm:$0xff] %vm3338_vm3, %v3317_v5  ;;  %11938 = vpow2.f32 %v3248_v35  ;;  %v3244_v53 = vmul.f32 1.442695, %v13465_v29  ;;  %v3127_v58 = vadd.f32 %v3060_v47, %v2829_v41  ;;  %v3430_v19 = vld [vmem:[#allocation2 + $0x70] sm:$0xff]  ;;  %11214 = vmatprep.subr.bf16.mxu1 %v11853_v51  ;;  %11148 = vmatprep.mubr.msk.bf16.mxu1 %vm3338_vm3, %v13494_v32  ;;  %vm3194_vm8 = vcmp.gt.f32.partialorder %v13436_v42, 0.0  ;;  %v3377_v5 = vld [vmem:[#allocation2 + $0x67] sm:$0xff] }
 0x202   : > { %v9806_v4 = vadd.f32 -1.0, %v11927_v11  ;;  %v3254_v3 = vmul.f32 1.442695, %v13477_v50  ;;  %v3315_v49 = vsel %vm3187_vm15, %v13362_v12, %v9801_v40  ;;  %v11104_v41 = vpop.f32.mrf.mxu1  ;;  %11250 = vmatprep.subr.bf16.mxu0 %v11855_v24  ;;  %11184 = vmatprep.mubr.msk.bf16.mxu0 %vm3338_vm3, %v13501_v63  ;;  %v3378_v55 = vld [vmem:[#allocation2 + $0x6f] sm:$0xff]  ;;  %v2836_v6 = vadd.f32 %v13447_v2, %v13090_v20 }
 0x203   : > { %v3063_v61 = vpop.f32.mrf.mxu0  ;;  %v11929_v22 = vpop.eup %11928  ;;  %11940 = vpow2.f32 %v3244_v53  ;;  %3348 = vst.msk [vmem:[#allocation2 + $0xb0] sm:$0xff] %vm3338_vm3, %v3315_v49  ;;  %v13529_v54 = vadd.f32 %v13177_v7, %v3127_v58  ;;  %v13537_v35 = vpack.c.bf16 %v3430_v19, %v3429_v43  ;;  %vm3197_vm9 = vcmp.gt.f32.partialorder %v13455_v34, 0.0 }
 0x204   : > { %v3320_v12 = vsel %vm3192_vm1, %v13365_v45, %v9806_v4  ;;  %v9804_v18 = vadd.f32 -1.0, %v11929_v22  ;;  %11942 = vpow2.f32 %v3254_v3  ;;  %v3130_v45 = vadd.f32 %v11131_v52, %v13452_v14  ;;  %11215 = vmatpush3.bf16.msra.mxu1 %v11853_v51  ;;  %11251 = vmatpush3.bf16.msra.mxu0 %v11855_v24  ;;  %v13546_v2 = vpop.f32.mrf.mxu1  ;;  %v3380_v52 = vld [vmem:[#allocation2 + $0x8f] sm:$0xff] }
 0x205   : > { %v11134_v30 = vpop.f32.mrf.mxu0  ;;  %3353 = vst.msk [vmem:[#allocation2 + $0x108] sm:$0xff] %vm3338_vm3, %v3320_v12  ;;  %v3128_v0 = vadd.f32 %v3063_v61, %v2830_v16  ;;  %v11931_v56 = vpop.eup %11930  ;;  %v2834_v16 = vadd.f32 %v2781_v25, %v13304_v62  ;;  %v3250_v60 = vmul.f32 1.442695, %v13529_v54  ;;  %11284 = vmatprep.subr.bf16.mxu1 %v13507_v17  ;;  %v13554_v62 = vpack.c.bf16 %v3378_v55, %v3377_v5 }
 0x206   : > { %v3318_v48 = vsel %vm3190_vm4, %v13384_v39, %v9804_v18  ;;  %v3133_v47 = vadd.f32 %v11134_v30, %v2835_v44  ;;  %v9807_v14 = vadd.f32 -1.0, %v11931_v56  ;;  %v13543_v37 = vadd.f32 %v13177_v7, %v3130_v45  ;;  %v3431_v39 = vld [vmem:[#allocation2 + $0x88] sm:$0xff]  ;;  %11320 = vmatprep.subr.bf16.mxu0 %v13522_v10  ;;  %v11105_v8 = vpop.f32.mrf.mxu1 }
 0x207   : > { %v3076_v31 = vpop.f32.mrf.mxu0  ;;  %3351 = vst.msk [vmem:[#allocation2 + $0xe8] sm:$0xff] %vm3338_vm3, %v3318_v48  ;;  %v11933_v20 = vpop.eup %11932  ;;  %v13549_v51 = vadd.f32 %v13177_v7, %v3128_v0  ;;  %v13556_v25 = vpack.c.bf16 %v3432_v23, %v3431_v39  ;;  %11944 = vpow2.f32 %v3250_v60  ;;  %11149 = vmatmul.mubr.msk.bf16.gmra.mxu1 %vm3338_vm3, %v13537_v35  ;;  %v2839_v46 = vadd.f32 %v11104_v41, %v13311_v21  ;;  %v3433_v45 = vld [vmem:[#allocation2 + $0xa8] sm:$0xff] }
 0x208   : > { %v13552_v13 = vadd.f32 %v13177_v7, %v3133_v47  ;;  %v3321_v40 = vsel %vm3193_vm5, %v13404_v15, %v9807_v14  ;;  %v9805_v44 = vadd.f32 -1.0, %v11933_v20  ;;  %v3256_v4 = vmul.f32 1.442695, %v13543_v37  ;;  %11185 = vmatmul.mubr.msk.bf16.gmra.mxu0 %vm3338_vm3, %v13554_v62  ;;  %v3379_v15 = vld [vmem:[#allocation2 + $0x87] sm:$0xff]  ;;  %v3436_v43 = vld [vmem:[#allocation2 + $0xd0] sm:$0xff]  ;;  %v2797_v60 = vpop.f32.mrf.mxu1 }
 0x209   : > { %v11135_v11 = vpop.f32.mrf.mxu0  ;;  %v11935_v24 = vpop.eup %11934  ;;  %3354 = vst.msk [vmem:[#allocation2 + $0x110] sm:$0xff] %vm3338_vm3, %v3321_v40  ;;  %v3252_v3 = vmul.f32 1.442695, %v13549_v51  ;;  %11152 = vmatprep.mubr.msk.bf16.mxu1 %vm3338_vm3, %v13556_v25  ;;  %vm3195_vm10 = vcmp.gt.f32.partialorder %v13465_v29, 0.0  ;;  %v13578_v22 = vpack.c.bf16 %v3380_v52, %v3379_v15  ;;  %v3131_v12 = vadd.f32 %v3076_v31, %v13515_v9  ;;  %v3435_v14 = vld [vmem:[#allocation2 + $0xc8] sm:$0xff] }
 0x20a   : > { %v9810_v53 = vadd.f32 -1.0, %v11935_v24  ;;  %v3319_v61 = vsel %vm3191_vm6, %v13416_v57, %v9805_v44  ;;  %v3262_v21 = vmul.f32 1.442695, %v13552_v13  ;;  %v3434_v49 = vld [vmem:[#allocation2 + $0xb0] sm:$0xff]  ;;  %11946 = vpow2.f32 %v3256_v4 }
 0x20b   : > { %v3079_v36 = vpop.f32.mrf.mxu0  ;;  %v11937_v1 = vpop.eup %11936  ;;  %3352 = vst.msk [vmem:[#allocation2 + $0xf0] sm:$0xff] %vm3338_vm3, %v3319_v61  ;;  %11948 = vpow2.f32 %v3252_v3  ;;  %11188 = vmatprep.mubr.msk.bf16.mxu0 %vm3338_vm3, %v13578_v22  ;;  %v3134_v57 = vadd.f32 %v11135_v11, %v2836_v6  ;;  %v3382_v0 = vld [vmem:[#allocation2 + $0xaf] sm:$0xff]  ;;  %v13592_v9 = vadd.f32 %v13177_v7, %v3131_v12  ;;  %v13594_v23 = vpack.c.bf16 %v3434_v49, %v3433_v45 }
 0x20c   : > { %v3324_v58 = vsel %vm3196_vm7, %v13422_v28, %v9810_v53  ;;  %v9808_v19 = vadd.f32 -1.0, %v11937_v1  ;;  %v3132_v41 = vadd.f32 %v3079_v36, %v2834_v16  ;;  %11950 = vpow2.f32 %v3262_v21 }
 0x20d   : > { %v11138_v18 = vpop.f32.mrf.mxu0  ;;  %3357 = vst.msk [vmem:[#allocation2 + $0x148] sm:$0xff] %vm3338_vm3, %v3324_v58  ;;  %v13598_v6 = vadd.f32 %v13177_v7, %v3134_v57  ;;  %vm3200_vm11 = vcmp.gt.f32.partialorder %v13477_v50, 0.0  ;;  %v3258_v5 = vmul.f32 1.442695, %v13592_v9  ;;  %v13610_v20 = vpack.c.bf16 %v3436_v43, %v3435_v14 }
 0x20e   : > { %v3137_v30 = vadd.f32 %v11138_v18, %v2839_v46  ;;  %v11939_v55 = vpop.eup %11938  ;;  %v3322_v28 = vsel %vm3194_vm8, %v13436_v42, %v9808_v19  ;;  %v13601_v47 = vadd.f32 %v13177_v7, %v3132_v41  ;;  %v3381_v42 = vld [vmem:[#allocation2 + $0xa7] sm:$0xff]  ;;  %v2837_v44 = vadd.f32 %v13546_v2, %v13132_v26  ;;  %v3384_v46 = vld [vmem:[#allocation2 + $0xcf] sm:$0xff] }
 0x20f   : > { %v3092_v56 = vpop.f32.mrf.mxu0  ;;  %3355 = vst.msk [vmem:[#allocation2 + $0x128] sm:$0xff] %vm3338_vm3, %v3322_v28  ;;  %v9811_v48 = vadd.f32 -1.0, %v11939_v55  ;;  %v13608_v39 = vpack.c.bf16 %v3382_v0, %v3381_v42  ;;  %v3264_v53 = vmul.f32 1.442695, %v13598_v6  ;;  %11153 = vmatmul.mubr.msk.bf16.gmra.mxu1 %vm3338_vm3, %v13594_v23  ;;  %v2840_v3 = vadd.f32 %v11105_v8, %v13149_v38  ;;  %v3383_v38 = vld [vmem:[#allocation2 + $0xc7] sm:$0xff] }
 0x210   : > { %v13604_v31 = vadd.f32 %v13177_v7, %v3137_v30  ;;  %v11941_v16 = vpop.eup %11940  ;;  %11952 = vpow2.f32 %v3258_v5  ;;  %v3260_v15 = vmul.f32 1.442695, %v13601_v47  ;;  %11156 = vmatprep.mubr.msk.bf16.mxu1 %vm3338_vm3, %v13610_v20  ;;  %v2838_v2 = vadd.f32 %v2797_v60, %v13314_v27  ;;  %v3437_v19 = vld [vmem:[#allocation2 + $0xe8] sm:$0xff]  ;;  %v3440_v18 = vld [vmem:[#allocation2 + $0x110] sm:$0xff] }
 0x211   : > { %v11139_v52 = vpop.f32.mrf.mxu0  ;;  %v11943_v11 = vpop.eup %11942  ;;  %v3325_v24 = vsel %vm3197_vm9, %v13455_v34, %v9811_v48  ;;  %v9809_v40 = vadd.f32 -1.0, %v11941_v16  ;;  %11189 = vmatmul.mubr.msk.bf16.gmra.mxu0 %vm3338_vm3, %v13608_v39  ;;  %11954 = vpow2.f32 %v3264_v53  ;;  %v13636_v49 = vpack.c.bf16 %v3384_v46, %v3383_v38  ;;  %v3385_v12 = vld [vmem:[#allocation2 + $0xe7] sm:$0xff]  ;;  %v3388_v30 = vld [vmem:[#allocation2 + $0x10f] sm:$0xff] }
 0x212   : > { %3358 = vst.msk [vmem:[#allocation2 + $0x150] sm:$0xff] %vm3338_vm3, %v3325_v24  ;;  %v9814_v4 = vadd.f32 -1.0, %v11943_v11  ;;  %v3270_v36 = vmul.f32 1.442695, %v13604_v31  ;;  %v3438_v1 = vld [vmem:[#allocation2 + $0xf0] sm:$0xff]  ;;  %11956 = vpow2.f32 %v3260_v15  ;;  %v3135_v58 = vadd.f32 %v3092_v56, %v2837_v44  ;;  %v3439_v55 = vld [vmem:[#allocation2 + $0x108] sm:$0xff] }
 0x213   : > { %v3095_v26 = vpop.f32.mrf.mxu0  ;;  %v3323_v34 = vsel %vm3195_vm10, %v13465_v29, %v9809_v40  ;;  %v3386_v61 = vld [vmem:[#allocation2 + $0xef] sm:$0xff]  ;;  %v3138_v27 = vadd.f32 %v11139_v52, %v2840_v3  ;;  %v13639_v8 = vpack.c.bf16 %v3438_v1, %v3437_v19  ;;  %11192 = vmatprep.mubr.msk.bf16.mxu0 %vm3338_vm3, %v13636_v49  ;;  %vm3198_vm12 = vcmp.gt.f32.partialorder %v13529_v54, 0.0  ;;  %v3387_v48 = vld [vmem:[#allocation2 + $0x107] sm:$0xff] }
 0x214   : > { %3356 = vst.msk [vmem:[#allocation2 + $0x130] sm:$0xff] %vm3338_vm3, %v3323_v34  ;;  %v3328_v21 = vsel %vm3200_vm11, %v13477_v50, %v9814_v4  ;;  %11958 = vpow2.f32 %v3270_v36  ;;  %v3136_v29 = vadd.f32 %v3095_v26, %v2838_v2  ;;  %v11945_v57 = vpop.eup %11944  ;;  %v13644_v50 = vadd.f32 %v13177_v7, %v3135_v58  ;;  %v3443_v38 = vld [vmem:[#allocation2 + $0x148] sm:$0xff] }
 0x215   : > { %3361 = vst.msk [vmem:[#allocation2 + $0x188] sm:$0xff] %vm3338_vm3, %v3328_v21  ;;  %v13646_v41 = vpack.c.bf16 %v3386_v61, %v3385_v12  ;;  %v9812_v45 = vadd.f32 -1.0, %v11945_v57  ;;  %v13649_v0 = vadd.f32 %v13177_v7, %v3138_v27  ;;  %v13656_v56 = vpack.c.bf16 %v3440_v18, %v3439_v55  ;;  %v3391_v21 = vld [vmem:[#allocation2 + $0x147] sm:$0xff] }
 0x216   : > { %v13652_v43 = vadd.f32 %v13177_v7, %v3136_v29  ;;  %v3266_v28 = vmul.f32 1.442695, %v13644_v50  ;;  %v13662_v60 = vpack.c.bf16 %v3388_v30, %v3387_v48  ;;  %vm3201_vm13 = vcmp.gt.f32.partialorder %v13543_v37, 0.0  ;;  %v3441_v46 = vld [vmem:[#allocation2 + $0x128] sm:$0xff] }
 0x217   : > { %v11947_v42 = vpop.eup %11946  ;;  %v3326_v14 = vsel %vm3198_vm12, %v13529_v54, %v9812_v45  ;;  %v3272_v16 = vmul.f32 1.442695, %v13649_v0  ;;  %11157 = vmatmul.mubr.msk.bf16.gmra.mxu1 %vm3338_vm3, %v13639_v8  ;;  %vm3199_vm14 = vcmp.gt.f32.partialorder %v13549_v51, 0.0  ;;  %vm3204_vm15 = vcmp.gt.f32.partialorder %v13552_v13, 0.0  ;;  %v3389_v15 = vld [vmem:[#allocation2 + $0x127] sm:$0xff] }
 0x218   : > { %v11949_v7 = vpop.eup %11948  ;;  %3359 = vst.msk [vmem:[#allocation2 + $0x168] sm:$0xff] %vm3338_vm3, %v3326_v14  ;;  %v9815_v5 = vadd.f32 -1.0, %v11947_v42  ;;  %11960 = vpow2.f32 %v3266_v28  ;;  %v3268_v52 = vmul.f32 1.442695, %v13652_v43  ;;  %11160 = vmatprep.mubr.msk.bf16.mxu1 %vm3338_vm3, %v13656_v56  ;;  %vm3202_vm1 = vcmp.gt.f32.partialorder %v13592_v9, 0.0 }
 0x219   : > { %11193 = vmatmul.mubr.msk.bf16.gmra.mxu0 %vm3338_vm3, %v13646_v41  ;;  %v11951_v54 = vpop.eup %11950  ;;  %v9813_v11 = vadd.f32 -1.0, %v11949_v7  ;;  %11962 = vpow2.f32 %v3272_v16  ;;  %v3444_v26 = vld [vmem:[#allocation2 + $0x150] sm:$0xff]  ;;  %vm3205_vm4 = vcmp.gt.f32.partialorder %v13598_v6, 0.0  ;;  %vm3203_vm5 = vcmp.gt.f32.partialorder %v13601_v47, 0.0 }
 0x21a   : > { %11196 = vmatprep.mubr.msk.bf16.mxu0 %vm3338_vm3, %v13662_v60  ;;  %v3329_v44 = vsel %vm3201_vm13, %v13543_v37, %v9815_v5  ;;  %v9818_v53 = vadd.f32 -1.0, %v11951_v54  ;;  %11964 = vpow2.f32 %v3268_v52  ;;  %v3392_v2 = vld [vmem:[#allocation2 + $0x14f] sm:$0xff]  ;;  %vm3208_vm6 = vcmp.gt.f32.partialorder %v13604_v31, 0.0 }
 0x21b   : > { %v3442_v24 = vld [vmem:[#allocation2 + $0x130] sm:$0xff]  ;;  %3362 = vst.msk [vmem:[#allocation2 + $0x190] sm:$0xff] %vm3338_vm3, %v3329_v44  ;;  %v3327_v4 = vsel %vm3199_vm14, %v13549_v51, %v9813_v11  ;;  %v13685_v51 = vpack.c.bf16 %v3444_v26, %v3443_v38  ;;  %vm3206_vm7 = vcmp.gt.f32.partialorder %v13644_v50, 0.0  ;;  %vm3209_vm8 = vcmp.gt.f32.partialorder %v13649_v0, 0.0 }
 0x21c   : > { %v3390_v40 = vld [vmem:[#allocation2 + $0x12f] sm:$0xff]  ;;  %v13678_v3 = vpack.c.bf16 %v3442_v24, %v3441_v46  ;;  %3360 = vst.msk [vmem:[#allocation2 + $0x170] sm:$0xff] %vm3338_vm3, %v3327_v4  ;;  %v3332_v34 = vsel %vm3204_vm15, %v13552_v13, %v9818_v53  ;;  %v13690_v13 = vpack.c.bf16 %v3392_v2, %v3391_v21  ;;  %v3395_v11 = vld [vmem:[#allocation2 + $0x187] sm:$0xff]  ;;  %vm3207_vm9 = vcmp.gt.f32.partialorder %v13652_v43, 0.0 }
 0x21d   : > { %v13682_v37 = vpack.c.bf16 %v3390_v40, %v3389_v15  ;;  %v11953_v36 = vpop.eup %11952  ;;  %3365 = vst.msk [vmem:[#allocation2 + $0x1c8] sm:$0xff] %vm3338_vm3, %v3332_v34 }
 0x21e   : > { %v11955_v1 = vpop.eup %11954  ;;  %v9816_v61 = vadd.f32 -1.0, %v11953_v36 }
 0x21f   : > { %v11957_v58 = vpop.eup %11956  ;;  %v9819_v19 = vadd.f32 -1.0, %v11955_v1  ;;  %11161 = vmatmul.mubr.msk.bf16.gmra.mxu1 %vm3338_vm3, %v13678_v3  ;;  %v3445_v30 = vld [vmem:[#allocation2 + $0x168] sm:$0xff] }
 0x220   : > { %v3330_v29 = vsel %vm3202_vm1, %v13592_v9, %v9816_v61  ;;  %v9817_v12 = vadd.f32 -1.0, %v11957_v58  ;;  %11164 = vmatprep.mubr.msk.bf16.mxu1 %vm3338_vm3, %v13685_v51  ;;  %v3393_v45 = vld [vmem:[#allocation2 + $0x167] sm:$0xff] }
 0x221   : > { %v11959_v27 = vpop.eup %11958  ;;  %11197 = vmatmul.mubr.msk.bf16.gmra.mxu0 %vm3338_vm3, %v13682_v37  ;;  %3363 = vst.msk [vmem:[#allocation2 + $0x1a8] sm:$0xff] %vm3338_vm3, %v3330_v29  ;;  %v3333_v18 = vsel %vm3205_vm4, %v13598_v6, %v9819_v19  ;;  %v3918_v58 = vld [vmem:[#allocation2 + $0x9] sm:$0xff]  ;;  %v3919_v19 = vld [vmem:[#allocation2 + $0x11] sm:$0xff] }
 0x222   : > { %v9822_v57 = vadd.f32 -1.0, %v11959_v27  ;;  %11200 = vmatprep.mubr.msk.bf16.mxu0 %vm3338_vm3, %v13690_v13  ;;  %3366 = vst.msk [vmem:[#allocation2 + $0x1d0] sm:$0xff] %vm3338_vm3, %v3333_v18  ;;  %v3331_v9 = vsel %vm3203_vm5, %v13601_v47, %v9817_v12  ;;  %v3448_v48 = vld [vmem:[#allocation2 + $0x190] sm:$0xff]  ;;  %v3447_v47 = vld [vmem:[#allocation2 + $0x188] sm:$0xff] }
 0x223   : > { %3364 = vst.msk [vmem:[#allocation2 + $0x1b0] sm:$0xff] %vm3338_vm3, %v3331_v9  ;;  %v3446_v28 = vld [vmem:[#allocation2 + $0x170] sm:$0xff]  ;;  %v13713_v54 = vpack.c.bf16 %v3448_v48, %v3447_v47 }
 0x224   : > { %v3336_v55 = vsel %vm3208_vm6, %v13604_v31, %v9822_v57  ;;  %v3394_v6 = vld [vmem:[#allocation2 + $0x16f] sm:$0xff]  ;;  %v13709_v42 = vpack.c.bf16 %v3446_v28, %v3445_v30  ;;  %v3399_v21 = vld [vmem:[#allocation2 + $0x1c7] sm:$0xff]  ;;  %v3950_v30 = vpack.c.bf16 %v3919_v19, %v3918_v58 }
 0x225   : > { %3369 = vst.msk [vmem:[#allocation2 + $0x208] sm:$0xff] %vm3338_vm3, %v3336_v55  ;;  %v13711_v14 = vpack.c.bf16 %v3394_v6, %v3393_v45  ;;  %v3396_v16 = vld [vmem:[#allocation2 + $0x18f] sm:$0xff]  ;;  %v11961_v7 = vpop.eup %11960 }
 0x226   : > { %v11963_v5 = vpop.eup %11962  ;;  %v9820_v52 = vadd.f32 -1.0, %v11961_v7  ;;  %v13718_v40 = vpack.c.bf16 %v3396_v16, %v3395_v11  ;;  %v3451_v1 = vld [vmem:[#allocation2 + $0x1c8] sm:$0xff]  ;;  %v3921_v55 = vld [vmem:[#allocation2 + $0x31] sm:$0xff]  ;;  %v11857_v7 = vld [vmem:[%s15876_s5 + $0x40] sm:$0xff]  }
 0x227   : > { %v11965_v24 = vpop.eup %11964  ;;  %v9823_v31 = vadd.f32 -1.0, %v11963_v5  ;;  %11165 = vmatmul.mubr.msk.bf16.gmra.mxu1 %vm3338_vm3, %v13709_v42  ;;  %v3920_v45 = vld [vmem:[#allocation2 + $0x29] sm:$0xff]  ;;  %v3923_v6 = vld [vmem:[#allocation2 + $0x51] sm:$0xff] }
 0x228   : > { %v3334_v44 = vsel %vm3206_vm7, %v13644_v50, %v9820_v52  ;;  %v9821_v53 = vadd.f32 -1.0, %v11965_v24  ;;  %11168 = vmatprep.mubr.msk.bf16.mxu1 %vm3338_vm3, %v13713_v54  ;;  %v3449_v4 = vld [vmem:[#allocation2 + $0x1a8] sm:$0xff]  ;;  %v13761_v48 = vpack.c.bf16 %v3921_v55, %v3920_v45  ;;  %v11859_v47 = vld [vmem:[%s15876_s5 + $0x50] sm:$0xff]   ;;  %v13789_v24 = vld [vmem:[%s15876_s5 + $0x78] sm:$0xff]  }
 0x229   : > { %11201 = vmatmul.mubr.msk.bf16.gmra.mxu0 %vm3338_vm3, %v13711_v14  ;;  %3367 = vst.msk [vmem:[#allocation2 + $0x1e8] sm:$0xff] %vm3338_vm3, %v3334_v44  ;;  %v3337_v46 = vsel %vm3209_vm8, %v13649_v0, %v9823_v31  ;;  %v3397_v2 = vld [vmem:[#allocation2 + $0x1a7] sm:$0xff]  ;;  %v3452_v36 = vld [vmem:[#allocation2 + $0x1d0] sm:$0xff] }
 0x22a   : > { %11204 = vmatprep.mubr.msk.bf16.mxu0 %vm3338_vm3, %v13718_v40  ;;  %3370 = vst.msk [vmem:[#allocation2 + $0x210] sm:$0xff] %vm3338_vm3, %v3337_v46  ;;  %v3335_v50 = vsel %vm3207_vm9, %v13652_v43, %v9821_v53  ;;  %v3450_v15 = vld [vmem:[#allocation2 + $0x1b0] sm:$0xff]  ;;  %v13738_v61 = vpack.c.bf16 %v3452_v36, %v3451_v1  ;;  %v13784_v52 = vld [vmem:[%s15876_s5 + $0x68] sm:$0xff]  }
 0x22b   : > { %v3398_v26 = vld [vmem:[#allocation2 + $0x1af] sm:$0xff]  ;;  %3368 = vst.msk [vmem:[#allocation2 + $0x1f0] sm:$0xff] %vm3338_vm3, %v3335_v50  ;;  %v13734_v34 = vpack.c.bf16 %v3450_v15, %v3449_v4 }
 0x22c   : > { %v13736_v38 = vpack.c.bf16 %v3398_v26, %v3397_v2  ;;  %v3400_v0 = vld [vmem:[#allocation2 + $0x1cf] sm:$0xff] }
 0x22d   : > { %v13742_v43 = vpack.c.bf16 %v3400_v0, %v3399_v21  ;;  %v3922_v28 = vld [vmem:[#allocation2 + $0x49] sm:$0xff]  ;;  %v3925_v5 = vld [vmem:[#allocation2 + $0x71] sm:$0xff] }
 0x22e   : > { %v13763_v16 = vpack.c.bf16 %v3923_v6, %v3922_v28  ;;  %v3926_v11 = vld [vmem:[#allocation2 + $0x89] sm:$0xff]  ;;  %v3929_v44 = vld [vmem:[#allocation2 + $0xb1] sm:$0xff] }
 0x22f   : > { %11169 = vmatmul.mubr.msk.bf16.gmra.mxu1 %vm3338_vm3, %v13734_v34  ;;  %v3930_v53 = vld [vmem:[#allocation2 + $0xc9] sm:$0xff]  ;;  %v3931_v46 = vld [vmem:[#allocation2 + $0xd1] sm:$0xff] }
 0x230   : > { %11172 = vmatprep.mubr.msk.bf16.mxu1 %vm3338_vm3, %v13738_v61  ;;  %v3453_v27 = vld [vmem:[#allocation2 + $0x1e8] sm:$0xff]  ;;  %v13807_v4 = vpack.c.bf16 %v3931_v46, %v3930_v53  ;;  %v3933_v26 = vld [vmem:[#allocation2 + $0xf1] sm:$0xff] }
 0x231   : > { %11205 = vmatmul.mubr.msk.bf16.gmra.mxu0 %vm3338_vm3, %v13736_v38  ;;  %v3401_v57 = vld [vmem:[#allocation2 + $0x1e7] sm:$0xff]  ;;  %v3935_v36 = vld [vmem:[#allocation2 + $0x111] sm:$0xff] }
 0x232   : > { %11208 = vmatprep.mubr.msk.bf16.mxu0 %vm3338_vm3, %v13742_v43  ;;  %v3454_v29 = vld [vmem:[#allocation2 + $0x1f0] sm:$0xff] }
 0x233   : > { %v3402_v12 = vld [vmem:[#allocation2 + $0x1ef] sm:$0xff]  ;;  %v13750_v18 = vpack.c.bf16 %v3454_v29, %v3453_v27 }
 0x234   : > { %v13752_v9 = vpack.c.bf16 %v3402_v12, %v3401_v57  ;;  %v3932_v15 = vld [vmem:[#allocation2 + $0xe9] sm:$0xff]  ;;  %v3937_v58 = vld [vmem:[#allocation2 + $0x131] sm:$0xff] }
 0x235   : > { %v3934_v2 = vld [vmem:[#allocation2 + $0x109] sm:$0xff]  ;;  %v13817_v0 = vpack.c.bf16 %v3933_v26, %v3932_v15  ;;  %v3939_v27 = vld [vmem:[#allocation2 + $0x151] sm:$0xff] }
 0x236   : > { %v13819_v1 = vpack.c.bf16 %v3935_v36, %v3934_v2  ;;  %v3936_v21 = vld [vmem:[#allocation2 + $0x129] sm:$0xff]  ;;  %v3943_v55 = vld [vmem:[#allocation2 + $0x191] sm:$0xff]  ;;  %v11861_v2 = vld [vmem:[%s15876_s5 + $0x60] sm:$0xff]  }
 0x237   : > { %11173 = vmatmul.mubr.msk.bf16.gmra.mxu1 %vm3338_vm3, %v13750_v18  ;;  %v3938_v19 = vld [vmem:[#allocation2 + $0x149] sm:$0xff]  ;;  %v3959_v29 = vpack.c.bf16 %v3937_v58, %v3936_v21 }
 0x238   : > { %11216 = vmatprep.mubr.msk.bf16.mxu1 %vm3338_vm3, %v3950_v30  ;;  %v3960_v12 = vpack.c.bf16 %v3939_v27, %v3938_v19  ;;  %v3940_v57 = vld [vmem:[#allocation2 + $0x169] sm:$0xff]  ;;  %v3941_v30 = vld [vmem:[#allocation2 + $0x171] sm:$0xff] }
 0x239   : > { %11209 = vmatmul.mubr.msk.bf16.gmra.mxu0 %vm3338_vm3, %v13752_v9  ;;  %v3942_v45 = vld [vmem:[#allocation2 + $0x189] sm:$0xff]  ;;  %v3961_v28 = vpack.c.bf16 %v3941_v30, %v3940_v57 }
 0x23a   : > { %11252 = vmatprep.mubr.msk.bf16.mxu0 %vm3338_vm3, %v13479_v59  ;;  %v3924_v59 = vld [vmem:[#allocation2 + $0x69] sm:$0xff]  ;;  %v3962_v6 = vpack.c.bf16 %v3943_v55, %v3942_v45 }
 0x23b   : > { %v13791_v31 = vpack.c.bf16 %v3925_v5, %v3924_v59  ;;  %v3946_v59 = vld [vmem:[#allocation2 + $0x1c9] sm:$0xff]  ;;  %v3947_v5 = vld [vmem:[#allocation2 + $0x1d1] sm:$0xff] }
 0x23c   : > { %v4255_v53 = vld [vmem:[#allocation2 + $0x20f] sm:$0xff]  ;;  %v4254_v15 = vld [vmem:[#allocation2 + $0x207] sm:$0xff] }
 0x23d   : > { %v13847_v26 = vpack.c.bf16 %v4255_v53, %v4254_v15  ;;  %v11863_v36 = vld [vmem:[%s15876_s5 + $0x70] sm:$0xff]   ;;  %v5448_v19 = vld [vmem:[#allocation2 + $0x48] sm:$0xff] }
 0x23f   : > { %11217 = vmatmul.mubr.msk.bf16.vlgmr.msra.gmra.mxu1 %vm3338_vm3, %v13761_v48 }
 0x240   : > { %11220 = vmatprep.mubr.msk.bf16.mxu1 %vm3338_vm3, %v13763_v16  ;;  %11285 = vmatpush3.bf16.msra.mxu1 %v13507_v17 }
 0x241   : > { %11253 = vmatmul.mubr.msk.bf16.vlgmr.msra.gmra.mxu0 %vm3338_vm3, %v13501_v63  ;;  %11286 = vmatprep.subr.bf16.mxu1 %v11857_v7  ;;  %v3927_v63 = vld [vmem:[#allocation2 + $0x91] sm:$0xff] }
 0x242   : > { %11256 = vmatprep.mubr.msk.bf16.mxu0 %vm3338_vm3, %v13554_v62  ;;  %11321 = vmatpush3.bf16.msra.mxu0 %v13522_v10  ;;  %v13793_v17 = vpack.c.bf16 %v3927_v63, %v3926_v11  ;;  %v3928_v10 = vld [vmem:[#allocation2 + $0xa9] sm:$0xff]  ;;  %v3964_v63 = vpack.c.bf16 %v3947_v5, %v3946_v59 }
 0x243   : > { %11322 = vmatprep.subr.bf16.mxu0 %v11859_v47  ;;  %v13805_v50 = vpack.c.bf16 %v3929_v44, %v3928_v10  ;;  %v3948_v10 = vld [vmem:[#allocation2 + $0x1e9] sm:$0xff]  ;;  %v3949_v44 = vld [vmem:[#allocation2 + $0x1f1] sm:$0xff] }
 0x244   : > { %11287 = vmatpush3.bf16.msra.mxu1 %v11857_v7  ;;  %v3944_v7 = vld [vmem:[#allocation2 + $0x1a9] sm:$0xff]  ;;  %v3965_v46 = vpack.c.bf16 %v3949_v44, %v3948_v10 }
 0x245   : > { %11356 = vmatprep.subr.bf16.mxu1 %v13784_v52 }
 0x246   : > { %11323 = vmatpush3.bf16.msra.mxu0 %v11859_v47  ;;  %v3945_v47 = vld [vmem:[#allocation2 + $0x1b1] sm:$0xff] }
 0x247   : > { %11221 = vmatmul.mubr.msk.bf16.gmra.mxu1 %vm3338_vm3, %v13791_v31  ;;  %11392 = vmatprep.subr.bf16.mxu0 %v13789_v24  ;;  %v3963_v11 = vpack.c.bf16 %v3945_v47, %v3944_v7 }
 0x248   : > { %11224 = vmatprep.mubr.msk.bf16.mxu1 %vm3338_vm3, %v13793_v17 }
 0x249   : > { %11257 = vmatmul.mubr.msk.bf16.gmra.mxu0 %vm3338_vm3, %v13578_v22 }
 0x24a   : > { %11260 = vmatprep.mubr.msk.bf16.mxu0 %vm3338_vm3, %v13608_v39 }
 0x24f   : > { %11225 = vmatmul.mubr.msk.bf16.gmra.mxu1 %vm3338_vm3, %v13805_v50 }
 0x250   : > { %11228 = vmatprep.mubr.msk.bf16.mxu1 %vm3338_vm3, %v13807_v4 }
 0x251   : > { %11261 = vmatmul.mubr.msk.bf16.gmra.mxu0 %vm3338_vm3, %v13636_v49 }
 0x252   : > { %11264 = vmatprep.mubr.msk.bf16.mxu0 %vm3338_vm3, %v13646_v41 }
 0x257   : > { %11229 = vmatmul.mubr.msk.bf16.gmra.mxu1 %vm3338_vm3, %v13817_v0 }
 0x258   : > { %11232 = vmatprep.mubr.msk.bf16.mxu1 %vm3338_vm3, %v13819_v1 }
 0x259   : > { %11265 = vmatmul.mubr.msk.bf16.gmra.mxu0 %vm3338_vm3, %v13662_v60 }
 0x25a   : > { %11268 = vmatprep.mubr.msk.bf16.mxu0 %vm3338_vm3, %v13682_v37 }
 0x25f   : > { %11233 = vmatmul.mubr.msk.bf16.gmra.mxu1 %vm3338_vm3, %v3959_v29 }
 0x260   : > { %11236 = vmatprep.mubr.msk.bf16.mxu1 %vm3338_vm3, %v3960_v12 }
 0x261   : > { %11269 = vmatmul.mubr.msk.bf16.gmra.mxu0 %vm3338_vm3, %v13690_v13 }
 0x262   : > { %11272 = vmatprep.mubr.msk.bf16.mxu0 %vm3338_vm3, %v13711_v14 }
 0x267   : > { %11237 = vmatmul.mubr.msk.bf16.gmra.mxu1 %vm3338_vm3, %v3961_v28 }
 0x268   : > { %11240 = vmatprep.mubr.msk.bf16.mxu1 %vm3338_vm3, %v3962_v6 }
 0x269   : > { %11273 = vmatmul.mubr.msk.bf16.gmra.mxu0 %vm3338_vm3, %v13718_v40 }
 0x26a   : > { %11276 = vmatprep.mubr.msk.bf16.mxu0 %vm3338_vm3, %v13736_v38 }
 0x26f   : > { %11241 = vmatmul.mubr.msk.bf16.gmra.mxu1 %vm3338_vm3, %v3963_v11 }
 0x270   : > { %11244 = vmatprep.mubr.msk.bf16.mxu1 %vm3338_vm3, %v3964_v63 }
 0x271   : > { %11277 = vmatmul.mubr.msk.bf16.gmra.mxu0 %vm3338_vm3, %v13742_v43 }
 0x272   : > { %11280 = vmatprep.mubr.msk.bf16.mxu0 %vm3338_vm3, %v13752_v9 }
 0x277   : > { %11245 = vmatmul.mubr.msk.bf16.gmra.mxu1 %vm3338_vm3, %v3965_v46 }
 0x278   : > { %11288 = vmatprep.mubr.msk.bf16.mxu1 %vm3338_vm3, %v13467_v33  ;;  %v11864_v33 = vld [vmem:[%s15876_s5 + $0x88] sm:$0xff]  }
 0x279   : > { %11281 = vmatmul.mubr.msk.bf16.gmra.mxu0 %vm3338_vm3, %v13847_v26 }
 0x27a   : > { %11324 = vmatprep.mubr.msk.bf16.mxu0 %vm3338_vm3, %v13761_v48  ;;  %v4866_v48 = vld [vmem:[#allocation2 + $0x209] sm:$0xff] }
 0x27f   : > { %11289 = vmatmul.mubr.msk.bf16.vlgmr.msra.gmra.mxu1 %vm3338_vm3, %v13494_v32  ;;  %v4561_v32 = vld [vmem:[#allocation2 + $0x210] sm:$0xff] }
 0x280   : > { %11292 = vmatprep.mubr.msk.bf16.mxu1 %vm3338_vm3, %v13537_v35  ;;  %11357 = vmatpush3.bf16.msra.mxu1 %v13784_v52  ;;  %v4867_v52 = vld [vmem:[#allocation2 + $0x211] sm:$0xff] }
 0x281   : > { %11325 = vmatmul.mubr.msk.bf16.vlgmr.msra.gmra.mxu0 %vm3338_vm3, %v13763_v16  ;;  %11358 = vmatprep.subr.bf16.mxu1 %v11861_v2  ;;  %v13918_v21 = vpack.c.bf16 %v4867_v52, %v4866_v48 }
 0x282   : > { %11328 = vmatprep.mubr.msk.bf16.mxu0 %vm3338_vm3, %v13791_v31  ;;  %11393 = vmatpush3.bf16.msra.mxu0 %v13789_v24  ;;  %v5143_v24 = vld [vmem:[#allocation2 + $0x4f] sm:$0xff] }
 0x283   : > { %11394 = vmatprep.subr.bf16.mxu0 %v11863_v36 }
 0x284   : > { %11359 = vmatpush3.bf16.msra.mxu1 %v11861_v2 }
 0x285   : > { %11428 = vmatprep.subr.bf16.mxu1 %v11864_v33 }
 0x286   : > { %11395 = vmatpush3.bf16.msra.mxu0 %v11863_v36 }
 0x287   : > { %11293 = vmatmul.mubr.msk.bf16.gmra.mxu1 %vm3338_vm3, %v13556_v25 }
 0x288   : > { %11296 = vmatprep.mubr.msk.bf16.mxu1 %vm3338_vm3, %v13594_v23 }
 0x289   : > { %11329 = vmatmul.mubr.msk.bf16.gmra.mxu0 %vm3338_vm3, %v13793_v17 }
 0x28a   : > { %11332 = vmatprep.mubr.msk.bf16.mxu0 %vm3338_vm3, %v13805_v50  ;;  %v4560_v50 = vld [vmem:[#allocation2 + $0x208] sm:$0xff] }
 0x28f   : > { %11297 = vmatmul.mubr.msk.bf16.gmra.mxu1 %vm3338_vm3, %v13610_v20 }
 0x290   : > { %11300 = vmatprep.mubr.msk.bf16.mxu1 %vm3338_vm3, %v13639_v8 }
 0x291   : > { %11333 = vmatmul.mubr.msk.bf16.gmra.mxu0 %vm3338_vm3, %v13807_v4  ;;  %v5449_v4 = vld [vmem:[#allocation2 + $0x50] sm:$0xff] }
 0x292   : > { %11336 = vmatprep.mubr.msk.bf16.mxu0 %vm3338_vm3, %v13817_v0  ;;  %v13916_v0 = vpack.c.bf16 %v4561_v32, %v4560_v50  ;;  %v5480_v27 = vpack.c.bf16 %v5449_v4, %v5448_v19 }
 0x297   : > { %11301 = vmatmul.mubr.msk.bf16.gmra.mxu1 %vm3338_vm3, %v13656_v56 }
 0x298   : > { %11304 = vmatprep.mubr.msk.bf16.mxu1 %vm3338_vm3, %v13678_v3 }
 0x299   : > { %11337 = vmatmul.mubr.msk.bf16.gmra.mxu0 %vm3338_vm3, %v13819_v1  ;;  %v5142_v1 = vld [vmem:[#allocation2 + $0x47] sm:$0xff] }
 0x29a   : > { %11340 = vmatprep.mubr.msk.bf16.mxu0 %vm3338_vm3, %v3959_v29  ;;  %v5174_v58 = vpack.c.bf16 %v5143_v24, %v5142_v1  ;;  %v11865_v29 = vld [vmem:[%s15876_s5 + $0x80] sm:$0xff]  }
 0x29f   : > { %11305 = vmatmul.mubr.msk.bf16.gmra.mxu1 %vm3338_vm3, %v13685_v51 }
 0x2a0   : > { %11308 = vmatprep.mubr.msk.bf16.mxu1 %vm3338_vm3, %v13709_v42 }
 0x2a1   : > { %11341 = vmatmul.mubr.msk.bf16.gmra.mxu0 %vm3338_vm3, %v3960_v12 }
 0x2a2   : > { %11344 = vmatprep.mubr.msk.bf16.mxu0 %vm3338_vm3, %v3961_v28 }
 0x2a7   : > { %11309 = vmatmul.mubr.msk.bf16.gmra.mxu1 %vm3338_vm3, %v13713_v54 }
 0x2a8   : > { %11312 = vmatprep.mubr.msk.bf16.mxu1 %vm3338_vm3, %v13734_v34 }
 0x2a9   : > { %11345 = vmatmul.mubr.msk.bf16.gmra.mxu0 %vm3338_vm3, %v3962_v6 }
 0x2aa   : > { %11348 = vmatprep.mubr.msk.bf16.mxu0 %vm3338_vm3, %v3963_v11 }
 0x2af   : > { %11313 = vmatmul.mubr.msk.bf16.gmra.mxu1 %vm3338_vm3, %v13738_v61 }
 0x2b0   : > { %11316 = vmatprep.mubr.msk.bf16.mxu1 %vm3338_vm3, %v13750_v18 }
 0x2b1   : > { %11349 = vmatmul.mubr.msk.bf16.gmra.mxu0 %vm3338_vm3, %v3964_v63 }
 0x2b2   : > { %11352 = vmatprep.mubr.msk.bf16.mxu0 %vm3338_vm3, %v3965_v46 }
 0x2b7   : > { %11317 = vmatmul.mubr.msk.bf16.gmra.mxu1 %vm3338_vm3, %v13916_v0 }
 0x2b8   : > { %11360 = vmatprep.mubr.msk.bf16.mxu1 %vm3338_vm3, %v5174_v58 }
 0x2b9   : > { %11353 = vmatmul.mubr.msk.bf16.gmra.mxu0 %vm3338_vm3, %v13918_v21 }
 0x2ba   : > { %11396 = vmatprep.mubr.msk.bf16.mxu0 %vm3338_vm3, %v5480_v27 }
 0x2bf   : > { %v11146_v12 = vpop.f32.mrf.mxu1  ;;  %11361 = vmatmul.mubr.msk.bf16.vlgmr.msra.gmra.mxu1 %vm3338_vm3, %v13554_v62  ;;  %v11182_v57 = vpop.f32.mrf.mxu0 }
 0x2c0   : > { %11364 = vmatprep.mubr.msk.bf16.mxu1 %vm3338_vm3, %v13578_v22  ;;  %v13935_v30 = vadd.f32 %v11182_v57, %v11146_v12  ;;  %11429 = vmatpush3.bf16.msra.mxu1 %v11864_v33 }
 0x2c1   : > { %11397 = vmatmul.mubr.msk.bf16.vlgmr.msra.gmra.mxu0 %vm3338_vm3, %v13537_v35  ;;  %v3570_v45 = vpop.f32.mrf.mxu1  ;;  %v3791_v55 = vpop.f32.mrf.mxu0  ;;  %11430 = vmatprep.subr.bf16.mxu1 %v11865_v29 }
 0x2c2   : > { %11400 = vmatprep.mubr.msk.bf16.mxu0 %vm3338_vm3, %v13556_v25  ;;  %v13939_v28 = vadd.f32 %v3791_v55, %v3570_v45 }
 0x2c3   : > { %v11147_v6 = vpop.f32.mrf.mxu1  ;;  %v11183_v62 = vpop.f32.mrf.mxu0 }
 0x2c4   : > { %v13941_v7 = vadd.f32 %v11183_v62, %v11147_v6  ;;  %11431 = vmatpush3.bf16.msra.mxu1 %v11865_v29 }
 0x2c5   : > { %v3573_v47 = vpop.f32.mrf.mxu1  ;;  %v3794_v35 = vpop.f32.mrf.mxu0 }
 0x2c6   : > { %v13943_v59 = vadd.f32 %v3794_v35, %v3573_v47 }
 0x2c7   : > { %v11150_v22 = vpop.f32.mrf.mxu1  ;;  %11365 = vmatmul.mubr.msk.bf16.gmra.mxu1 %vm3338_vm3, %v13608_v39 }
 0x2c8   : > { %v11186_v25 = vpop.f32.mrf.mxu0  ;;  %11368 = vmatprep.mubr.msk.bf16.mxu1 %vm3338_vm3, %v13636_v49 }
 0x2c9   : > { %11401 = vmatmul.mubr.msk.bf16.gmra.mxu0 %vm3338_vm3, %v13594_v23  ;;  %v13951_v5 = vadd.f32 %v11186_v25, %v11150_v22  ;;  %v3586_v11 = vpop.f32.mrf.mxu1 }
 0x2ca   : > { %11404 = vmatprep.mubr.msk.bf16.mxu0 %vm3338_vm3, %v13610_v20  ;;  %v3807_v63 = vpop.f32.mrf.mxu0 }
 0x2cb   : > { %v13955_v10 = vadd.f32 %v3807_v63, %v3586_v11  ;;  %v11151_v44 = vpop.f32.mrf.mxu1 }
 0x2cc   : > { %v11187_v53 = vpop.f32.mrf.mxu0 }
 0x2cd   : > { %v13957_v46 = vadd.f32 %v11187_v53, %v11151_v44  ;;  %v3589_v39 = vpop.f32.mrf.mxu1 }
 0x2ce   : > { %v3810_v15 = vpop.f32.mrf.mxu0 }
 0x2cf   : > { %v13959_v2 = vadd.f32 %v3810_v15, %v3589_v39  ;;  %v11154_v23 = vpop.f32.mrf.mxu1  ;;  %11369 = vmatmul.mubr.msk.bf16.gmra.mxu1 %vm3338_vm3, %v13646_v41 }
 0x2d0   : > { %11372 = vmatprep.mubr.msk.bf16.mxu1 %vm3338_vm3, %v13662_v60 }
 0x2d1   : > { %v11190_v49 = vpop.f32.mrf.mxu0  ;;  %11405 = vmatmul.mubr.msk.bf16.gmra.mxu0 %vm3338_vm3, %v13639_v8  ;;  %v3602_v36 = vpop.f32.mrf.mxu1 }
 0x2d2   : > { %v13967_v20 = vadd.f32 %v11190_v49, %v11154_v23  ;;  %11408 = vmatprep.mubr.msk.bf16.mxu0 %vm3338_vm3, %v13656_v56  ;;  %v5173_v49 = vld [vmem:[#allocation2 + $0x22f] sm:$0xff] }
 0x2d3   : > { %v3823_v33 = vpop.f32.mrf.mxu0  ;;  %v11155_v48 = vpop.f32.mrf.mxu1 }
 0x2d4   : > { %v13971_v32 = vadd.f32 %v3823_v33, %v3602_v36 }
 0x2d5   : > { %v11191_v52 = vpop.f32.mrf.mxu0  ;;  %v3605_v41 = vpop.f32.mrf.mxu1 }
 0x2d6   : > { %v13973_v24 = vadd.f32 %v11191_v52, %v11155_v48  ;;  %v5478_v48 = vld [vmem:[#allocation2 + $0x228] sm:$0xff]  ;;  %v5479_v52 = vld [vmem:[#allocation2 + $0x230] sm:$0xff] }
 0x2d7   : > { %v3826_v50 = vpop.f32.mrf.mxu0  ;;  %v11158_v8 = vpop.f32.mrf.mxu1  ;;  %11373 = vmatmul.mubr.msk.bf16.gmra.mxu1 %vm3338_vm3, %v13682_v37 }
 0x2d8   : > { %v13975_v4 = vadd.f32 %v3826_v50, %v3605_v41  ;;  %11376 = vmatprep.mubr.msk.bf16.mxu1 %vm3338_vm3, %v13690_v13 }
 0x2d9   : > { %v11194_v60 = vpop.f32.mrf.mxu0  ;;  %11409 = vmatmul.mubr.msk.bf16.gmra.mxu0 %vm3338_vm3, %v13678_v3  ;;  %v3618_v1 = vpop.f32.mrf.mxu1 }
 0x2da   : > { %v13983_v56 = vadd.f32 %v11194_v60, %v11158_v8  ;;  %11412 = vmatprep.mubr.msk.bf16.mxu0 %vm3338_vm3, %v13685_v51 }
 0x2db   : > { %v3839_v58 = vpop.f32.mrf.mxu0  ;;  %v11159_v27 = vpop.f32.mrf.mxu1 }
 0x2dc   : > { %v13987_v19 = vadd.f32 %v3839_v58, %v3618_v1 }
 0x2dd   : > { %v11195_v29 = vpop.f32.mrf.mxu0  ;;  %v3621_v37 = vpop.f32.mrf.mxu1 }
 0x2de   : > { %v13989_v12 = vadd.f32 %v11195_v29, %v11159_v27 }
 0x2df   : > { %v3842_v57 = vpop.f32.mrf.mxu0  ;;  %v11162_v3 = vpop.f32.mrf.mxu1  ;;  %11377 = vmatmul.mubr.msk.bf16.gmra.mxu1 %vm3338_vm3, %v13711_v14 }
 0x2e0   : > { %v13991_v45 = vadd.f32 %v3842_v57, %v3621_v37  ;;  %11380 = vmatprep.mubr.msk.bf16.mxu1 %vm3338_vm3, %v13718_v40 }
 0x2e1   : > { %v11198_v13 = vpop.f32.mrf.mxu0  ;;  %11413 = vmatmul.mubr.msk.bf16.gmra.mxu0 %vm3338_vm3, %v13709_v42  ;;  %v3634_v55 = vpop.f32.mrf.mxu1 }
 0x2e2   : > { %v13999_v51 = vadd.f32 %v11198_v13, %v11162_v3  ;;  %11416 = vmatprep.mubr.msk.bf16.mxu0 %vm3338_vm3, %v13713_v54 }
 0x2e3   : > { %v3855_v6 = vpop.f32.mrf.mxu0  ;;  %v11163_v47 = vpop.f32.mrf.mxu1 }
 0x2e4   : > { %v14003_v62 = vadd.f32 %v3855_v6, %v3634_v55 }
 0x2e5   : > { %v11199_v35 = vpop.f32.mrf.mxu0  ;;  %v14007_v14 = vpop.f32.mrf.mxu1 }
 0x2e6   : > { %v14005_v22 = vadd.f32 %v11199_v35, %v11163_v47 }
 0x2e7   : > { %v14009_v25 = vpop.f32.mrf.mxu0  ;;  %v11166_v42 = vpop.f32.mrf.mxu1  ;;  %11381 = vmatmul.mubr.msk.bf16.gmra.mxu1 %vm3338_vm3, %v13736_v38 }
 0x2e8   : > { %11384 = vmatprep.mubr.msk.bf16.mxu1 %vm3338_vm3, %v13742_v43 }
 0x2e9   : > { %v11202_v40 = vpop.f32.mrf.mxu0  ;;  %11417 = vmatmul.mubr.msk.bf16.gmra.mxu0 %vm3338_vm3, %v13734_v34  ;;  %v3650_v11 = vpop.f32.mrf.mxu1 }
 0x2ea   : > { %v14017_v54 = vadd.f32 %v11202_v40, %v11166_v42  ;;  %11420 = vmatprep.mubr.msk.bf16.mxu0 %vm3338_vm3, %v13738_v61  ;;  %v5172_v61 = vld [vmem:[#allocation2 + $0x227] sm:$0xff] }
 0x2eb   : > { %v3871_v63 = vpop.f32.mrf.mxu0  ;;  %v11167_v53 = vpop.f32.mrf.mxu1  ;;  %v5189_v8 = vpack.c.bf16 %v5173_v49, %v5172_v61  ;;  %v5762_v49 = vld [vmem:[#allocation2 + $0xc9] sm:$0xff] }
 0x2ec   : > { %v14021_v44 = vadd.f32 %v3871_v63, %v3650_v11 }
 0x2ed   : > { %v11203_v39 = vpop.f32.mrf.mxu0  ;;  %v14025_v38 = vpop.f32.mrf.mxu1 }
 0x2ee   : > { %v14023_v15 = vadd.f32 %v11203_v39, %v11167_v53 }
 0x2ef   : > { %v14027_v23 = vpop.f32.mrf.mxu0  ;;  %v11170_v34 = vpop.f32.mrf.mxu1  ;;  %11385 = vmatmul.mubr.msk.bf16.gmra.mxu1 %vm3338_vm3, %v13752_v9 }
 0x2f0   : > { %11388 = vmatprep.mubr.msk.bf16.mxu1 %vm3338_vm3, %v13847_v26 }
 0x2f1   : > { %v11206_v43 = vpop.f32.mrf.mxu0  ;;  %11421 = vmatmul.mubr.msk.bf16.gmra.mxu0 %vm3338_vm3, %v13750_v18  ;;  %v3666_v33 = vpop.f32.mrf.mxu1  ;;  %v5495_v18 = vpack.c.bf16 %v5479_v52, %v5478_v48 }
 0x2f2   : > { %v14035_v36 = vadd.f32 %v11206_v43, %v11170_v34  ;;  %11424 = vmatprep.mubr.msk.bf16.mxu0 %vm3338_vm3, %v13916_v0  ;;  %v5760_v34 = vld [vmem:[#allocation2 + $0xa9] sm:$0xff]  ;;  %v5761_v43 = vld [vmem:[#allocation2 + $0xb1] sm:$0xff] }
 0x2f3   : > { %v3887_v41 = vpop.f32.mrf.mxu0  ;;  %v11171_v9 = vpop.f32.mrf.mxu1 }
 0x2f4   : > { %v14039_v50 = vadd.f32 %v3887_v41, %v3666_v33  ;;  %v5763_v33 = vld [vmem:[#allocation2 + $0xd1] sm:$0xff]  ;;  %v5789_v41 = vpack.c.bf16 %v5761_v43, %v5760_v34 }
 0x2f5   : > { %v11207_v60 = vpop.f32.mrf.mxu0  ;;  %v14043_v26 = vpop.f32.mrf.mxu1 }
 0x2f6   : > { %v14041_v1 = vadd.f32 %v11207_v60, %v11171_v9  ;;  %15999 = vst [vmem:[#allocation3_spill] sm:$0xff] %v14043_v26 }
 0x2f7   : > { %v14045_v58 = vpop.f32.mrf.mxu0  ;;  %v11174_v27 = vpop.f32.mrf.mxu1  ;;  %11389 = vmatmul.mubr.msk.bf16.gmra.mxu1 %vm3338_vm3, %v5189_v8 }
 0x2f8   : > { %16000 = vst [vmem:[#allocation16_spill] sm:$0xff] %v14045_v58  ;;  %11432 = vmatprep.mubr.msk.bf16.mxu1 %vm3338_vm3, %v13763_v16 }
 0x2f9   : > { %v11210_v0 = vpop.f32.mrf.mxu0  ;;  %11425 = vmatmul.mubr.msk.bf16.gmra.mxu0 %vm3338_vm3, %v5495_v18  ;;  %v3682_v37 = vpop.f32.mrf.mxu1 }
 0x2fa   : > { %v14051_v29 = vadd.f32 %v11210_v0, %v11174_v27 }
 0x2fb   : > { %v3903_v57 = vpop.f32.mrf.mxu0  ;;  %v11175_v13 = vpop.f32.mrf.mxu1 }
 0x2fc   : > { %v14053_v3 = vadd.f32 %v3903_v57, %v3682_v37 }
 0x2fd   : > { %v11211_v55 = vpop.f32.mrf.mxu0  ;;  %v14057_v47 = vpop.f32.mrf.mxu1 }
 0x2fe   : > { %v14055_v6 = vadd.f32 %v11211_v55, %v11175_v13  ;;  %16001 = vst [vmem:[#allocation17_spill] sm:$0xff] %v14057_v47  ;;  %v5764_v13 = vld [vmem:[#allocation2 + $0xe9] sm:$0xff] }
 0x2ff   : > { %v14059_v35 = vpop.f32.mrf.mxu0  ;;  %v11218_v42 = vpop.f32.mrf.mxu1  ;;  %11433 = vmatmul.mubr.msk.bf16.vlgmr.msra.gmra.mxu1 %vm3338_vm3, %v13791_v31 }
 0x300   : > { %16002 = vst [vmem:[#allocation18_spill] sm:$0xff] %v14059_v35  ;;  %v4194_v16 = vadd.f32 %v11218_v42, %v13935_v30  ;;  %11436 = vmatprep.mubr.msk.bf16.mxu1 %vm3338_vm3, %v13793_v17  ;;  %v5766_v42 = vld [vmem:[#allocation2 + $0x109] sm:$0xff] }
 0x301   : > { %v11254_v40 = vpop.f32.mrf.mxu0  ;;  %v4065_v11 = vpop.f32.mrf.mxu1 }
 0x302   : > { %v14066_v63 = vadd.f32 %v11254_v40, %v4194_v16  ;;  %v4192_v53 = vadd.f32 %v4065_v11, %v13939_v28  ;;  %v5790_v28 = vpack.c.bf16 %v5763_v33, %v5762_v49  ;;  %v5767_v16 = vld [vmem:[#allocation2 + $0x111] sm:$0xff] }
 0x303   : > { %v4371_v39 = vpop.f32.mrf.mxu0  ;;  %v11219_v61 = vpop.f32.mrf.mxu1 }
 0x304   : > { %v14069_v48 = vadd.f32 %v4371_v39, %v4192_v53  ;;  %v4195_v31 = vadd.f32 %v11219_v61, %v13941_v7 }
 0x305   : > { %v11255_v30 = vpop.f32.mrf.mxu0  ;;  %v4068_v52 = vpop.f32.mrf.mxu1 }
 0x306   : > { %v14072_v9 = vadd.f32 %v11255_v30, %v4195_v31  ;;  %v14075_v17 = vadd.f32 %v4068_v52, %v13943_v59  ;;  %v5765_v59 = vld [vmem:[#allocation2 + $0xf1] sm:$0xff] }
 0x307   : > { %v14077_v8 = vpop.f32.mrf.mxu0  ;;  %v11222_v60 = vpop.f32.mrf.mxu1  ;;  %11437 = vmatmul.mubr.msk.bf16.gmra.mxu1 %vm3338_vm3, %v5789_v41  ;;  %v5791_v39 = vpack.c.bf16 %v5765_v59, %v5764_v13 }
 0x308   : > { %v4198_v18 = vadd.f32 %v11222_v60, %v13951_v5  ;;  %11440 = vmatprep.mubr.msk.bf16.mxu1 %vm3338_vm3, %v5790_v28  ;;  %v5768_v28 = vld [vmem:[#allocation2 + $0x129] sm:$0xff] }
 0x309   : > { %v11258_v27 = vpop.f32.mrf.mxu0  ;;  %v4081_v7 = vpop.f32.mrf.mxu1 }
 0x30a   : > { %v14082_v0 = vadd.f32 %v11258_v27, %v4198_v18  ;;  %v4196_v37 = vadd.f32 %v4081_v7, %v13955_v10  ;;  %v5792_v10 = vpack.c.bf16 %v5767_v16, %v5766_v42  ;;  %v5770_v18 = vld [vmem:[#allocation2 + $0x149] sm:$0xff]  ;;  %v5771_v27 = vld [vmem:[#allocation2 + $0x151] sm:$0xff] }
 0x30b   : > { %v4387_v57 = vpop.f32.mrf.mxu0  ;;  %v11223_v55 = vpop.f32.mrf.mxu1  ;;  %v11866_v16 = vld [vmem:[%s15878_s7 + $0x38] sm:$0xff]  }
 0x30c   : > { %v14085_v40 = vadd.f32 %v4387_v57, %v4196_v37  ;;  %v4199_v11 = vadd.f32 %v11223_v55, %v13957_v46  ;;  %11464 = vmatprep.subr.bf16.mxu0 %v11866_v16 }
 0x30d   : > { %v11259_v53 = vpop.f32.mrf.mxu0  ;;  %v4084_v5 = vpop.f32.mrf.mxu1  ;;  %11465 = vmatpush3.bf16.msra.mxu0 %v11866_v16 }
 0x30e   : > { %v14088_v34 = vadd.f32 %v11259_v53, %v4199_v11  ;;  %v14091_v43 = vadd.f32 %v4084_v5, %v13959_v2  ;;  %v5769_v2 = vld [vmem:[#allocation2 + $0x131] sm:$0xff] }
 0x30f   : > { %v14093_v61 = vpop.f32.mrf.mxu0  ;;  %v11226_v49 = vpop.f32.mrf.mxu1  ;;  %11441 = vmatmul.mubr.msk.bf16.gmra.mxu1 %vm3338_vm3, %v5791_v39  ;;  %v5793_v13 = vpack.c.bf16 %v5769_v2, %v5768_v28 }
 0x310   : > { %v4202_v33 = vadd.f32 %v11226_v49, %v13967_v20  ;;  %11444 = vmatprep.mubr.msk.bf16.mxu1 %vm3338_vm3, %v5792_v10  ;;  %v5772_v49 = vld [vmem:[#allocation2 + $0x169] sm:$0xff] }
 0x311   : > { %v11262_v31 = vpop.f32.mrf.mxu0  ;;  %v4097_v46 = vpop.f32.mrf.mxu1 }
 0x312   : > { %v14098_v30 = vadd.f32 %v11262_v31, %v4202_v33  ;;  %v4200_v52 = vadd.f32 %v4097_v46, %v13971_v32  ;;  %v5794_v32 = vpack.c.bf16 %v5771_v27, %v5770_v18  ;;  %v5773_v33 = vld [vmem:[#allocation2 + $0x171] sm:$0xff]  ;;  %v5774_v46 = vld [vmem:[#allocation2 + $0x189] sm:$0xff] }
 0x313   : > { %v4403_v41 = vpop.f32.mrf.mxu0  ;;  %v11227_v60 = vpop.f32.mrf.mxu1 }
 0x314   : > { %v14101_v7 = vadd.f32 %v4403_v41, %v4200_v52  ;;  %v4203_v37 = vadd.f32 %v11227_v60, %v13973_v24  ;;  %v5775_v52 = vld [vmem:[#allocation2 + $0x191] sm:$0xff]  ;;  %v5795_v60 = vpack.c.bf16 %v5773_v33, %v5772_v49 }
 0x315   : > { %v11263_v57 = vpop.f32.mrf.mxu0  ;;  %v4100_v20 = vpop.f32.mrf.mxu1 }
 0x316   : > { %v14104_v59 = vadd.f32 %v11263_v57, %v4203_v37  ;;  %v14107_v55 = vadd.f32 %v4100_v20, %v13975_v4 }
 0x317   : > { %v14109_v42 = vpop.f32.mrf.mxu0  ;;  %v11230_v11 = vpop.f32.mrf.mxu1  ;;  %11445 = vmatmul.mubr.msk.bf16.gmra.mxu1 %vm3338_vm3, %v5793_v13 }
 0x318   : > { %v4206_v24 = vadd.f32 %v11230_v11, %v13983_v56  ;;  %11448 = vmatprep.mubr.msk.bf16.mxu1 %vm3338_vm3, %v5794_v32 }
 0x319   : > { %v11266_v53 = vpop.f32.mrf.mxu0  ;;  %v4113_v5 = vpop.f32.mrf.mxu1 }
 0x31a   : > { %v14117_v4 = vadd.f32 %v11266_v53, %v4206_v24  ;;  %v4204_v39 = vadd.f32 %v4113_v5, %v13987_v19  ;;  %v5796_v19 = vpack.c.bf16 %v5775_v52, %v5774_v46  ;;  %v5776_v24 = vld [vmem:[#allocation2 + $0x1a9] sm:$0xff] }
 0x31b   : > { %v4419_v10 = vpop.f32.mrf.mxu0  ;;  %v11231_v31 = vpop.f32.mrf.mxu1  ;;  %v5778_v5 = vld [vmem:[#allocation2 + $0x1c9] sm:$0xff] }
 0x31c   : > { %v14120_v41 = vadd.f32 %v4419_v10, %v4204_v39  ;;  %v4207_v56 = vadd.f32 %v11231_v31, %v13989_v12  ;;  %v5779_v39 = vld [vmem:[#allocation2 + $0x1d1] sm:$0xff] }
 0x31d   : > { %v11267_v28 = vpop.f32.mrf.mxu0  ;;  %v4116_v2 = vpop.f32.mrf.mxu1 }
 0x31e   : > { %v14123_v18 = vadd.f32 %v11267_v28, %v4207_v56  ;;  %v14126_v27 = vadd.f32 %v4116_v2, %v13991_v45  ;;  %v5777_v45 = vld [vmem:[#allocation2 + $0x1b1] sm:$0xff]  ;;  %v5798_v56 = vpack.c.bf16 %v5779_v39, %v5778_v5 }
 0x31f   : > { %v14128_v37 = vpop.f32.mrf.mxu0  ;;  %v11234_v57 = vpop.f32.mrf.mxu1  ;;  %11449 = vmatmul.mubr.msk.bf16.gmra.mxu1 %vm3338_vm3, %v5795_v60  ;;  %v5797_v31 = vpack.c.bf16 %v5777_v45, %v5776_v24 }
 0x320   : > { %16003 = vst [vmem:[#allocation4_spill] sm:$0xff] %v14126_v27  ;;  %16004 = vst [vmem:[#allocation20_spill] sm:$0xff] %v14128_v37  ;;  %v4210_v20 = vadd.f32 %v11234_v57, %v13999_v51  ;;  %11452 = vmatprep.mubr.msk.bf16.mxu1 %vm3338_vm3, %v5796_v19 }
 0x321   : > { %v11270_v13 = vpop.f32.mrf.mxu0  ;;  %v4129_v12 = vpop.f32.mrf.mxu1 }
 0x322   : > { %v14133_v32 = vadd.f32 %v11270_v13, %v4210_v20  ;;  %v4208_v16 = vadd.f32 %v4129_v12, %v14003_v62  ;;  %v11867_v62 = vld [vmem:[%s15878_s7 + $0x30] sm:$0xff]  }
 0x323   : > { %v4435_v11 = vpop.f32.mrf.mxu0  ;;  %v11235_v53 = vpop.f32.mrf.mxu1  ;;  %11466 = vmatprep.subr.bf16.mxu0 %v11867_v62  ;;  %v5780_v13 = vld [vmem:[#allocation2 + $0x1e9] sm:$0xff]  ;;  %v5781_v12 = vld [vmem:[#allocation2 + $0x1f1] sm:$0xff] }
 0x324   : > { %v14136_v10 = vadd.f32 %v4435_v11, %v4208_v16  ;;  %v4211_v49 = vadd.f32 %v11235_v53, %v14005_v22  ;;  %11467 = vmatpush3.bf16.msra.mxu0 %v11867_v62  ;;  %v5799_v53 = vpack.c.bf16 %v5781_v12, %v5780_v13 }
 0x325   : > { %v11271_v33 = vpop.f32.mrf.mxu0  ;;  %v14139_v51 = vpop.f32.mrf.mxu1 }
 0x326   : > { %16005 = vst [vmem:[#allocation21_spill] sm:$0xff] %v14139_v51  ;;  %v14141_v46 = vadd.f32 %v11271_v33, %v4211_v49  ;;  %v14276_v51 = vld [vmem:[%s15878_s7 + $0x58] sm:$0xff]  }
 0x327   : > { %v14143_v52 = vpop.f32.mrf.mxu0  ;;  %v11238_v28 = vpop.f32.mrf.mxu1  ;;  %11453 = vmatmul.mubr.msk.bf16.gmra.mxu1 %vm3338_vm3, %v5797_v31  ;;  %v5784_v31 = vld [vmem:[#allocation2 + $0x229] sm:$0xff]  ;;  %16015 = vst [vmem:[#allocation28_spill] sm:$0xff] %v14276_v51 }
 0x328   : > { %16006 = vst [vmem:[#allocation5_spill] sm:$0xff] %v14143_v52  ;;  %v4214_v2 = vadd.f32 %v11238_v28, %v14017_v54  ;;  %11456 = vmatprep.mubr.msk.bf16.mxu1 %vm3338_vm3, %v5798_v56  ;;  %v5785_v56 = vld [vmem:[#allocation2 + $0x231] sm:$0xff] }
 0x329   : > { %v11274_v60 = vpop.f32.mrf.mxu0  ;;  %v4145_v22 = vpop.f32.mrf.mxu1  ;;  %v6132_v52 = vld [vmem:[#allocation2 + $0xf] sm:$0xff] }
 0x32a   : > { %v14151_v19 = vadd.f32 %v11274_v60, %v4214_v2  ;;  %v4212_v57 = vadd.f32 %v4145_v22, %v14021_v44  ;;  %v5801_v22 = vpack.c.bf16 %v5785_v56, %v5784_v31 }
 0x32b   : > { %v4451_v20 = vpop.f32.mrf.mxu0  ;;  %v11239_v16 = vpop.f32.mrf.mxu1 }
 0x32c   : > { %v14154_v11 = vadd.f32 %v4451_v20, %v4212_v57  ;;  %v4215_v24 = vadd.f32 %v11239_v16, %v14023_v15  ;;  %v11868_v16 = vld [vmem:[%s15878_s7 + $0x28] sm:$0xff]  }
 0x32d   : > { %v11275_v45 = vpop.f32.mrf.mxu0  ;;  %v14157_v54 = vpop.f32.mrf.mxu1  ;;  %11468 = vmatprep.subr.bf16.mxu0 %v11868_v16 }
 0x32e   : > { %16007 = vst [vmem:[#allocation22_spill] sm:$0xff] %v14157_v54  ;;  %v14159_v5 = vadd.f32 %v11275_v45, %v4215_v24  ;;  %11469 = vmatpush3.bf16.msra.mxu0 %v11868_v16 }
 0x32f   : > { %v14161_v39 = vpop.f32.mrf.mxu0  ;;  %v11242_v49 = vpop.f32.mrf.mxu1  ;;  %11457 = vmatmul.mubr.msk.bf16.gmra.mxu1 %vm3338_vm3, %v5799_v53 }
 0x330   : > { %16008 = vst [vmem:[#allocation23_spill] sm:$0xff] %v14161_v39  ;;  %v4218_v44 = vadd.f32 %v11242_v49, %v14035_v36  ;;  %11460 = vmatprep.mubr.msk.bf16.mxu1 %vm3338_vm3, %v13918_v21 }
 0x331   : > { %v11278_v33 = vpop.f32.mrf.mxu0  ;;  %v4161_v15 = vpop.f32.mrf.mxu1 }
 0x332   : > { %v14167_v62 = vadd.f32 %v11278_v33, %v4218_v44  ;;  %v4216_v28 = vadd.f32 %v4161_v15, %v14039_v50 }
 0x333   : > { %v4467_v2 = vpop.f32.mrf.mxu0  ;;  %v11243_v60 = vpop.f32.mrf.mxu1 }
 0x334   : > { %v14170_v57 = vadd.f32 %v4467_v2, %v4216_v28  ;;  %v4219_v20 = vadd.f32 %v11243_v60, %v14041_v1 }
 0x335   : > { %v11279_v13 = vpop.f32.mrf.mxu0  ;;  %v14173_v36 = vpop.f32.mrf.mxu1 }
 0x336   : > { %16009 = vst [vmem:[#allocation6_spill] sm:$0xff] %v14173_v36  ;;  %v14175_v12 = vadd.f32 %v11279_v13, %v4219_v20  ;;  %v6131_v36 = vld [vmem:[#allocation2 + $0x7] sm:$0xff] }
 0x337   : > { %v14177_v21 = vpop.f32.mrf.mxu0  ;;  %v11246_v24 = vpop.f32.mrf.mxu1  ;;  %11461 = vmatmul.mubr.msk.bf16.gmra.mxu1 %vm3338_vm3, %v5801_v22 }
 0x338   : > { %16010 = vst [vmem:[#allocation24_spill] sm:$0xff] %v14177_v21  ;;  %v4222_v50 = vadd.f32 %v11246_v24, %v14051_v29 }
 0x339   : > { %v11282_v45 = vpop.f32.mrf.mxu0  ;;  %v4177_v53 = vpop.f32.mrf.mxu1 }
 0x33a   : > { %v14184_v1 = vadd.f32 %v11282_v45, %v4222_v50  ;;  %v4220_v49 = vadd.f32 %v4177_v53, %v14053_v3 }
 0x33b   : > { %v4483_v44 = vpop.f32.mrf.mxu0  ;;  %v11247_v33 = vpop.f32.mrf.mxu1 }
 0x33c   : > { %v14187_v31 = vadd.f32 %v4483_v44, %v4220_v49  ;;  %v4223_v56 = vadd.f32 %v11247_v33, %v14055_v6 }
 0x33d   : > { %v11283_v15 = vpop.f32.mrf.mxu0  ;;  %v14190_v28 = vpop.f32.mrf.mxu1 }
 0x33e   : > { %16011 = vst [vmem:[#allocation25_spill] sm:$0xff] %v14190_v28  ;;  %v14192_v2 = vadd.f32 %v11283_v15, %v4223_v56 }
 0x33f   : > { %v14194_v29 = vpop.f32.mrf.mxu0  ;;  %v11290_v60 = vpop.f32.mrf.mxu1 }
 0x340   : > { %16012 = vst [vmem:[#allocation26_spill] sm:$0xff] %v14194_v29  ;;  %v14197_v22 = vadd.f32 %v11290_v60, %v14066_v63 }
 0x341   : > { %v14199_v20 = vpop.f32.mrf.mxu0  ;;  %v4677_v3 = vpop.f32.mrf.mxu1 }
 0x342   : > { %v14202_v13 = vadd.f32 %v4677_v3, %v14069_v48  ;;  %v11869_v48 = vld [vmem:[%s15878_s7 + $0x20] sm:$0xff]  }
 0x343   : > { %v14204_v16 = vpop.f32.mrf.mxu0  ;;  %v11291_v6 = vpop.f32.mrf.mxu1  ;;  %11470 = vmatprep.subr.bf16.mxu0 %v11869_v48 }
 0x344   : > { %v14207_v24 = vadd.f32 %v11291_v6, %v14072_v9  ;;  %v11870_v9 = vld [vmem:[%s15878_s7 + $0x18] sm:$0xff]   ;;  %11471 = vmatpush3.bf16.msra.mxu0 %v11869_v48  ;;  %v11871_v6 = vld [vmem:[%s15878_s7 + $0x10] sm:$0xff]  }
 0x345   : > { %v14209_v50 = vpop.f32.mrf.mxu0  ;;  %v14211_v45 = vpop.f32.mrf.mxu1  ;;  %11504 = vmatprep.subr.bf16.mxu1 %v11870_v9  ;;  %11544 = vmatprep.subr.bf16.mxu0 %v14276_v51 }
 0x346   : > { %11505 = vmatpush3.bf16.msra.mxu1 %v11870_v9 }
 0x347   : > { %v14213_v53 = vpop.f32.mrf.mxu0  ;;  %v11294_v63 = vpop.f32.mrf.mxu1  ;;  %11506 = vmatprep.subr.bf16.mxu1 %v11871_v6 }
 0x348   : > { %v14216_v49 = vadd.f32 %v11294_v63, %v14082_v0 }
 0x349   : > { %v14218_v44 = vpop.f32.mrf.mxu0  ;;  %v4693_v33 = vpop.f32.mrf.mxu1 }
 0x34a   : > { %v14227_v56 = vadd.f32 %v4693_v33, %v14085_v40  ;;  %11507 = vmatpush3.bf16.msra.mxu1 %v11871_v6 }
 0x34b   : > { %v14229_v15 = vpop.f32.mrf.mxu0  ;;  %v11295_v0 = vpop.f32.mrf.mxu1 }
 0x34c   : > { %v14232_v60 = vadd.f32 %v11295_v0, %v14088_v34  ;;  %v11872_v34 = vld [vmem:[%s15878_s7 + $0x8] sm:$0xff]  }
 0x34d   : > { %v14234_v3 = vpop.f32.mrf.mxu0  ;;  %v14239_v63 = vpop.f32.mrf.mxu1  ;;  %11508 = vmatprep.subr.bf16.mxu1 %v11872_v34 }
 0x34e   : > { %11509 = vmatpush3.bf16.msra.mxu1 %v11872_v34 }
 0x34f   : > { %v14241_v40 = vpop.f32.mrf.mxu0  ;;  %v11298_v33 = vpop.f32.mrf.mxu1 }
 0x350   : > { %v14244_v29 = vadd.f32 %v11298_v33, %v14098_v30  ;;  %v11873_v33 = vld [vmem:[%s15878_s7] sm:$0xff]  }
 0x351   : > { %v14246_v48 = vpop.f32.mrf.mxu0  ;;  %v4709_v9 = vpop.f32.mrf.mxu1  ;;  %11510 = vmatprep.subr.bf16.mxu1 %v11873_v33 }
 0x352   : > { %v14252_v0 = vadd.f32 %v4709_v9, %v14101_v7  ;;  %11511 = vmatpush3.bf16.msra.mxu1 %v11873_v33 }
 0x353   : > { %v14254_v28 = vpop.f32.mrf.mxu0  ;;  %v11299_v21 = vpop.f32.mrf.mxu1 }
 0x354   : > { %v14257_v6 = vadd.f32 %v11299_v21, %v14104_v59  ;;  %v6187_v59 = vld [vmem:[#allocation2 + $0x8] sm:$0xff]  ;;  %v6188_v21 = vld [vmem:[#allocation2 + $0x10] sm:$0xff] }
 0x355   : > { %v14259_v30 = vpop.f32.mrf.mxu0  ;;  %v14264_v35 = vpop.f32.mrf.mxu1  ;;  %v6219_v54 = vpack.c.bf16 %v6188_v21, %v6187_v59 }
 0x357   : > { %v14266_v47 = vpop.f32.mrf.mxu0  ;;  %v11302_v7 = vpop.f32.mrf.mxu1  ;;  %11472 = vmatprep.mubr.msk.bf16.mxu0 %vm408_vm0, %v6219_v54 }
 0x358   : > { %v14269_v9 = vadd.f32 %v11302_v7, %v14117_v4  ;;  %v6163_v4 = vpack.c.bf16 %v6132_v52, %v6131_v36 }
 0x359   : > { %v14271_v34 = vpop.f32.mrf.mxu0  ;;  %v4725_v39 = vpop.f32.mrf.mxu1 }
 0x35a   : > { %16013 = vst [vmem:[#allocation27_spill] sm:$0xff] %v14269_v9  ;;  %16014 = vst [vmem:[#allocation7_spill] sm:$0xff] %v14271_v34  ;;  %v14279_v37 = vadd.f32 %v4725_v39, %v14120_v41  ;;  %11512 = vmatprep.mubr.msk.bf16.mxu1 %vm408_vm0, %v6163_v4 }
 0x35b   : > { %v14281_v33 = vpop.f32.mrf.mxu0  ;;  %v11303_v7 = vpop.f32.mrf.mxu1 }
 0x35c   : > { %16016 = vst [vmem:[#allocation29_spill] sm:$0xff] %v14279_v37  ;;  %16017 = vst [vmem:[#allocation8_spill] sm:$0xff] %v14281_v33  ;;  %v14286_v34 = vadd.f32 %v11303_v7, %v14123_v18 }
 0x35d   : > { %v14288_v59 = vpop.f32.mrf.mxu0  ;;  %v14291_v21 = vpop.f32.mrf.mxu1 }
 0x35e   : > { %16018 = vst [vmem:[#allocation30_spill] sm:$0xff] %v14286_v34  ;;  %16019 = vst [vmem:[#allocation31_spill] sm:$0xff] %v14288_v59 }
 0x35f   : > { %16020 = vst [vmem:[#allocation9_spill] sm:$0xff] %v14291_v21  ;;  %v14293_v9 = vpop.f32.mrf.mxu0  ;;  %v11306_v41 = vpop.f32.mrf.mxu1 }
 0x360   : > { %16021 = vst [vmem:[#allocation32_spill] sm:$0xff] %v14293_v9  ;;  %v14296_v39 = vadd.f32 %v11306_v41, %v14133_v32 }
 0x361   : > { %v14298_v52 = vpop.f32.mrf.mxu0  ;;  %v4741_v54 = vpop.f32.mrf.mxu1 }
 0x362   : > { %16022 = vst [vmem:[#allocation33_spill] sm:$0xff] %v14296_v39  ;;  %16023 = vst [vmem:[#allocation34_spill] sm:$0xff] %v14298_v52  ;;  %v14301_v36 = vadd.f32 %v4741_v54, %v14136_v10 }
 0x363   : > { %v14303_v18 = vpop.f32.mrf.mxu0  ;;  %v11307_v7 = vpop.f32.mrf.mxu1 }
 0x364   : > { %16024 = vst [vmem:[#allocation35_spill] sm:$0xff] %v14301_v36  ;;  %16025 = vst [vmem:[#allocation10_spill] sm:$0xff] %v14303_v18  ;;  %v14306_v51 = vadd.f32 %v11307_v7, %v14141_v46 }
 0x365   : > { %v14308_v4 = vpop.f32.mrf.mxu0  ;;  %v14310_v59 = vpop.f32.mrf.mxu1 }
 0x366   : > { %16026 = vst [vmem:[#allocation36_spill] sm:$0xff] %v14306_v51  ;;  %16027 = vst [vmem:[#allocation37_spill] sm:$0xff] %v14308_v4 }
 0x367   : > { %16028 = vst [vmem:[#allocation11_spill] sm:$0xff] %v14310_v59  ;;  %v14312_v9 = vpop.f32.mrf.mxu0  ;;  %v11310_v32 = vpop.f32.mrf.mxu1 }
 0x368   : > { %16029 = vst [vmem:[#allocation38_spill] sm:$0xff] %v14312_v9  ;;  %v14315_v41 = vadd.f32 %v11310_v32, %v14151_v19 }
 0x369   : > { %v14317_v52 = vpop.f32.mrf.mxu0  ;;  %v4757_v10 = vpop.f32.mrf.mxu1 }
 0x36a   : > { %16030 = vst [vmem:[#allocation39_spill] sm:$0xff] %v14315_v41  ;;  %16031 = vst [vmem:[#allocation12_spill] sm:$0xff] %v14317_v52  ;;  %v14320_v54 = vadd.f32 %v4757_v10, %v14154_v11 }
 0x36b   : > { %v14322_v18 = vpop.f32.mrf.mxu0  ;;  %v11311_v46 = vpop.f32.mrf.mxu1 }
 0x36c   : > { %16032 = vst [vmem:[#allocation40_spill] sm:$0xff] %v14320_v54  ;;  %16033 = vst [vmem:[#allocation41_spill] sm:$0xff] %v14322_v18  ;;  %v14325_v7 = vadd.f32 %v11311_v46, %v14159_v5 }
 0x36d   : > { %v14327_v4 = vpop.f32.mrf.mxu0  ;;  %v14329_v59 = vpop.f32.mrf.mxu1 }
 0x36e   : > { %16034 = vst [vmem:[#allocation42_spill] sm:$0xff] %v14325_v7  ;;  %16035 = vst [vmem:[#allocation43_spill] sm:$0xff] %v14327_v4 }
 0x36f   : > { %16036 = vst [vmem:[#allocation13_spill] sm:$0xff] %v14329_v59  ;;  %v14331_v9 = vpop.f32.mrf.mxu0  ;;  %v11314_v19 = vpop.f32.mrf.mxu1 }
 0x370   : > { %16037 = vst [vmem:[#allocation44_spill] sm:$0xff] %v14331_v9  ;;  %v14334_v32 = vadd.f32 %v11314_v19, %v14167_v62 }
 0x371   : > { %v14336_v52 = vpop.f32.mrf.mxu0  ;;  %v4773_v11 = vpop.f32.mrf.mxu1 }
 0x372   : > { %16038 = vst [vmem:[#allocation45_spill] sm:$0xff] %v14334_v32  ;;  %16039 = vst [vmem:[#allocation46_spill] sm:$0xff] %v14336_v52  ;;  %v14339_v10 = vadd.f32 %v4773_v11, %v14170_v57 }
 0x373   : > { %v14341_v18 = vpop.f32.mrf.mxu0  ;;  %v11315_v5 = vpop.f32.mrf.mxu1 }
 0x374   : > { %16040 = vst [vmem:[#allocation47_spill] sm:$0xff] %v14339_v10  ;;  %16041 = vst [vmem:[#allocation48_spill] sm:$0xff] %v14341_v18  ;;  %v14344_v46 = vadd.f32 %v11315_v5, %v14175_v12 }
 0x375   : > { %v14346_v4 = vpop.f32.mrf.mxu0  ;;  %v14348_v59 = vpop.f32.mrf.mxu1 }
 0x376   : > { %16042 = vst [vmem:[#allocation49_spill] sm:$0xff] %v14344_v46  ;;  %16043 = vst [vmem:[#allocation14_spill] sm:$0xff] %v14346_v4 }
 0x377   : > { %16044 = vst [vmem:[#allocation50_spill] sm:$0xff] %v14348_v59  ;;  %v14350_v9 = vpop.f32.mrf.mxu0  ;;  %v11318_v62 = vpop.f32.mrf.mxu1 }
 0x378   : > { %16045 = vst [vmem:[#allocation51_spill] sm:$0xff] %v14350_v9  ;;  %v14353_v19 = vadd.f32 %v11318_v62, %v14184_v1 }
 0x379   : > { %v14355_v52 = vpop.f32.mrf.mxu0  ;;  %v4789_v57 = vpop.f32.mrf.mxu1 }
 0x37a   : > { %16046 = vst [vmem:[#allocation52_spill] sm:$0xff] %v14353_v19  ;;  %16047 = vst [vmem:[#allocation53_spill] sm:$0xff] %v14355_v52  ;;  %v14358_v11 = vadd.f32 %v4789_v57, %v14187_v31  ;;  %v14374_v31 = vld [vmem:[%s15878_s7 + $0x78] sm:$0xff]  }
 0x37b   : > { %v14360_v18 = vpop.f32.mrf.mxu0  ;;  %v11319_v12 = vpop.f32.mrf.mxu1  ;;  %16054 = vst [vmem:[#allocation58_spill] sm:$0xff] %v14374_v31  ;;  %11584 = vmatprep.subr.bf16.mxu1 %v14374_v31 }
 0x37c   : > { %16048 = vst [vmem:[#allocation55_spill] sm:$0xff] %v14358_v11  ;;  %16049 = vst [vmem:[#allocation56_spill] sm:$0xff] %v14360_v18  ;;  %v14363_v5 = vadd.f32 %v11319_v12, %v14192_v2 }
 0x37d   : > { %v14365_v4 = vpop.f32.mrf.mxu0  ;;  %v14367_v46 = vpop.f32.mrf.mxu1 }
 0x37e   : > { %16050 = vst [vmem:[#allocation15_spill] sm:$0xff] %v14363_v5  ;;  %16051 = vst [vmem:[#allocation57_spill] sm:$0xff] %v14365_v4 }
 0x37f   : > { %16052 = vst [vmem:[#allocation19_spill] sm:$0xff] %v14367_v46  ;;  %v14369_v9 = vpop.f32.mrf.mxu0  ;;  %v11362_v1 = vpop.f32.mrf.mxu1 }
 0x380   : > { %16053 = vst [vmem:[#allocation54_spill] sm:$0xff] %v14369_v9 }
 0x381   : > { %v11398_v62 = vpop.f32.mrf.mxu0  ;;  %v5289_v19 = vpop.f32.mrf.mxu1 }
 0x383   : > { %v5595_v52 = vpop.f32.mrf.mxu0  ;;  %v11363_v59 = vpop.f32.mrf.mxu1 }
 0x385   : > { %v5292_v57 = vpop.f32.mrf.mxu1  ;;  %v14377_v2 = vpop.f32.mrf.mxu0 }
 0x387   : > { %v14379_v12 = vpop.f32.mrf.mxu1  ;;  %v14383_v9 = vpop.f32.mrf.mxu0 }
 0x389   : > { %v14381_v4 = vpop.f32.mrf.mxu1  ;;  %v14389_v18 = vpop.f32.mrf.mxu0 }
 0x38b   : > { %v14385_v5 = vpop.f32.mrf.mxu1  ;;  %v14395_v32 = vpop.f32.mrf.mxu0 }
 0x38d   : > { %v14387_v46 = vpop.f32.mrf.mxu1  ;;  %v14401_v41 = vpop.f32.mrf.mxu0 }
 0x38f   : > { %v14391_v11 = vpop.f32.mrf.mxu1  ;;  %v14407_v39 = vpop.f32.mrf.mxu0 }
 0x391   : > { %v14393_v10 = vpop.f32.mrf.mxu1  ;;  %v14413_v21 = vpop.f32.mrf.mxu0 }
 0x392   : > { %16060 = vst [vmem:[#allocation64_spill] sm:$0xff] %v14413_v21 }
 0x393   : > { %v14397_v7 = vpop.f32.mrf.mxu1  ;;  %v14419_v27 = vpop.f32.mrf.mxu0 }
 0x394   : > { %16063 = vst [vmem:[#allocation67_spill] sm:$0xff] %v14419_v27 }
 0x395   : > { %v14399_v54 = vpop.f32.mrf.mxu1 }
 0x396   : > { %16055 = vst [vmem:[#allocation59_spill] sm:$0xff] %v14399_v54 }
 0x397   : > { %v14403_v51 = vpop.f32.mrf.mxu1 }
 0x398   : > { %16056 = vst [vmem:[#allocation60_spill] sm:$0xff] %v14403_v51  ;;  %v14425_v51 = vpop.f32.mrf.mxu0 }
 0x399   : > { %v14405_v36 = vpop.f32.mrf.mxu1  ;;  %16066 = vst [vmem:[#allocation70_spill] sm:$0xff] %v14425_v51 }
 0x39a   : > { %16057 = vst [vmem:[#allocation61_spill] sm:$0xff] %v14405_v36 }
 0x39b   : > { %v14409_v31 = vpop.f32.mrf.mxu1 }
 0x39c   : > { %16058 = vst [vmem:[#allocation62_spill] sm:$0xff] %v14409_v31  ;;  %v14431_v31 = vpop.f32.mrf.mxu0 }
 0x39d   : > { %v14411_v34 = vpop.f32.mrf.mxu1 }
 0x39e   : > { %16059 = vst [vmem:[#allocation63_spill] sm:$0xff] %v14411_v34 }
 0x39f   : > { %v14415_v33 = vpop.f32.mrf.mxu1 }
 0x3a0   : > { %16061 = vst [vmem:[#allocation65_spill] sm:$0xff] %v14415_v33  ;;  %v14437_v33 = vpop.f32.mrf.mxu0 }
 0x3a1   : > { %v14417_v37 = vpop.f32.mrf.mxu1  ;;  %16071 = vst [vmem:[#allocation75_spill] sm:$0xff] %v14437_v33 }
 0x3a2   : > { %16062 = vst [vmem:[#allocation66_spill] sm:$0xff] %v14417_v37 }
 0x3a3   : > { %v14421_v54 = vpop.f32.mrf.mxu1 }
 0x3a4   : > { %16064 = vst [vmem:[#allocation68_spill] sm:$0xff] %v14421_v54  ;;  %v14443_v54 = vpop.f32.mrf.mxu0 }
 0x3a5   : > { %v14423_v58 = vpop.f32.mrf.mxu1  ;;  %16074 = vst [vmem:[#allocation78_spill] sm:$0xff] %v14443_v54 }
 0x3a6   : > { %16065 = vst [vmem:[#allocation69_spill] sm:$0xff] %v14423_v58 }
 0x3a7   : > { %v14427_v36 = vpop.f32.mrf.mxu1 }
 0x3a8   : > { %16067 = vst [vmem:[#allocation71_spill] sm:$0xff] %v14427_v36  ;;  %v14449_v36 = vpop.f32.mrf.mxu0 }
 0x3a9   : > { %v14429_v26 = vpop.f32.mrf.mxu1  ;;  %16077 = vst [vmem:[#allocation81_spill] sm:$0xff] %v14449_v36 }
 0x3aa   : > { %16068 = vst [vmem:[#allocation72_spill] sm:$0xff] %v14429_v26  ;;  %v14462_v54 = vpop.f32.mrf.mxu0 }
 0x3ab   : > { %v14433_v34 = vpop.f32.mrf.mxu1 }
 0x3ac   : > { %16069 = vst [vmem:[#allocation73_spill] sm:$0xff] %v14433_v34  ;;  %v4499_v34 = vadd.f32 %v14077_v8, %v14075_v17 }
 0x3ad   : > { %v14435_v21 = vpop.f32.mrf.mxu1 }
 0x3ae   : > { %16070 = vst [vmem:[#allocation74_spill] sm:$0xff] %v14435_v21  ;;  %v5112_v21 = vadd.f32 %v14199_v20, %v14197_v22 }
 0x3af   : > { %v14439_v37 = vpop.f32.mrf.mxu1 }
 0x3b0   : > { %16072 = vst [vmem:[#allocation76_spill] sm:$0xff] %v14439_v37  ;;  %v4805_v37 = vadd.f32 %v14211_v45, %v4499_v34  ;;  %v14478_v34 = vld [vmem:[%s15877_s6] ss:$0 sm:$0xff] }
 0x3b1   : > { %v14441_v27 = vpop.f32.mrf.mxu1 }
 0x3b2   : > { %16073 = vst [vmem:[#allocation77_spill] sm:$0xff] %v14441_v27  ;;  %v5110_v27 = vadd.f32 %v14204_v16, %v14202_v13  ;;  %v5111_v8 = vadd.f32 %v14213_v53, %v4805_v37  ;;  %v4503_v13 = vadd.f32 %v14093_v61, %v14091_v43  ;;  %v14473_v16 = vpop.f32.mrf.mxu0 }
 0x3b3   : > { %v14445_v58 = vpop.f32.mrf.mxu1 }
 0x3b4   : > { %16075 = vst [vmem:[#allocation79_spill] sm:$0xff] %v14445_v58  ;;  %v5418_v58 = vadd.f32 %v11362_v1, %v5112_v21  ;;  %v5416_v36 = vadd.f32 %v5289_v19, %v5110_v27  ;;  %v5116_v27 = vadd.f32 %v14218_v44, %v14216_v49  ;;  %v5117_v19 = vadd.f32 %v14234_v3, %v14232_v60  ;;  %v14490_v49 = vpop.f32.mrf.mxu0 }
 0x3b5   : > { %v14447_v51 = vpop.f32.mrf.mxu1 }
 0x3b6   : > { %16076 = vst [vmem:[#allocation80_spill] sm:$0xff] %v14447_v51  ;;  %v5724_v22 = vadd.f32 %v11398_v62, %v5418_v58  ;;  %v4809_v58 = vadd.f32 %v14239_v63, %v4503_v13  ;;  %v5422_v37 = vadd.f32 %v14379_v12, %v5116_v27 }
 0x3b7   : > { %v14451_v26 = vpop.f32.mrf.mxu1 }
 0x3b8   : > { %16078 = vst [vmem:[#allocation82_spill] sm:$0xff] %v14451_v26  ;;  %v5113_v26 = vadd.f32 %v14209_v50, %v14207_v24  ;;  %v5722_v24 = vadd.f32 %v5595_v52, %v5416_v36  ;;  %v5417_v50 = vadd.f32 %v5292_v57, %v5111_v8  ;;  %v5115_v36 = vadd.f32 %v14241_v40, %v4809_v58  ;;  %v16081_v58 = vld [vmem:[#allocation16_spill] sm:$0xff] }
 0x3b9   : > { %v14457_v33 = vpop.f32.mrf.mxu1  ;;  %v5728_v62 = vadd.f32 %v14389_v18, %v5422_v37  ;;  %v5423_v57 = vadd.f32 %v14385_v5, %v5117_v19  ;;  %v16087_v19 = vld [vmem:[#allocation21_spill] sm:$0xff] }
 0x3ba   : > { %v5419_v20 = vadd.f32 %v11363_v59, %v5113_v26  ;;  %v5114_v26 = vadd.f32 %v14229_v15, %v14227_v56  ;;  %v5723_v52 = vadd.f32 %v14383_v9, %v5417_v50  ;;  %v4507_v9 = vadd.f32 %v14109_v42, %v14107_v55  ;;  %v16079_v50 = vld [vmem:[#allocation64_spill] sm:$0xff] }
 0x3bb   : > { %v14464_v51 = vpop.f32.mrf.mxu1  ;;  %v5421_v18 = vadd.f32 %v14387_v46, %v5115_v36 }
 0x3bc   : > { %v5725_v61 = vadd.f32 %v14377_v2, %v5419_v20  ;;  %v5420_v56 = vadd.f32 %v14381_v4, %v5114_v26  ;;  %v5120_v4 = vadd.f32 %v14246_v48, %v14244_v29  ;;  %v14505_v2 = vpop.f32.mrf.mxu0  ;;  %v4813_v55 = vadd.f32 %v14264_v35, %v4507_v9  ;;  %v16080_v26 = vld [vmem:[#allocation3_spill] sm:$0xff]  ;;  %v16091_v9 = vld [vmem:[#allocation9_spill] sm:$0xff] }
 0x3bd   : > { %v14468_v17 = vpop.f32.mrf.mxu1  ;;  %v5729_v29 = vadd.f32 %v14401_v41, %v5423_v57  ;;  %v5121_v20 = vadd.f32 %v14259_v30, %v14257_v6  ;;  %v3875_v30 = vadd.f32 %v14027_v23, %v14025_v38  ;;  %v16089_v57 = vld [vmem:[#allocation29_spill] sm:$0xff] }
 0x3be   : > { %v5726_v40 = vadd.f32 %v14395_v32, %v5420_v56  ;;  %v5426_v48 = vadd.f32 %v14391_v11, %v5120_v4  ;;  %v14520_v13 = vpop.f32.mrf.mxu0  ;;  %v3859_v11 = vadd.f32 %v14009_v25, %v14007_v14  ;;  %v5119_v27 = vadd.f32 %v14266_v47, %v4813_v55  ;;  %v16082_v14 = vld [vmem:[#allocation4_spill] sm:$0xff] }
 0x3bf   : > { %v11434_v45 = vpop.f32.mrf.mxu1  ;;  %v16083_v25 = vld [vmem:[#allocation20_spill] sm:$0xff] }
 0x3c0   : > { %v6030_v21 = vadd.f32 %v11434_v45, %v5724_v22  ;;  %v5118_v22 = vadd.f32 %v14254_v28, %v14252_v0  ;;  %v5727_v28 = vadd.f32 %v14407_v39, %v5421_v18  ;;  %v5732_v39 = vadd.f32 %v16079_v50, %v5426_v48  ;;  %v14544_v38 = vpop.f32.mrf.mxu0  ;;  %v16093_v18 = vld [vmem:[#allocation60_spill] sm:$0xff]  ;;  %v11875_v50 = vld [vmem:[%s15878_s7 + $0x50] sm:$0xff]  }
 0x3c1   : > { %v5901_v43 = vpop.f32.mrf.mxu1  ;;  %v4511_v47 = vadd.f32 %v16083_v25, %v16082_v14  ;;  %v16098_v25 = vld [vmem:[#allocation32_spill] sm:$0xff] }
 0x3c2   : > { %v6069_v53 = vadd.f32 %v14478_v34, %v6030_v21  ;;  %v6028_v59 = vadd.f32 %v5901_v43, %v5722_v24  ;;  %v5424_v35 = vadd.f32 %v14393_v10, %v5118_v22  ;;  %v5427_v24 = vadd.f32 %v14397_v7, %v5121_v20  ;;  %v16085_v7 = vld [vmem:[#allocation7_spill] sm:$0xff] }
 0x3c3   : > { %v11435_v44 = vpop.f32.mrf.mxu1  ;;  %v14537_v43 = vadd.f32 %v16081_v58, %v16080_v26  ;;  %v4817_v4 = vadd.f32 %v16091_v9, %v4511_v47  ;;  %v16097_v58 = vld [vmem:[#allocation5_spill] sm:$0xff]  ;;  %v11876_v9 = vld [vmem:[%s15878_s7 + $0x48] sm:$0xff]  }
 0x3c4   : > { %6101 = vst.msk [vmem:[#allocation2 + $0x48] sm:$0xff] %vm408_vm0, %v6069_v53  ;;  %v6067_v15 = vadd.f32 %v14478_v34, %v6028_v59  ;;  %v6031_v63 = vadd.f32 %v11435_v44, %v5725_v61  ;;  %v16084_v61 = vld [vmem:[#allocation27_spill] sm:$0xff]  ;;  %v4209_v44 = vadd.f32 %v16087_v19, %v3859_v11  ;;  %v14564_v11 = vpop.f32.mrf.mxu0 }
 0x3c5   : > { %v5904_v1 = vpop.f32.mrf.mxu1  ;;  %v5124_v37 = vadd.f32 %v16085_v7, %v16084_v61  ;;  %v16086_v53 = vld [vmem:[#allocation59_spill] sm:$0xff]  ;;  %v5123_v47 = vadd.f32 %v16098_v25, %v4817_v4  ;;  %v16099_v61 = vld [vmem:[#allocation62_spill] sm:$0xff] }
 0x3c6   : > { %6099 = vst.msk [vmem:[#allocation2 + $0x28] sm:$0xff] %vm408_vm0, %v6067_v15  ;;  %v6070_v60 = vadd.f32 %v14478_v34, %v6031_v63  ;;  %v6029_v3 = vadd.f32 %v5904_v1, %v5723_v52  ;;  %v5425_v59 = vadd.f32 %v16086_v53, %v5119_v27  ;;  %v16088_v52 = vld [vmem:[#allocation67_spill] sm:$0xff]  ;;  %v4515_v14 = vadd.f32 %v16097_v58, %v4209_v44  ;;  %v16102_v44 = vld [vmem:[#allocation58_spill] sm:$0xff] }
 0x3c7   : > { %v11438_v12 = vpop.f32.mrf.mxu1  ;;  %v5730_v56 = vadd.f32 %v16088_v52, %v5424_v35  ;;  %v16095_v35 = vld [vmem:[#allocation31_spill] sm:$0xff]  ;;  %v16101_v52 = vld [vmem:[#allocation28_spill] sm:$0xff] }
 0x3c8   : > { %6102 = vst.msk [vmem:[#allocation2 + $0x50] sm:$0xff] %vm408_vm0, %v6070_v60  ;;  %v6068_v5 = vadd.f32 %v14478_v34, %v6029_v3  ;;  %v6034_v8 = vadd.f32 %v11438_v12, %v5728_v62  ;;  %v16090_v60 = vld [vmem:[#allocation8_spill] sm:$0xff]  ;;  %v16092_v12 = vld [vmem:[#allocation70_spill] sm:$0xff]  ;;  %v16100_v53 = vld [vmem:[#allocation75_spill] sm:$0xff] }
 0x3c9   : > { %v5917_v42 = vpop.f32.mrf.mxu1  ;;  %v5122_v3 = vadd.f32 %v16090_v60, %v16089_v57  ;;  %v14599_v60 = vpop.f32.mrf.mxu0  ;;  %v16107_v4 = vld [vmem:[#allocation35_spill] sm:$0xff] }
 0x3ca   : > { %6100 = vst.msk [vmem:[#allocation2 + $0x30] sm:$0xff] %vm408_vm0, %v6068_v5  ;;  %v6073_v32 = vadd.f32 %v14478_v34, %v6034_v8  ;;  %v6032_v46 = vadd.f32 %v5917_v42, %v5726_v40  ;;  %v5733_v40 = vadd.f32 %v16092_v12, %v5427_v24  ;;  %v5430_v5 = vadd.f32 %v16093_v18, %v5124_v37  ;;  %v16108_v12 = vld [vmem:[#allocation10_spill] sm:$0xff] }
 0x3cb   : > { %v11439_v45 = vpop.f32.mrf.mxu1  ;;  %v6191_v20 = vld [vmem:[#allocation2 + $0x48] sm:$0xff]  ;;  %v16109_v18 = vld [vmem:[#allocation78_spill] sm:$0xff] }
 0x3cc   : > { %6105 = vst.msk [vmem:[#allocation2 + $0x88] sm:$0xff] %vm408_vm0, %v6073_v32  ;;  %v6071_v0 = vadd.f32 %v14478_v34, %v6032_v46  ;;  %v6035_v41 = vadd.f32 %v11439_v45, %v5729_v29  ;;  %v6135_v45 = vld [vmem:[#allocation2 + $0x47] sm:$0xff] }
 0x3cd   : > { %v5920_v6 = vpop.f32.mrf.mxu1  ;;  %v6189_v36 = vld [vmem:[#allocation2 + $0x28] sm:$0xff] }
 0x3ce   : > { %6103 = vst.msk [vmem:[#allocation2 + $0x68] sm:$0xff] %vm408_vm0, %v6071_v0  ;;  %v6074_v10 = vadd.f32 %v14478_v34, %v6035_v41  ;;  %v6033_v21 = vadd.f32 %v5920_v6, %v5727_v28  ;;  %v6133_v55 = vld [vmem:[#allocation2 + $0x27] sm:$0xff]  ;;  %v16094_v28 = vld [vmem:[#allocation30_spill] sm:$0xff]  ;;  %v5731_v41 = vadd.f32 %v14431_v31, %v5425_v59  ;;  %v5736_v59 = vadd.f32 %v16100_v53, %v5430_v5 }
 0x3cf   : > { %v11442_v23 = vpop.f32.mrf.mxu1  ;;  %v6192_v1 = vld [vmem:[#allocation2 + $0x50] sm:$0xff]  ;;  %v5125_v0 = vadd.f32 %v16095_v35, %v16094_v28 }
 0x3d0   : > { %6106 = vst.msk [vmem:[#allocation2 + $0x90] sm:$0xff] %vm408_vm0, %v6074_v10  ;;  %v6072_v15 = vadd.f32 %v14478_v34, %v6033_v21  ;;  %v6038_v63 = vadd.f32 %v11442_v23, %v5732_v39  ;;  %v6136_v62 = vld [vmem:[#allocation2 + $0x4f] sm:$0xff]  ;;  %v14566_v24 = vpack.c.bf16 %v6192_v1, %v6191_v20 }
 0x3d1   : > { %v5933_v8 = vpop.f32.mrf.mxu1  ;;  %v6190_v22 = vld [vmem:[#allocation2 + $0x30] sm:$0xff]  ;;  %v14568_v6 = vpack.c.bf16 %v6136_v62, %v6135_v45  ;;  %v5431_v7 = vadd.f32 %v16099_v61, %v5125_v0  ;;  %v16106_v62 = vld [vmem:[#allocation63_spill] sm:$0xff] }
 0x3d2   : > { %v6134_v42 = vld [vmem:[#allocation2 + $0x2f] sm:$0xff]  ;;  %6104 = vst.msk [vmem:[#allocation2 + $0x70] sm:$0xff] %vm408_vm0, %v6072_v15  ;;  %v6077_v29 = vadd.f32 %v14478_v34, %v6038_v63  ;;  %v6036_v48 = vadd.f32 %v5933_v8, %v5730_v56  ;;  %v14557_v32 = vpack.c.bf16 %v6190_v22, %v6189_v36  ;;  %v16103_v56 = vld [vmem:[#allocation22_spill] sm:$0xff]  ;;  %v5429_v57 = vadd.f32 %v16106_v62, %v5123_v47  ;;  %v16112_v45 = vld [vmem:[#allocation11_spill] sm:$0xff] }
 0x3d3   : > { %v14559_v46 = vpack.c.bf16 %v6134_v42, %v6133_v55  ;;  %v11443_v27 = vpop.f32.mrf.mxu1  ;;  %v11879_v39 = vld [vmem:[%s15878_s7 + $0x70] sm:$0xff]   ;;  %v4213_v15 = vadd.f32 %v16103_v56, %v3875_v30  ;;  %v16105_v36 = vld [vmem:[#allocation34_spill] sm:$0xff]  ;;  %v4821_v28 = vadd.f32 %v16112_v45, %v4515_v14  ;;  %v6139_v53 = vld [vmem:[#allocation2 + $0x87] sm:$0xff] }
 0x3d4   : > { %v16096_v10 = vld [vmem:[#allocation61_spill] sm:$0xff]  ;;  %6109 = vst.msk [vmem:[#allocation2 + $0xc8] sm:$0xff] %vm408_vm0, %v6077_v29  ;;  %v6075_v31 = vadd.f32 %v14478_v34, %v6036_v48  ;;  %v6039_v26 = vadd.f32 %v11443_v27, %v5733_v40  ;;  %11473 = vmatmul.mubr.msk.bf16.vlgmr.msra.gmra.mxu0 %vm408_vm0, %v14557_v32  ;;  %v5126_v40 = vadd.f32 %v16108_v12, %v16107_v4  ;;  %v16110_v29 = vld [vmem:[#allocation36_spill] sm:$0xff] }
 0x3d5   : > { %v5428_v21 = vadd.f32 %v16096_v10, %v5122_v3  ;;  %11513 = vmatmul.mubr.msk.bf16.vlgmr.msra.gmra.mxu1 %vm408_vm0, %v14559_v46  ;;  %v5936_v37 = vpop.f32.mrf.mxu1  ;;  %11476 = vmatprep.mubr.msk.bf16.mxu0 %vm408_vm0, %v14566_v24  ;;  %v16104_v63 = vld [vmem:[#allocation33_spill] sm:$0xff]  ;;  %v6193_v22 = vld [vmem:[#allocation2 + $0x68] sm:$0xff] }
 0x3d6   : > { %11516 = vmatprep.mubr.msk.bf16.mxu1 %vm408_vm0, %v14568_v6  ;;  %6107 = vst.msk [vmem:[#allocation2 + $0xa8] sm:$0xff] %vm408_vm0, %v6075_v31  ;;  %v6078_v23 = vadd.f32 %v14478_v34, %v6039_v26  ;;  %v6037_v19 = vadd.f32 %v5936_v37, %v5731_v41  ;;  %11545 = vmatpush3.bf16.msra.mxu0 %v16101_v52  ;;  %v16111_v48 = vld [vmem:[#allocation37_spill] sm:$0xff]  ;;  %v6195_v37 = vld [vmem:[#allocation2 + $0x88] sm:$0xff] }
 0x3d7   : > { %11585 = vmatpush3.bf16.msra.mxu1 %v16102_v44  ;;  %v5128_v1 = vadd.f32 %v16105_v36, %v16104_v63  ;;  %v11446_v3 = vpop.f32.mrf.mxu1  ;;  %11546 = vmatprep.subr.bf16.mxu0 %v11875_v50  ;;  %v5734_v5 = vadd.f32 %v16109_v18, %v5428_v21  ;;  %v6196_v55 = vld [vmem:[#allocation2 + $0x90] sm:$0xff]  ;;  %v5129_v20 = vadd.f32 %v16111_v48, %v16110_v29  ;;  %v6137_v21 = vld [vmem:[#allocation2 + $0x67] sm:$0xff] }
 0x3d8   : > { %11586 = vmatprep.subr.bf16.mxu1 %v11879_v39  ;;  %6110 = vst.msk [vmem:[#allocation2 + $0xd0] sm:$0xff] %vm408_vm0, %v6078_v23  ;;  %v6076_v30 = vadd.f32 %v14478_v34, %v6037_v19  ;;  %v6042_v8 = vadd.f32 %v11446_v3, %v5736_v59  ;;  %v6140_v42 = vld [vmem:[#allocation2 + $0x8f] sm:$0xff]  ;;  %v14624_v59 = vpop.f32.mrf.mxu0  ;;  %v14626_v19 = vpack.c.bf16 %v6196_v55, %v6195_v37  ;;  %v11877_v44 = vld [vmem:[%s15878_s7 + $0x40] sm:$0xff]  }
 0x3d9   : > { %v16113_v35 = vld [vmem:[#allocation81_spill] sm:$0xff]  ;;  %v5949_v10 = vpop.f32.mrf.mxu1  ;;  %v11880_v14 = vld [vmem:[%s15878_s7 + $0x68] sm:$0xff]   ;;  %v14628_v52 = vpack.c.bf16 %v6140_v42, %v6139_v53  ;;  %v11881_v36 = vld [vmem:[%s15878_s7 + $0x60] sm:$0xff]  }
 0x3da   : > { %v5737_v0 = vadd.f32 %v16113_v35, %v5431_v7  ;;  %v16114_v41 = vld [vmem:[#allocation65_spill] sm:$0xff]  ;;  %6108 = vst.msk [vmem:[#allocation2 + $0xb0] sm:$0xff] %vm408_vm0, %v6076_v30  ;;  %v6081_v58 = vadd.f32 %v14478_v34, %v6042_v8  ;;  %v6040_v25 = vadd.f32 %v5949_v10, %v5734_v5  ;;  %11547 = vmatpush3.bf16.msra.mxu0 %v11875_v50  ;;  %v16115_v50 = vld [vmem:[#allocation66_spill] sm:$0xff]  ;;  %v16118_v3 = vld [vmem:[#allocation68_spill] sm:$0xff]  ;;  %v14658_v48 = vpop.f32.mrf.mxu0 }
 0x3db   : > { %v5434_v27 = vadd.f32 %v16114_v41, %v5128_v1  ;;  %v6194_v31 = vld [vmem:[#allocation2 + $0x70] sm:$0xff]  ;;  %v5735_v7 = vadd.f32 %v14462_v54, %v5429_v57  ;;  %v11447_v23 = vpop.f32.mrf.mxu1  ;;  %11548 = vmatprep.subr.bf16.mxu0 %v11876_v9  ;;  %11587 = vmatpush3.bf16.msra.mxu1 %v11879_v39  ;;  %v5432_v56 = vadd.f32 %v16115_v50, %v5126_v40  ;;  %v16116_v1 = vld [vmem:[#allocation23_spill] sm:$0xff]  ;;  %v16117_v39 = vld [vmem:[#allocation38_spill] sm:$0xff] }
 0x3dc   : > { %v6138_v26 = vld [vmem:[#allocation2 + $0x6f] sm:$0xff]  ;;  %v14616_v47 = vpack.c.bf16 %v6194_v31, %v6193_v22  ;;  %6113 = vst.msk [vmem:[#allocation2 + $0x108] sm:$0xff] %vm408_vm0, %v6081_v58  ;;  %v6079_v63 = vadd.f32 %v14478_v34, %v6040_v25  ;;  %v6043_v54 = vadd.f32 %v11447_v23, %v5737_v0  ;;  %v4519_v62 = vadd.f32 %v16116_v1, %v4213_v15  ;;  %v16119_v15 = vld [vmem:[#allocation6_spill] sm:$0xff]  ;;  %v16120_v8 = vld [vmem:[#allocation39_spill] sm:$0xff] }
 0x3dd   : > { %v14618_v61 = vpack.c.bf16 %v6138_v26, %v6137_v21  ;;  %v5127_v57 = vadd.f32 %v16117_v39, %v4821_v28  ;;  %v5435_v4 = vadd.f32 %v16118_v3, %v5129_v20  ;;  %v5952_v12 = vpop.f32.mrf.mxu1  ;;  %v5740_v40 = vadd.f32 %v14473_v16, %v5434_v27  ;;  %11588 = vmatprep.subr.bf16.mxu1 %v11880_v14  ;;  %v16121_v22 = vld [vmem:[#allocation12_spill] sm:$0xff]  ;;  %v16122_v42 = vld [vmem:[#allocation69_spill] sm:$0xff]  ;;  %v14663_v16 = vld [vmem:[%s15878_s7 + $0x98] sm:$0xff]   ;;  %v14687_v3 = vpop.f32.mrf.mxu0 }
 0x3de   : > { %11477 = vmatmul.mubr.msk.bf16.gmra.mxu0 %vm408_vm0, %v14616_v47  ;;  %6111 = vst.msk [vmem:[#allocation2 + $0xe8] sm:$0xff] %vm408_vm0, %v6079_v63  ;;  %v6082_v18 = vadd.f32 %v14478_v34, %v6043_v54  ;;  %v6041_v5 = vadd.f32 %v5952_v12, %v5735_v7  ;;  %v4217_v30 = vadd.f32 %v16119_v15, %v14537_v43  ;;  %v16124_v45 = vld [vmem:[#allocation41_spill] sm:$0xff]  ;;  %v6197_v41 = vld [vmem:[#allocation2 + $0xa8] sm:$0xff]  ;;  %v16125_v31 = vld [vmem:[#allocation42_spill] sm:$0xff] }
 0x3df   : > { %11517 = vmatmul.mubr.msk.bf16.gmra.mxu1 %vm408_vm0, %v14618_v61  ;;  %11480 = vmatprep.mubr.msk.bf16.mxu0 %vm408_vm0, %v14626_v19  ;;  %v5132_v55 = vadd.f32 %v16121_v22, %v16120_v8  ;;  %v5433_v29 = vadd.f32 %v16122_v42, %v5127_v57  ;;  %v11450_v20 = vpop.f32.mrf.mxu1  ;;  %v5738_v43 = vadd.f32 %v14490_v49, %v5432_v56  ;;  %v6200_v27 = vld [vmem:[#allocation2 + $0xd0] sm:$0xff]  ;;  %v16126_v21 = vld [vmem:[#allocation43_spill] sm:$0xff]  ;;  %v6199_v39 = vld [vmem:[#allocation2 + $0xc8] sm:$0xff] }
 0x3e0   : > { %11520 = vmatprep.mubr.msk.bf16.mxu1 %vm408_vm0, %v14628_v52  ;;  %11549 = vmatpush3.bf16.msra.mxu0 %v11876_v9  ;;  %v16123_v9 = vld [vmem:[#allocation40_spill] sm:$0xff]  ;;  %6114 = vst.msk [vmem:[#allocation2 + $0x110] sm:$0xff] %vm408_vm0, %v6082_v18  ;;  %v6080_v35 = vadd.f32 %v14478_v34, %v6041_v5  ;;  %v6046_v0 = vadd.f32 %v11450_v20, %v5740_v40  ;;  %v16127_v58 = vld [vmem:[#allocation13_spill] sm:$0xff]  ;;  %v16128_v53 = vld [vmem:[#allocation71_spill] sm:$0xff] }
 0x3e1   : > { %11550 = vmatprep.subr.bf16.mxu0 %v11877_v44  ;;  %11589 = vmatpush3.bf16.msra.mxu1 %v11880_v14  ;;  %v5130_v28 = vadd.f32 %v16124_v45, %v16123_v9  ;;  %v6144_v10 = vld [vmem:[#allocation2 + $0xcf] sm:$0xff]  ;;  %v5133_v26 = vadd.f32 %v16126_v21, %v16125_v31  ;;  %v4825_v25 = vadd.f32 %v16127_v58, %v4519_v62  ;;  %v5965_v7 = vpop.f32.mrf.mxu1  ;;  %v6141_v23 = vld [vmem:[#allocation2 + $0xa7] sm:$0xff]  ;;  %v11423_v21 = vpop.f32.mrf.mxu0 }
 0x3e2   : > { %11590 = vmatprep.subr.bf16.mxu1 %v11881_v36  ;;  %v5741_v37 = vadd.f32 %v14505_v2, %v5435_v4  ;;  %v5438_v14 = vadd.f32 %v16128_v53, %v5132_v55  ;;  %v6198_v49 = vld [vmem:[#allocation2 + $0xb0] sm:$0xff]  ;;  %6112 = vst.msk [vmem:[#allocation2 + $0xf0] sm:$0xff] %vm408_vm0, %v6080_v35  ;;  %v6085_v56 = vadd.f32 %v14478_v34, %v6046_v0  ;;  %v6143_v57 = vld [vmem:[#allocation2 + $0xc7] sm:$0xff]  ;;  %v14684_v2 = vld [vmem:[%s15878_s7 + $0xb8] sm:$0xff]  }
 0x3e3   : > { %v6142_v50 = vld [vmem:[#allocation2 + $0xaf] sm:$0xff]  ;;  %v6044_v63 = vadd.f32 %v5965_v7, %v5738_v43  ;;  %v14677_v54 = vpack.c.bf16 %v6198_v49, %v6197_v41  ;;  %v5739_v62 = vadd.f32 %v14520_v13, %v5433_v29  ;;  %v11451_v4 = vpop.f32.mrf.mxu1  ;;  %v14689_v12 = vpack.c.bf16 %v6200_v27, %v6199_v39  ;;  %v16133_v29 = vld [vmem:[#allocation18_spill] sm:$0xff] }
 0x3e4   : > { %v14679_v1 = vpack.c.bf16 %v6142_v50, %v6141_v23  ;;  %11551 = vmatpush3.bf16.msra.mxu0 %v11877_v44  ;;  %v14691_v40 = vpack.c.bf16 %v6144_v10, %v6143_v57  ;;  %v16129_v18 = vld [vmem:[#allocation72_spill] sm:$0xff]  ;;  %6117 = vst.msk [vmem:[#allocation2 + $0x148] sm:$0xff] %vm408_vm0, %v6085_v56  ;;  %v6047_v15 = vadd.f32 %v11451_v4, %v5741_v37  ;;  %v16131_v22 = vld [vmem:[#allocation73_spill] sm:$0xff]  ;;  %v16136_v41 = vld [vmem:[#allocation46_spill] sm:$0xff] }
 0x3e5   : > { %11591 = vmatpush3.bf16.msra.mxu1 %v11881_v36  ;;  %11624 = vmatprep.subr.bf16.mxu0 %v14663_v16  ;;  %v5436_v5 = vadd.f32 %v16129_v18, %v5130_v28  ;;  %v6083_v44 = vadd.f32 %v14478_v34, %v6044_v63  ;;  %v16130_v13 = vld [vmem:[#allocation44_spill] sm:$0xff]  ;;  %v5439_v55 = vadd.f32 %v16131_v22, %v5133_v26  ;;  %v5968_v36 = vpop.f32.mrf.mxu1  ;;  %v16132_v42 = vld [vmem:[#allocation17_spill] sm:$0xff]  ;;  %v16137_v10 = vld [vmem:[#allocation74_spill] sm:$0xff] }
 0x3e6   : > { %11481 = vmatmul.mubr.msk.bf16.gmra.mxu0 %vm408_vm0, %v14677_v54  ;;  %v5131_v8 = vadd.f32 %v16130_v13, %v4825_v25  ;;  %v3907_v20 = vadd.f32 %v16133_v29, %v16132_v42  ;;  %v5744_v9 = vadd.f32 %v14544_v38, %v5438_v14  ;;  %v6086_v45 = vadd.f32 %v14478_v34, %v6047_v15  ;;  %v16134_v43 = vld [vmem:[#allocation24_spill] sm:$0xff]  ;;  %v16135_v0 = vld [vmem:[#allocation45_spill] sm:$0xff]  ;;  %v16141_v56 = vld [vmem:[#allocation50_spill] sm:$0xff] }
 0x3e7   : > { %11521 = vmatmul.mubr.msk.bf16.gmra.mxu1 %vm408_vm0, %v14679_v1  ;;  %11484 = vmatprep.mubr.msk.bf16.mxu0 %vm408_vm0, %v14689_v12  ;;  %6115 = vst.msk [vmem:[#allocation2 + $0x128] sm:$0xff] %vm408_vm0, %v6083_v44  ;;  %v6045_v28 = vadd.f32 %v5968_v36, %v5739_v62  ;;  %v4523_v35 = vadd.f32 %v16134_v43, %v4217_v30  ;;  %v11454_v26 = vpop.f32.mrf.mxu1  ;;  %v16138_v58 = vld [vmem:[#allocation25_spill] sm:$0xff]  ;;  %v6201_v14 = vld [vmem:[#allocation2 + $0xe8] sm:$0xff]  ;;  %v16139_v30 = vld [vmem:[#allocation47_spill] sm:$0xff] }
 0x3e8   : > { %11524 = vmatprep.mubr.msk.bf16.mxu1 %vm408_vm0, %v14691_v40  ;;  %11664 = vmatprep.subr.bf16.mxu1 %v14684_v2  ;;  %v5136_v27 = vadd.f32 %v16136_v41, %v16135_v0  ;;  %v5437_v31 = vadd.f32 %v16137_v10, %v5131_v8  ;;  %v4221_v25 = vadd.f32 %v16138_v58, %v3907_v20  ;;  %v6204_v7 = vld [vmem:[#allocation2 + $0x110] sm:$0xff]  ;;  %v16140_v23 = vld [vmem:[#allocation48_spill] sm:$0xff]  ;;  %v16144_v29 = vld [vmem:[#allocation14_spill] sm:$0xff]  ;;  %v5694_v20 = vpop.f32.mrf.mxu0 }
 0x3e9   : > { %v5742_v38 = vadd.f32 %v14564_v11, %v5436_v5  ;;  %6118 = vst.msk [vmem:[#allocation2 + $0x150] sm:$0xff] %vm408_vm0, %v6086_v45  ;;  %v6084_v37 = vadd.f32 %v14478_v34, %v6045_v28  ;;  %v6050_v53 = vadd.f32 %v11454_v26, %v5744_v9  ;;  %v6148_v49 = vld [vmem:[#allocation2 + $0x10f] sm:$0xff]  ;;  %v5134_v50 = vadd.f32 %v16140_v23, %v16139_v30  ;;  %v5981_v4 = vpop.f32.mrf.mxu1  ;;  %v6145_v11 = vld [vmem:[#allocation2 + $0xe7] sm:$0xff] }
 0x3ea   : > { %v4829_v63 = vadd.f32 %v16141_v56, %v4523_v35  ;;  %v5745_v39 = vadd.f32 %v14599_v60, %v5439_v55  ;;  %v16142_v57 = vld [vmem:[#allocation76_spill] sm:$0xff]  ;;  %v6202_v18 = vld [vmem:[#allocation2 + $0xf0] sm:$0xff]  ;;  %v5743_v55 = vadd.f32 %v14624_v59, %v5437_v31  ;;  %v16146_v59 = vld [vmem:[#allocation51_spill] sm:$0xff]  ;;  %v11426_v26 = vpop.f32.mrf.mxu0 }
 0x3eb   : > { %v5442_v62 = vadd.f32 %v16142_v57, %v5136_v27  ;;  %v6146_v5 = vld [vmem:[#allocation2 + $0xef] sm:$0xff]  ;;  %6116 = vst.msk [vmem:[#allocation2 + $0x130] sm:$0xff] %vm408_vm0, %v6084_v37  ;;  %v6089_v44 = vadd.f32 %v14478_v34, %v6050_v53  ;;  %v6048_v15 = vadd.f32 %v5981_v4, %v5742_v38  ;;  %v14728_v13 = vpack.c.bf16 %v6202_v18, %v6201_v14  ;;  %v6147_v36 = vld [vmem:[#allocation2 + $0x107] sm:$0xff]  ;;  %v11455_v9 = vpop.f32.mrf.mxu1  ;;  %v16148_v14 = vld [vmem:[#allocation26_spill] sm:$0xff] }
 0x3ec   : > { %v14730_v8 = vpack.c.bf16 %v6146_v5, %v6145_v11  ;;  %v6203_v22 = vld [vmem:[#allocation2 + $0x108] sm:$0xff]  ;;  %v16143_v42 = vld [vmem:[#allocation49_spill] sm:$0xff]  ;;  %v14737_v28 = vpack.c.bf16 %v6148_v49, %v6147_v36  ;;  %v6051_v41 = vadd.f32 %v11455_v9, %v5745_v39  ;;  %v5135_v27 = vadd.f32 %v16146_v59, %v4829_v63  ;;  %v16147_v10 = vld [vmem:[#allocation79_spill] sm:$0xff] }
 0x3ed   : > { %v5137_v60 = vadd.f32 %v16144_v29, %v16143_v42  ;;  %v14735_v45 = vpack.c.bf16 %v6204_v7, %v6203_v22  ;;  %v16145_v43 = vld [vmem:[#allocation77_spill] sm:$0xff]  ;;  %6121 = vst.msk [vmem:[#allocation2 + $0x188] sm:$0xff] %vm408_vm0, %v6089_v44  ;;  %v6087_v0 = vadd.f32 %v14478_v34, %v6048_v15  ;;  %v5984_v58 = vpop.f32.mrf.mxu1  ;;  %v5748_v38 = vadd.f32 %v14658_v48, %v5442_v62  ;;  %v16149_v49 = vld [vmem:[#allocation52_spill] sm:$0xff]  ;;  %v16152_v11 = vld [vmem:[#allocation55_spill] sm:$0xff]  ;;  %v5707_v29 = vpop.f32.mrf.mxu0 }
 0x3ee   : > { %v5440_v35 = vadd.f32 %v16145_v43, %v5134_v50  ;;  %11485 = vmatmul.mubr.msk.bf16.gmra.mxu0 %vm408_vm0, %v14728_v13  ;;  %v6090_v37 = vadd.f32 %v14478_v34, %v6051_v41  ;;  %v6049_v53 = vadd.f32 %v5984_v58, %v5743_v55  ;;  %v4527_v7 = vadd.f32 %v16148_v14, %v4221_v25  ;;  %v16150_v30 = vld [vmem:[#allocation53_spill] sm:$0xff]  ;;  %v16151_v50 = vld [vmem:[#allocation80_spill] sm:$0xff]  ;;  %v16154_v25 = vld [vmem:[#allocation19_spill] sm:$0xff] }
 0x3ef   : > { %11525 = vmatmul.mubr.msk.bf16.gmra.mxu1 %vm408_vm0, %v14730_v8  ;;  %v5443_v31 = vadd.f32 %v16147_v10, %v5137_v60  ;;  %11488 = vmatprep.mubr.msk.bf16.mxu0 %vm408_vm0, %v14735_v45  ;;  %6119 = vst.msk [vmem:[#allocation2 + $0x168] sm:$0xff] %vm408_vm0, %v6087_v0  ;;  %v5140_v23 = vadd.f32 %v16150_v30, %v16149_v49  ;;  %v11458_v63 = vpop.f32.mrf.mxu1  ;;  %v6205_v62 = vld [vmem:[#allocation2 + $0x128] sm:$0xff]  ;;  %v16155_v36 = vld [vmem:[#allocation82_spill] sm:$0xff]  ;;  %v16156_v10 = vld [vmem:[#allocation15_spill] sm:$0xff]  ;;  %v11427_v30 = vpop.f32.mrf.mxu0 }
 0x3f0   : > { %11528 = vmatprep.mubr.msk.bf16.mxu1 %vm408_vm0, %v14737_v28  ;;  %v5441_v56 = vadd.f32 %v16151_v50, %v5135_v27  ;;  %v5746_v39 = vadd.f32 %v14687_v3, %v5440_v35  ;;  %6122 = vst.msk [vmem:[#allocation2 + $0x190] sm:$0xff] %vm408_vm0, %v6090_v37  ;;  %v6088_v57 = vadd.f32 %v14478_v34, %v6049_v53  ;;  %v6208_v4 = vld [vmem:[#allocation2 + $0x150] sm:$0xff]  ;;  %v16153_v5 = vld [vmem:[#allocation56_spill] sm:$0xff] }
 0x3f1   : > { %v6054_v48 = vadd.f32 %v11458_v63, %v5748_v38  ;;  %v6152_v18 = vld [vmem:[#allocation2 + $0x14f] sm:$0xff]  ;;  %v5138_v44 = vadd.f32 %v16153_v5, %v16152_v11  ;;  %v4833_v15 = vadd.f32 %v16154_v25, %v4527_v7  ;;  %v5749_v22 = vadd.f32 %v11423_v21, %v5443_v31  ;;  %v5997_v60 = vpop.f32.mrf.mxu1  ;;  %v6149_v3 = vld [vmem:[#allocation2 + $0x127] sm:$0xff]  ;;  %v5710_v25 = vpop.f32.mrf.mxu0 }
 0x3f2   : > { %v5446_v42 = vadd.f32 %v16155_v36, %v5140_v23  ;;  %v6206_v55 = vld [vmem:[#allocation2 + $0x130] sm:$0xff]  ;;  %6120 = vst.msk [vmem:[#allocation2 + $0x170] sm:$0xff] %vm408_vm0, %v6088_v57  ;;  %v6052_v35 = vadd.f32 %v5997_v60, %v5746_v39  ;;  %v6207_v59 = vld [vmem:[#allocation2 + $0x148] sm:$0xff]  ;;  %v5747_v58 = vadd.f32 %v5694_v20, %v5441_v56 }
 0x3f3   : > { %v6150_v9 = vld [vmem:[#allocation2 + $0x12f] sm:$0xff]  ;;  %v6093_v43 = vadd.f32 %v14478_v34, %v6054_v48  ;;  %v14768_v0 = vpack.c.bf16 %v6206_v55, %v6205_v62  ;;  %v6151_v27 = vld [vmem:[#allocation2 + $0x147] sm:$0xff]  ;;  %v11459_v38 = vpop.f32.mrf.mxu1  ;;  %v14774_v37 = vpack.c.bf16 %v6208_v4, %v6207_v59  ;;  %v5444_v14 = vadd.f32 %v14457_v33, %v5138_v44  ;;  %v16158_v33 = vld [vmem:[#allocation54_spill] sm:$0xff] }
 0x3f4   : > { %v14770_v41 = vpack.c.bf16 %v6150_v9, %v6149_v3  ;;  %v16157_v21 = vld [vmem:[#allocation57_spill] sm:$0xff]  ;;  %v14776_v53 = vpack.c.bf16 %v6152_v18, %v6151_v27  ;;  %v6091_v7 = vadd.f32 %v14478_v34, %v6052_v35  ;;  %v6055_v49 = vadd.f32 %v11459_v38, %v5749_v22  ;;  %v6211_v55 = vld [vmem:[#allocation2 + $0x188] sm:$0xff] }
 0x3f5   : > { %v5141_v31 = vadd.f32 %v16157_v21, %v16156_v10  ;;  %6125 = vst.msk [vmem:[#allocation2 + $0x1c8] sm:$0xff] %vm408_vm0, %v6093_v43  ;;  %v6000_v23 = vpop.f32.mrf.mxu1  ;;  %v5139_v50 = vadd.f32 %v16158_v33, %v4833_v15  ;;  %v5752_v56 = vadd.f32 %v11426_v26, %v5446_v42  ;;  %v5750_v48 = vadd.f32 %v5707_v29, %v5444_v14  ;;  %v6155_v3 = vld [vmem:[#allocation2 + $0x187] sm:$0xff] }
 0x3f6   : > { %11489 = vmatmul.mubr.msk.bf16.gmra.mxu0 %vm408_vm0, %v14768_v0  ;;  %6123 = vst.msk [vmem:[#allocation2 + $0x1a8] sm:$0xff] %vm408_vm0, %v6091_v7  ;;  %v6094_v63 = vadd.f32 %v14478_v34, %v6055_v49  ;;  %v6053_v39 = vadd.f32 %v6000_v23, %v5747_v58  ;;  %v6209_v18 = vld [vmem:[#allocation2 + $0x168] sm:$0xff] }
 0x3f7   : > { %11529 = vmatmul.mubr.msk.bf16.gmra.mxu1 %vm408_vm0, %v14770_v41  ;;  %v5447_v20 = vadd.f32 %v14464_v51, %v5141_v31  ;;  %11492 = vmatprep.mubr.msk.bf16.mxu0 %vm408_vm0, %v14774_v37  ;;  %v11462_v57 = vpop.f32.mrf.mxu1  ;;  %v5445_v51 = vadd.f32 %v14468_v17, %v5139_v50  ;;  %v6212_v11 = vld [vmem:[#allocation2 + $0x190] sm:$0xff]  ;;  %v6153_v22 = vld [vmem:[#allocation2 + $0x167] sm:$0xff] }
 0x3f8   : > { %11532 = vmatprep.mubr.msk.bf16.mxu1 %vm408_vm0, %v14776_v53  ;;  %6126 = vst.msk [vmem:[#allocation2 + $0x1d0] sm:$0xff] %vm408_vm0, %v6094_v63  ;;  %v6092_v62 = vadd.f32 %v14478_v34, %v6053_v39  ;;  %v6058_v4 = vadd.f32 %v11462_v57, %v5752_v56  ;;  %v6156_v5 = vld [vmem:[#allocation2 + $0x18f] sm:$0xff]  ;;  %v14802_v43 = vpack.c.bf16 %v6212_v11, %v6211_v55 }
 0x3f9   : > { %v5753_v44 = vadd.f32 %v11427_v30, %v5447_v20  ;;  %v6013_v26 = vpop.f32.mrf.mxu1  ;;  %v6210_v15 = vld [vmem:[#allocation2 + $0x170] sm:$0xff]  ;;  %v14804_v35 = vpack.c.bf16 %v6156_v5, %v6155_v3  ;;  %v5751_v59 = vadd.f32 %v5710_v25, %v5445_v51 }
 0x3fa   : > { %v6154_v36 = vld [vmem:[#allocation2 + $0x16f] sm:$0xff]  ;;  %6124 = vst.msk [vmem:[#allocation2 + $0x1b0] sm:$0xff] %vm408_vm0, %v6092_v62  ;;  %v6097_v42 = vadd.f32 %v14478_v34, %v6058_v4  ;;  %v6056_v29 = vadd.f32 %v6013_v26, %v5750_v48  ;;  %v14798_v17 = vpack.c.bf16 %v6210_v15, %v6209_v18 }
 0x3fb   : > { %v14800_v60 = vpack.c.bf16 %v6154_v36, %v6153_v22  ;;  %v11463_v9 = vpop.f32.mrf.mxu1  ;;  %v6711_v48 = vld [vmem:[#allocation2 + $0x11] sm:$0xff]  ;;  %v6712_v25 = vld [vmem:[#allocation2 + $0x29] sm:$0xff] }
 0x3fc   : > { %6129 = vst.msk [vmem:[#allocation2 + $0x208] sm:$0xff] %vm408_vm0, %v6097_v42  ;;  %v6095_v27 = vadd.f32 %v14478_v34, %v6056_v29  ;;  %v6059_v10 = vadd.f32 %v11463_v9, %v5753_v44  ;;  %v6215_v56 = vld [vmem:[#allocation2 + $0x1c8] sm:$0xff]  ;;  %v6713_v26 = vld [vmem:[#allocation2 + $0x31] sm:$0xff] }
 0x3fd   : > { %v6016_v21 = vpop.f32.mrf.mxu1  ;;  %v6213_v14 = vld [vmem:[#allocation2 + $0x1a8] sm:$0xff]  ;;  %v6715_v22 = vld [vmem:[#allocation2 + $0x51] sm:$0xff]  ;;  %v14848_v36 = vpack.c.bf16 %v6713_v26, %v6712_v25 }
 0x3fe   : > { %11493 = vmatmul.mubr.msk.bf16.gmra.mxu0 %vm408_vm0, %v14798_v17  ;;  %6127 = vst.msk [vmem:[#allocation2 + $0x1e8] sm:$0xff] %vm408_vm0, %v6095_v27  ;;  %v6098_v31 = vadd.f32 %v14478_v34, %v6059_v10  ;;  %v6057_v58 = vadd.f32 %v6016_v21, %v5751_v59  ;;  %v6157_v30 = vld [vmem:[#allocation2 + $0x1a7] sm:$0xff]  ;;  %v11883_v29 = vld [vmem:[%s15878_s7 + $0x90] sm:$0xff]   ;;  %v14895_v21 = vld [vmem:[%s15878_s7 + $0xd8] sm:$0xff]  }
 0x3ff   : > { %11533 = vmatmul.mubr.msk.bf16.gmra.mxu1 %vm408_vm0, %v14800_v60  ;;  %11496 = vmatprep.mubr.msk.bf16.mxu0 %vm408_vm0, %v14802_v43  ;;  %v6216_v7 = vld [vmem:[#allocation2 + $0x1d0] sm:$0xff]  ;;  %v6159_v63 = vld [vmem:[#allocation2 + $0x1c7] sm:$0xff] }
 0x400   : > { %11536 = vmatprep.mubr.msk.bf16.mxu1 %vm408_vm0, %v14804_v35  ;;  %6130 = vst.msk [vmem:[#allocation2 + $0x210] sm:$0xff] %vm408_vm0, %v6098_v31  ;;  %v6096_v38 = vadd.f32 %v14478_v34, %v6057_v58  ;;  %v6160_v49 = vld [vmem:[#allocation2 + $0x1cf] sm:$0xff]  ;;  %v14825_v39 = vpack.c.bf16 %v6216_v7, %v6215_v56 }
 0x401   : > { %v6214_v20 = vld [vmem:[#allocation2 + $0x1b0] sm:$0xff]  ;;  %v14827_v57 = vpack.c.bf16 %v6160_v49, %v6159_v63 }
 0x402   : > { %v6158_v23 = vld [vmem:[#allocation2 + $0x1af] sm:$0xff]  ;;  %6128 = vst.msk [vmem:[#allocation2 + $0x1f0] sm:$0xff] %vm408_vm0, %v6096_v38  ;;  %v14821_v33 = vpack.c.bf16 %v6214_v20, %v6213_v14 }
 0x403   : > { %v14823_v50 = vpack.c.bf16 %v6158_v23, %v6157_v30  ;;  %v6710_v34 = vld [vmem:[#allocation2 + $0x9] sm:$0xff]  ;;  %v6717_v9 = vld [vmem:[#allocation2 + $0x71] sm:$0xff] }
 0x404   : > { %v6742_v11 = vpack.c.bf16 %v6711_v48, %v6710_v34  ;;  %v6714_v15 = vld [vmem:[#allocation2 + $0x49] sm:$0xff]  ;;  %v6719_v27 = vld [vmem:[#allocation2 + $0x91] sm:$0xff] }
 0x405   : > { %v6217_v51 = vld [vmem:[#allocation2 + $0x1e8] sm:$0xff]  ;;  %v14850_v42 = vpack.c.bf16 %v6715_v22, %v6714_v15  ;;  %v11887_v55 = vld [vmem:[%s15878_s7 + $0xb0] sm:$0xff]  }
 0x406   : > { %11497 = vmatmul.mubr.msk.bf16.gmra.mxu0 %vm408_vm0, %v14821_v33  ;;  %v6161_v4 = vld [vmem:[#allocation2 + $0x1e7] sm:$0xff]  ;;  %v6721_v58 = vld [vmem:[#allocation2 + $0xb1] sm:$0xff] }
 0x407   : > { %11537 = vmatmul.mubr.msk.bf16.gmra.mxu1 %vm408_vm0, %v14823_v50  ;;  %11500 = vmatprep.mubr.msk.bf16.mxu0 %vm408_vm0, %v14825_v39  ;;  %v6716_v3 = vld [vmem:[#allocation2 + $0x69] sm:$0xff]  ;;  %v6723_v14 = vld [vmem:[#allocation2 + $0xd1] sm:$0xff] }
 0x408   : > { %11540 = vmatprep.mubr.msk.bf16.mxu1 %vm408_vm0, %v14827_v57  ;;  %v6718_v59 = vld [vmem:[#allocation2 + $0x89] sm:$0xff]  ;;  %v14874_v10 = vpack.c.bf16 %v6717_v9, %v6716_v3  ;;  %v6725_v20 = vld [vmem:[#allocation2 + $0xf1] sm:$0xff] }
 0x409   : > { %v6218_v62 = vld [vmem:[#allocation2 + $0x1f0] sm:$0xff] }
 0x40a   : > { %v6162_v18 = vld [vmem:[#allocation2 + $0x1ef] sm:$0xff]  ;;  %v14837_v5 = vpack.c.bf16 %v6218_v62, %v6217_v51 }
 0x40b   : > { %v14839_v44 = vpack.c.bf16 %v6162_v18, %v6161_v4  ;;  %v6720_v31 = vld [vmem:[#allocation2 + $0xa9] sm:$0xff]  ;;  %v6727_v23 = vld [vmem:[#allocation2 + $0x111] sm:$0xff] }
 0x40c   : > { %v6722_v38 = vld [vmem:[#allocation2 + $0xc9] sm:$0xff]  ;;  %v14902_v7 = vpack.c.bf16 %v6721_v58, %v6720_v31  ;;  %v6731_v48 = vld [vmem:[#allocation2 + $0x151] sm:$0xff] }
 0x40d   : > { %v6724_v49 = vld [vmem:[#allocation2 + $0xe9] sm:$0xff]  ;;  %v6735_v18 = vld [vmem:[#allocation2 + $0x191] sm:$0xff] }
 0x40e   : > { %11501 = vmatmul.mubr.msk.bf16.gmra.mxu0 %vm408_vm0, %v14837_v5  ;;  %v6726_v30 = vld [vmem:[#allocation2 + $0x109] sm:$0xff]  ;;  %v14916_v56 = vpack.c.bf16 %v6725_v20, %v6724_v49  ;;  %v6739_v15 = vld [vmem:[#allocation2 + $0x1d1] sm:$0xff] }
 0x40f   : > { %11541 = vmatmul.mubr.msk.bf16.gmra.mxu1 %vm408_vm0, %v14839_v44  ;;  %11552 = vmatprep.mubr.msk.bf16.mxu0 %vm408_vm0, %v6742_v11  ;;  %v14918_v63 = vpack.c.bf16 %v6727_v23, %v6726_v30  ;;  %v6730_v34 = vld [vmem:[#allocation2 + $0x149] sm:$0xff] }
 0x410   : > { %11592 = vmatprep.mubr.msk.bf16.mxu1 %vm408_vm0, %v14559_v46  ;;  %v11884_v46 = vld [vmem:[%s15878_s7 + $0x88] sm:$0xff]   ;;  %v14930_v62 = vpack.c.bf16 %v6731_v48, %v6730_v34 }
 0x411   : > { %v6734_v4 = vld [vmem:[#allocation2 + $0x189] sm:$0xff] }
 0x412   : > { %v14942_v25 = vpack.c.bf16 %v6735_v18, %v6734_v4  ;;  %v6738_v26 = vld [vmem:[#allocation2 + $0x1c9] sm:$0xff] }
 0x413   : > { %v8002_v31 = vld [vmem:[#allocation2 + $0x87] sm:$0xff]  ;;  %v8007_v48 = vld [vmem:[#allocation2 + $0xcf] sm:$0xff] }
 0x414   : > { %v8324_v58 = vld [vmem:[#allocation2 + $0x88] sm:$0xff] }
 0x416   : > { %11553 = vmatmul.mubr.msk.bf16.vlgmr.msra.gmra.mxu0 %vm408_vm0, %v14848_v36 }
 0x417   : > { %11593 = vmatmul.mubr.msk.bf16.vlgmr.msra.gmra.mxu1 %vm408_vm0, %v14568_v6  ;;  %11556 = vmatprep.mubr.msk.bf16.mxu0 %vm408_vm0, %v14850_v42  ;;  %v11888_v6 = vld [vmem:[%s15878_s7 + $0xa8] sm:$0xff]  }
 0x418   : > { %11596 = vmatprep.mubr.msk.bf16.mxu1 %vm408_vm0, %v14618_v61  ;;  %11625 = vmatpush3.bf16.msra.mxu0 %v14663_v16  ;;  %v14876_v61 = vpack.c.bf16 %v6719_v27, %v6718_v59  ;;  %v11885_v16 = vld [vmem:[%s15878_s7 + $0x80] sm:$0xff]   ;;  %v8323_v59 = vld [vmem:[#allocation2 + $0x70] sm:$0xff] }
 0x419   : > { %11665 = vmatpush3.bf16.msra.mxu1 %v14684_v2  ;;  %11626 = vmatprep.subr.bf16.mxu0 %v11883_v29  ;;  %v11889_v2 = vld [vmem:[%s15878_s7 + $0xa0] sm:$0xff]   ;;  %v8003_v27 = vld [vmem:[#allocation2 + $0x8f] sm:$0xff] }
 0x41a   : > { %11666 = vmatprep.subr.bf16.mxu1 %v11887_v55 }
 0x41c   : > { %11627 = vmatpush3.bf16.msra.mxu0 %v11883_v29  ;;  %v6756_v29 = vpack.c.bf16 %v6739_v15, %v6738_v26 }
 0x41d   : > { %11667 = vmatpush3.bf16.msra.mxu1 %v11887_v55  ;;  %11628 = vmatprep.subr.bf16.mxu0 %v11884_v46  ;;  %v6741_v55 = vld [vmem:[#allocation2 + $0x1f1] sm:$0xff] }
 0x41e   : > { %11668 = vmatprep.subr.bf16.mxu1 %v11888_v6  ;;  %11557 = vmatmul.mubr.msk.bf16.gmra.mxu0 %vm408_vm0, %v14874_v10 }
 0x41f   : > { %11597 = vmatmul.mubr.msk.bf16.gmra.mxu1 %vm408_vm0, %v14628_v52  ;;  %11560 = vmatprep.mubr.msk.bf16.mxu0 %vm408_vm0, %v14876_v61  ;;  %v14900_v52 = vld [vmem:[%s15878_s7 + $0xf8] sm:$0xff]  }
 0x420   : > { %11600 = vmatprep.mubr.msk.bf16.mxu1 %vm408_vm0, %v14679_v1  ;;  %11629 = vmatpush3.bf16.msra.mxu0 %v11884_v46  ;;  %v14904_v1 = vpack.c.bf16 %v6723_v14, %v6722_v38  ;;  %v7063_v46 = vld [vmem:[#allocation2 + $0x20f] sm:$0xff] }
 0x421   : > { %11669 = vmatpush3.bf16.msra.mxu1 %v11888_v6  ;;  %11630 = vmatprep.subr.bf16.mxu0 %v11885_v16  ;;  %v11899_v14 = vld [vmem:[%s15878_s7 + $0x110] sm:$0xff]  }
 0x422   : > { %11670 = vmatprep.subr.bf16.mxu1 %v11889_v2 }
 0x424   : > { %11631 = vmatpush3.bf16.msra.mxu0 %v11885_v16  ;;  %v8322_v16 = vld [vmem:[#allocation2 + $0x68] sm:$0xff] }
 0x425   : > { %11671 = vmatpush3.bf16.msra.mxu1 %v11889_v2  ;;  %11704 = vmatprep.subr.bf16.mxu0 %v14895_v21 }
 0x426   : > { %11744 = vmatprep.subr.bf16.mxu1 %v14900_v52  ;;  %11561 = vmatmul.mubr.msk.bf16.gmra.mxu0 %vm408_vm0, %v14902_v7 }
 0x427   : > { %11601 = vmatmul.mubr.msk.bf16.gmra.mxu1 %vm408_vm0, %v14691_v40  ;;  %11564 = vmatprep.mubr.msk.bf16.mxu0 %vm408_vm0, %v14904_v1  ;;  %v6728_v40 = vld [vmem:[#allocation2 + $0x129] sm:$0xff] }
 0x428   : > { %11604 = vmatprep.mubr.msk.bf16.mxu1 %vm408_vm0, %v14730_v8  ;;  %v6729_v8 = vld [vmem:[#allocation2 + $0x131] sm:$0xff] }
 0x429   : > { %v14928_v51 = vpack.c.bf16 %v6729_v8, %v6728_v40  ;;  %v11900_v40 = vld [vmem:[%s15878_s7 + $0x108] sm:$0xff]  }
 0x42e   : > { %11565 = vmatmul.mubr.msk.bf16.gmra.mxu0 %vm408_vm0, %v14916_v56 }
 0x42f   : > { %11605 = vmatmul.mubr.msk.bf16.gmra.mxu1 %vm408_vm0, %v14737_v28  ;;  %11568 = vmatprep.mubr.msk.bf16.mxu0 %vm408_vm0, %v14918_v63  ;;  %v6732_v28 = vld [vmem:[#allocation2 + $0x169] sm:$0xff] }
 0x430   : > { %11608 = vmatprep.mubr.msk.bf16.mxu1 %vm408_vm0, %v14770_v41  ;;  %v6733_v41 = vld [vmem:[#allocation2 + $0x171] sm:$0xff] }
 0x431   : > { %v14940_v11 = vpack.c.bf16 %v6733_v41, %v6732_v28  ;;  %v8004_v28 = vld [vmem:[#allocation2 + $0xa7] sm:$0xff] }
 0x432   : > { %v8326_v41 = vld [vmem:[#allocation2 + $0xa8] sm:$0xff] }
 0x436   : > { %11569 = vmatmul.mubr.msk.bf16.gmra.mxu0 %vm408_vm0, %v14928_v51 }
 0x437   : > { %11609 = vmatmul.mubr.msk.bf16.gmra.mxu1 %vm408_vm0, %v14776_v53  ;;  %11572 = vmatprep.mubr.msk.bf16.mxu0 %vm408_vm0, %v14930_v62  ;;  %v6736_v53 = vld [vmem:[#allocation2 + $0x1a9] sm:$0xff] }
 0x438   : > { %11612 = vmatprep.mubr.msk.bf16.mxu1 %vm408_vm0, %v14800_v60  ;;  %v6737_v60 = vld [vmem:[#allocation2 + $0x1b1] sm:$0xff] }
 0x439   : > { %v6755_v22 = vpack.c.bf16 %v6737_v60, %v6736_v53  ;;  %v8006_v53 = vld [vmem:[#allocation2 + $0xc7] sm:$0xff] }
 0x43a   : > { %v8328_v60 = vld [vmem:[#allocation2 + $0xc8] sm:$0xff]  ;;  %v8034_v15 = vpack.c.bf16 %v8007_v48, %v8006_v53 }
 0x43b   : > { %v8336_v48 = vld [vmem:[#allocation2 + $0x148] sm:$0xff] }
 0x43e   : > { %11573 = vmatmul.mubr.msk.bf16.gmra.mxu0 %vm408_vm0, %v14940_v11 }
 0x43f   : > { %11613 = vmatmul.mubr.msk.bf16.gmra.mxu1 %vm408_vm0, %v14804_v35  ;;  %11576 = vmatprep.mubr.msk.bf16.mxu0 %vm408_vm0, %v14942_v25  ;;  %v6740_v35 = vld [vmem:[#allocation2 + $0x1e9] sm:$0xff] }
 0x440   : > { %11616 = vmatprep.mubr.msk.bf16.mxu1 %vm408_vm0, %v14823_v50  ;;  %v7062_v50 = vld [vmem:[#allocation2 + $0x207] sm:$0xff]  ;;  %v6757_v3 = vpack.c.bf16 %v6741_v55, %v6740_v35 }
 0x441   : > { %v14958_v9 = vpack.c.bf16 %v7063_v46, %v7062_v50 }
 0x446   : > { %11577 = vmatmul.mubr.msk.bf16.gmra.mxu0 %vm408_vm0, %v6755_v22 }
 0x447   : > { %11617 = vmatmul.mubr.msk.bf16.gmra.mxu1 %vm408_vm0, %v14827_v57  ;;  %11580 = vmatprep.mubr.msk.bf16.mxu0 %vm408_vm0, %v6756_v29  ;;  %v11891_v57 = vld [vmem:[%s15878_s7 + $0xd0] sm:$0xff]  }
 0x448   : > { %11620 = vmatprep.mubr.msk.bf16.mxu1 %vm408_vm0, %v14839_v44  ;;  %v11895_v44 = vld [vmem:[%s15878_s7 + $0xf0] sm:$0xff]  }
 0x44e   : > { %11581 = vmatmul.mubr.msk.bf16.gmra.mxu0 %vm408_vm0, %v6757_v3 }
 0x44f   : > { %11621 = vmatmul.mubr.msk.bf16.gmra.mxu1 %vm408_vm0, %v14958_v9  ;;  %11632 = vmatprep.mubr.msk.bf16.mxu0 %vm408_vm0, %v14557_v32  ;;  %v11892_v32 = vld [vmem:[%s15878_s7 + $0xc8] sm:$0xff]  }
 0x450   : > { %11672 = vmatprep.mubr.msk.bf16.mxu1 %vm408_vm0, %v14848_v36  ;;  %v11897_v36 = vld [vmem:[%s15878_s7 + $0xe0] sm:$0xff]  }
 0x456   : > { %11633 = vmatmul.mubr.msk.bf16.vlgmr.msra.gmra.mxu0 %vm408_vm0, %v14566_v24  ;;  %v11896_v24 = vld [vmem:[%s15878_s7 + $0xe8] sm:$0xff]  }
 0x457   : > { %11673 = vmatmul.mubr.msk.bf16.vlgmr.msra.gmra.mxu1 %vm408_vm0, %v14850_v42  ;;  %11636 = vmatprep.mubr.msk.bf16.mxu0 %vm408_vm0, %v14616_v47  ;;  %v11893_v47 = vld [vmem:[%s15878_s7 + $0xc0] sm:$0xff]   ;;  %v11898_v42 = vld [vmem:[%s15878_s7 + $0x118] sm:$0xff]  }
 0x458   : > { %11676 = vmatprep.mubr.msk.bf16.mxu1 %vm408_vm0, %v14874_v10  ;;  %11705 = vmatpush3.bf16.msra.mxu0 %v14895_v21  ;;  %v8325_v10 = vld [vmem:[#allocation2 + $0x90] sm:$0xff]  ;;  %v8353_v21 = vpack.c.bf16 %v8323_v59, %v8322_v16 }
 0x459   : > { %11745 = vmatpush3.bf16.msra.mxu1 %v14900_v52  ;;  %11706 = vmatprep.subr.bf16.mxu0 %v11891_v57  ;;  %v8032_v52 = vpack.c.bf16 %v8003_v27, %v8002_v31  ;;  %v8354_v38 = vpack.c.bf16 %v8325_v10, %v8324_v58  ;;  %v8013_v31 = vld [vmem:[#allocation2 + $0x12f] sm:$0xff] }
 0x45a   : > { %11746 = vmatprep.subr.bf16.mxu1 %v11895_v44  ;;  %v8335_v58 = vld [vmem:[#allocation2 + $0x130] sm:$0xff] }
 0x45c   : > { %11707 = vmatpush3.bf16.msra.mxu0 %v11891_v57 }
 0x45d   : > { %11747 = vmatpush3.bf16.msra.mxu1 %v11895_v44  ;;  %11708 = vmatprep.subr.bf16.mxu0 %v11892_v32  ;;  %v8009_v44 = vld [vmem:[#allocation2 + $0xef] sm:$0xff] }
 0x45e   : > { %11748 = vmatprep.subr.bf16.mxu1 %v11896_v24  ;;  %11637 = vmatmul.mubr.msk.bf16.gmra.mxu0 %vm408_vm0, %v14626_v19  ;;  %v7385_v19 = vld [vmem:[#allocation2 + $0x210] sm:$0xff] }
 0x45f   : > { %11677 = vmatmul.mubr.msk.bf16.gmra.mxu1 %vm408_vm0, %v14876_v61  ;;  %11640 = vmatprep.mubr.msk.bf16.mxu0 %vm408_vm0, %v14677_v54  ;;  %v7706_v54 = vld [vmem:[#allocation2 + $0x209] sm:$0xff] }
 0x460   : > { %11680 = vmatprep.mubr.msk.bf16.mxu1 %vm408_vm0, %v14902_v7  ;;  %11709 = vmatpush3.bf16.msra.mxu0 %v11892_v32  ;;  %v8000_v61 = vld [vmem:[#allocation2 + $0x67] sm:$0xff]  ;;  %v8331_v32 = vld [vmem:[#allocation2 + $0xf0] sm:$0xff] }
 0x461   : > { %11749 = vmatpush3.bf16.msra.mxu1 %v11896_v24  ;;  %11710 = vmatprep.subr.bf16.mxu0 %v11893_v47 }
 0x462   : > { %11750 = vmatprep.subr.bf16.mxu1 %v11897_v36 }
 0x464   : > { %11711 = vmatpush3.bf16.msra.mxu0 %v11893_v47 }
 0x465   : > { %11751 = vmatpush3.bf16.msra.mxu1 %v11897_v36  ;;  %11784 = vmatprep.subr.bf16.mxu0 %v11898_v42  ;;  %v8011_v36 = vld [vmem:[#allocation2 + $0x10f] sm:$0xff] }
 0x466   : > { %11641 = vmatmul.mubr.msk.bf16.gmra.mxu0 %vm408_vm0, %v14689_v12  ;;  %v7707_v12 = vld [vmem:[#allocation2 + $0x211] sm:$0xff] }
 0x467   : > { %11681 = vmatmul.mubr.msk.bf16.gmra.mxu1 %vm408_vm0, %v14904_v1  ;;  %11644 = vmatprep.mubr.msk.bf16.mxu0 %vm408_vm0, %v14728_v13  ;;  %v7999_v13 = vld [vmem:[#allocation2 + $0x4f] sm:$0xff] }
 0x468   : > { %11684 = vmatprep.mubr.msk.bf16.mxu1 %vm408_vm0, %v14916_v56  ;;  %v8005_v56 = vld [vmem:[#allocation2 + $0xaf] sm:$0xff] }
 0x46e   : > { %11645 = vmatmul.mubr.msk.bf16.gmra.mxu0 %vm408_vm0, %v14735_v45  ;;  %v8321_v45 = vld [vmem:[#allocation2 + $0x50] sm:$0xff] }
 0x46f   : > { %11685 = vmatmul.mubr.msk.bf16.gmra.mxu1 %vm408_vm0, %v14918_v63  ;;  %11648 = vmatprep.mubr.msk.bf16.mxu0 %vm408_vm0, %v14768_v0  ;;  %v7384_v0 = vld [vmem:[#allocation2 + $0x208] sm:$0xff]  ;;  %v8327_v63 = vld [vmem:[#allocation2 + $0xb0] sm:$0xff] }
 0x470   : > { %11688 = vmatprep.mubr.msk.bf16.mxu1 %vm408_vm0, %v14928_v51  ;;  %v8329_v51 = vld [vmem:[#allocation2 + $0xd0] sm:$0xff] }
 0x476   : > { %11649 = vmatmul.mubr.msk.bf16.gmra.mxu0 %vm408_vm0, %v14774_v37  ;;  %v15043_v37 = vpack.c.bf16 %v7385_v19, %v7384_v0 }
 0x477   : > { %11689 = vmatmul.mubr.msk.bf16.gmra.mxu1 %vm408_vm0, %v14930_v62  ;;  %11652 = vmatprep.mubr.msk.bf16.mxu0 %vm408_vm0, %v14798_v17  ;;  %v15045_v17 = vpack.c.bf16 %v7707_v12, %v7706_v54  ;;  %v8008_v54 = vld [vmem:[#allocation2 + $0xe7] sm:$0xff] }
 0x478   : > { %11692 = vmatprep.mubr.msk.bf16.mxu1 %vm408_vm0, %v14940_v11  ;;  %v8033_v11 = vpack.c.bf16 %v8005_v56, %v8004_v28  ;;  %v8330_v12 = vld [vmem:[#allocation2 + $0xe8] sm:$0xff]  ;;  %v8035_v0 = vpack.c.bf16 %v8009_v44, %v8008_v54 }
 0x479   : > { %v8016_v44 = vld [vmem:[#allocation2 + $0x167] sm:$0xff] }
 0x47a   : > { %v8018_v54 = vld [vmem:[#allocation2 + $0x187] sm:$0xff] }
 0x47e   : > { %11653 = vmatmul.mubr.msk.bf16.gmra.mxu0 %vm408_vm0, %v14802_v43  ;;  %v7998_v43 = vld [vmem:[#allocation2 + $0x47] sm:$0xff] }
 0x47f   : > { %11693 = vmatmul.mubr.msk.bf16.gmra.mxu1 %vm408_vm0, %v14942_v25  ;;  %11656 = vmatprep.mubr.msk.bf16.mxu0 %vm408_vm0, %v14821_v33  ;;  %v8320_v33 = vld [vmem:[#allocation2 + $0x48] sm:$0xff]  ;;  %v8355_v25 = vpack.c.bf16 %v8327_v63, %v8326_v41 }
 0x480   : > { %11696 = vmatprep.mubr.msk.bf16.mxu1 %vm408_vm0, %v6755_v22  ;;  %v8352_v6 = vpack.c.bf16 %v8321_v45, %v8320_v33  ;;  %v8356_v22 = vpack.c.bf16 %v8329_v51, %v8328_v60  ;;  %v8010_v33 = vld [vmem:[#allocation2 + $0x107] sm:$0xff] }
 0x486   : > { %11657 = vmatmul.mubr.msk.bf16.gmra.mxu0 %vm408_vm0, %v14825_v39  ;;  %v8030_v39 = vpack.c.bf16 %v7999_v13, %v7998_v43  ;;  %v8357_v43 = vpack.c.bf16 %v8331_v32, %v8330_v12  ;;  %v8338_v32 = vld [vmem:[#allocation2 + $0x168] sm:$0xff] }
 0x487   : > { %11697 = vmatmul.mubr.msk.bf16.gmra.mxu1 %vm408_vm0, %v6756_v29  ;;  %11660 = vmatprep.mubr.msk.bf16.mxu0 %vm408_vm0, %v14837_v5  ;;  %v8001_v5 = vld [vmem:[#allocation2 + $0x6f] sm:$0xff]  ;;  %v11901_v29 = vld [vmem:[%s15878_s7 + $0x100] sm:$0xff]  }
 0x488   : > { %11700 = vmatprep.mubr.msk.bf16.mxu1 %vm408_vm0, %v6757_v3  ;;  %v8031_v2 = vpack.c.bf16 %v8001_v5, %v8000_v61  ;;  %v8036_v5 = vpack.c.bf16 %v8011_v36, %v8010_v33  ;;  %v8340_v12 = vld [vmem:[#allocation2 + $0x188] sm:$0xff] }
 0x48e   : > { %11661 = vmatmul.mubr.msk.bf16.gmra.mxu0 %vm408_vm0, %v15043_v37 }
 0x48f   : > { %11701 = vmatmul.mubr.msk.bf16.gmra.mxu1 %vm408_vm0, %v15045_v17  ;;  %11712 = vmatprep.mubr.msk.bf16.mxu0 %vm408_vm0, %v8030_v39  ;;  %v8332_v39 = vld [vmem:[#allocation2 + $0x108] sm:$0xff] }
 0x490   : > { %11752 = vmatprep.mubr.msk.bf16.mxu1 %vm408_vm0, %v8352_v6 }
 0x494   : > { %v11474_v7 = vpop.f32.mrf.mxu0 }
 0x495   : > { %v11514_v1 = vpop.f32.mrf.mxu1 }
 0x496   : > { %11713 = vmatmul.mubr.msk.bf16.vlgmr.msra.gmra.mxu0 %vm408_vm0, %v8031_v2  ;;  %v15058_v49 = vadd.f32 %v11514_v1, %v11474_v7  ;;  %v6350_v20 = vpop.f32.mrf.mxu0  ;;  %v8337_v7 = vld [vmem:[#allocation2 + $0x150] sm:$0xff] }
 0x497   : > { %11753 = vmatmul.mubr.msk.bf16.vlgmr.msra.gmra.mxu1 %vm408_vm0, %v8353_v21  ;;  %11716 = vmatprep.mubr.msk.bf16.mxu0 %vm408_vm0, %v8032_v52  ;;  %v6583_v30 = vpop.f32.mrf.mxu1  ;;  %v8360_v41 = vpack.c.bf16 %v8337_v7, %v8336_v48 }
 0x498   : > { %11756 = vmatprep.mubr.msk.bf16.mxu1 %vm408_vm0, %v8354_v38  ;;  %11785 = vmatpush3.bf16.msra.mxu0 %v11898_v42  ;;  %v15062_v23 = vadd.f32 %v6583_v30, %v6350_v20  ;;  %v11475_v8 = vpop.f32.mrf.mxu0  ;;  %v8333_v42 = vld [vmem:[#allocation2 + $0x110] sm:$0xff]  ;;  %v8012_v20 = vld [vmem:[#allocation2 + $0x127] sm:$0xff] }
 0x499   : > { %11786 = vmatprep.subr.bf16.mxu0 %v11899_v14  ;;  %v11515_v34 = vpop.f32.mrf.mxu1  ;;  %v8358_v59 = vpack.c.bf16 %v8333_v42, %v8332_v39  ;;  %v8334_v30 = vld [vmem:[#allocation2 + $0x128] sm:$0xff] }
 0x49a   : > { %v15067_v62 = vadd.f32 %v11515_v34, %v11475_v8  ;;  %v6353_v4 = vpop.f32.mrf.mxu0  ;;  %v8359_v8 = vpack.c.bf16 %v8335_v58, %v8334_v30  ;;  %v8014_v34 = vld [vmem:[#allocation2 + $0x147] sm:$0xff]  ;;  %v8345_v58 = vld [vmem:[#allocation2 + $0x1d0] sm:$0xff] }
 0x49b   : > { %v6586_v18 = vpop.f32.mrf.mxu1 }
 0x49c   : > { %11787 = vmatpush3.bf16.msra.mxu0 %v11899_v14  ;;  %v15069_v26 = vadd.f32 %v6586_v18, %v6353_v4  ;;  %v8015_v14 = vld [vmem:[#allocation2 + $0x14f] sm:$0xff] }
 0x49d   : > { %11788 = vmatprep.subr.bf16.mxu0 %v11900_v40  ;;  %v8038_v28 = vpack.c.bf16 %v8015_v14, %v8014_v34  ;;  %v8342_v14 = vld [vmem:[#allocation2 + $0x1a8] sm:$0xff] }
 0x49e   : > { %v11478_v35 = vpop.f32.mrf.mxu0  ;;  %11717 = vmatmul.mubr.msk.bf16.gmra.mxu0 %vm408_vm0, %v8033_v11 }
 0x49f   : > { %v11518_v55 = vpop.f32.mrf.mxu1  ;;  %11757 = vmatmul.mubr.msk.bf16.gmra.mxu1 %vm408_vm0, %v8355_v25  ;;  %11720 = vmatprep.mubr.msk.bf16.mxu0 %vm408_vm0, %v8034_v15  ;;  %v8017_v15 = vld [vmem:[#allocation2 + $0x16f] sm:$0xff] }
 0x4a0   : > { %v15076_v46 = vadd.f32 %v11518_v55, %v11478_v35  ;;  %11760 = vmatprep.mubr.msk.bf16.mxu1 %vm408_vm0, %v8356_v22  ;;  %v6366_v50 = vpop.f32.mrf.mxu0  ;;  %11789 = vmatpush3.bf16.msra.mxu0 %v11900_v40  ;;  %v8037_v40 = vpack.c.bf16 %v8013_v31, %v8012_v20  ;;  %v8339_v22 = vld [vmem:[#allocation2 + $0x170] sm:$0xff]  ;;  %v8039_v36 = vpack.c.bf16 %v8017_v15, %v8016_v44 }
 0x4a1   : > { %v6599_v3 = vpop.f32.mrf.mxu1  ;;  %11790 = vmatprep.subr.bf16.mxu0 %v11901_v29  ;;  %v8019_v55 = vld [vmem:[#allocation2 + $0x18f] sm:$0xff]  ;;  %v8361_v42 = vpack.c.bf16 %v8339_v22, %v8338_v32 }
 0x4a2   : > { %v15080_v57 = vadd.f32 %v6599_v3, %v6366_v50  ;;  %v11479_v24 = vpop.f32.mrf.mxu0  ;;  %v8341_v50 = vld [vmem:[#allocation2 + $0x190] sm:$0xff] }
 0x4a3   : > { %v11519_v47 = vpop.f32.mrf.mxu1  ;;  %v8023_v31 = vld [vmem:[#allocation2 + $0x1cf] sm:$0xff] }
 0x4a4   : > { %v15082_v19 = vadd.f32 %v11519_v47, %v11479_v24  ;;  %v6369_v13 = vpop.f32.mrf.mxu0  ;;  %11791 = vmatpush3.bf16.msra.mxu0 %v11901_v29  ;;  %v8347_v15 = vld [vmem:[#allocation2 + $0x1f0] sm:$0xff] }
 0x4a5   : > { %v6602_v45 = vpop.f32.mrf.mxu1 }
 0x4a6   : > { %v15084_v6 = vadd.f32 %v6602_v45, %v6369_v13  ;;  %v11482_v27 = vpop.f32.mrf.mxu0  ;;  %11721 = vmatmul.mubr.msk.bf16.gmra.mxu0 %vm408_vm0, %v8035_v0  ;;  %v8040_v45 = vpack.c.bf16 %v8019_v55, %v8018_v54  ;;  %v8362_v0 = vpack.c.bf16 %v8341_v50, %v8340_v12  ;;  %v8024_v55 = vld [vmem:[#allocation2 + $0x1e7] sm:$0xff] }
 0x4a7   : > { %v11522_v10 = vpop.f32.mrf.mxu1  ;;  %11761 = vmatmul.mubr.msk.bf16.gmra.mxu1 %vm408_vm0, %v8357_v43  ;;  %11724 = vmatprep.mubr.msk.bf16.mxu0 %vm408_vm0, %v8036_v5  ;;  %v8346_v50 = vld [vmem:[#allocation2 + $0x1e8] sm:$0xff] }
 0x4a8   : > { %v15088_v61 = vadd.f32 %v11522_v10, %v11482_v27  ;;  %11764 = vmatprep.mubr.msk.bf16.mxu1 %vm408_vm0, %v8358_v59  ;;  %v6382_v16 = vpop.f32.mrf.mxu0  ;;  %v8021_v27 = vld [vmem:[#allocation2 + $0x1af] sm:$0xff]  ;;  %v8028_v12 = vld [vmem:[#allocation2 + $0x227] sm:$0xff] }
 0x4a9   : > { %v6615_v2 = vpop.f32.mrf.mxu1  ;;  %v8343_v10 = vld [vmem:[#allocation2 + $0x1b0] sm:$0xff] }
 0x4aa   : > { %v15092_v21 = vadd.f32 %v6615_v2, %v6382_v16  ;;  %v11483_v52 = vpop.f32.mrf.mxu0 }
 0x4ab   : > { %v11523_v38 = vpop.f32.mrf.mxu1 }
 0x4ac   : > { %v15094_v1 = vadd.f32 %v11523_v38, %v11483_v52  ;;  %v6385_v56 = vpop.f32.mrf.mxu0  ;;  %v8020_v38 = vld [vmem:[#allocation2 + $0x1a7] sm:$0xff] }
 0x4ad   : > { %v6618_v63 = vpop.f32.mrf.mxu1  ;;  %v8041_v30 = vpack.c.bf16 %v8021_v27, %v8020_v38  ;;  %v8642_v38 = vld [vmem:[#allocation2 + $0x49] sm:$0xff] }
 0x4ae   : > { %v15096_v51 = vadd.f32 %v6618_v63, %v6385_v56  ;;  %v11486_v4 = vpop.f32.mrf.mxu0  ;;  %11725 = vmatmul.mubr.msk.bf16.gmra.mxu0 %vm408_vm0, %v8037_v40  ;;  %v8363_v56 = vpack.c.bf16 %v8343_v10, %v8342_v14  ;;  %v8022_v63 = vld [vmem:[#allocation2 + $0x1c7] sm:$0xff]  ;;  %v8643_v14 = vld [vmem:[#allocation2 + $0x51] sm:$0xff] }
 0x4af   : > { %v11526_v18 = vpop.f32.mrf.mxu1  ;;  %11765 = vmatmul.mubr.msk.bf16.gmra.mxu1 %vm408_vm0, %v8359_v8  ;;  %11728 = vmatprep.mubr.msk.bf16.mxu0 %vm408_vm0, %v8038_v28  ;;  %v8344_v40 = vld [vmem:[#allocation2 + $0x1c8] sm:$0xff]  ;;  %v8042_v8 = vpack.c.bf16 %v8023_v31, %v8022_v63 }
 0x4b0   : > { %v15100_v11 = vadd.f32 %v11526_v18, %v11486_v4  ;;  %11768 = vmatprep.mubr.msk.bf16.mxu1 %vm408_vm0, %v8360_v41  ;;  %v6398_v25 = vpop.f32.mrf.mxu0  ;;  %v8364_v34 = vpack.c.bf16 %v8345_v58, %v8344_v40 }
 0x4b1   : > { %v6631_v53 = vpop.f32.mrf.mxu1 }
 0x4b2   : > { %v15104_v60 = vadd.f32 %v6631_v53, %v6398_v25  ;;  %v11487_v29 = vpop.f32.mrf.mxu0  ;;  %v8025_v53 = vld [vmem:[#allocation2 + $0x1ef] sm:$0xff] }
 0x4b3   : > { %v11527_v35 = vpop.f32.mrf.mxu1 }
 0x4b4   : > { %v15106_v3 = vadd.f32 %v11527_v35, %v11487_v29  ;;  %v6401_v24 = vpop.f32.mrf.mxu0 }
 0x4b5   : > { %v6634_v47 = vpop.f32.mrf.mxu1 }
 0x4b6   : > { %v15108_v13 = vadd.f32 %v6634_v47, %v6401_v24  ;;  %v11490_v43 = vpop.f32.mrf.mxu0  ;;  %11729 = vmatmul.mubr.msk.bf16.gmra.mxu0 %vm408_vm0, %v8039_v36  ;;  %v8043_v24 = vpack.c.bf16 %v8025_v53, %v8024_v55  ;;  %v8365_v47 = vpack.c.bf16 %v8347_v15, %v8346_v50  ;;  %v8644_v53 = vld [vmem:[#allocation2 + $0x69] sm:$0xff]  ;;  %v8645_v15 = vld [vmem:[#allocation2 + $0x71] sm:$0xff] }
 0x4b7   : > { %v11530_v33 = vpop.f32.mrf.mxu1  ;;  %11769 = vmatmul.mubr.msk.bf16.gmra.mxu1 %vm408_vm0, %v8361_v42  ;;  %11732 = vmatprep.mubr.msk.bf16.mxu0 %vm408_vm0, %v8040_v45  ;;  %v8646_v55 = vld [vmem:[#allocation2 + $0x89] sm:$0xff]  ;;  %v8647_v50 = vld [vmem:[#allocation2 + $0x91] sm:$0xff] }
 0x4b8   : > { %v15112_v39 = vadd.f32 %v11530_v33, %v11490_v43  ;;  %11772 = vmatprep.mubr.msk.bf16.mxu1 %vm408_vm0, %v8362_v0  ;;  %v15116_v5 = vpop.f32.mrf.mxu0  ;;  %v8029_v0 = vld [vmem:[#allocation2 + $0x22f] sm:$0xff] }
 0x4b9   : > { %v15118_v59 = vpop.f32.mrf.mxu1  ;;  %v8350_v43 = vld [vmem:[#allocation2 + $0x228] sm:$0xff]  ;;  %v8351_v33 = vld [vmem:[#allocation2 + $0x230] sm:$0xff]  ;;  %v8045_v58 = vpack.c.bf16 %v8029_v0, %v8028_v12 }
 0x4ba   : > { %v11491_v16 = vpop.f32.mrf.mxu0 }
 0x4bb   : > { %v11531_v2 = vpop.f32.mrf.mxu1 }
 0x4bc   : > { %v15120_v52 = vadd.f32 %v11531_v2, %v11491_v16  ;;  %v15122_v7 = vpop.f32.mrf.mxu0 }
 0x4bd   : > { %v15124_v20 = vpop.f32.mrf.mxu1 }
 0x4be   : > { %v11494_v48 = vpop.f32.mrf.mxu0  ;;  %11733 = vmatmul.mubr.msk.bf16.gmra.mxu0 %vm408_vm0, %v8041_v30  ;;  %v8367_v30 = vpack.c.bf16 %v8351_v33, %v8350_v43 }
 0x4bf   : > { %v11534_v28 = vpop.f32.mrf.mxu1  ;;  %11773 = vmatmul.mubr.msk.bf16.gmra.mxu1 %vm408_vm0, %v8363_v56  ;;  %11736 = vmatprep.mubr.msk.bf16.mxu0 %vm408_vm0, %v8042_v8 }
 0x4c0   : > { %v15128_v41 = vadd.f32 %v11534_v28, %v11494_v48  ;;  %11776 = vmatprep.mubr.msk.bf16.mxu1 %vm408_vm0, %v8364_v34  ;;  %v6430_v4 = vpop.f32.mrf.mxu0 }
 0x4c1   : > { %v6663_v18 = vpop.f32.mrf.mxu1 }
 0x4c2   : > { %v15132_v25 = vadd.f32 %v6663_v18, %v6430_v4  ;;  %v11495_v22 = vpop.f32.mrf.mxu0 }
 0x4c3   : > { %v11535_v29 = vpop.f32.mrf.mxu1 }
 0x4c4   : > { %v15134_v35 = vadd.f32 %v11535_v29, %v11495_v22  ;;  %v6433_v44 = vpop.f32.mrf.mxu0 }
 0x4c5   : > { %v6666_v32 = vpop.f32.mrf.mxu1 }
 0x4c6   : > { %v15136_v36 = vadd.f32 %v6666_v32, %v6433_v44  ;;  %v11498_v42 = vpop.f32.mrf.mxu0  ;;  %11737 = vmatmul.mubr.msk.bf16.gmra.mxu0 %vm408_vm0, %v8043_v24 }
 0x4c7   : > { %v11538_v54 = vpop.f32.mrf.mxu1  ;;  %11777 = vmatmul.mubr.msk.bf16.gmra.mxu1 %vm408_vm0, %v8365_v47  ;;  %11740 = vmatprep.mubr.msk.bf16.mxu0 %vm408_vm0, %v14958_v9  ;;  %v8675_v47 = vpack.c.bf16 %v8645_v15, %v8644_v53 }
 0x4c8   : > { %v15140_v45 = vadd.f32 %v11538_v54, %v11498_v42  ;;  %11780 = vmatprep.mubr.msk.bf16.mxu1 %vm408_vm0, %v15043_v37  ;;  %v6446_v27 = vpop.f32.mrf.mxu0  ;;  %v8674_v37 = vpack.c.bf16 %v8643_v14, %v8642_v38  ;;  %v8676_v54 = vpack.c.bf16 %v8647_v50, %v8646_v55 }
 0x4c9   : > { %v6679_v10 = vpop.f32.mrf.mxu1 }
 0x4ca   : > { %v15146_v16 = vadd.f32 %v6679_v10, %v6446_v27  ;;  %v11499_v2 = vpop.f32.mrf.mxu0 }
 0x4cb   : > { %v11539_v31 = vpop.f32.mrf.mxu1 }
 0x4cc   : > { %v15148_v56 = vadd.f32 %v11539_v31, %v11499_v2  ;;  %v6449_v63 = vpop.f32.mrf.mxu0  ;;  %v8648_v31 = vld [vmem:[#allocation2 + $0xa9] sm:$0xff] }
 0x4cd   : > { %v6682_v9 = vpop.f32.mrf.mxu1 }
 0x4ce   : > { %v15150_v40 = vadd.f32 %v6682_v9, %v6449_v63  ;;  %v11502_v8 = vpop.f32.mrf.mxu0  ;;  %11741 = vmatmul.mubr.msk.bf16.gmra.mxu0 %vm408_vm0, %v8045_v58  ;;  %v8649_v58 = vld [vmem:[#allocation2 + $0xb1] sm:$0xff] }
 0x4cf   : > { %v11542_v34 = vpop.f32.mrf.mxu1  ;;  %11781 = vmatmul.mubr.msk.bf16.gmra.mxu1 %vm408_vm0, %v8367_v30  ;;  %11792 = vmatprep.mubr.msk.bf16.mxu0 %vm408_vm0, %v8674_v37  ;;  %v8650_v30 = vld [vmem:[#allocation2 + $0xc9] sm:$0xff]  ;;  %v8651_v63 = vld [vmem:[#allocation2 + $0xd1] sm:$0xff] }
 0x4d0   : > { %v15154_v48 = vadd.f32 %v11542_v34, %v11502_v8  ;;  %v6462_v28 = vpop.f32.mrf.mxu0  ;;  %v8677_v34 = vpack.c.bf16 %v8649_v58, %v8648_v31  ;;  %v8678_v53 = vpack.c.bf16 %v8651_v63, %v8650_v30 }
 0x4d1   : > { %v6695_v4 = vpop.f32.mrf.mxu1 }
 0x4d2   : > { %v15157_v18 = vadd.f32 %v6695_v4, %v6462_v28  ;;  %v11503_v22 = vpop.f32.mrf.mxu0 }
 0x4d3   : > { %v11543_v29 = vpop.f32.mrf.mxu1 }
 0x4d4   : > { %v15159_v44 = vadd.f32 %v11543_v29, %v11503_v22  ;;  %v6465_v32 = vpop.f32.mrf.mxu0 }
 0x4d5   : > { %v6698_v24 = vpop.f32.mrf.mxu1 }
 0x4d6   : > { %v15161_v42 = vadd.f32 %v6698_v24, %v6465_v32  ;;  %v11554_v12 = vpop.f32.mrf.mxu0  ;;  %11793 = vmatmul.mubr.msk.bf16.vlgmr.msra.gmra.mxu0 %vm408_vm0, %v8675_v47  ;;  %v8652_v24 = vld [vmem:[#allocation2 + $0xe9] sm:$0xff]  ;;  %v8653_v47 = vld [vmem:[#allocation2 + $0xf1] sm:$0xff] }
 0x4d7   : > { %v11594_v0 = vpop.f32.mrf.mxu1  ;;  %v7002_v43 = vadd.f32 %v11554_v12, %v15058_v49  ;;  %11796 = vmatprep.mubr.msk.bf16.mxu0 %vm408_vm0, %v8676_v54  ;;  %v8654_v12 = vld [vmem:[#allocation2 + $0x109] sm:$0xff] }
 0x4d8   : > { %v6873_v33 = vpop.f32.mrf.mxu0 }
 0x4d9   : > { %v7195_v27 = vpop.f32.mrf.mxu1  ;;  %v15166_v10 = vadd.f32 %v11594_v0, %v7002_v43  ;;  %v7000_v2 = vadd.f32 %v6873_v33, %v15062_v23  ;;  %v8655_v0 = vld [vmem:[#allocation2 + $0x111] sm:$0xff] }
 0x4da   : > { %v11555_v38 = vpop.f32.mrf.mxu0 }
 0x4db   : > { %v11595_v14 = vpop.f32.mrf.mxu1  ;;  %v15169_v9 = vadd.f32 %v7195_v27, %v7000_v2  ;;  %v7003_v37 = vadd.f32 %v11555_v38, %v15067_v62  ;;  %v8679_v2 = vpack.c.bf16 %v8653_v47, %v8652_v24  ;;  %v8680_v38 = vpack.c.bf16 %v8655_v0, %v8654_v12 }
 0x4dc   : > { %v6876_v8 = vpop.f32.mrf.mxu0 }
 0x4dd   : > { %v7198_v49 = vpop.f32.mrf.mxu1  ;;  %v15172_v28 = vadd.f32 %v11595_v14, %v7003_v37  ;;  %v7001_v4 = vadd.f32 %v6876_v8, %v15069_v26 }
 0x4de   : > { %v11558_v15 = vpop.f32.mrf.mxu0  ;;  %11797 = vmatmul.mubr.msk.bf16.gmra.mxu0 %vm408_vm0, %v8677_v34  ;;  %v8656_v34 = vld [vmem:[#allocation2 + $0x129] sm:$0xff] }
 0x4df   : > { %v11598_v23 = vpop.f32.mrf.mxu1  ;;  %v15176_v22 = vadd.f32 %v7198_v49, %v7001_v4  ;;  %v7006_v29 = vadd.f32 %v11558_v15, %v15076_v46  ;;  %11800 = vmatprep.mubr.msk.bf16.mxu0 %vm408_vm0, %v8678_v53  ;;  %v8657_v4 = vld [vmem:[#allocation2 + $0x131] sm:$0xff]  ;;  %v8658_v15 = vld [vmem:[#allocation2 + $0x149] sm:$0xff] }
 0x4e0   : > { %v6889_v55 = vpop.f32.mrf.mxu0 }
 0x4e1   : > { %v7211_v62 = vpop.f32.mrf.mxu1  ;;  %v15180_v50 = vadd.f32 %v11598_v23, %v7006_v29  ;;  %v7004_v32 = vadd.f32 %v6889_v55, %v15080_v57  ;;  %v8659_v23 = vld [vmem:[#allocation2 + $0x151] sm:$0xff] }
 0x4e2   : > { %v11559_v26 = vpop.f32.mrf.mxu0 }
 0x4e3   : > { %v11599_v54 = vpop.f32.mrf.mxu1  ;;  %v15183_v43 = vadd.f32 %v7211_v62, %v7004_v32  ;;  %v7007_v33 = vadd.f32 %v11559_v26, %v15082_v19  ;;  %v8681_v32 = vpack.c.bf16 %v8657_v4, %v8656_v34  ;;  %v8682_v26 = vpack.c.bf16 %v8659_v23, %v8658_v15 }
 0x4e4   : > { %v6892_v27 = vpop.f32.mrf.mxu0  ;;  %v6648_v15 = vadd.f32 %v15118_v59, %v15116_v5  ;;  %v6651_v5 = vadd.f32 %v15124_v20, %v15122_v7 }
 0x4e5   : > { %v7214_v46 = vpop.f32.mrf.mxu1  ;;  %v15186_v31 = vadd.f32 %v11599_v54, %v7007_v33  ;;  %v7005_v58 = vadd.f32 %v6892_v27, %v15084_v6 }
 0x4e6   : > { %v11562_v14 = vpop.f32.mrf.mxu0  ;;  %11801 = vmatmul.mubr.msk.bf16.gmra.mxu0 %vm408_vm0, %v8679_v2  ;;  %v8660_v2 = vld [vmem:[#allocation2 + $0x169] sm:$0xff] }
 0x4e7   : > { %v11602_v57 = vpop.f32.mrf.mxu1  ;;  %v15190_v30 = vadd.f32 %v7214_v46, %v7005_v58  ;;  %v7010_v63 = vadd.f32 %v11562_v14, %v15088_v61  ;;  %11804 = vmatprep.mubr.msk.bf16.mxu0 %vm408_vm0, %v8680_v38  ;;  %v8661_v58 = vld [vmem:[#allocation2 + $0x171] sm:$0xff]  ;;  %v8662_v14 = vld [vmem:[#allocation2 + $0x189] sm:$0xff] }
 0x4e8   : > { %v6905_v37 = vpop.f32.mrf.mxu0 }
 0x4e9   : > { %v7227_v19 = vpop.f32.mrf.mxu1  ;;  %v15194_v8 = vadd.f32 %v11602_v57, %v7010_v63  ;;  %v7008_v49 = vadd.f32 %v6905_v37, %v15092_v21  ;;  %v8663_v57 = vld [vmem:[#allocation2 + $0x191] sm:$0xff] }
 0x4ea   : > { %v11563_v6 = vpop.f32.mrf.mxu0 }
 0x4eb   : > { %v11603_v53 = vpop.f32.mrf.mxu1  ;;  %v15197_v29 = vadd.f32 %v7227_v19, %v7008_v49  ;;  %v7011_v55 = vadd.f32 %v11563_v6, %v15094_v1  ;;  %v8683_v49 = vpack.c.bf16 %v8661_v58, %v8660_v2  ;;  %v8684_v6 = vpack.c.bf16 %v8663_v57, %v8662_v14 }
 0x4ec   : > { %v6908_v62 = vpop.f32.mrf.mxu0 }
 0x4ed   : > { %v7230_v61 = vpop.f32.mrf.mxu1  ;;  %v15200_v24 = vadd.f32 %v11603_v53, %v7011_v55  ;;  %v7009_v47 = vadd.f32 %v6908_v62, %v15096_v51 }
 0x4ee   : > { %v11566_v54 = vpop.f32.mrf.mxu0  ;;  %11805 = vmatmul.mubr.msk.bf16.gmra.mxu0 %vm408_vm0, %v8681_v32 }
 0x4ef   : > { %v11606_v21 = vpop.f32.mrf.mxu1  ;;  %v15204_v12 = vadd.f32 %v7230_v61, %v7009_v47  ;;  %v7014_v0 = vadd.f32 %v11566_v54, %v15100_v11  ;;  %11808 = vmatprep.mubr.msk.bf16.mxu0 %vm408_vm0, %v8682_v26  ;;  %v8665_v47 = vld [vmem:[#allocation2 + $0x1b1] sm:$0xff] }
 0x4f0   : > { %v6921_v33 = vpop.f32.mrf.mxu0 }
 0x4f1   : > { %v7243_v1 = vpop.f32.mrf.mxu1  ;;  %v15208_v27 = vadd.f32 %v11606_v21, %v7014_v0  ;;  %v7012_v46 = vadd.f32 %v6921_v33, %v15104_v60  ;;  %v8666_v21 = vld [vmem:[#allocation2 + $0x1c9] sm:$0xff]  ;;  %v8667_v0 = vld [vmem:[#allocation2 + $0x1d1] sm:$0xff] }
 0x4f2   : > { %v11567_v51 = vpop.f32.mrf.mxu0 }
 0x4f3   : > { %v11607_v38 = vpop.f32.mrf.mxu1  ;;  %v15211_v63 = vadd.f32 %v7243_v1, %v7012_v46  ;;  %v7015_v37 = vadd.f32 %v11567_v51, %v15106_v3  ;;  %v8686_v51 = vpack.c.bf16 %v8667_v0, %v8666_v21 }
 0x4f4   : > { %v6924_v19 = vpop.f32.mrf.mxu0 }
 0x4f5   : > { %v7246_v11 = vpop.f32.mrf.mxu1  ;;  %v15214_v34 = vadd.f32 %v11607_v38, %v7015_v37  ;;  %v7013_v4 = vadd.f32 %v6924_v19, %v15108_v13  ;;  %v8664_v13 = vld [vmem:[#allocation2 + $0x1a9] sm:$0xff] }
 0x4f6   : > { %v11570_v53 = vpop.f32.mrf.mxu0  ;;  %11809 = vmatmul.mubr.msk.bf16.gmra.mxu0 %vm408_vm0, %v8683_v49  ;;  %v8685_v46 = vpack.c.bf16 %v8665_v47, %v8664_v13  ;;  %v8669_v49 = vld [vmem:[#allocation2 + $0x1f1] sm:$0xff] }
 0x4f7   : > { %v11610_v60 = vpop.f32.mrf.mxu1  ;;  %v15220_v23 = vadd.f32 %v7246_v11, %v7013_v4  ;;  %v7018_v55 = vadd.f32 %v11570_v53, %v15112_v39  ;;  %11812 = vmatprep.mubr.msk.bf16.mxu0 %vm408_vm0, %v8684_v6  ;;  %v8668_v11 = vld [vmem:[#allocation2 + $0x1e9] sm:$0xff] }
 0x4f8   : > { %v6937_v3 = vpop.f32.mrf.mxu0 }
 0x4f9   : > { %v7259_v62 = vpop.f32.mrf.mxu1  ;;  %v15224_v61 = vadd.f32 %v11610_v60, %v7018_v55  ;;  %v7016_v32 = vadd.f32 %v6937_v3, %v6648_v15  ;;  %v8687_v3 = vpack.c.bf16 %v8669_v49, %v8668_v11 }
 0x4fa   : > { %v11571_v26 = vpop.f32.mrf.mxu0 }
 0x4fb   : > { %v11611_v54 = vpop.f32.mrf.mxu1  ;;  %v15228_v59 = vadd.f32 %v7259_v62, %v7016_v32  ;;  %v7019_v39 = vadd.f32 %v11571_v26, %v15120_v52  ;;  %v8672_v26 = vld [vmem:[#allocation2 + $0x229] sm:$0xff] }
 0x4fc   : > { %v6940_v33 = vpop.f32.mrf.mxu0 }
 0x4fd   : > { %v7262_v1 = vpop.f32.mrf.mxu1  ;;  %v15231_v2 = vadd.f32 %v11611_v54, %v7019_v39  ;;  %v7017_v58 = vadd.f32 %v6940_v33, %v6651_v5 }
 0x4fe   : > { %v11574_v38 = vpop.f32.mrf.mxu0  ;;  %11813 = vmatmul.mubr.msk.bf16.gmra.mxu0 %vm408_vm0, %v8685_v46 }
 0x4ff   : > { %v11614_v14 = vpop.f32.mrf.mxu1  ;;  %v15234_v57 = vadd.f32 %v7262_v1, %v7017_v58  ;;  %v7022_v37 = vadd.f32 %v11574_v38, %v15128_v41  ;;  %11816 = vmatprep.mubr.msk.bf16.mxu0 %vm408_vm0, %v8686_v51 }
 0x500   : > { %v6953_v7 = vpop.f32.mrf.mxu0 }
 0x501   : > { %v7275_v20 = vpop.f32.mrf.mxu1  ;;  %v15238_v52 = vadd.f32 %v11614_v14, %v7022_v37  ;;  %v7020_v19 = vadd.f32 %v6953_v7, %v15132_v25 }
 0x502   : > { %v11575_v4 = vpop.f32.mrf.mxu0 }
 0x503   : > { %v11615_v6 = vpop.f32.mrf.mxu1  ;;  %v15241_v53 = vadd.f32 %v7275_v20, %v7020_v19  ;;  %v7023_v60 = vadd.f32 %v11575_v4, %v15134_v35  ;;  %v8673_v35 = vld [vmem:[#allocation2 + $0x231] sm:$0xff] }
 0x504   : > { %v6956_v15 = vpop.f32.mrf.mxu0  ;;  %v8689_v33 = vpack.c.bf16 %v8673_v35, %v8672_v26 }
 0x505   : > { %v7278_v55 = vpop.f32.mrf.mxu1  ;;  %v15244_v41 = vadd.f32 %v11615_v6, %v7023_v60  ;;  %v7021_v62 = vadd.f32 %v6956_v15, %v15136_v36 }
 0x506   : > { %v11578_v32 = vpop.f32.mrf.mxu0  ;;  %11817 = vmatmul.mubr.msk.bf16.gmra.mxu0 %vm408_vm0, %v8687_v3 }
 0x507   : > { %v11618_v13 = vpop.f32.mrf.mxu1  ;;  %v15248_v25 = vadd.f32 %v7278_v55, %v7021_v62  ;;  %v7026_v47 = vadd.f32 %v11578_v32, %v15140_v45  ;;  %11820 = vmatprep.mubr.msk.bf16.mxu0 %vm408_vm0, %v15045_v17 }
 0x508   : > { %v6969_v54 = vpop.f32.mrf.mxu0 }
 0x509   : > { %v7291_v21 = vpop.f32.mrf.mxu1  ;;  %v15253_v0 = vadd.f32 %v11618_v13, %v7026_v47  ;;  %v7024_v5 = vadd.f32 %v6969_v54, %v15146_v16 }
 0x50a   : > { %v11579_v36 = vpop.f32.mrf.mxu0 }
 0x50b   : > { %v11619_v39 = vpop.f32.mrf.mxu1  ;;  %v15256_v1 = vadd.f32 %v7291_v21, %v7024_v5  ;;  %v7027_v46 = vadd.f32 %v11579_v36, %v15148_v56 }
 0x50c   : > { %v6972_v58 = vpop.f32.mrf.mxu0 }
 0x50d   : > { %v7294_v45 = vpop.f32.mrf.mxu1  ;;  %v15259_v51 = vadd.f32 %v11619_v39, %v7027_v46  ;;  %v7025_v17 = vadd.f32 %v6972_v58, %v15150_v40 }
 0x50e   : > { %v11582_v38 = vpop.f32.mrf.mxu0  ;;  %11821 = vmatmul.mubr.msk.bf16.gmra.mxu0 %vm408_vm0, %v8689_v33 }
 0x50f   : > { %v11622_v14 = vpop.f32.mrf.mxu1  ;;  %v15263_v37 = vadd.f32 %v7294_v45, %v7025_v17  ;;  %v7030_v16 = vadd.f32 %v11582_v38, %v15154_v48 }
 0x510   : > { %v6985_v7 = vpop.f32.mrf.mxu0 }
 0x511   : > { %v7307_v20 = vpop.f32.mrf.mxu1  ;;  %v15266_v19 = vadd.f32 %v11622_v14, %v7030_v16  ;;  %v7028_v56 = vadd.f32 %v6985_v7, %v15157_v18 }
 0x512   : > { %v11583_v11 = vpop.f32.mrf.mxu0 }
 0x513   : > { %v11623_v49 = vpop.f32.mrf.mxu1  ;;  %v15269_v4 = vadd.f32 %v7307_v20, %v7028_v56  ;;  %v7031_v40 = vadd.f32 %v11583_v11, %v15159_v44 }
 0x514   : > { %v6988_v6 = vpop.f32.mrf.mxu0 }
 0x515   : > { %v7310_v60 = vpop.f32.mrf.mxu1  ;;  %v15272_v15 = vadd.f32 %v11623_v49, %v7031_v40  ;;  %v7029_v55 = vadd.f32 %v6988_v6, %v15161_v42 }
 0x516   : > { %v11634_v3 = vpop.f32.mrf.mxu0 }
 0x517   : > { %v11674_v48 = vpop.f32.mrf.mxu1  ;;  %v15275_v62 = vadd.f32 %v7310_v60, %v7029_v55  ;;  %v7646_v32 = vadd.f32 %v11634_v3, %v15166_v10 }
 0x518   : > { %v7517_v13 = vpop.f32.mrf.mxu0 }
 0x519   : > { %v7839_v18 = vpop.f32.mrf.mxu1  ;;  %v15278_v47 = vadd.f32 %v11674_v48, %v7646_v32  ;;  %v7644_v26 = vadd.f32 %v7517_v13, %v15169_v9 }
 0x51a   : > { %v11635_v35 = vpop.f32.mrf.mxu0 }
 0x51b   : > { %v11675_v44 = vpop.f32.mrf.mxu1  ;;  %v15281_v54 = vadd.f32 %v7839_v18, %v7644_v26  ;;  %v7647_v21 = vadd.f32 %v11635_v35, %v15172_v28 }
 0x51c   : > { %v7520_v5 = vpop.f32.mrf.mxu0 }
 0x51d   : > { %v7842_v42 = vpop.f32.mrf.mxu1  ;;  %v15284_v36 = vadd.f32 %v11675_v44, %v7647_v21  ;;  %v7645_v39 = vadd.f32 %v7520_v5, %v15176_v22 }
 0x51e   : > { %v11638_v33 = vpop.f32.mrf.mxu0 }
 0x51f   : > { %v11678_v10 = vpop.f32.mrf.mxu1  ;;  %v15287_v46 = vadd.f32 %v7842_v42, %v7645_v39  ;;  %v7650_v58 = vadd.f32 %v11638_v33, %v15180_v50 }
 0x520   : > { %v7533_v45 = vpop.f32.mrf.mxu0 }
 0x521   : > { %v7855_v9 = vpop.f32.mrf.mxu1  ;;  %v15290_v17 = vadd.f32 %v11678_v10, %v7650_v58  ;;  %v7648_v38 = vadd.f32 %v7533_v45, %v15183_v43 }
 0x522   : > { %v11639_v14 = vpop.f32.mrf.mxu0 }
 0x523   : > { %v11679_v28 = vpop.f32.mrf.mxu1  ;;  %v15293_v16 = vadd.f32 %v7855_v9, %v7648_v38  ;;  %v7651_v7 = vadd.f32 %v11639_v14, %v15186_v31 }
 0x524   : > { %v7536_v20 = vpop.f32.mrf.mxu0 }
 0x525   : > { %v7858_v22 = vpop.f32.mrf.mxu1  ;;  %v15296_v56 = vadd.f32 %v11679_v28, %v7651_v7  ;;  %v7649_v11 = vadd.f32 %v7536_v20, %v15190_v30 }
 0x526   : > { %v11642_v49 = vpop.f32.mrf.mxu0 }
 0x527   : > { %v11682_v50 = vpop.f32.mrf.mxu1  ;;  %v15299_v40 = vadd.f32 %v7858_v22, %v7649_v11  ;;  %v7654_v6 = vadd.f32 %v11642_v49, %v15194_v8 }
 0x528   : > { %v7549_v60 = vpop.f32.mrf.mxu0 }
 0x529   : > { %v7871_v43 = vpop.f32.mrf.mxu1  ;;  %v15302_v55 = vadd.f32 %v11682_v50, %v7654_v6  ;;  %v7652_v3 = vadd.f32 %v7549_v60, %v15197_v29 }
 0x52a   : > { %v11643_v48 = vpop.f32.mrf.mxu0 }
 0x52b   : > { %v11683_v31 = vpop.f32.mrf.mxu1  ;;  %v15305_v32 = vadd.f32 %v7871_v43, %v7652_v3  ;;  %v7655_v13 = vadd.f32 %v11643_v48, %v15200_v24 }
 0x52c   : > { %v7552_v18 = vpop.f32.mrf.mxu0 }
 0x52d   : > { %v7874_v30 = vpop.f32.mrf.mxu1  ;;  %v15308_v26 = vadd.f32 %v11683_v31, %v7655_v13  ;;  %v7653_v35 = vadd.f32 %v7552_v18, %v15204_v12 }
 0x52e   : > { %v11646_v44 = vpop.f32.mrf.mxu0 }
 0x52f   : > { %v11686_v8 = vpop.f32.mrf.mxu1  ;;  %v15311_v21 = vadd.f32 %v7874_v30, %v7653_v35  ;;  %v7658_v5 = vadd.f32 %v11646_v44, %v15208_v27 }
 0x530   : > { %v7565_v42 = vpop.f32.mrf.mxu0 }
 0x531   : > { %v7887_v29 = vpop.f32.mrf.mxu1  ;;  %v15314_v39 = vadd.f32 %v11686_v8, %v7658_v5  ;;  %v7656_v33 = vadd.f32 %v7565_v42, %v15211_v63 }
 0x532   : > { %v11647_v10 = vpop.f32.mrf.mxu0 }
 0x533   : > { %v11687_v24 = vpop.f32.mrf.mxu1  ;;  %v15317_v58 = vadd.f32 %v7887_v29, %v7656_v33  ;;  %v7659_v45 = vadd.f32 %v11647_v10, %v15214_v34 }
 0x534   : > { %v7568_v9 = vpop.f32.mrf.mxu0 }
 0x535   : > { %v7890_v12 = vpop.f32.mrf.mxu1  ;;  %v15320_v38 = vadd.f32 %v11687_v24, %v7659_v45  ;;  %v7657_v14 = vadd.f32 %v7568_v9, %v15220_v23 }
 0x536   : > { %v11650_v28 = vpop.f32.mrf.mxu0 }
 0x537   : > { %v11690_v27 = vpop.f32.mrf.mxu1  ;;  %v15323_v7 = vadd.f32 %v7890_v12, %v7657_v14  ;;  %v7662_v20 = vadd.f32 %v11650_v28, %v15224_v61 }
 0x538   : > { %v7581_v22 = vpop.f32.mrf.mxu0 }
 0x539   : > { %v7903_v63 = vpop.f32.mrf.mxu1  ;;  %v15326_v11 = vadd.f32 %v11690_v27, %v7662_v20  ;;  %v7660_v49 = vadd.f32 %v7581_v22, %v15228_v59 }
 0x53a   : > { %v11651_v50 = vpop.f32.mrf.mxu0 }
 0x53b   : > { %v11691_v34 = vpop.f32.mrf.mxu1  ;;  %v15329_v6 = vadd.f32 %v7903_v63, %v7660_v49  ;;  %v7663_v60 = vadd.f32 %v11651_v50, %v15231_v2 }
 0x53c   : > { %v7584_v43 = vpop.f32.mrf.mxu0 }
 0x53d   : > { %v7906_v23 = vpop.f32.mrf.mxu1  ;;  %v15332_v3 = vadd.f32 %v11691_v34, %v7663_v60  ;;  %v7661_v48 = vadd.f32 %v7584_v43, %v15234_v57 }
 0x53e   : > { %v11654_v31 = vpop.f32.mrf.mxu0 }
 0x53f   : > { %v11694_v61 = vpop.f32.mrf.mxu1  ;;  %v15335_v13 = vadd.f32 %v7906_v23, %v7661_v48  ;;  %v7666_v18 = vadd.f32 %v11654_v31, %v15238_v52 }
 0x540   : > { %v7597_v30 = vpop.f32.mrf.mxu0 }
 0x541   : > { %v7919_v59 = vpop.f32.mrf.mxu1  ;;  %v15338_v35 = vadd.f32 %v11694_v61, %v7666_v18  ;;  %v7664_v44 = vadd.f32 %v7597_v30, %v15241_v53 }
 0x542   : > { %v11655_v8 = vpop.f32.mrf.mxu0 }
 0x543   : > { %v11695_v2 = vpop.f32.mrf.mxu1  ;;  %v15341_v5 = vadd.f32 %v7919_v59, %v7664_v44  ;;  %v7667_v42 = vadd.f32 %v11655_v8, %v15244_v41 }
 0x544   : > { %v7600_v29 = vpop.f32.mrf.mxu0 }
 0x545   : > { %v7922_v57 = vpop.f32.mrf.mxu1  ;;  %v15344_v33 = vadd.f32 %v11695_v2, %v7667_v42  ;;  %v7665_v10 = vadd.f32 %v7600_v29, %v15248_v25 }
 0x546   : > { %v11658_v24 = vpop.f32.mrf.mxu0 }
 0x547   : > { %v11698_v52 = vpop.f32.mrf.mxu1  ;;  %v15347_v45 = vadd.f32 %v7922_v57, %v7665_v10  ;;  %v7670_v9 = vadd.f32 %v11658_v24, %v15253_v0 }
 0x548   : > { %v7613_v12 = vpop.f32.mrf.mxu0 }
 0x549   : > { %v7935_v53 = vpop.f32.mrf.mxu1  ;;  %v15350_v14 = vadd.f32 %v11698_v52, %v7670_v9  ;;  %v7668_v28 = vadd.f32 %v7613_v12, %v15256_v1 }
 0x54a   : > { %v11659_v27 = vpop.f32.mrf.mxu0 }
 0x54b   : > { %v11699_v41 = vpop.f32.mrf.mxu1  ;;  %v15353_v20 = vadd.f32 %v7935_v53, %v7668_v28  ;;  %v7671_v22 = vadd.f32 %v11659_v27, %v15259_v51 }
 0x54c   : > { %v7616_v63 = vpop.f32.mrf.mxu0 }
 0x54d   : > { %v7938_v25 = vpop.f32.mrf.mxu1  ;;  %v15356_v49 = vadd.f32 %v11699_v41, %v7671_v22  ;;  %v7669_v50 = vadd.f32 %v7616_v63, %v15263_v37 }
 0x54e   : > { %v11662_v34 = vpop.f32.mrf.mxu0 }
 0x54f   : > { %v15359_v0 = vpop.f32.mrf.mxu1  ;;  %v15361_v60 = vadd.f32 %v7938_v25, %v7669_v50  ;;  %v15364_v43 = vadd.f32 %v11662_v34, %v15266_v19 }
 0x550   : > { %v7629_v1 = vpop.f32.mrf.mxu0 }
 0x551   : > { %v7951_v23 = vpop.f32.mrf.mxu1  ;;  %v7672_v48 = vadd.f32 %v7629_v1, %v15269_v4 }
 0x552   : > { %v11663_v31 = vpop.f32.mrf.mxu0 }
 0x553   : > { %v15367_v51 = vpop.f32.mrf.mxu1  ;;  %v15369_v61 = vadd.f32 %v7951_v23, %v7672_v48  ;;  %v15372_v18 = vadd.f32 %v11663_v31, %v15272_v15 }
 0x554   : > { %v7632_v37 = vpop.f32.mrf.mxu0 }
 0x555   : > { %v7954_v30 = vpop.f32.mrf.mxu1  ;;  %v7673_v59 = vadd.f32 %v7632_v37, %v15275_v62 }
 0x556   : > { %v11714_v44 = vpop.f32.mrf.mxu0 }
 0x557   : > { %v11754_v8 = vpop.f32.mrf.mxu1  ;;  %v15375_v19 = vadd.f32 %v7954_v30, %v7673_v59  ;;  %v8290_v2 = vadd.f32 %v11714_v44, %v15278_v47 }
 0x558   : > { %v8161_v42 = vpop.f32.mrf.mxu0 }
 0x559   : > { %v8483_v4 = vpop.f32.mrf.mxu1  ;;  %v15378_v29 = vadd.f32 %v11754_v8, %v8290_v2  ;;  %v8288_v57 = vadd.f32 %v8161_v42, %v15281_v54 }
 0x55a   : > { %v11715_v10 = vpop.f32.mrf.mxu0 }
 0x55b   : > { %v11755_v24 = vpop.f32.mrf.mxu1  ;;  %v15381_v15 = vadd.f32 %v8483_v4, %v8288_v57  ;;  %v8291_v52 = vadd.f32 %v11715_v10, %v15284_v36 }
 0x55c   : > { %v8164_v9 = vpop.f32.mrf.mxu0 }
 0x55d   : > { %v8486_v62 = vpop.f32.mrf.mxu1  ;;  %v15384_v12 = vadd.f32 %v11755_v24, %v8291_v52  ;;  %v8289_v53 = vadd.f32 %v8164_v9, %v15287_v46 }
 0x55e   : > { %v11718_v28 = vpop.f32.mrf.mxu0 }
 0x55f   : > { %v11758_v47 = vpop.f32.mrf.mxu1  ;;  %v15387_v27 = vadd.f32 %v8486_v62, %v8289_v53  ;;  %v8294_v41 = vadd.f32 %v11718_v28, %v15290_v17 }
 0x560   : > { %v8177_v22 = vpop.f32.mrf.mxu0 }
 0x561   : > { %v8499_v54 = vpop.f32.mrf.mxu1  ;;  %v15390_v63 = vadd.f32 %v11758_v47, %v8294_v41  ;;  %v8292_v25 = vadd.f32 %v8177_v22, %v15293_v16 }
 0x562   : > { %v11719_v50 = vpop.f32.mrf.mxu0 }
 0x563   : > { %v11759_v36 = vpop.f32.mrf.mxu1  ;;  %v15393_v34 = vadd.f32 %v8499_v54, %v8292_v25  ;;  %v8295_v1 = vadd.f32 %v11719_v50, %v15296_v56 }
 0x564   : > { %v8180_v23 = vpop.f32.mrf.mxu0 }
 0x565   : > { %v8502_v46 = vpop.f32.mrf.mxu1  ;;  %v15396_v48 = vadd.f32 %v11759_v36, %v8295_v1  ;;  %v8293_v31 = vadd.f32 %v8180_v23, %v15299_v40 }
 0x566   : > { %v11722_v37 = vpop.f32.mrf.mxu0 }
 0x567   : > { %v15399_v17 = vpop.f32.mrf.mxu1  ;;  %v15401_v30 = vadd.f32 %v8502_v46, %v8293_v31  ;;  %v15404_v59 = vadd.f32 %v11722_v37, %v15302_v55 }
 0x568   : > { %v8193_v16 = vpop.f32.mrf.mxu0 }
 0x569   : > { %v8515_v44 = vpop.f32.mrf.mxu1  ;;  %v8296_v8 = vadd.f32 %v8193_v16, %v15305_v32 }
 0x56a   : > { %v11723_v2 = vpop.f32.mrf.mxu0 }
 0x56b   : > { %v15407_v56 = vpop.f32.mrf.mxu1  ;;  %v15409_v42 = vadd.f32 %v8515_v44, %v8296_v8  ;;  %v15412_v4 = vadd.f32 %v11723_v2, %v15308_v26 }
 0x56c   : > { %v8196_v40 = vpop.f32.mrf.mxu0 }
 0x56d   : > { %v15414_v57 = vpop.f32.mrf.mxu1  ;;  %v15417_v10 = vadd.f32 %v8196_v40, %v15311_v21 }
 0x56e   : > { %v11726_v55 = vpop.f32.mrf.mxu0 }
 0x56f   : > { %v15419_v24 = vpop.f32.mrf.mxu1  ;;  %v15422_v52 = vadd.f32 %v11726_v55, %v15314_v39 }
 0x570   : > { %v8209_v32 = vpop.f32.mrf.mxu0 }
 0x571   : > { %v15424_v9 = vpop.f32.mrf.mxu1  ;;  %v15427_v62 = vadd.f32 %v8209_v32, %v15317_v58 }
 0x572   : > { %v11727_v26 = vpop.f32.mrf.mxu0 }
 0x573   : > { %v15429_v53 = vpop.f32.mrf.mxu1  ;;  %v15432_v28 = vadd.f32 %v11727_v26, %v15320_v38 }
 0x574   : > { %v8212_v21 = vpop.f32.mrf.mxu0 }
 0x575   : > { %v15434_v47 = vpop.f32.mrf.mxu1  ;;  %v15437_v41 = vadd.f32 %v8212_v21, %v15323_v7 }
 0x576   : > { %v11730_v39 = vpop.f32.mrf.mxu0 }
 0x577   : > { %v11770_v22 = vpop.f32.mrf.mxu1  ;;  %v8306_v54 = vadd.f32 %v11730_v39, %v15326_v11 }
 0x578   : > { %v8225_v25 = vpop.f32.mrf.mxu0 }
 0x579   : > { %v8547_v50 = vpop.f32.mrf.mxu1  ;;  %v15440_v58 = vadd.f32 %v11770_v22, %v8306_v54  ;;  %v8304_v36 = vadd.f32 %v8225_v25, %v15329_v6 }
 0x57a   : > { %v11731_v1 = vpop.f32.mrf.mxu0 }
 0x57b   : > { %v11771_v23 = vpop.f32.mrf.mxu1  ;;  %v15443_v38 = vadd.f32 %v8547_v50, %v8304_v36  ;;  %v8307_v46 = vadd.f32 %v11731_v1, %v15332_v3 }
 0x57c   : > { %v8228_v31 = vpop.f32.mrf.mxu0 }
 0x57d   : > { %v15446_v37 = vadd.f32 %v11771_v23, %v8307_v46  ;;  %v8305_v7 = vadd.f32 %v8228_v31, %v15335_v13  ;;  %v8550_v16 = vpop.f32.mrf.mxu1 }
 0x57e   : > { %v11734_v44 = vpop.f32.mrf.mxu0 }
 0x57f   : > { %v8627_v11 = vadd.f32 %v8550_v16, %v8305_v7  ;;  %v15450_v8 = vadd.f32 %v11734_v44, %v15338_v35 }
 0x580   : > { %v8241_v2 = vpop.f32.mrf.mxu0 }
 0x581   : > { %v15453_v6 = vadd.f32 %v8241_v2, %v15341_v5 }
 0x582   : > { %v11735_v40 = vpop.f32.mrf.mxu0 }
 0x583   : > { %v15456_v55 = vadd.f32 %v11735_v40, %v15344_v33  ;;  %v15505_v40 = vpop.f32.mrf.mxu1 }
 0x584   : > { %v8244_v3 = vpop.f32.mrf.mxu0 }
 0x585   : > { %v15459_v32 = vadd.f32 %v8244_v3, %v15347_v45 }
 0x586   : > { %v11738_v26 = vpop.f32.mrf.mxu0 }
 0x587   : > { %v15462_v13 = vadd.f32 %v11738_v26, %v15350_v14  ;;  %v15509_v26 = vpop.f32.mrf.mxu1 }
 0x588   : > { %v8257_v21 = vpop.f32.mrf.mxu0  ;;  %16164 = vst [vmem:[#allocation27_spill] sm:$0xff] %v15509_v26 }
 0x589   : > { %v15465_v35 = vadd.f32 %v8257_v21, %v15353_v20 }
 0x58a   : > { %v11739_v39 = vpop.f32.mrf.mxu0 }
 0x58b   : > { %v15468_v5 = vadd.f32 %v11739_v39, %v15356_v49  ;;  %v15516_v39 = vpop.f32.mrf.mxu1 }
 0x58c   : > { %v8260_v22 = vpop.f32.mrf.mxu0 }
 0x58d   : > { %v15471_v33 = vadd.f32 %v8260_v22, %v15361_v60 }
 0x58e   : > { %v11742_v54 = vpop.f32.mrf.mxu0 }
 0x590   : > { %v8273_v25 = vpop.f32.mrf.mxu0 }
 0x591   : > { %v15474_v45 = vadd.f32 %v8273_v25, %v15369_v61  ;;  %v15518_v25 = vpop.f32.mrf.mxu1 }
 0x592   : > { %v15476_v50 = vpop.f32.mrf.mxu0 }
 0x594   : > { %v8276_v14 = vpop.f32.mrf.mxu0 }
 0x595   : > { %v15479_v36 = vadd.f32 %v8276_v14, %v15375_v19 }
 0x596   : > { %v11794_v20 = vpop.f32.mrf.mxu0 }
 0x597   : > { %v15482_v1 = vadd.f32 %v11794_v20, %v15378_v29  ;;  %v15520_v20 = vpop.f32.mrf.mxu1 }
 0x598   : > { %v8805_v49 = vpop.f32.mrf.mxu0 }
 0x599   : > { %16159 = vst [vmem:[#allocation64_spill] sm:$0xff] %v15482_v1  ;;  %v15485_v23 = vadd.f32 %v8805_v49, %v15381_v15 }
 0x59a   : > { %v11795_v60 = vpop.f32.mrf.mxu0 }
 0x59b   : > { %16160 = vst [vmem:[#allocation3_spill] sm:$0xff] %v15485_v23  ;;  %v15488_v46 = vadd.f32 %v11795_v60, %v15384_v12 }
 0x59c   : > { %v8808_v61 = vpop.f32.mrf.mxu0 }
 0x59d   : > { %16161 = vst [vmem:[#allocation16_spill] sm:$0xff] %v15488_v46  ;;  %v15491_v31 = vadd.f32 %v8808_v61, %v15387_v27 }
 0x59e   : > { %v11798_v7 = vpop.f32.mrf.mxu0 }
 0x59f   : > { %16162 = vst [vmem:[#allocation4_spill] sm:$0xff] %v15491_v31  ;;  %v15494_v19 = vadd.f32 %v11798_v7, %v15390_v63 }
 0x5a0   : > { %v8821_v16 = vpop.f32.mrf.mxu0 }
 0x5a1   : > { %v15497_v29 = vadd.f32 %v8821_v16, %v15393_v34 }
 0x5a2   : > { %v11799_v44 = vpop.f32.mrf.mxu0 }
 0x5a3   : > { %16163 = vst [vmem:[#allocation20_spill] sm:$0xff] %v15497_v29  ;;  %v15500_v15 = vadd.f32 %v11799_v44, %v15396_v48  ;;  %v15531_v44 = vld [vmem:[%s15879_s8] ss:$0 sm:$0xff]  ;;  %v7997_v29 = vadd.f32 %v15367_v51, %v15372_v18 }
 0x5a4   : > { %v8824_v2 = vpop.f32.mrf.mxu0 }
 0x5a5   : > { %v15503_v12 = vadd.f32 %v8824_v2, %v15401_v30 }
 0x5a6   : > { %v15507_v27 = vpop.f32.mrf.mxu0 }
 0x5a8   : > { %v8837_v3 = vpop.f32.mrf.mxu0 }
 0x5a9   : > { %v15512_v63 = vadd.f32 %v8837_v3, %v15409_v42  ;;  %v15525_v42 = vpop.f32.mrf.mxu1 }
 0x5aa   : > { %v11803_v34 = vpop.f32.mrf.mxu0 }
 0x5ac   : > { %v15514_v21 = vpop.f32.mrf.mxu0 }
 0x5ae   : > { %v11806_v48 = vpop.f32.mrf.mxu0 }
 0x5b0   : > { %v8853_v22 = vpop.f32.mrf.mxu0 }
 0x5b2   : > { %v11807_v30 = vpop.f32.mrf.mxu0 }
 0x5b4   : > { %v8856_v14 = vpop.f32.mrf.mxu0 }
 0x5b6   : > { %v11810_v49 = vpop.f32.mrf.mxu0 }
 0x5b7   : > { %v15523_v60 = vadd.f32 %v11810_v49, %v15440_v58  ;;  %v11779_v49 = vpop.f32.mrf.mxu1 }
 0x5b8   : > { %v8869_v61 = vpop.f32.mrf.mxu0 }
 0x5b9   : > { %16165 = vst [vmem:[#allocation7_spill] sm:$0xff] %v15523_v60  ;;  %v8948_v7 = vadd.f32 %v8869_v61, %v15443_v38  ;;  %v15545_v38 = vpop.f32.mrf.mxu1 }
 0x5ba   : > { %v11811_v16 = vpop.f32.mrf.mxu0 }
 0x5bb   : > { %v15534_v2 = vadd.f32 %v11811_v16, %v15446_v37  ;;  %v15537_v3 = vadd.f32 %v15531_v44, %v8948_v7  ;;  %v11782_v1 = vpop.f32.mrf.mxu1  ;;  %v8624_v37 = vadd.f32 %v15419_v24, %v15422_v52  ;;  %v8623_v24 = vadd.f32 %v15434_v47, %v15437_v41 }
 0x5bc   : > { %v8872_v23 = vpop.f32.mrf.mxu0 }
 0x5bd   : > { %16166 = vst [vmem:[#allocation59_spill] sm:$0xff] %v15534_v2  ;;  %16167 = vst [vmem:[#allocation21_spill] sm:$0xff] %v15537_v3  ;;  %v15539_v58 = vadd.f32 %v8872_v23, %v8627_v11  ;;  %v7996_v11 = vadd.f32 %v15359_v0, %v15364_v43  ;;  %v8595_v23 = vpop.f32.mrf.mxu1  ;;  %v8946_v16 = vadd.f32 %v11806_v48, %v8624_v37 }
 0x5be   : > { %v15541_v60 = vpop.f32.mrf.mxu0  ;;  %v8319_v48 = vadd.f32 %v15476_v50, %v7997_v29  ;;  %v8945_v37 = vadd.f32 %v8856_v14, %v8623_v24 }
 0x5bf   : > { %16168 = vst [vmem:[#allocation67_spill] sm:$0xff] %v15539_v58  ;;  %v8625_v58 = vadd.f32 %v15429_v53, %v15432_v28  ;;  %v8318_v2 = vadd.f32 %v11742_v54, %v7996_v11  ;;  %v11783_v52 = vpop.f32.mrf.mxu1  ;;  %v15566_v26 = vadd.f32 %v15531_v44, %v8946_v16  ;;  %v8622_v53 = vadd.f32 %v15424_v9, %v15427_v62 }
 0x5c0   : > { %v15543_v31 = vpop.f32.mrf.mxu0  ;;  %v15580_v50 = vadd.f32 %v15531_v44, %v8945_v37  ;;  %v8637_v37 = vadd.f32 %v11779_v49, %v15468_v5 }
 0x5c1   : > { %16169 = vst [vmem:[#allocation29_spill] sm:$0xff] %v15543_v31  ;;  %v8947_v0 = vadd.f32 %v11807_v30, %v8625_v58  ;;  %v8640_v28 = vadd.f32 %v11782_v1, %v8318_v2  ;;  %v8598_v11 = vpop.f32.mrf.mxu1  ;;  %v9017_v51 = vsub.f32 0.0, %v15566_v26  ;;  %v8944_v18 = vadd.f32 %v8853_v22, %v8622_v53 }
 0x5c2   : > { %v15547_v61 = vpop.f32.mrf.mxu0  ;;  %v8621_v30 = vadd.f32 %v15407_v56, %v15412_v4  ;;  %v8641_v58 = vadd.f32 %v11783_v52, %v8319_v48  ;;  %v8638_v1 = vadd.f32 %v8595_v23, %v15474_v45  ;;  %v8639_v29 = vadd.f32 %v8598_v11, %v15479_v36 }
 0x5c3   : > { %v15575_v47 = vadd.f32 %v15531_v44, %v8947_v0  ;;  %v9063_v2 = vmul.f32 1.442695, %v9017_v51  ;;  %v15588_v24 = vadd.f32 %v15531_v44, %v8944_v18  ;;  %v8620_v0 = vadd.f32 %v15399_v17, %v15404_v59 }
 0x5c4   : > { %v15549_v46 = vpop.f32.mrf.mxu0  ;;  %v8943_v22 = vadd.f32 %v11803_v34, %v8621_v30  ;;  %v9016_v48 = vsub.f32 0.0, %v15580_v50  ;;  %v8619_v51 = vadd.f32 %v15414_v57, %v15417_v10 }
 0x5c5   : > { %v9018_v56 = vsub.f32 0.0, %v15575_v47  ;;  %v8942_v53 = vadd.f32 %v15507_v27, %v8620_v0  ;;  %11966 = vpow2.f32 %v9063_v2  ;;  %v9015_v17 = vsub.f32 0.0, %v15588_v24 }
 0x5c6   : > { %v15553_v7 = vpop.f32.mrf.mxu0  ;;  %v15605_v11 = vadd.f32 %v15531_v44, %v8943_v22  ;;  %v9061_v18 = vmul.f32 1.442695, %v9016_v48  ;;  %v8941_v30 = vadd.f32 %v15514_v21, %v8619_v51  ;;  %v8635_v21 = vadd.f32 %v15545_v38, %v15471_v33 }
 0x5c7   : > { %v9065_v59 = vmul.f32 1.442695, %v9018_v56  ;;  %v9059_v57 = vmul.f32 1.442695, %v9015_v17 }
 0x5c8   : > { %v15557_v3 = vpop.f32.mrf.mxu0 }
 0x5ca   : > { %v11819_v31 = vpop.f32.mrf.mxu0 }
 0x5cc   : > { %v15568_v43 = vpop.f32.mrf.mxu0 }
 0x5cd   : > { %v8957_v2 = vadd.f32 %v15568_v43, %v8635_v21 }
 0x5ce   : > { %v11822_v54 = vpop.f32.mrf.mxu0 }
 0x5cf   : > { %v8962_v41 = vadd.f32 %v11822_v54, %v8640_v28  ;;  %v15647_v43 = vadd.f32 %v15531_v44, %v8957_v2 }
 0x5d0   : > { %v8917_v16 = vpop.f32.mrf.mxu0 }
 0x5d1   : > { %v15583_v9 = vadd.f32 %v15531_v44, %v8962_v41  ;;  %v8960_v23 = vadd.f32 %v8917_v16, %v8638_v1  ;;  %v8959_v41 = vadd.f32 %v11819_v31, %v8637_v37  ;;  %v8636_v16 = vadd.f32 %v15520_v20, %v15462_v13 }
 0x5d2   : > { %v11823_v62 = vpop.f32.mrf.mxu0  ;;  %v15627_v13 = vadd.f32 %v15531_v44, %v8941_v30  ;;  %v11967_v0 = vpop.eup %11966 }
 0x5d3   : > { %v8963_v14 = vadd.f32 %v11823_v62, %v8641_v58  ;;  %v9033_v4 = vsub.f32 0.0, %v15583_v9  ;;  %v15611_v5 = vadd.f32 %v15531_v44, %v8960_v23  ;;  %v15618_v58 = vadd.f32 %v15531_v44, %v8942_v53 }
 0x5d4   : > { %v8920_v52 = vpop.f32.mrf.mxu0  ;;  %v9014_v62 = vsub.f32 0.0, %v15605_v11  ;;  %v8958_v10 = vadd.f32 %v15553_v7, %v8636_v16  ;;  %v15623_v31 = vadd.f32 %v15531_v44, %v8959_v41  ;;  %v9012_v33 = vsub.f32 0.0, %v15627_v13 }
 0x5d5   : > { %v15596_v45 = vadd.f32 %v15531_v44, %v8963_v14  ;;  %v8961_v36 = vadd.f32 %v8920_v52, %v8639_v29  ;;  %v9095_v34 = vmul.f32 1.442695, %v9033_v4  ;;  %v9031_v1 = vsub.f32 0.0, %v15611_v5 }
 0x5d6   : > { %v9013_v20 = vsub.f32 0.0, %v15618_v58  ;;  %v9057_v22 = vmul.f32 1.442695, %v9014_v62  ;;  %v15633_v14 = vadd.f32 %v15531_v44, %v8958_v10  ;;  %v9030_v7 = vsub.f32 0.0, %v15623_v31 }
 0x5d7   : > { %v9034_v28 = vsub.f32 0.0, %v15596_v45  ;;  %v15602_v54 = vadd.f32 %v15531_v44, %v8961_v36  ;;  %11968 = vpow2.f32 %v9095_v34  ;;  %v9091_v56 = vmul.f32 1.442695, %v9031_v1 }
 0x5d8   : > { %11970 = vpow2.f32 %v9065_v59  ;;  %v8634_v4 = vadd.f32 %v15525_v42, %v15465_v35  ;;  %v15641_v52 = vadd.f32 %v15531_v44, %v15512_v63  ;;  %v9055_v38 = vmul.f32 1.442695, %v9013_v20 }
 0x5d9   : > { %v9097_v27 = vmul.f32 1.442695, %v9034_v28  ;;  %v9032_v49 = vsub.f32 0.0, %v15602_v54  ;;  %11972 = vpow2.f32 %v9061_v18  ;;  %v9029_v48 = vsub.f32 0.0, %v15633_v14 }
 0x5da   : > { %v8956_v36 = vadd.f32 %v15557_v3, %v8634_v4  ;;  %v9089_v34 = vmul.f32 1.442695, %v9030_v7  ;;  %v8633_v35 = vadd.f32 %v15516_v39, %v15456_v55  ;;  %v15653_v63 = vadd.f32 %v15531_v44, %v15500_v15 }
 0x5db   : > { %11974 = vpow2.f32 %v9097_v27  ;;  %v9093_v29 = vmul.f32 1.442695, %v9032_v49  ;;  %v9011_v42 = vsub.f32 0.0, %v15641_v52  ;;  %v9053_v37 = vmul.f32 1.442695, %v9012_v33 }
 0x5dc   : > { %11976 = vpow2.f32 %v9059_v57  ;;  %v9113_v53 = vadd.f32 1.0, %v11967_v0  ;;  %v8955_v17 = vadd.f32 %v15547_v61, %v8633_v35  ;;  %v9087_v59 = vmul.f32 1.442695, %v9029_v48  ;;  %v16171_v0 = vld [vmem:[#allocation20_spill] sm:$0xff] }
 0x5dd   : > { %11978 = vpow2.f32 %v9093_v29  ;;  %v15658_v51 = vadd.f32 %v15531_v44, %v8956_v36  ;;  %v8632_v55 = vadd.f32 %v15505_v40, %v15450_v8  ;;  %v9028_v15 = vsub.f32 0.0, %v15647_v43 }
 0x5de   : > { %11980 = vpow2.f32 %v9057_v22  ;;  %v15665_v41 = vadd.f32 %v15531_v44, %v15494_v19  ;;  %v9010_v27 = vsub.f32 0.0, %v15653_v63  ;;  %v9051_v61 = vmul.f32 1.442695, %v9011_v42 }
 0x5df   : > { %11982 = vpow2.f32 %v9091_v56  ;;  %v8954_v16 = vadd.f32 %v15541_v60, %v8632_v55  ;;  %v15670_v8 = vadd.f32 %v15531_v44, %v8955_v17  ;;  %v9027_v40 = vsub.f32 0.0, %v15658_v51  ;;  %v16170_v56 = vld [vmem:[#allocation27_spill] sm:$0xff]  ;;  %v16173_v17 = vld [vmem:[#allocation16_spill] sm:$0xff] }
 0x5e0   : > { %11984 = vpow2.f32 %v9055_v38  ;;  %v8631_v19 = vadd.f32 %v15518_v25, %v15459_v32  ;;  %v9085_v10 = vmul.f32 1.442695, %v9028_v15  ;;  %v9009_v29 = vsub.f32 0.0, %v15665_v41 }
 0x5e1   : > { %11986 = vpow2.f32 %v9089_v34  ;;  %v9049_v21 = vmul.f32 1.442695, %v9010_v27  ;;  %v15678_v60 = vadd.f32 %v15531_v44, %v15503_v12  ;;  %v15681_v22 = vadd.f32 %v15531_v44, %v8954_v16 }
 0x5e2   : > { %v9026_v32 = vsub.f32 0.0, %v15670_v8  ;;  %v8953_v25 = vadd.f32 %v15549_v46, %v8631_v19  ;;  %v9083_v2 = vmul.f32 1.442695, %v9027_v40  ;;  %v8630_v4 = vadd.f32 %v16170_v56, %v15453_v6  ;;  %v16174_v40 = vld [vmem:[#allocation64_spill] sm:$0xff] }
 0x5e3   : > { %v9047_v38 = vmul.f32 1.442695, %v9009_v29  ;;  %v15689_v48 = vadd.f32 %v15531_v44, %v16171_v0  ;;  %v9008_v36 = vsub.f32 0.0, %v15678_v60  ;;  %v9025_v42 = vsub.f32 0.0, %v15681_v22  ;;  %v16176_v0 = vld [vmem:[#allocation4_spill] sm:$0xff] }
 0x5e4   : > { %v11969_v23 = vpop.eup %11968  ;;  %v15695_v6 = vadd.f32 %v15531_v44, %v8953_v25  ;;  %v15709_v19 = vadd.f32 %v15531_v44, %v16174_v40 }
 0x5e5   : > { %v9129_v28 = vadd.f32 1.0, %v11969_v23  ;;  %v11971_v3 = vpop.eup %11970  ;;  %v16172_v23 = vld [vmem:[#allocation29_spill] sm:$0xff]  ;;  %v9045_v55 = vmul.f32 1.442695, %v9008_v36  ;;  %v15722_v36 = vadd.f32 %v15531_v44, %v16176_v0 }
 0x5e6   : > { %v11973_v18 = vpop.eup %11972  ;;  %v9114_v49 = vadd.f32 1.0, %v11971_v3  ;;  %v8952_v35 = vadd.f32 %v16172_v23, %v8630_v4  ;;  %v9024_v16 = vsub.f32 0.0, %v15695_v6 }
 0x5e7   : > { %11988 = vrcp.f32 %v9129_v28  ;;  %v9112_v57 = vadd.f32 1.0, %v11973_v18  ;;  %v9007_v18 = vsub.f32 0.0, %v15689_v48 }
 0x5e8   : > { %v11975_v39 = vpop.eup %11974  ;;  %11990 = vpow2.f32 %v9053_v37  ;;  %v9081_v37 = vmul.f32 1.442695, %v9026_v32 }
 0x5e9   : > { %11992 = vrcp.f32 %v9113_v53  ;;  %v9130_v30 = vadd.f32 1.0, %v11975_v39  ;;  %v11977_v62 = vpop.eup %11976 }
 0x5ea   : > { %11994 = vpow2.f32 %v9087_v59  ;;  %v11979_v1 = vpop.eup %11978  ;;  %v9111_v20 = vadd.f32 1.0, %v11977_v62  ;;  %v15699_v59 = vadd.f32 %v15531_v44, %v16173_v17 }
 0x5eb   : > { %11996 = vrcp.f32 %v9130_v30  ;;  %v11981_v7 = vpop.eup %11980  ;;  %v9128_v33 = vadd.f32 1.0, %v11979_v1  ;;  %v9043_v1 = vmul.f32 1.442695, %v9007_v18 }
 0x5ec   : > { %11998 = vpow2.f32 %v9051_v61  ;;  %v11983_v12 = vpop.eup %11982  ;;  %v9110_v34 = vadd.f32 1.0, %v11981_v7  ;;  %v9079_v61 = vmul.f32 1.442695, %v9025_v42  ;;  %v16175_v7 = vld [vmem:[#allocation59_spill] sm:$0xff] }
 0x5ed   : > { %12000 = vrcp.f32 %v9114_v49  ;;  %v11985_v46 = vpop.eup %11984  ;;  %v9127_v28 = vadd.f32 1.0, %v11983_v12  ;;  %v15704_v49 = vadd.f32 %v15531_v44, %v8952_v35  ;;  %v15716_v32 = vadd.f32 %v15531_v44, %v16175_v7 }
 0x5ee   : > { %12002 = vrcp.f32 %v9112_v57  ;;  %v11987_v53 = vpop.eup %11986  ;;  %v9109_v39 = vadd.f32 1.0, %v11985_v46  ;;  %v9005_v12 = vsub.f32 0.0, %v15709_v19  ;;  %v16177_v46 = vld [vmem:[#allocation7_spill] sm:$0xff] }
 0x5ef   : > { %12004 = vpow2.f32 %v9085_v10  ;;  %v9126_v62 = vadd.f32 1.0, %v11987_v53  ;;  %v9006_v10 = vsub.f32 0.0, %v15699_v59  ;;  %v9023_v25 = vsub.f32 0.0, %v15704_v49 }
 0x5f0   : > { %12006 = vpow2.f32 %v9049_v21  ;;  %v15728_v42 = vadd.f32 %v15531_v44, %v16177_v46  ;;  %v9039_v18 = vmul.f32 1.442695, %v9005_v12 }
 0x5f1   : > { %12008 = vrcp.f32 %v9111_v20  ;;  %v9075_v53 = vmul.f32 1.442695, %v9023_v25 }
 0x5f2   : > { %12010 = vpow2.f32 %v9083_v2  ;;  %v9077_v2 = vmul.f32 1.442695, %v9024_v16 }
 0x5f3   : > { %12012 = vrcp.f32 %v9128_v33 }
 0x5f4   : > { %v11989_v3 = vpop.eup %11988  ;;  %12014 = vpow2.f32 %v9047_v38  ;;  %v9041_v38 = vmul.f32 1.442695, %v9006_v10 }
 0x5f5   : > { %v11991_v15 = vpop.eup %11990  ;;  %12016 = vrcp.f32 %v9110_v34  ;;  %9255 = vrot.lane.b32.xlu1 %v11989_v3, %s12103_s20 }
 0x5f6   : > { %v11993_v27 = vpop.eup %11992  ;;  %12018 = vpow2.f32 %v9081_v37  ;;  %v9108_v21 = vadd.f32 1.0, %v11991_v15  ;;  %v9022_v37 = vsub.f32 0.0, %v15716_v32 }
 0x5f7   : > { %v11995_v30 = vpop.eup %11994  ;;  %12020 = vrcp.f32 %v9127_v28 }
 0x5f8   : > { %v11997_v57 = vpop.eup %11996  ;;  %12022 = vpow2.f32 %v9045_v55  ;;  %v9125_v4 = vadd.f32 1.0, %v11995_v30  ;;  %v16178_v55 = vld [vmem:[#allocation3_spill] sm:$0xff]  ;;  %v9021_v30 = vsub.f32 0.0, %v15728_v42 }
 0x5f9   : > { %v11999_v29 = vpop.eup %11998  ;;  %12024 = vrcp.f32 %v9109_v39  ;;  %9223 = vrot.lane.b32.xlu1 %v11993_v27, %s12103_s20  ;;  %9257 = vrot.lane.b32.xlu0 %v11997_v57, %s12103_s20  ;;  %v15733_v15 = vadd.f32 %v15531_v44, %v16178_v55  ;;  %v9004_v39 = vsub.f32 0.0, %v15722_v36  ;;  %v16179_v57 = vld [vmem:[#allocation67_spill] sm:$0xff] }
 0x5fa   : > { %v12001_v20 = vpop.eup %12000  ;;  %12026 = vpow2.f32 %v9079_v61  ;;  %v9107_v23 = vadd.f32 1.0, %v11999_v29  ;;  %v15741_v40 = vadd.f32 %v15531_v44, %v16179_v57 }
 0x5fb   : > { %v12003_v56 = vpop.eup %12002  ;;  %12028 = vrcp.f32 %v9126_v62  ;;  %v9073_v62 = vmul.f32 1.442695, %v9022_v37 }
 0x5fc   : > { %v12005_v33 = vpop.eup %12004  ;;  %12030 = vpow2.f32 %v9043_v1  ;;  %v9020_v44 = vsub.f32 0.0, %v15741_v40 }
 0x5fd   : > { %v12007_v34 = vpop.eup %12006  ;;  %12032 = vrcp.f32 %v9108_v21  ;;  %9225 = vrot.lane.b32.xlu0 %v12001_v20, %s12103_s20  ;;  %9221 = vrot.lane.b32.xlu1 %v12003_v56, %s12103_s20  ;;  %v9124_v3 = vadd.f32 1.0, %v12005_v33  ;;  %v9003_v21 = vsub.f32 0.0, %v15733_v15  ;;  %v9037_v20 = vmul.f32 1.442695, %v9004_v39 }
 0x5fe   : > { %v12009_v35 = vpop.eup %12008  ;;  %12034 = vpow2.f32 %v9077_v2  ;;  %v9106_v61 = vadd.f32 1.0, %v12007_v34  ;;  %v9071_v56 = vmul.f32 1.442695, %v9021_v30  ;;  %v9069_v37 = vmul.f32 1.442695, %v9020_v44 }
 0x5ff   : > { %v12011_v28 = vpop.eup %12010  ;;  %12036 = vrcp.f32 %v9125_v4 }
 0x600   : > { %v12013_v17 = vpop.eup %12012  ;;  %12038 = vpow2.f32 %v9041_v38  ;;  %v9123_v1 = vadd.f32 1.0, %v12011_v28  ;;  %v9035_v38 = vmul.f32 1.442695, %v9003_v21 }
 0x601   : > { %v12015_v27 = vpop.eup %12014  ;;  %12040 = vrcp.f32 %v9107_v23  ;;  %9253 = vrot.lane.b32.xlu0 %v12013_v17, %s12103_s20  ;;  %9219 = vrot.lane.b32.xlu1 %v12009_v35, %s12103_s20  ;;  %v16180_v35 = vld [vmem:[#allocation21_spill] sm:$0xff] }
 0x602   : > { %v12017_v16 = vpop.eup %12016  ;;  %12042 = vpow2.f32 %v9075_v53  ;;  %v9105_v25 = vadd.f32 1.0, %v12015_v27  ;;  %v9019_v46 = vsub.f32 0.0, %v16180_v35 }
 0x603   : > { %v12019_v10 = vpop.eup %12018  ;;  %12044 = vrcp.f32 %v9124_v3 }
 0x604   : > { %v12021_v29 = vpop.eup %12020  ;;  %12046 = vpow2.f32 %v9039_v18  ;;  %v9122_v33 = vadd.f32 1.0, %v12019_v10  ;;  %v9067_v39 = vmul.f32 1.442695, %v9019_v46 }
 0x605   : > { %v12023_v7 = vpop.eup %12022  ;;  %12048 = vrcp.f32 %v9106_v61  ;;  %9251 = vrot.lane.b32.xlu0 %v12021_v29, %s12103_s20  ;;  %9217 = vrot.lane.b32.xlu1 %v12017_v16, %s12103_s20 }
 0x606   : > { %v12025_v2 = vpop.eup %12024  ;;  %12050 = vpow2.f32 %v9073_v62  ;;  %v9104_v34 = vadd.f32 1.0, %v12023_v7 }
 0x607   : > { %v12027_v4 = vpop.eup %12026  ;;  %12052 = vrcp.f32 %v9123_v1 }
 0x608   : > { %v12029_v12 = vpop.eup %12028  ;;  %12054 = vpow2.f32 %v9037_v20  ;;  %v9121_v28 = vadd.f32 1.0, %v12027_v4 }
 0x609   : > { %v12031_v0 = vpop.eup %12030  ;;  %12056 = vrcp.f32 %v9105_v25  ;;  %9249 = vrot.lane.b32.xlu0 %v12029_v12, %s12103_s20  ;;  %9215 = vrot.lane.b32.xlu1 %v12025_v2, %s12103_s20 }
 0x60a   : > { %v12033_v23 = vpop.eup %12032  ;;  %12058 = vpow2.f32 %v9071_v56  ;;  %v9103_v18 = vadd.f32 1.0, %v12031_v0 }
 0x60b   : > { %v12035_v53 = vpop.eup %12034  ;;  %12060 = vrcp.f32 %v9122_v33 }
 0x60c   : > { %v12037_v3 = vpop.eup %12036  ;;  %12062 = vpow2.f32 %v9035_v38  ;;  %v9120_v61 = vadd.f32 1.0, %v12035_v53 }
 0x60d   : > { %v12039_v17 = vpop.eup %12038  ;;  %12064 = vrcp.f32 %v9104_v34  ;;  %9247 = vrot.lane.b32.xlu0 %v12037_v3, %s12103_s20  ;;  %9213 = vrot.lane.b32.xlu1 %v12033_v23, %s12103_s20 }
 0x60e   : > { %v12041_v55 = vpop.eup %12040  ;;  %12066 = vpow2.f32 %v9069_v37  ;;  %v9102_v57 = vadd.f32 1.0, %v12039_v17 }
 0x60f   : > { %v12043_v27 = vpop.eup %12042  ;;  %12068 = vrcp.f32 %v9121_v28 }
 0x610   : > { %v12045_v16 = vpop.eup %12044  ;;  %12070 = vrcp.f32 %v9103_v18  ;;  %v9119_v1 = vadd.f32 1.0, %v12043_v27 }
 0x611   : > { %v12047_v30 = vpop.eup %12046  ;;  %9245 = vrot.lane.b32.xlu0 %v12045_v16, %s12103_s20  ;;  %9211 = vrot.lane.b32.xlu1 %v12041_v55, %s12103_s20  ;;  %12072 = vpow2.f32 %v9067_v39 }
 0x612   : > { %v12049_v62 = vpop.eup %12048  ;;  %12074 = vrcp.f32 %v9120_v61  ;;  %v9101_v7 = vadd.f32 1.0, %v12047_v30  ;;  %v15771_v61 = vld [vmem:[%s15873_s2] sm:$0xff] }
 0x613   : > { %v12051_v10 = vpop.eup %12050  ;;  %12076 = vrcp.f32 %v9102_v57  ;;  %10830 = vmatprep.mubr.msk.f32.mxu1 %vm488_vm2, %v15771_v61  ;;  %v9509_v57 = vld [vmem:[%s15880_s9 + $0x8] sm:$0xff] }
 0x614   : > { %v12053_v29 = vpop.eup %12052  ;;  %v9118_v2 = vadd.f32 1.0, %v12051_v10  ;;  %12078 = vrcp.f32 %v9119_v1  ;;  %v12104_v10 = vmov 0   ;;  %v9508_v1 = vld [vmem:[%s15880_s9] sm:$0xff] }
 0x615   : > { %v12055_v21 = vpop.eup %12054  ;;  %9243 = vrot.lane.b32.xlu0 %v12053_v29, %s12103_s20  ;;  %9209 = vrot.lane.b32.xlu1 %v12049_v62, %s12103_s20  ;;  %12080 = vrcp.f32 %v9101_v7  ;;  %v9524_v29 = vld [vmem:[%s15881_s10] sm:$0xff] }
 0x616   : > { %v12057_v20 = vpop.eup %12056  ;;  %v9100_v33 = vadd.f32 1.0, %v12055_v21  ;;  %12082 = vrcp.f32 %v9118_v2  ;;  %11838 = vset.pattern.permute.xlu1 %v12104_v10  ;;  %11837 = vset.pattern.permute.xlu0 %v12104_v10  ;;  %v9525_v21 = vld [vmem:[%s15881_s10 + $0x8] sm:$0xff] }
 0x617   : > { %v12059_v25 = vpop.eup %12058 }
 0x618   : > { %v12061_v56 = vpop.eup %12060  ;;  %v9117_v38 = vadd.f32 1.0, %v12059_v25  ;;  %12084 = vrcp.f32 %v9100_v33 }
 0x619   : > { %v12063_v44 = vpop.eup %12062  ;;  %9241 = vrot.lane.b32.xlu0 %v12061_v56, %s12103_s20  ;;  %9207 = vrot.lane.b32.xlu1 %v12057_v20, %s12103_s20 }
 0x61a   : > { %v12065_v4 = vpop.eup %12064  ;;  %v9099_v23 = vadd.f32 1.0, %v12063_v44  ;;  %12086 = vrcp.f32 %v9117_v38 }
 0x61b   : > { %v12067_v12 = vpop.eup %12066 }
 0x61c   : > { %v12069_v0 = vpop.eup %12068  ;;  %v9116_v37 = vadd.f32 1.0, %v12067_v12  ;;  %12088 = vrcp.f32 %v9099_v23 }
 0x61d   : > { %9239 = vrot.lane.b32.xlu0 %v12069_v0, %s12103_s20  ;;  %9205 = vrot.lane.b32.xlu1 %v12065_v4, %s12103_s20  ;;  %v12071_v34 = vpop.eup %12070 }
 0x61e   : > { %v12073_v46 = vpop.eup %12072  ;;  %12090 = vrcp.f32 %v9116_v37 }
 0x61f   : > { %v12075_v53 = vpop.eup %12074  ;;  %v9115_v3 = vadd.f32 1.0, %v12073_v46 }
 0x620   : > { %v12077_v28 = vpop.eup %12076 }
 0x621   : > { %9237 = vrot.lane.b32.xlu0 %v12075_v53, %s12103_s20  ;;  %9203 = vrot.lane.b32.xlu1 %v12071_v34, %s12103_s20  ;;  %v12079_v17 = vpop.eup %12078  ;;  %12092 = vrcp.f32 %v9115_v3 }
 0x622   : > { %v12081_v18 = vpop.eup %12080 }
 0x623   : > { %v12083_v55 = vpop.eup %12082 }
 0x625   : > { %9235 = vrot.lane.b32.xlu0 %v12079_v17, %s12103_s20  ;;  %9201 = vrot.lane.b32.xlu1 %v12077_v28, %s12103_s20  ;;  %v12085_v39 = vpop.eup %12084 }
 0x627   : > { %v12087_v27 = vpop.eup %12086 }
 0x629   : > { %9233 = vrot.lane.b32.xlu0 %v12083_v55, %s12103_s20  ;;  %9199 = vrot.lane.b32.xlu1 %v12081_v18, %s12103_s20  ;;  %v12089_v16 = vpop.eup %12088 }
 0x62b   : > { %v12091_v30 = vpop.eup %12090 }
 0x62d   : > { %9231 = vrot.lane.b32.xlu0 %v12087_v27, %s12103_s20  ;;  %9197 = vrot.lane.b32.xlu1 %v12085_v39, %s12103_s20 }
 0x62e   : > { %v12093_v62 = vpop.eup %12092 }
 0x631   : > { %9229 = vrot.lane.b32.xlu0 %v12091_v30, %s12103_s20  ;;  %9195 = vrot.lane.b32.xlu1 %v12089_v16, %s12103_s20 }
 0x635   : > { %9227 = vrot.lane.b32.xlu0 %v12093_v62, %s12103_s20  ;;  %9517 = vperm.xlu1 %11838, %v9509_v57  }
 0x639   : > { %9512 = vperm.xlu0 %11837, %v9508_v1   ;;  %9528 = vperm.xlu1 %11838, %v9524_v29  }
 0x63d   : > { %9533 = vperm.xlu0 %11837, %v9525_v21  }
 0x667   : > { %v9256_v20 = vpop.permute.xlu1 %9255 }
 0x668   : > { %v9321_v33 = vmul.f32 %v9256_v20, %v15583_v9 }
 0x66b   : > { %v9224_v7 = vpop.permute.xlu1 %9223  ;;  %v9258_v25 = vpop.permute.xlu0 %9257 }
 0x66c   : > { %v9322_v2 = vmul.f32 %v9258_v25, %v15596_v45  ;;  %v9305_v0 = vmul.f32 %v9224_v7, %v15566_v26 }
 0x66e   : > { %10798 = vmatprep.subr.msk.mxu1 %vm488_vm2, %v9322_v2 }
 0x66f   : > { %v9226_v56 = vpop.permute.xlu0 %9225  ;;  %v9222_v44 = vpop.permute.xlu1 %9221 }
 0x670   : > { %v9306_v4 = vmul.f32 %v9226_v56, %v15575_v47  ;;  %v9304_v47 = vmul.f32 %v9222_v44, %v15580_v50 }
 0x672   : > { %10799 = vmatpush3.xpose.msk.msra.mxu1 %vm488_vm2, %v9306_v4 }
 0x673   : > { %10800 = vmatprep.subr.msk.mxu1 %vm488_vm2, %v9321_v33  ;;  %v9254_v12 = vpop.permute.xlu0 %9253  ;;  %v9220_v38 = vpop.permute.xlu1 %9219 }
 0x674   : > { %v9320_v34 = vmul.f32 %v9254_v12, %v15602_v54  ;;  %v9303_v26 = vmul.f32 %v9220_v38, %v15588_v24  ;;  %v9327_v38 = vld [vmem:[%s401_s19 + $0x10] sm:$0xff] }
 0x676   : > { %10801 = vmatpush3.xpose.msk.msra.mxu1 %vm488_vm2, %v9305_v0 }
 0x677   : > { %10802 = vmatprep.subr.msk.mxu1 %vm488_vm2, %v9320_v34  ;;  %v9252_v45 = vpop.permute.xlu0 %9251  ;;  %v9218_v23 = vpop.permute.xlu1 %9217 }
 0x678   : > { %v9319_v9 = vmul.f32 %v9252_v45, %v15611_v5  ;;  %v9302_v50 = vmul.f32 %v9218_v23, %v15605_v11  ;;  %v9328_v23 = vld [vmem:[%s401_s19 + $0x18] sm:$0xff] }
 0x67a   : > { %10803 = vmatpush3.xpose.msk.msra.mxu1 %vm488_vm2, %v9304_v47 }
 0x67b   : > { %v9250_v46 = vpop.permute.xlu0 %9249  ;;  %10804 = vmatprep.subr.msk.mxu1 %vm488_vm2, %v9319_v9  ;;  %v9216_v37 = vpop.permute.xlu1 %9215 }
 0x67c   : > { %v9318_v54 = vmul.f32 %v9250_v46, %v15623_v31  ;;  %v9301_v24 = vmul.f32 %v9216_v37, %v15618_v58 }
 0x67e   : > { %10805 = vmatpush3.xpose.msk.msra.mxu1 %vm488_vm2, %v9303_v26 }
 0x67f   : > { %v9248_v53 = vpop.permute.xlu0 %9247  ;;  %10806 = vmatprep.subr.msk.mxu1 %vm488_vm2, %v9318_v54  ;;  %v9214_v28 = vpop.permute.xlu1 %9213 }
 0x680   : > { %v9317_v5 = vmul.f32 %v9248_v53, %v15633_v14  ;;  %v9300_v11 = vmul.f32 %v9214_v28, %v15627_v13 }
 0x682   : > { %10807 = vmatpush3.xpose.msk.msra.mxu1 %vm488_vm2, %v9302_v50 }
 0x683   : > { %v9246_v3 = vpop.permute.xlu0 %9245  ;;  %10808 = vmatprep.subr.msk.mxu1 %vm488_vm2, %v9317_v5  ;;  %v9212_v17 = vpop.permute.xlu1 %9211 }
 0x684   : > { %v9316_v31 = vmul.f32 %v9246_v3, %v15647_v43  ;;  %v9299_v58 = vmul.f32 %v9212_v17, %v15641_v52 }
 0x686   : > { %10809 = vmatpush3.xpose.msk.msra.mxu1 %vm488_vm2, %v9301_v24 }
 0x687   : > { %v9244_v18 = vpop.permute.xlu0 %9243  ;;  %10810 = vmatprep.subr.msk.mxu1 %vm488_vm2, %v9316_v31  ;;  %v9210_v55 = vpop.permute.xlu1 %9209 }
 0x688   : > { %v9315_v14 = vmul.f32 %v9244_v18, %v15658_v51  ;;  %v9298_v13 = vmul.f32 %v9210_v55, %v15653_v63 }
 0x68a   : > { %10811 = vmatpush3.xpose.msk.msra.mxu1 %vm488_vm2, %v9300_v11 }
 0x68b   : > { %v9242_v39 = vpop.permute.xlu0 %9241  ;;  %10812 = vmatprep.subr.msk.mxu1 %vm488_vm2, %v9315_v14  ;;  %v9208_v27 = vpop.permute.xlu1 %9207 }
 0x68c   : > { %v9314_v43 = vmul.f32 %v9242_v39, %v15670_v8  ;;  %v9297_v52 = vmul.f32 %v9208_v27, %v15665_v41 }
 0x68e   : > { %10813 = vmatpush3.xpose.msk.msra.mxu1 %vm488_vm2, %v9299_v58 }
 0x68f   : > { %v9240_v16 = vpop.permute.xlu0 %9239  ;;  %10814 = vmatprep.subr.msk.mxu1 %vm488_vm2, %v9314_v43  ;;  %v9206_v30 = vpop.permute.xlu1 %9205 }
 0x690   : > { %v9313_v51 = vmul.f32 %v9240_v16, %v15681_v22  ;;  %v9296_v63 = vmul.f32 %v9206_v30, %v15678_v60 }
 0x692   : > { %10815 = vmatpush3.xpose.msk.msra.mxu1 %vm488_vm2, %v9298_v13 }
 0x693   : > { %v9238_v62 = vpop.permute.xlu0 %9237  ;;  %10816 = vmatprep.subr.msk.mxu1 %vm488_vm2, %v9313_v51  ;;  %v9204_v57 = vpop.permute.xlu1 %9203 }
 0x694   : > { %v9312_v8 = vmul.f32 %v9238_v62, %v15695_v6  ;;  %v9295_v21 = vmul.f32 %v9204_v57, %v15689_v48 }
 0x696   : > { %10817 = vmatpush3.xpose.msk.msra.mxu1 %vm488_vm2, %v9297_v52 }
 0x697   : > { %v9236_v10 = vpop.permute.xlu0 %9235  ;;  %10818 = vmatprep.subr.msk.mxu1 %vm488_vm2, %v9312_v8  ;;  %v9202_v1 = vpop.permute.xlu1 %9201 }
 0x698   : > { %v9311_v22 = vmul.f32 %v9236_v10, %v15704_v49  ;;  %v9294_v7 = vmul.f32 %v9202_v1, %v15699_v59 }
 0x69a   : > { %10819 = vmatpush3.xpose.msk.msra.mxu1 %vm488_vm2, %v9296_v63 }
 0x69b   : > { %v9234_v29 = vpop.permute.xlu0 %9233  ;;  %10820 = vmatprep.subr.msk.mxu1 %vm488_vm2, %v9311_v22  ;;  %v9200_v6 = vpop.permute.xlu1 %9199 }
 0x69c   : > { %v9310_v41 = vmul.f32 %v9234_v29, %v15716_v32  ;;  %v9293_v48 = vmul.f32 %v9200_v6, %v15709_v19  ;;  %v9324_v19 = vld [vmem:[%s15873_s2 + $0x8] sm:$0xff] }
 0x69e   : > { %10821 = vmatpush3.xpose.msk.msra.mxu1 %vm488_vm2, %v9295_v21 }
 0x69f   : > { %v9232_v20 = vpop.permute.xlu0 %9231  ;;  %10822 = vmatprep.subr.msk.mxu1 %vm488_vm2, %v9310_v41  ;;  %v9198_v49 = vpop.permute.xlu1 %9197 }
 0x6a0   : > { %v9309_v60 = vmul.f32 %v9232_v20, %v15728_v42  ;;  %v9292_v59 = vmul.f32 %v9198_v49, %v15722_v36 }
 0x6a2   : > { %10823 = vmatpush3.xpose.msk.msra.mxu1 %vm488_vm2, %v9294_v7 }
 0x6a3   : > { %v9230_v25 = vpop.permute.xlu0 %9229  ;;  %10824 = vmatprep.subr.msk.mxu1 %vm488_vm2, %v9309_v60  ;;  %v9196_v56 = vpop.permute.xlu1 %9195 }
 0x6a4   : > { %v9308_v32 = vmul.f32 %v9230_v25, %v15741_v40  ;;  %v9291_v44 = vmul.f32 %v9196_v56, %v15733_v15  ;;  %v9325_v15 = vld [vmem:[%s401_s19] sm:$0xff] }
 0x6a6   : > { %10825 = vmatpush3.xpose.msk.msra.mxu1 %vm488_vm2, %v9293_v48 }
 0x6a7   : > { %v9228_v2 = vpop.permute.xlu0 %9227  ;;  %10826 = vmatprep.subr.msk.mxu1 %vm488_vm2, %v9308_v32 }
 0x6a8   : > { %v9307_v42 = vmul.f32 %v9228_v2, %v16180_v35  ;;  %v9326_v35 = vld [vmem:[%s401_s19 + $0x8] sm:$0xff] }
 0x6aa   : > { %10827 = vmatpush3.xpose.msk.msra.mxu1 %vm488_vm2, %v9292_v59 }
 0x6ab   : > { %10828 = vmatprep.subr.msk.mxu1 %vm488_vm2, %v9307_v42 }
 0x6ae   : > { %10829 = vmatpush3.xpose.msk.msra.mxu1 %vm488_vm2, %v9291_v44 }
 0x6b0   : > { %v9518_v36 = vpop.permute.xlu1 %9517 }
 0x6b1   : > { %10831 = vmatmul.mubr.msk.f32.vlgmr.msra.gmra.mxu1 %vm488_vm2, %v15771_v61 }
 0x6b2   : > { %10832 = vmatprep.mubr.msk.f32.mxu1 %vm488_vm2, %v9324_v19 }
 0x6b4   : > { %v9513_v4 = vpop.permute.xlu0 %9512  ;;  %v9529_v0 = vpop.permute.xlu1 %9528 }
 0x6b5   : > { %10833 = vmatmul.mubr.msk.f32.gmra.mxu1 %vm488_vm2, %v9324_v19 }
 0x6b8   : > { %v9534_v28 = vpop.permute.xlu0 %9533 }
 0x771   : > { %v9497_v40 = vpop.f32.mrf.mxu1 }
 0x772   : > { %v9498_v33 = vadd.f32 %v9497_v40, %v9325_v15 }
 0x773   : > { %v9499_v12 = vpop.f32.mrf.mxu1 }
 0x774   : > { %v9500_v34 = vadd.f32 %v9499_v12, %v9326_v35  ;;  %v9520_v61 = vmul.f32 %v9513_v4, %v9498_v33 }
 0x775   : > { %v9503_v45 = vpop.f32.mrf.mxu1 }
 0x776   : > { %v9521_v47 = vmul.f32 %v9513_v4, %v9500_v34  ;;  %v9504_v9 = vadd.f32 %v9503_v45, %v9327_v38  ;;  %v9536_v46 = vadd.f32 %v9529_v0, %v9520_v61 }
 0x777   : > { %v9505_v37 = vpop.f32.mrf.mxu1 }
 0x778   : > { %v9537_v26 = vadd.f32 %v9529_v0, %v9521_v47  ;;  %9540 = vst [vmem:[%s406_s18] sm:$0xff] %v9536_v46  ;;  %v9506_v54 = vadd.f32 %v9505_v37, %v9328_v23  ;;  %v9522_v53 = vmul.f32 %v9518_v36, %v9504_v9 }
 0x77a   : > { %9541 = vst [vmem:[%s406_s18 + $0x8] sm:$0xff] %v9537_v26  ;;  %v9523_v50 = vmul.f32 %v9518_v36, %v9506_v54  ;;  %v9538_v5 = vadd.f32 %v9534_v28, %v9522_v53 }
 0x77c   : > { %v9539_v3 = vadd.f32 %v9534_v28, %v9523_v50  ;;  %9542 = vst [vmem:[%s406_s18 + $0x10] sm:$0xff] %v9538_v5 }
 0x77e   : > { %9543 = vst [vmem:[%s406_s18 + $0x18] sm:$0xff] %v9539_v3 }
 0x77f PF: > { %s21_s17 = sadd.s32 1, %s12100_s17  }
 0x780   : > { %p18_p4 = scmp.ge.s32.totalorder %s21_s17, 4  }
 0x782   :  { %20 = sbr.rel (!%p18_p4) target bundleno = 1 (0x1), region = 124 }

</bundles_post_ra>
